<compile_context>
chip_gen: v7x
topology: tpu7x:2x2x1
jax: 0.10.0
libtpu: 0.0.40
codegen_flags: <defaults>
</compile_context>

<pallas_src>
import jax
import jax.numpy as jnp
from jax.experimental import pallas as pl
from jax.experimental.pallas import tpu as pltpu

# ---- shapes forced by the PyTorch module ----------------------------------
B = 8                        # x6.view(8, 256*12)
C_IN = 64
L_IN = 105
L_C1 = (L_IN - 3) // 2 + 1   # 52  conv1 (k=3, stride=2)
L_P1 = L_C1 // 2             # 26  maxpool(2,2)
L_C2 = L_P1 - 3 + 1          # 24  conv2 (k=3, stride=1)
L_P2 = L_C2 // 2             # 12  maxpool(2,2)
C1 = 128
C2 = 256
HID = 256 * 6                # 1536
FLAT = C2 * L_P2             # 3072
NUM_CLASSES = 10
DROPOUT_P = 0.5

TN = 768                     # line1 output tile (bf16 weight tile = 4.7 MB)
NT = HID // TN               # 2 grid steps


def _mish(v):
    # mish(x) = x * tanh(softplus(x)), numerically stable softplus
    sp = jnp.maximum(v, 0.0) + jnp.log1p(jnp.exp(-jnp.abs(v)))
    return v * jnp.tanh(sp)


# ---------------------------------------------------------------------------
# Fused kernel: conv1 -> pool1 -> mish -> dropout -> conv2 -> pool2 -> mish ->
# dropout -> line1 -> mish -> line2.  Grid iterates over the 1536-wide hidden
# dim of line1 (the only large weight).  The conv stack runs once at step 0 and
# its (t, b, c) feature map persists in VMEM scratch; every step then does the
# line1 tile contraction + Mish and accumulates line2 logits.
# ---------------------------------------------------------------------------
def _fused_kernel(cols1_ref, m1_ref, m2_ref,
                  w1_ref, b1_ref, w2_ref, b2_ref,
                  w1h_ref, bl1_ref, wl2_ref, bl2_ref,
                  out_ref, x8_ref,
                  feat_ref, acc_ref):
    j = pl.program_id(0)

    # ---- step 0: batched conv stack for the whole batch -------------------
    @pl.when(j == 0)
    def _():
        acc_ref[...] = jnp.zeros_like(acc_ref)
        # Conv1d(64->128, k=3, s=2) as two batched bf16 dots (even/odd output
        # positions, rows are t-major: row = u*B + b).  Pool1 = elementwise max.
        a_e = jnp.dot(cols1_ref[0], w1_ref[...],
                      preferred_element_type=jnp.float32)        # (208, 128)
        a_o = jnp.dot(cols1_ref[1], w1_ref[...],
                      preferred_element_type=jnp.float32)
        p1 = jnp.maximum(a_e, a_o) + b1_ref[...]                 # pool1 + bias
        h1 = (_mish(p1) * m1_ref[...]).astype(jnp.bfloat16)      # mish + dropout

        # Conv1d(128->256, k=3, s=1): t-major rows make the 3 taps contiguous,
        # 8-aligned sublane windows -> one lane-concat im2col, one dot.
        cols2 = jnp.concatenate(
            [h1[0:L_C2 * B, :],                                  # rows  0..191
             h1[B:(L_C2 + 1) * B, :],                            # rows  8..199
             h1[2 * B:(L_C2 + 2) * B, :]],                       # rows 16..207
            axis=-1)                                             # (192, 384)
        a2 = jnp.dot(cols2, w2_ref[...],
                     preferred_element_type=jnp.float32) + b2_ref[...]   # (192, 256)
        # Pool2: tile-aligned reshape (192,256) -> (12,16,256); max of the two
        # 8-row halves pairs conv outputs (2v, 2v+1) per batch.
        a2r = a2.reshape(L_P2, 2 * B, C2)
        p2 = jnp.maximum(a2r[:, :B, :], a2r[:, B:, :])           # (12, 8, 256)
        h2 = _mish(p2) * m2_ref[...]                             # mish + dropout
        feat_ref[...] = h2.astype(feat_ref.dtype)                # single store

    # ---- every step: line1 tile (TN wide) + Mish, accumulate line2 logits --
    h = jnp.zeros((B, TN), jnp.float32)
    for t in range(L_P2):
        # bf16 x bf16 -> f32 accumulate on the MXU; feat already (t, b, c).
        h = h + jnp.dot(feat_ref[t], w1h_ref[t],
                        preferred_element_type=jnp.float32)
    h = _mish(h + bl1_ref[...])
    x8_ref[...] = h

    acc_ref[...] += jnp.dot(h, wl2_ref[...],
                            preferred_element_type=jnp.float32)

    @pl.when(j == NT - 1)
    def _():
        out_ref[...] = acc_ref[...] + bl2_ref[...]


def _fused_forward(cols1, m1, m2, p):
    grid_spec = pltpu.PrefetchScalarGridSpec(
        num_scalar_prefetch=0,
        grid=(NT,),
        in_specs=[
            pl.BlockSpec((2, L_P1 * B, 3 * C_IN), lambda j: (0, 0, 0)),  # conv1 im2col (even/odd)
            pl.BlockSpec((L_P1 * B, C1), lambda j: (0, 0)),              # dropout m1
            pl.BlockSpec((L_P2, B, C2), lambda j: (0, 0, 0)),            # dropout m2
            pl.BlockSpec((3 * C_IN, C1), lambda j: (0, 0)),              # conv1 w (im2col, bf16)
            pl.BlockSpec((1, C1), lambda j: (0, 0)),                     # conv1 b
            pl.BlockSpec((3 * C1, C2), lambda j: (0, 0)),                # conv2 w (im2col, bf16)
            pl.BlockSpec((1, C2), lambda j: (0, 0)),                     # conv2 b
            pl.BlockSpec((L_P2, C2, TN), lambda j: (0, 0, j)),           # line1 w (t,c,n) bf16
            pl.BlockSpec((1, TN), lambda j: (0, j)),                     # line1 b
            pl.BlockSpec((TN, NUM_CLASSES), lambda j: (j, 0)),           # line2 w
            pl.BlockSpec((1, NUM_CLASSES), lambda j: (0, 0)),            # line2 b
        ],
        out_specs=[
            pl.BlockSpec((B, NUM_CLASSES), lambda j: (0, 0)),            # logits
            pl.BlockSpec((B, TN), lambda j: (0, j)),                     # x8
        ],
        scratch_shapes=[
            pltpu.VMEM((L_P2, B, C2), jnp.bfloat16),                     # conv features (t,b,c)
            pltpu.VMEM((B, NUM_CLASSES), jnp.float32),                   # logits accumulator
        ],
    )
    return pl.pallas_call(
        _fused_kernel,
        out_shape=(jax.ShapeDtypeStruct((B, NUM_CLASSES), jnp.float32),
                   jax.ShapeDtypeStruct((B, HID), jnp.float32)),
        grid_spec=grid_spec,
        compiler_params=pltpu.CompilerParams(
            # step 1 consumes step-0 scratch -> must stay sequential on one core.
            dimension_semantics=("arbitrary",),
            vmem_limit_bytes=32 * 1024 * 1024),
    )(cols1, m1, m2, p["w1"], p["b1"], p["w2"], p["b2"],
      p["w1h"], p["bl1"], p["wl2"], p["bl2"])


def prepare_params(torch_layout):
    """One-time (offline) conversion from PyTorch weight layout to kernel layout."""
    W1 = torch_layout["line1_w"]          # (1536, 3072), input index = c*12 + t
    return {
        # conv weights -> (k*Cin, Cout) im2col layout, bf16 (single-pass MXU)
        "w1": jnp.transpose(torch_layout["conv1_w"], (2, 1, 0))
                 .reshape(3 * C_IN, C1).astype(jnp.bfloat16),
        "b1": torch_layout["conv1_b"].reshape(1, C1).astype(jnp.float32),
        "w2": jnp.transpose(torch_layout["conv2_w"], (2, 1, 0))
                 .reshape(3 * C1, C2).astype(jnp.bfloat16),
        "b2": torch_layout["conv2_b"].reshape(1, C2).astype(jnp.float32),
        # line1 weight: (out, c*12+t) -> (t, c, out); streamed as bf16 (HBM-bound).
        "w1h": jnp.transpose(W1.T.reshape(C2, L_P2, HID), (1, 0, 2))
                  .astype(jnp.bfloat16),
        "bl1": torch_layout["line1_b"].reshape(1, HID).astype(jnp.float32),
        "wl2": torch_layout["line2_w"].T.astype(jnp.float32),
        "bl2": torch_layout["line2_b"].reshape(1, NUM_CLASSES).astype(jnp.float32),
    }


def _im2col_conv1(x_blc):
    """Even/odd (pool1-split) im2col for conv1, t-major rows: (2, L_P1*B, 3*C_IN).

    stream 0 row (u*B + b) = concat(x[b,4u], x[b,4u+1], x[b,4u+2])   (conv pos 2u)
    stream 1 row (u*B + b) = concat(x[b,4u+2], x[b,4u+3], x[b,4u+4]) (conv pos 2u+1)
    """
    def stream(starts):
        taps = [x_blc[:, s:s + 4 * (L_P1 - 1) + 1:4, :] for s in starts]  # 3 x (B,26,64)
        cols = jnp.concatenate(taps, axis=-1)                             # (B, 26, 192)
        return jnp.transpose(cols, (1, 0, 2)).reshape(L_P1 * B, 3 * C_IN)  # t-major
    return jnp.stack([stream((0, 1, 2)), stream((2, 3, 4))], axis=0)


def _make_dropout_masks(dropout_key):
    k1, k2 = jax.random.split(dropout_key)
    scale = 1.0 / (1.0 - DROPOUT_P)
    m1 = (jax.random.bernoulli(k1, 1.0 - DROPOUT_P, (L_P1 * B, C1))
          * scale).astype(jnp.bfloat16)
    m2 = (jax.random.bernoulli(k2, 1.0 - DROPOUT_P, (L_P2, B, C2))
          * scale).astype(jnp.bfloat16)
    return m1, m2


@jax.jit
def msscaeaa_forward(aaf_out3, params, dropout_key):
    # TODO(synk): layer_SC_AE_AA is an externally supplied submodule with no
    # source here; its third output AAF_out3 is consumed directly as the input.
    x03 = aaf_out3.reshape(B, C_IN, L_IN)                # .view(B, C, L)
    x_blc = jnp.transpose(x03, (0, 2, 1))                 # NCW -> (B, L, C)
    cols1 = _im2col_conv1(x_blc).astype(jnp.bfloat16)     # im2col hoisted to XLA
    # TODO(synk): F.dropout defaults to training=True; masks use the JAX RNG
    # (same zero-w.p.-p / scale-1/(1-p) semantics, different bits than torch).
    m1, m2 = _make_dropout_masks(dropout_key)
    out, x8 = _fused_forward(cols1, m1, m2, params)
    return out, x8


# ---------------------------------------------------------------------------
# Pure-JAX reference (same math, same dropout masks) for a correctness check.
# ---------------------------------------------------------------------------
def _reference_forward(aaf_out3, params, m1, m2):
    x = jnp.transpose(aaf_out3.reshape(B, C_IN, L_IN), (0, 2, 1)).astype(jnp.float32)
    w1 = params["w1"].astype(jnp.float32)
    w2 = params["w2"].astype(jnp.float32)
    cols1 = jnp.concatenate(
        [x[:, k:k + 2 * (L_C1 - 1) + 1:2, :] for k in range(3)], axis=-1)  # (B,52,192)
    a1 = jnp.einsum("blk,kc->blc", cols1, w1) + params["b1"]
    p1 = jnp.maximum(a1[:, 0::2, :], a1[:, 1::2, :])                       # (B,26,128)
    m1b = m1.astype(jnp.float32).reshape(L_P1, B, C1).transpose(1, 0, 2)
    h1 = _mish(p1) * m1b
    cols2 = jnp.concatenate(
        [h1[:, k:k + L_C2, :] for k in range(3)], axis=-1)                 # (B,24,384)
    a2 = jnp.einsum("blk,kc->blc", cols2, w2) + params["b2"]
    p2 = jnp.maximum(a2[:, 0::2, :], a2[:, 1::2, :])                       # (B,12,256)
    m2b = m2.astype(jnp.float32).transpose(1, 0, 2)                        # (B,12,256)
    h2 = _mish(p2) * m2b
    w1h = params["w1h"].astype(jnp.float32)                                # (12,256,1536)
    x8 = _mish(jnp.einsum("btc,tcn->bn", h2, w1h) + params["bl1"])
    out = x8 @ params["wl2"] + params["bl2"]
    return out, x8


if __name__ == "__main__":
    key = jax.random.PRNGKey(0)
    ks = jax.random.split(key, 10)
    # Random weights in PyTorch layout, converted once (offline) to kernel layout.
    torch_layout = {
        "conv1_w": jax.random.normal(ks[0], (C1, C_IN, 3), jnp.float32) * 0.05,
        "conv1_b": jax.random.normal(ks[1], (C1,), jnp.float32) * 0.05,
        "conv2_w": jax.random.normal(ks[2], (C2, C1, 3), jnp.float32) * 0.05,
        "conv2_b": jax.random.normal(ks[3], (C2,), jnp.float32) * 0.05,
        "line1_w": jax.random.normal(ks[4], (HID, FLAT), jnp.float32) * 0.02,
        "line1_b": jax.random.normal(ks[5], (HID,), jnp.float32) * 0.02,
        "line2_w": jax.random.normal(ks[6], (NUM_CLASSES, HID), jnp.float32) * 0.02,
        "line2_b": jax.random.normal(ks[7], (NUM_CLASSES,), jnp.float32) * 0.02,
    }
    params = prepare_params(torch_layout)
    aaf_out3 = jax.random.normal(ks[8], (B, C_IN, 1, L_IN), jnp.float32)
    dropout_key = ks[9]

    out, x8 = msscaeaa_forward(aaf_out3, params, dropout_key)
    jax.block_until_ready((out, x8))
    assert out.shape == (B, NUM_CLASSES)
    assert x8.shape == (B, HID)

    # Correctness check vs pure-JAX reference (same dropout masks; tolerance
    # accounts for bf16 weight/activation streaming in the kernel).
    m1, m2 = _make_dropout_masks(dropout_key)
    ref_out, ref_x8 = _reference_forward(aaf_out3, params, m1, m2)
    err_out = float(jnp.max(jnp.abs(out - ref_out)))
    err_x8 = float(jnp.max(jnp.abs(x8 - ref_x8)))
    assert err_out < 1e-1, err_out
    assert err_x8 < 1e-1, err_x8
    print("KERNEL_OK")
</pallas_src>

<mosaic_0001>
module attributes {stable_mosaic.version = 11 : i64} {
  func.func @_fused_kernel(%arg0: i32, %arg1: memref<2x208x192xbf16, #tpu.memory_space<vmem>>, %arg2: memref<208x128xbf16, #tpu.memory_space<vmem>>, %arg3: memref<12x8x256xbf16, #tpu.memory_space<vmem>>, %arg4: memref<192x128xbf16, #tpu.memory_space<vmem>>, %arg5: memref<1x128xf32, #tpu.memory_space<vmem>>, %arg6: memref<384x256xbf16, #tpu.memory_space<vmem>>, %arg7: memref<1x256xf32, #tpu.memory_space<vmem>>, %arg8: memref<12x256x768xbf16, #tpu.memory_space<vmem>>, %arg9: memref<1x768xf32, #tpu.memory_space<vmem>>, %arg10: memref<768x10xf32, #tpu.memory_space<vmem>>, %arg11: memref<1x10xf32, #tpu.memory_space<vmem>>, %arg12: memref<8x10xf32, #tpu.memory_space<vmem>>, %arg13: memref<8x768xf32, #tpu.memory_space<vmem>>, %arg14: memref<12x8x256xbf16, #tpu.memory_space<vmem>>, %arg15: memref<8x10xf32, #tpu.memory_space<vmem>>) attributes {dimension_semantics = [#tpu.dimension_semantics<arbitrary>], iteration_bounds = array<i64: 2>, scalar_prefetch = 0 : i64, scratch_operands = 2 : i64, tpu.core_type = #tpu.core_type<tc>, window_params = [{pipeline_mode = #tpu.pipeline_mode<synchronous>, transform_indices = @transform_0, window_bounds = array<i64: 2, 208, 192>}, {pipeline_mode = #tpu.pipeline_mode<synchronous>, transform_indices = @transform_1, window_bounds = array<i64: 208, 128>}, {pipeline_mode = #tpu.pipeline_mode<synchronous>, transform_indices = @transform_2, window_bounds = array<i64: 12, 8, 256>}, {pipeline_mode = #tpu.pipeline_mode<synchronous>, transform_indices = @transform_3, window_bounds = array<i64: 192, 128>}, {pipeline_mode = #tpu.pipeline_mode<synchronous>, transform_indices = @transform_4, window_bounds = array<i64: 1, 128>}, {pipeline_mode = #tpu.pipeline_mode<synchronous>, transform_indices = @transform_5, window_bounds = array<i64: 384, 256>}, {pipeline_mode = #tpu.pipeline_mode<synchronous>, transform_indices = @transform_6, window_bounds = array<i64: 1, 256>}, {transform_indices = @transform_7, window_bounds = array<i64: 12, 256, 768>}, {transform_indices = @transform_8, window_bounds = array<i64: 1, 768>}, {transform_indices = @transform_9, window_bounds = array<i64: 768, 10>}, {pipeline_mode = #tpu.pipeline_mode<synchronous>, transform_indices = @transform_10, window_bounds = array<i64: 1, 10>}, {pipeline_mode = #tpu.pipeline_mode<synchronous>, transform_indices = @transform_11, window_bounds = array<i64: 8, 10>}, {transform_indices = @transform_12, window_bounds = array<i64: 8, 768>}]} {
    %c0_i32 = arith.constant 0 : i32
    %0 = arith.cmpi eq, %arg0, %c0_i32 : i32
    %1 = arith.extui %0 : i1 to i32
    %c0_i32_0 = arith.constant 0 : i32
    %2 = arith.cmpi ne, %1, %c0_i32_0 : i32
    scf.if %2 {
      %cst_87 = arith.constant 0.000000e+00 : f32
      %98 = vector.broadcast %cst_87 : f32 to vector<8x10xf32>
      %c0_88 = arith.constant 0 : index
      %c0_89 = arith.constant 0 : index
      %99 = vector.load %arg15[%c0_88, %c0_89] : memref<8x10xf32, #tpu.memory_space<vmem>>, vector<8x10xf32>
      tpu.vector_store %arg15[%c0_88, %c0_89], %98 {strides = array<i32>} : memref<8x10xf32, #tpu.memory_space<vmem>>, vector<8x10xf32>,
      %c0_90 = arith.constant 0 : index
      %c0_91 = arith.constant 0 : index
      %c0_92 = arith.constant 0 : index
      %100 = vector.load %arg1[%c0_90, %c0_91, %c0_92] : memref<2x208x192xbf16, #tpu.memory_space<vmem>>, vector<1x208x192xbf16>
      %101 = vector.shape_cast %100 : vector<1x208x192xbf16> to vector<208x192xbf16>
      %c0_93 = arith.constant 0 : index
      %c0_94 = arith.constant 0 : index
      %102 = vector.load %arg4[%c0_93, %c0_94] : memref<192x128xbf16, #tpu.memory_space<vmem>>, vector<192x128xbf16>
      %cst_95 = arith.constant dense<0.000000e+00> : vector<208x128xf32>
      %103 = tpu.matmul %101, %102, %cst_95 {dimension_numbers = #tpu.dot_dimension_numbers<[1], [0], [0], [1], [0, 0, 1, 1], [], []>} : vector<208x192xbf16>, vector<192x128xbf16>, vector<208x128xf32> -> vector<208x128xf32>
      %c1_96 = arith.constant 1 : index
      %c0_97 = arith.constant 0 : index
      %c0_98 = arith.constant 0 : index
      %104 = vector.load %arg1[%c1_96, %c0_97, %c0_98] : memref<2x208x192xbf16, #tpu.memory_space<vmem>>, vector<1x208x192xbf16>
      %105 = vector.shape_cast %104 : vector<1x208x192xbf16> to vector<208x192xbf16>
      %c0_99 = arith.constant 0 : index
      %c0_100 = arith.constant 0 : index
      %106 = vector.load %arg4[%c0_99, %c0_100] : memref<192x128xbf16, #tpu.memory_space<vmem>>, vector<192x128xbf16>
      %cst_101 = arith.constant dense<0.000000e+00> : vector<208x128xf32>
      %107 = tpu.matmul %105, %106, %cst_101 {dimension_numbers = #tpu.dot_dimension_numbers<[1], [0], [0], [1], [0, 0, 1, 1], [], []>} : vector<208x192xbf16>, vector<192x128xbf16>, vector<208x128xf32> -> vector<208x128xf32>
      %108 = arith.maximumf %103, %107 : vector<208x128xf32>
      %c0_102 = arith.constant 0 : index
      %c0_103 = arith.constant 0 : index
      %109 = vector.load %arg5[%c0_102, %c0_103] : memref<1x128xf32, #tpu.memory_space<vmem>>, vector<1x128xf32>
      %110 = vector.broadcast %109 : vector<1x128xf32> to vector<208x128xf32>
      %111 = arith.addf %108, %110 : vector<208x128xf32>
      %cst_104 = arith.constant 0.000000e+00 : f32
      %112 = vector.broadcast %cst_104 : f32 to vector<208x128xf32>
      %113 = arith.maximumf %111, %112 : vector<208x128xf32>
      %114 = math.absf %111 : vector<208x128xf32>
      %cst_105 = arith.constant 0.000000e+00 : f32
      %115 = vector.broadcast %cst_105 : f32 to vector<208x128xf32>
      %116 = arith.subf %115, %114 : vector<208x128xf32>
      %117 = math.exp %116 : vector<208x128xf32>
      %118 = math.log1p %117 : vector<208x128xf32>
      %119 = arith.addf %113, %118 : vector<208x128xf32>
      %120 = math.tanh %119 : vector<208x128xf32>
      %121 = arith.mulf %111, %120 : vector<208x128xf32>
      %c0_106 = arith.constant 0 : index
      %c0_107 = arith.constant 0 : index
      %122 = vector.load %arg2[%c0_106, %c0_107] : memref<208x128xbf16, #tpu.memory_space<vmem>>, vector<208x128xbf16>
      %123 = arith.extf %122 : vector<208x128xbf16> to vector<208x128xf32>
      %124 = arith.mulf %121, %123 : vector<208x128xf32>
      %125 = arith.truncf %124 : vector<208x128xf32> to vector<208x128xbf16>
      %126 = vector.extract_strided_slice %125 {offsets = [0, 0], sizes = [192, 128], strides = [1, 1]} : vector<208x128xbf16> to vector<192x128xbf16>
      %127 = vector.extract_strided_slice %125 {offsets = [8, 0], sizes = [192, 128], strides = [1, 1]} : vector<208x128xbf16> to vector<192x128xbf16>
      %128 = vector.extract_strided_slice %125 {offsets = [16, 0], sizes = [192, 128], strides = [1, 1]} : vector<208x128xbf16> to vector<192x128xbf16>
      %129 = tpu.concatenate %126, %127, %128 in 1 : vector<192x128xbf16>, vector<192x128xbf16>, vector<192x128xbf16> -> vector<192x384xbf16>
      %c0_108 = arith.constant 0 : index
      %c0_109 = arith.constant 0 : index
      %130 = vector.load %arg6[%c0_108, %c0_109] : memref<384x256xbf16, #tpu.memory_space<vmem>>, vector<384x256xbf16>
      %cst_110 = arith.constant dense<0.000000e+00> : vector<192x256xf32>
      %131 = tpu.matmul %129, %130, %cst_110 {dimension_numbers = #tpu.dot_dimension_numbers<[1], [0], [0], [1], [0, 0, 1, 1], [], []>} : vector<192x384xbf16>, vector<384x256xbf16>, vector<192x256xf32> -> vector<192x256xf32>
      %c0_111 = arith.constant 0 : index
      %c0_112 = arith.constant 0 : index
      %132 = vector.load %arg7[%c0_111, %c0_112] : memref<1x256xf32, #tpu.memory_space<vmem>>, vector<1x256xf32>
      %133 = vector.broadcast %132 : vector<1x256xf32> to vector<192x256xf32>
      %134 = arith.addf %131, %133 : vector<192x256xf32>
      %135 = vector.shape_cast %134 : vector<192x256xf32> to vector<12x16x256xf32>
      %136 = vector.extract_strided_slice %135 {offsets = [0, 0, 0], sizes = [12, 8, 256], strides = [1, 1, 1]} : vector<12x16x256xf32> to vector<12x8x256xf32>
      %137 = vector.extract_strided_slice %135 {offsets = [0, 8, 0], sizes = [12, 8, 256], strides = [1, 1, 1]} : vector<12x16x256xf32> to vector<12x8x256xf32>
      %138 = arith.maximumf %136, %137 : vector<12x8x256xf32>
      %cst_113 = arith.constant 0.000000e+00 : f32
      %139 = vector.broadcast %cst_113 : f32 to vector<12x8x256xf32>
      %140 = arith.maximumf %138, %139 : vector<12x8x256xf32>
      %141 = math.absf %138 : vector<12x8x256xf32>
      %cst_114 = arith.constant 0.000000e+00 : f32
      %142 = vector.broadcast %cst_114 : f32 to vector<12x8x256xf32>
      %143 = arith.subf %142, %141 : vector<12x8x256xf32>
      %144 = math.exp %143 : vector<12x8x256xf32>
      %145 = math.log1p %144 : vector<12x8x256xf32>
      %146 = arith.addf %140, %145 : vector<12x8x256xf32>
      %147 = math.tanh %146 : vector<12x8x256xf32>
      %148 = arith.mulf %138, %147 : vector<12x8x256xf32>
      %c0_115 = arith.constant 0 : index
      %c0_116 = arith.constant 0 : index
      %c0_117 = arith.constant 0 : index
      %149 = vector.load %arg3[%c0_115, %c0_116, %c0_117] : memref<12x8x256xbf16, #tpu.memory_space<vmem>>, vector<12x8x256xbf16>
      %150 = arith.extf %149 : vector<12x8x256xbf16> to vector<12x8x256xf32>
      %151 = arith.mulf %148, %150 : vector<12x8x256xf32>
      %152 = arith.truncf %151 : vector<12x8x256xf32> to vector<12x8x256xbf16>
      %c0_118 = arith.constant 0 : index
      %c0_119 = arith.constant 0 : index
      %c0_120 = arith.constant 0 : index
      %153 = vector.load %arg14[%c0_118, %c0_119, %c0_120] : memref<12x8x256xbf16, #tpu.memory_space<vmem>>, vector<12x8x256xbf16>
      tpu.vector_store %arg14[%c0_118, %c0_119, %c0_120], %152 {strides = array<i32>} : memref<12x8x256xbf16, #tpu.memory_space<vmem>>, vector<12x8x256xbf16>,
    } else {
    }
    %cst = arith.constant 0.000000e+00 : f32
    %3 = vector.broadcast %cst : f32 to vector<8x768xf32>
    %c0 = arith.constant 0 : index
    %c0_1 = arith.constant 0 : index
    %c0_2 = arith.constant 0 : index
    %4 = vector.load %arg14[%c0, %c0_1, %c0_2] : memref<12x8x256xbf16, #tpu.memory_space<vmem>>, vector<1x8x256xbf16>
    %5 = vector.shape_cast %4 : vector<1x8x256xbf16> to vector<8x256xbf16>
    %c0_3 = arith.constant 0 : index
    %c0_4 = arith.constant 0 : index
    %c0_5 = arith.constant 0 : index
    %6 = vector.load %arg8[%c0_3, %c0_4, %c0_5] : memref<12x256x768xbf16, #tpu.memory_space<vmem>>, vector<1x256x768xbf16>
    %7 = vector.shape_cast %6 : vector<1x256x768xbf16> to vector<256x768xbf16>
    %cst_6 = arith.constant dense<0.000000e+00> : vector<8x768xf32>
    %8 = tpu.matmul %5, %7, %cst_6 {dimension_numbers = #tpu.dot_dimension_numbers<[1], [0], [0], [1], [0, 0, 1, 1], [], []>} : vector<8x256xbf16>, vector<256x768xbf16>, vector<8x768xf32> -> vector<8x768xf32>
    %9 = arith.addf %3, %8 : vector<8x768xf32>
    %c1 = arith.constant 1 : index
    %c0_7 = arith.constant 0 : index
    %c0_8 = arith.constant 0 : index
    %10 = vector.load %arg14[%c1, %c0_7, %c0_8] : memref<12x8x256xbf16, #tpu.memory_space<vmem>>, vector<1x8x256xbf16>
    %11 = vector.shape_cast %10 : vector<1x8x256xbf16> to vector<8x256xbf16>
    %c1_9 = arith.constant 1 : index
    %c0_10 = arith.constant 0 : index
    %c0_11 = arith.constant 0 : index
    %12 = vector.load %arg8[%c1_9, %c0_10, %c0_11] : memref<12x256x768xbf16, #tpu.memory_space<vmem>>, vector<1x256x768xbf16>
    %13 = vector.shape_cast %12 : vector<1x256x768xbf16> to vector<256x768xbf16>
    %cst_12 = arith.constant dense<0.000000e+00> : vector<8x768xf32>
    %14 = tpu.matmul %11, %13, %cst_12 {dimension_numbers = #tpu.dot_dimension_numbers<[1], [0], [0], [1], [0, 0, 1, 1], [], []>} : vector<8x256xbf16>, vector<256x768xbf16>, vector<8x768xf32> -> vector<8x768xf32>
    %15 = arith.addf %9, %14 : vector<8x768xf32>
    %c2 = arith.constant 2 : index
    %c0_13 = arith.constant 0 : index
    %c0_14 = arith.constant 0 : index
    %16 = vector.load %arg14[%c2, %c0_13, %c0_14] : memref<12x8x256xbf16, #tpu.memory_space<vmem>>, vector<1x8x256xbf16>
    %17 = vector.shape_cast %16 : vector<1x8x256xbf16> to vector<8x256xbf16>
    %c2_15 = arith.constant 2 : index
    %c0_16 = arith.constant 0 : index
    %c0_17 = arith.constant 0 : index
    %18 = vector.load %arg8[%c2_15, %c0_16, %c0_17] : memref<12x256x768xbf16, #tpu.memory_space<vmem>>, vector<1x256x768xbf16>
    %19 = vector.shape_cast %18 : vector<1x256x768xbf16> to vector<256x768xbf16>
    %cst_18 = arith.constant dense<0.000000e+00> : vector<8x768xf32>
    %20 = tpu.matmul %17, %19, %cst_18 {dimension_numbers = #tpu.dot_dimension_numbers<[1], [0], [0], [1], [0, 0, 1, 1], [], []>} : vector<8x256xbf16>, vector<256x768xbf16>, vector<8x768xf32> -> vector<8x768xf32>
    %21 = arith.addf %15, %20 : vector<8x768xf32>
    %c3 = arith.constant 3 : index
    %c0_19 = arith.constant 0 : index
    %c0_20 = arith.constant 0 : index
    %22 = vector.load %arg14[%c3, %c0_19, %c0_20] : memref<12x8x256xbf16, #tpu.memory_space<vmem>>, vector<1x8x256xbf16>
    %23 = vector.shape_cast %22 : vector<1x8x256xbf16> to vector<8x256xbf16>
    %c3_21 = arith.constant 3 : index
    %c0_22 = arith.constant 0 : index
    %c0_23 = arith.constant 0 : index
    %24 = vector.load %arg8[%c3_21, %c0_22, %c0_23] : memref<12x256x768xbf16, #tpu.memory_space<vmem>>, vector<1x256x768xbf16>
    %25 = vector.shape_cast %24 : vector<1x256x768xbf16> to vector<256x768xbf16>
    %cst_24 = arith.constant dense<0.000000e+00> : vector<8x768xf32>
    %26 = tpu.matmul %23, %25, %cst_24 {dimension_numbers = #tpu.dot_dimension_numbers<[1], [0], [0], [1], [0, 0, 1, 1], [], []>} : vector<8x256xbf16>, vector<256x768xbf16>, vector<8x768xf32> -> vector<8x768xf32>
    %27 = arith.addf %21, %26 : vector<8x768xf32>
    %c4 = arith.constant 4 : index
    %c0_25 = arith.constant 0 : index
    %c0_26 = arith.constant 0 : index
    %28 = vector.load %arg14[%c4, %c0_25, %c0_26] : memref<12x8x256xbf16, #tpu.memory_space<vmem>>, vector<1x8x256xbf16>
    %29 = vector.shape_cast %28 : vector<1x8x256xbf16> to vector<8x256xbf16>
    %c4_27 = arith.constant 4 : index
    %c0_28 = arith.constant 0 : index
    %c0_29 = arith.constant 0 : index
    %30 = vector.load %arg8[%c4_27, %c0_28, %c0_29] : memref<12x256x768xbf16, #tpu.memory_space<vmem>>, vector<1x256x768xbf16>
    %31 = vector.shape_cast %30 : vector<1x256x768xbf16> to vector<256x768xbf16>
    %cst_30 = arith.constant dense<0.000000e+00> : vector<8x768xf32>
    %32 = tpu.matmul %29, %31, %cst_30 {dimension_numbers = #tpu.dot_dimension_numbers<[1], [0], [0], [1], [0, 0, 1, 1], [], []>} : vector<8x256xbf16>, vector<256x768xbf16>, vector<8x768xf32> -> vector<8x768xf32>
    %33 = arith.addf %27, %32 : vector<8x768xf32>
    %c5 = arith.constant 5 : index
    %c0_31 = arith.constant 0 : index
    %c0_32 = arith.constant 0 : index
    %34 = vector.load %arg14[%c5, %c0_31, %c0_32] : memref<12x8x256xbf16, #tpu.memory_space<vmem>>, vector<1x8x256xbf16>
    %35 = vector.shape_cast %34 : vector<1x8x256xbf16> to vector<8x256xbf16>
    %c5_33 = arith.constant 5 : index
    %c0_34 = arith.constant 0 : index
    %c0_35 = arith.constant 0 : index
    %36 = vector.load %arg8[%c5_33, %c0_34, %c0_35] : memref<12x256x768xbf16, #tpu.memory_space<vmem>>, vector<1x256x768xbf16>
    %37 = vector.shape_cast %36 : vector<1x256x768xbf16> to vector<256x768xbf16>
    %cst_36 = arith.constant dense<0.000000e+00> : vector<8x768xf32>
    %38 = tpu.matmul %35, %37, %cst_36 {dimension_numbers = #tpu.dot_dimension_numbers<[1], [0], [0], [1], [0, 0, 1, 1], [], []>} : vector<8x256xbf16>, vector<256x768xbf16>, vector<8x768xf32> -> vector<8x768xf32>
    %39 = arith.addf %33, %38 : vector<8x768xf32>
    %c6 = arith.constant 6 : index
    %c0_37 = arith.constant 0 : index
    %c0_38 = arith.constant 0 : index
    %40 = vector.load %arg14[%c6, %c0_37, %c0_38] : memref<12x8x256xbf16, #tpu.memory_space<vmem>>, vector<1x8x256xbf16>
    %41 = vector.shape_cast %40 : vector<1x8x256xbf16> to vector<8x256xbf16>
    %c6_39 = arith.constant 6 : index
    %c0_40 = arith.constant 0 : index
    %c0_41 = arith.constant 0 : index
    %42 = vector.load %arg8[%c6_39, %c0_40, %c0_41] : memref<12x256x768xbf16, #tpu.memory_space<vmem>>, vector<1x256x768xbf16>
    %43 = vector.shape_cast %42 : vector<1x256x768xbf16> to vector<256x768xbf16>
    %cst_42 = arith.constant dense<0.000000e+00> : vector<8x768xf32>
    %44 = tpu.matmul %41, %43, %cst_42 {dimension_numbers = #tpu.dot_dimension_numbers<[1], [0], [0], [1], [0, 0, 1, 1], [], []>} : vector<8x256xbf16>, vector<256x768xbf16>, vector<8x768xf32> -> vector<8x768xf32>
    %45 = arith.addf %39, %44 : vector<8x768xf32>
    %c7 = arith.constant 7 : index
    %c0_43 = arith.constant 0 : index
    %c0_44 = arith.constant 0 : index
    %46 = vector.load %arg14[%c7, %c0_43, %c0_44] : memref<12x8x256xbf16, #tpu.memory_space<vmem>>, vector<1x8x256xbf16>
    %47 = vector.shape_cast %46 : vector<1x8x256xbf16> to vector<8x256xbf16>
    %c7_45 = arith.constant 7 : index
    %c0_46 = arith.constant 0 : index
    %c0_47 = arith.constant 0 : index
    %48 = vector.load %arg8[%c7_45, %c0_46, %c0_47] : memref<12x256x768xbf16, #tpu.memory_space<vmem>>, vector<1x256x768xbf16>
    %49 = vector.shape_cast %48 : vector<1x256x768xbf16> to vector<256x768xbf16>
    %cst_48 = arith.constant dense<0.000000e+00> : vector<8x768xf32>
    %50 = tpu.matmul %47, %49, %cst_48 {dimension_numbers = #tpu.dot_dimension_numbers<[1], [0], [0], [1], [0, 0, 1, 1], [], []>} : vector<8x256xbf16>, vector<256x768xbf16>, vector<8x768xf32> -> vector<8x768xf32>
    %51 = arith.addf %45, %50 : vector<8x768xf32>
    %c8 = arith.constant 8 : index
    %c0_49 = arith.constant 0 : index
    %c0_50 = arith.constant 0 : index
    %52 = vector.load %arg14[%c8, %c0_49, %c0_50] : memref<12x8x256xbf16, #tpu.memory_space<vmem>>, vector<1x8x256xbf16>
    %53 = vector.shape_cast %52 : vector<1x8x256xbf16> to vector<8x256xbf16>
    %c8_51 = arith.constant 8 : index
    %c0_52 = arith.constant 0 : index
    %c0_53 = arith.constant 0 : index
    %54 = vector.load %arg8[%c8_51, %c0_52, %c0_53] : memref<12x256x768xbf16, #tpu.memory_space<vmem>>, vector<1x256x768xbf16>
    %55 = vector.shape_cast %54 : vector<1x256x768xbf16> to vector<256x768xbf16>
    %cst_54 = arith.constant dense<0.000000e+00> : vector<8x768xf32>
    %56 = tpu.matmul %53, %55, %cst_54 {dimension_numbers = #tpu.dot_dimension_numbers<[1], [0], [0], [1], [0, 0, 1, 1], [], []>} : vector<8x256xbf16>, vector<256x768xbf16>, vector<8x768xf32> -> vector<8x768xf32>
    %57 = arith.addf %51, %56 : vector<8x768xf32>
    %c9 = arith.constant 9 : index
    %c0_55 = arith.constant 0 : index
    %c0_56 = arith.constant 0 : index
    %58 = vector.load %arg14[%c9, %c0_55, %c0_56] : memref<12x8x256xbf16, #tpu.memory_space<vmem>>, vector<1x8x256xbf16>
    %59 = vector.shape_cast %58 : vector<1x8x256xbf16> to vector<8x256xbf16>
    %c9_57 = arith.constant 9 : index
    %c0_58 = arith.constant 0 : index
    %c0_59 = arith.constant 0 : index
    %60 = vector.load %arg8[%c9_57, %c0_58, %c0_59] : memref<12x256x768xbf16, #tpu.memory_space<vmem>>, vector<1x256x768xbf16>
    %61 = vector.shape_cast %60 : vector<1x256x768xbf16> to vector<256x768xbf16>
    %cst_60 = arith.constant dense<0.000000e+00> : vector<8x768xf32>
    %62 = tpu.matmul %59, %61, %cst_60 {dimension_numbers = #tpu.dot_dimension_numbers<[1], [0], [0], [1], [0, 0, 1, 1], [], []>} : vector<8x256xbf16>, vector<256x768xbf16>, vector<8x768xf32> -> vector<8x768xf32>
    %63 = arith.addf %57, %62 : vector<8x768xf32>
    %c10 = arith.constant 10 : index
    %c0_61 = arith.constant 0 : index
    %c0_62 = arith.constant 0 : index
    %64 = vector.load %arg14[%c10, %c0_61, %c0_62] : memref<12x8x256xbf16, #tpu.memory_space<vmem>>, vector<1x8x256xbf16>
    %65 = vector.shape_cast %64 : vector<1x8x256xbf16> to vector<8x256xbf16>
    %c10_63 = arith.constant 10 : index
    %c0_64 = arith.constant 0 : index
    %c0_65 = arith.constant 0 : index
    %66 = vector.load %arg8[%c10_63, %c0_64, %c0_65] : memref<12x256x768xbf16, #tpu.memory_space<vmem>>, vector<1x256x768xbf16>
    %67 = vector.shape_cast %66 : vector<1x256x768xbf16> to vector<256x768xbf16>
    %cst_66 = arith.constant dense<0.000000e+00> : vector<8x768xf32>
    %68 = tpu.matmul %65, %67, %cst_66 {dimension_numbers = #tpu.dot_dimension_numbers<[1], [0], [0], [1], [0, 0, 1, 1], [], []>} : vector<8x256xbf16>, vector<256x768xbf16>, vector<8x768xf32> -> vector<8x768xf32>
    %69 = arith.addf %63, %68 : vector<8x768xf32>
    %c11 = arith.constant 11 : index
    %c0_67 = arith.constant 0 : index
    %c0_68 = arith.constant 0 : index
    %70 = vector.load %arg14[%c11, %c0_67, %c0_68] : memref<12x8x256xbf16, #tpu.memory_space<vmem>>, vector<1x8x256xbf16>
    %71 = vector.shape_cast %70 : vector<1x8x256xbf16> to vector<8x256xbf16>
    %c11_69 = arith.constant 11 : index
    %c0_70 = arith.constant 0 : index
    %c0_71 = arith.constant 0 : index
    %72 = vector.load %arg8[%c11_69, %c0_70, %c0_71] : memref<12x256x768xbf16, #tpu.memory_space<vmem>>, vector<1x256x768xbf16>
    %73 = vector.shape_cast %72 : vector<1x256x768xbf16> to vector<256x768xbf16>
    %cst_72 = arith.constant dense<0.000000e+00> : vector<8x768xf32>
    %74 = tpu.matmul %71, %73, %cst_72 {dimension_numbers = #tpu.dot_dimension_numbers<[1], [0], [0], [1], [0, 0, 1, 1], [], []>} : vector<8x256xbf16>, vector<256x768xbf16>, vector<8x768xf32> -> vector<8x768xf32>
    %75 = arith.addf %69, %74 : vector<8x768xf32>
    %c0_73 = arith.constant 0 : index
    %c0_74 = arith.constant 0 : index
    %76 = vector.load %arg9[%c0_73, %c0_74] : memref<1x768xf32, #tpu.memory_space<vmem>>, vector<1x768xf32>
    %77 = vector.broadcast %76 : vector<1x768xf32> to vector<8x768xf32>
    %78 = arith.addf %75, %77 : vector<8x768xf32>
    %cst_75 = arith.constant 0.000000e+00 : f32
    %79 = vector.broadcast %cst_75 : f32 to vector<8x768xf32>
    %80 = arith.maximumf %78, %79 : vector<8x768xf32>
    %81 = math.absf %78 : vector<8x768xf32>
    %cst_76 = arith.constant 0.000000e+00 : f32
    %82 = vector.broadcast %cst_76 : f32 to vector<8x768xf32>
    %83 = arith.subf %82, %81 : vector<8x768xf32>
    %84 = math.exp %83 : vector<8x768xf32>
    %85 = math.log1p %84 : vector<8x768xf32>
    %86 = arith.addf %80, %85 : vector<8x768xf32>
    %87 = math.tanh %86 : vector<8x768xf32>
    %88 = arith.mulf %78, %87 : vector<8x768xf32>
    %c0_77 = arith.constant 0 : index
    %c0_78 = arith.constant 0 : index
    %89 = vector.load %arg13[%c0_77, %c0_78] : memref<8x768xf32, #tpu.memory_space<vmem>>, vector<8x768xf32>
    tpu.vector_store %arg13[%c0_77, %c0_78], %88 {strides = array<i32>} : memref<8x768xf32, #tpu.memory_space<vmem>>, vector<8x768xf32>,
    %c0_79 = arith.constant 0 : index
    %c0_80 = arith.constant 0 : index
    %90 = vector.load %arg15[%c0_79, %c0_80] : memref<8x10xf32, #tpu.memory_space<vmem>>, vector<8x10xf32>
    %c0_81 = arith.constant 0 : index
    %c0_82 = arith.constant 0 : index
    %91 = vector.load %arg10[%c0_81, %c0_82] : memref<768x10xf32, #tpu.memory_space<vmem>>, vector<768x10xf32>
    %cst_83 = arith.constant dense<0.000000e+00> : vector<8x10xf32>
    %92 = tpu.matmul %88, %91, %cst_83 {dimension_numbers = #tpu.dot_dimension_numbers<[1], [0], [0], [1], [0, 0, 1, 1], [], []>} : vector<8x768xf32>, vector<768x10xf32>, vector<8x10xf32> -> vector<8x10xf32>
    %93 = arith.addf %90, %92 : vector<8x10xf32>
    %c0_84 = arith.constant 0 : index
    %c0_85 = arith.constant 0 : index
    %94 = vector.load %arg15[%c0_84, %c0_85] : memref<8x10xf32, #tpu.memory_space<vmem>>, vector<8x10xf32>
    tpu.vector_store %arg15[%c0_84, %c0_85], %93 {strides = array<i32>} : memref<8x10xf32, #tpu.memory_space<vmem>>, vector<8x10xf32>,
    %c1_i32 = arith.constant 1 : i32
    %95 = arith.cmpi eq, %arg0, %c1_i32 : i32
    %96 = arith.extui %95 : i1 to i32
    %c0_i32_86 = arith.constant 0 : i32
    %97 = arith.cmpi ne, %96, %c0_i32_86 : i32
    scf.if %97 {
      %c0_87 = arith.constant 0 : index
      %c0_88 = arith.constant 0 : index
      %98 = vector.load %arg15[%c0_87, %c0_88] : memref<8x10xf32, #tpu.memory_space<vmem>>, vector<8x10xf32>
      %c0_89 = arith.constant 0 : index
      %c0_90 = arith.constant 0 : index
      %99 = vector.load %arg11[%c0_89, %c0_90] : memref<1x10xf32, #tpu.memory_space<vmem>>, vector<1x10xf32>
      %100 = vector.broadcast %99 : vector<1x10xf32> to vector<8x10xf32>
      %101 = arith.addf %98, %100 : vector<8x10xf32>
      %c0_91 = arith.constant 0 : index
      %c0_92 = arith.constant 0 : index
      %102 = vector.load %arg12[%c0_91, %c0_92] : memref<8x10xf32, #tpu.memory_space<vmem>>, vector<8x10xf32>
      tpu.vector_store %arg12[%c0_91, %c0_92], %101 {strides = array<i32>} : memref<8x10xf32, #tpu.memory_space<vmem>>, vector<8x10xf32>,
    } else {
    }
    return
  }
  func.func @transform_0(%arg0: i32) -> (i32, i32, i32) {
    %c0_i32 = arith.constant 0 : i32
    %c0_i32_0 = arith.constant 0 : i32
    %c0_i32_1 = arith.constant 0 : i32
    %c0_i32_2 = arith.constant 0 : i32
    return %c0_i32, %c0_i32_0, %c0_i32_1 : i32, i32, i32
  }
  func.func @transform_1(%arg0: i32) -> (i32, i32) {
    %c0_i32 = arith.constant 0 : i32
    %c0_i32_0 = arith.constant 0 : i32
    %c0_i32_1 = arith.constant 0 : i32
    return %c0_i32, %c0_i32_0 : i32, i32
  }
  func.func @transform_2(%arg0: i32) -> (i32, i32, i32) {
    %c0_i32 = arith.constant 0 : i32
    %c0_i32_0 = arith.constant 0 : i32
    %c0_i32_1 = arith.constant 0 : i32
    %c0_i32_2 = arith.constant 0 : i32
    return %c0_i32, %c0_i32_0, %c0_i32_1 : i32, i32, i32
  }
  func.func @transform_3(%arg0: i32) -> (i32, i32) {
    %c0_i32 = arith.constant 0 : i32
    %c0_i32_0 = arith.constant 0 : i32
    %c0_i32_1 = arith.constant 0 : i32
    return %c0_i32, %c0_i32_0 : i32, i32
  }
  func.func @transform_4(%arg0: i32) -> (i32, i32) {
    %c0_i32 = arith.constant 0 : i32
    %c0_i32_0 = arith.constant 0 : i32
    %c0_i32_1 = arith.constant 0 : i32
    return %c0_i32, %c0_i32_0 : i32, i32
  }
  func.func @transform_5(%arg0: i32) -> (i32, i32) {
    %c0_i32 = arith.constant 0 : i32
    %c0_i32_0 = arith.constant 0 : i32
    %c0_i32_1 = arith.constant 0 : i32
    return %c0_i32, %c0_i32_0 : i32, i32
  }
  func.func @transform_6(%arg0: i32) -> (i32, i32) {
    %c0_i32 = arith.constant 0 : i32
    %c0_i32_0 = arith.constant 0 : i32
    %c0_i32_1 = arith.constant 0 : i32
    return %c0_i32, %c0_i32_0 : i32, i32
  }
  func.func @transform_7(%arg0: i32) -> (i32, i32, i32) {
    %c0_i32 = arith.constant 0 : i32
    %c0_i32_0 = arith.constant 0 : i32
    %c0_i32_1 = arith.constant 0 : i32
    return %c0_i32, %c0_i32_0, %arg0 : i32, i32, i32
  }
  func.func @transform_8(%arg0: i32) -> (i32, i32) {
    %c0_i32 = arith.constant 0 : i32
    %c0_i32_0 = arith.constant 0 : i32
    return %c0_i32, %arg0 : i32, i32
  }
  func.func @transform_9(%arg0: i32) -> (i32, i32) {
    %c0_i32 = arith.constant 0 : i32
    %c0_i32_0 = arith.constant 0 : i32
    return %arg0, %c0_i32 : i32, i32
  }
  func.func @transform_10(%arg0: i32) -> (i32, i32) {
    %c0_i32 = arith.constant 0 : i32
    %c0_i32_0 = arith.constant 0 : i32
    %c0_i32_1 = arith.constant 0 : i32
    return %c0_i32, %c0_i32_0 : i32, i32
  }
  func.func @transform_11(%arg0: i32) -> (i32, i32) {
    %c0_i32 = arith.constant 0 : i32
    %c0_i32_0 = arith.constant 0 : i32
    %c0_i32_1 = arith.constant 0 : i32
    return %c0_i32, %c0_i32_0 : i32, i32
  }
  func.func @transform_12(%arg0: i32) -> (i32, i32) {
    %c0_i32 = arith.constant 0 : i32
    %c0_i32_0 = arith.constant 0 : i32
    return %c0_i32, %arg0 : i32, i32
  }
}

</mosaic_0001>

<bundles_post_ra>
// kernel: msscaeaa_forward.1
= control target key start
LH: loop header
LB: loop body
LE: loop exit
PB: predicated region body
PF: predicated region fallthrough
CT: control target
= control target key end

     0   :  { %s21554_s0 = inlined_call_operand.vmem [shape: bf16[2,208,192], index: 0, kind: input, shape index: {}]   ;;  %s21555_s1 = inlined_call_operand.vmem [shape: bf16[208,128], index: 1, kind: input, shape index: {}]   ;;  %s21556_s2 = inlined_call_operand.vmem [shape: bf16[12,8,256], index: 2, kind: input, shape index: {}]   ;;  %s21557_s3 = inlined_call_operand.hbm [shape: bf16[192,128], index: 3, kind: input, shape index: {}]   ;;  %s21558_s4 = inlined_call_operand.hbm [shape: f32[1,128], index: 4, kind: input, shape index: {}]   ;;  %s21559_s5 = inlined_call_operand.hbm [shape: bf16[384,256], index: 5, kind: input, shape index: {}]   ;;  %s21560_s6 = inlined_call_operand.hbm [shape: f32[1,256], index: 6, kind: input, shape index: {}]   ;;  %s21561_s7 = inlined_call_operand.hbm [shape: bf16[12,256,1536], index: 7, kind: input, shape index: {}]   ;;  %s21562_s8 = inlined_call_operand.hbm [shape: f32[1,1536], index: 8, kind: input, shape index: {}]   ;;  %s21563_s9 = inlined_call_operand.vmem [shape: f32[1536,10], index: 9, kind: input, shape index: {}]   ;;  %s21564_s10 = inlined_call_operand.hbm [shape: f32[1,10], index: 10, kind: input, shape index: {}]   ;;  %s21565_s11 = inlined_call_operand.hbm [shape: f32[8,10], index: 11, kind: output, shape index: {0}]   ;;  %s21566_s12 = inlined_call_operand.hbm [shape: f32[8,1536], index: 12, kind: output, shape index: {1}]  }
   0x1   :  { %21585 = sst [smem:[#allocation29_spill]] %s21555_s1 }
   0x2   :  { %21586 = sst [smem:[#allocation30_spill]] %s21556_s2 }
   0x3   :  { %21587 = sst [smem:[#allocation31_spill]] %s21557_s3 }
   0x4   :  { %21588 = sst [smem:[#allocation32_spill]] %s21558_s4 }
   0x5   :  { %21589 = sst [smem:[#allocation33_spill]] %s21559_s5 }
   0x6   :  { %21590 = sst [smem:[#allocation34_spill]] %s21561_s7 }
   0x7   :  { %21591 = sst [smem:[#allocation35_spill]] %s21565_s11 }
   0x8   :  { %21592 = sst [smem:[#allocation36_spill]] %s21566_s12 }
   0x9   :  { %18 = vsyncpa [#allocation5], 0 }
   0xa   :  { %19 = vsyncpa [#allocation8], 0 }
   0xb   :  { %20 = vsyncpa [#allocation11], 0 }
   0xc   :  { %21 = vsyncpa [#allocation6], 0 }
   0xd   :  { %22 = vsyncpa [#allocation17], 0 }
   0xe   :  { %24 = vsyncpa [#allocation17 + $0x1], 0  ;;  %s17952_s21 = smov 0   ;;  %s17954_s22 = smov 0  }
   0xf   :  { %s17956_s23 = smov 0   ;;  %s17958_s24 = smov 0  }
  0x10 LB: > { %21593 = sst [smem:[#allocation25_spill]] %s17855_s21  ;;  %s17973_s25 = sadd.s32 4294967295, %s17867_s24   ;;  %s17867_s24 = sphi %s17958_s24, %s21726_s24   ;;  %s17863_s23 = sphi %s17956_s23, %s21730_s23   ;;  %s17859_s22 = sphi %s17954_s22, %s21729_s22   ;;  %s17855_s21 = sphi %s17952_s21, %s21728_s21  }
  0x11   : > { %s12371_s26 = sadd.s32 4294967294, %s17867_s24   ;;  %p197_p0 = scmp.ne.s32.totalorder %s17859_s22, %s17855_s21 }
  0x12   : > { %p21569_p1 = scmp.eq.s32.totalorder %s17973_s25, 0  ;;  %p321_p3 = scmp.eq.s32.totalorder %s12371_s26, 1 }
  0x13   : > { %p12372_p5 = scmp.ge.s32.totalorder %s17867_s24, 1  ;;  %p328_p7 = scmp.lt.s32.totalorder %s17867_s24, 3 }
  0x14   : > { %p17982_p4 = por %p21569_p1, %p197_p0  ;;  %p17987_p6 = por %p321_p3, %p197_p0 }
  0x15   : > { %p17993_p9 = pnand %p12372_p5, %p328_p7  ;;  %s17869_s30 = smov [#allocation4]  }
  0x16   : > { %s21594_s27 = scalar_select %p17982_p4, 1, 0 }
  0x17   : > { %s21595_s28 = scalar_select %p17987_p6, 1, 0 }
  0x18   : > { %s21597_s29 = scalar_select %p17993_p9, 1, 0 }
  0x19   : > { %21596 = sst [smem:[#allocation26_spill]] %s21595_s28  ;;  %s349_s13 = sshll.u32 %s17869_s30, 4  ;;  %s17997_s13 = int_to_ptr.vmem [resolvable:$true] %s349_s13 }
  0x1a   : > { %p15216_p10 = pneg %p17993_p9  ;;  %s17870_s15 = smov [#allocation7]  }
  0x1b   : > { %s363_s16 = sshll.u32 %s17870_s15, 4  ;;  %s17871_s17 = smov [#allocation9]   ;;  %s18008_s16 = int_to_ptr.vmem [resolvable:$true] %s363_s16 }
  0x1c   : > { %p18004_p12 = pnand %p15216_p10, %p21569_p1  ;;  %s18010_s18 = sshll.u32 %s17871_s17, 4  ;;  %s374_s18 = int_to_ptr.vmem [resolvable:$true] %s18010_s18 }
  0x1d   : > { %s21599_s3 = sld [smem:[#allocation31_spill]] }
  0x1e   : > { %s21598_s14 = scalar_select %p18004_p12, 1, 0 }
  0x1f   : > { %p18020_p0 = pneg %p18004_p12 }
  0x23   : > { %s17555_s26 = scalar_lea.hbm %s21599_s3, 1536 }
  0x24   : > { %p17556_p13 = scmp.ne.s32.totalorder %s21599_s3, %s17555_s26  ;;  %p17562_p7 = scmp.lt.u32.totalorder %s17555_s26, %s21599_s3 }
  0x26   : > { %p17558_p3 = pnand %p18020_p0, %p17556_p13 }
  0x28   : > { %p17559_p5 = pneg %p17558_p3 }
  0x2a   : > { %p17564_p10 = pnand %p17562_p7, %p17559_p5 }
  0x2c   : > { %17567 = shalt.err (!%p17564_p10)
}
  0x2d   : > { %s17568_s28 = scalar_lea.vmem %s17997_s13, 1536  ;;  %p17576_p2 = scmp.lt.s32.totalorder %s17997_s13, %s17997_s13 }
  0x2e   : > { %p17569_p11 = scmp.ne.s32.totalorder %s17997_s13, %s17568_s28  ;;  %p17577_p6 = scmp.lt.s32.totalorder %s17568_s28, %s17568_s28 }
  0x30   : > { %p17571_p8 = pnand %p17569_p11, %p18020_p0  ;;  %p17578_p13 = por %p17577_p6, %p17576_p2 }
  0x32   : > { %p17572_p1 = pneg %p17571_p8 }
  0x34   : > { %p17579_p3 = pnand %p17578_p13, %p17572_p1 }
  0x36   : > { %17582 = shalt.err (!%p17579_p3)
}
  0x37   : > { %s17872_s19 = smov 64   ;;  %s17873_s20 = smov 4  }
  0x38   : > { %15219 = dma.hbm_to_vmem [thread:$0]  (!%p18004_p12), %s21599_s3, 1536, %s17997_s13, [#allocation5], %s17872_s19, %s17872_s19, %s17873_s20  }
  0x39   : > { %s21601_s4 = sld [smem:[#allocation32_spill]] }
  0x3f   : > { %s17583_s12 = scalar_lea.hbm %s21601_s4, 16 }
  0x40   : > { %p17584_p2 = scmp.ne.s32.totalorder %s21601_s4, %s17583_s12  ;;  %p17590_p8 = scmp.lt.u32.totalorder %s17583_s12, %s21601_s4 }
  0x42   : > { %p17586_p1 = pnand %p17584_p2, %p18020_p0 }
  0x44   : > { %p17587_p6 = pneg %p17586_p1 }
  0x46   : > { %p17592_p11 = pnand %p17590_p8, %p17587_p6 }
  0x48   : > { %17595 = shalt.err (!%p17592_p11)
}
  0x49   : > { %s17596_s13 = scalar_lea.vmem %s18008_s16, 16  ;;  %s17603_s2 = scalar_lea.vmem %s18008_s16, 32 }
  0x4a   : > { %p17597_p5 = scmp.ne.s32.totalorder %s18008_s16, %s17596_s13  ;;  %p17604_p13 = scmp.lt.s32.totalorder %s18008_s16, %s18008_s16 }
  0x4b   : > { %p17605_p3 = scmp.lt.s32.totalorder %s17603_s2, %s17596_s13 }
  0x4c   : > { %p17599_p7 = pnand %p17597_p5, %p18020_p0 }
  0x4d   : > { %p17606_p2 = por %p17605_p3, %p17604_p13 }
  0x4e   : > { %p17600_p10 = pneg %p17599_p7 }
  0x50   : > { %p17607_p1 = pnand %p17606_p2, %p17600_p10 }
  0x52   : > { %17610 = shalt.err (!%p17607_p1)
}
  0x53   : > { %15222 = dma.hbm_to_vmem [thread:$0]  (!%p18004_p12), %s21601_s4, 16, %s18008_s16, [#allocation8]  }
  0x54   : > { %s21602_s5 = sld [smem:[#allocation33_spill]] }
  0x5a   : > { %s17611_s20 = scalar_lea.hbm %s21602_s5, 6144 }
  0x5b   : > { %p17612_p6 = scmp.ne.s32.totalorder %s21602_s5, %s17611_s20  ;;  %p17618_p5 = scmp.lt.u32.totalorder %s17611_s20, %s21602_s5 }
  0x5d   : > { %p17614_p8 = pnand %p17612_p6, %p18020_p0 }
  0x5f   : > { %p17615_p11 = pneg %p17614_p8 }
  0x61   : > { %p17620_p7 = pnand %p17618_p5, %p17615_p11 }
  0x63   : > { %17623 = shalt.err (!%p17620_p7)
}
  0x64   : > { %s17624_s28 = scalar_lea.vmem %s374_s18, 6144  ;;  %p17632_p2 = scmp.lt.s32.totalorder %s374_s18, %s374_s18 }
  0x65   : > { %p17625_p10 = scmp.ne.s32.totalorder %s374_s18, %s17624_s28  ;;  %p17633_p1 = scmp.lt.s32.totalorder %s17624_s28, %s17624_s28 }
  0x67   : > { %p17627_p13 = pnand %p17625_p10, %p18020_p0  ;;  %p17634_p4 = por %p17633_p1, %p17632_p2 }
  0x69   : > { %p17628_p3 = pneg %p17627_p13 }
  0x6b   : > { %p17635_p9 = pnand %p17634_p4, %p17628_p3 }
  0x6d   : > { %17638 = shalt.err (!%p17635_p9)
}
  0x6e   : > { %s17874_s16 = smov 128   ;;  %s17875_s13 = smov 8  }
  0x6f   : > { %15225 = dma.hbm_to_vmem [thread:$0]  (!%p18004_p12), %s21602_s5, 6144, %s374_s18, [#allocation8], %s17874_s16, %s17874_s16, %s17875_s13  }
  0x70   : > { %s18085_s11 = sadd.s32 1, %s17867_s24   ;;  %s184_s19 = sadd.s32 1, %s17863_s23 }
  0x71   : > { %21603 = sst [smem:[#allocation27_spill]] %s18085_s11  ;;  %s181_s12 = ssub.s32 %s17867_s24, %s18085_s11 }
  0x72   : > { %p182_p4 = scmp.eq.s32.totalorder %s181_s12, 0  ;;  %p191_p9 = scmp.ne.s32.totalorder %s17863_s23, %s17859_s22 }
  0x73   : > { %p192_p6 = scmp.eq.s32.totalorder %s17867_s24, 0  ;;  %p15248_p8 = scmp.lt.s32.totalorder %s17867_s24, 2 }
  0x74   : > { %s18095_s20 = scalar_select %p182_p4, %s17863_s23, %s184_s19  }
  0x75   : > { %p193_p11 = por %p192_p6, %p191_p9  ;;  %p21605_p5 = scmp.eq.s32.totalorder %s17973_s25, 1 }
  0x76   : > { %21604 = sst [smem:[#allocation28_spill]] %s18095_s20  ;;  %s409_s30 = sand.u32 1, %s17867_s24  }
  0x77   : > { %p18099_p7 = por %p21605_p5, %p191_p9  ;;  %s21576_s15 = sand.u32 1, %s17863_s23  }
  0x78   : > { %s15181_s18 = smul.u32 9216, %s21576_s15  ;;  %p18108_p10 = pnand %p15248_p8, %p193_p11 }
  0x79   : > { %s21606_s26 = scalar_select %p18099_p7, 1, 0 }
  0x7a   : > { %s14805_s17 = smul.u32 384, %s17867_s24  ;;  %s21608_s7 = sld [smem:[#allocation34_spill]] }
  0x7b   : > { %s413_s1 = scalar_lea.vmem [#allocation12], %s15181_s18  ;;  %s18119_s19 = scalar_lea.sflag [#allocation5], %s409_s30 }
  0x7c   : > { %s420_s12 = sshll.u32 %s413_s1, 4  ;;  %p21582_p3 = pneg %p18108_p10  ;;  %s18117_s12 = int_to_ptr.vmem [resolvable:$true] %s420_s12 }
  0x80   : > { %s18115_s2 = scalar_lea.hbm %s21608_s7, %s14805_s17  ;;  %s17644_s13 = scalar_lea.hbm %s21608_s7, 294912 }
  0x81   : > { %s17639_s15 = scalar_lea.hbm %s18115_s2, 147456  ;;  %p17645_p4 = scmp.lt.u32.totalorder %s18115_s2, %s21608_s7 }
  0x82   : > { %p17640_p13 = scmp.ne.s32.totalorder %s18115_s2, %s17639_s15  ;;  %p17646_p9 = scmp.lt.u32.totalorder %s17644_s13, %s17639_s15 }
  0x83   : > { %p17648_p8 = scmp.lt.u32.totalorder %s17639_s15, %s18115_s2 }
  0x84   : > { %p17642_p2 = pnand %p21582_p3, %p17640_p13  ;;  %p17647_p6 = por %p17646_p9, %p17645_p4 }
  0x86   : > { %p17643_p1 = pneg %p17642_p2  ;;  %p17649_p11 = por %p17648_p8, %p17647_p6 }
  0x88   : > { %p17650_p5 = pnand %p17649_p11, %p17643_p1 }
  0x8a   : > { %17653 = shalt.err (!%p17650_p5)
}
  0x8b   : > { %s17654_s30 = scalar_lea.vmem %s18117_s12, 147456  ;;  %s17876_s18 = smov [#allocation12]  }
  0x8c   : > { %p17655_p13 = scmp.ne.s32.totalorder %s18117_s12, %s17654_s30  ;;  %s17659_s1 = sshll.u32 %s17876_s18, 4  ;;  %s17660_s1 = int_to_ptr.vmem [resolvable:$false] %s17659_s1 }
  0x8d   : > { %s17661_s3 = scalar_lea.vmem %s17660_s1, 294912  ;;  %p17662_p12 = scmp.lt.s32.totalorder %s18117_s12, %s17660_s1 }
  0x8e   : > { %p17657_p2 = pnand %p17655_p13, %p21582_p3  ;;  %p17663_p4 = scmp.lt.s32.totalorder %s17661_s3, %s17654_s30 }
  0x90   : > { %p17658_p7 = pneg %p17657_p2  ;;  %p17664_p9 = por %p17663_p4, %p17662_p12 }
  0x92   : > { %p17665_p6 = pnand %p17664_p9, %p17658_p7 }
  0x94   : > { %17668 = shalt.err (!%p17665_p6)
}
  0x95   : > { %s17877_s4 = smov 768   ;;  %s17878_s15 = smov 384  }
  0x96   : > { %s17879_s17 = smov 24   ;;  %s17880_s16 = smov [#allocation10]  }
  0x97   : > { %15235 = dma.hbm_to_vmem [thread:$0]  (!%p18108_p10), %s18115_s2, 147456, %s18117_s12, %s18119_s19, %s17877_s4, %s17878_s15, %s17879_s17  }
  0x98   : > { %s387_s13 = sshll.u32 %s17880_s16, 4  ;;  %s17881_s18 = smov [#allocation14]   ;;  %s388_s13 = int_to_ptr.vmem [resolvable:$true] %s387_s13 }
  0x99   : > { %s398_s5 = sshll.u32 %s17881_s18, 4  ;;  %s17669_s3 = scalar_lea.hbm %s21560_s6, 32  ;;  %s18147_s5 = int_to_ptr.vmem [resolvable:$true] %s398_s5 }
  0x9a   : > { %p17670_p12 = scmp.ne.s32.totalorder %s21560_s6, %s17669_s3  ;;  %p17676_p8 = scmp.lt.u32.totalorder %s17669_s3, %s21560_s6 }
  0x9c   : > { %p17672_p7 = pnand %p17670_p12, %p18020_p0 }
  0x9e   : > { %p17673_p1 = pneg %p17672_p7 }
  0xa0   : > { %p17678_p11 = pnand %p17676_p8, %p17673_p1 }
  0xa2   : > { %17681 = shalt.err (!%p17678_p11)
}
  0xa3   : > { %s17682_s12 = scalar_lea.vmem %s388_s13, 32  ;;  %p17690_p4 = scmp.lt.s32.totalorder %s388_s13, %s388_s13 }
  0xa4   : > { %p17683_p5 = scmp.ne.s32.totalorder %s388_s13, %s17682_s12  ;;  %p17691_p9 = scmp.lt.s32.totalorder %s17682_s12, %s17682_s12 }
  0xa6   : > { %p17685_p13 = pnand %p17683_p5, %p18020_p0  ;;  %p17692_p6 = por %p17691_p9, %p17690_p4 }
  0xa8   : > { %p17686_p2 = pneg %p17685_p13 }
  0xaa   : > { %p17693_p3 = pnand %p17692_p6, %p17686_p2 }
  0xac   : > { %17696 = shalt.err (!%p17693_p3)
}
  0xad   : > { %p21609_p12 = scmp.ne.s32.totalorder %s21598_s14, 0  ;;  %s17697_s15 = scalar_lea.hbm %s21564_s10, 16 }
  0xae   : > { %p17698_p7 = scmp.ne.s32.totalorder %s21564_s10, %s17697_s15  ;;  %p17704_p3 = scmp.lt.u32.totalorder %s17697_s15, %s21564_s10 }
  0xaf   : > { %15228 = dma.hbm_to_vmem [thread:$0]  (!%p21609_p12), %s21560_s6, 32, %s388_s13, [#allocation11]  }
  0xb0   : > { %p17700_p1 = pnand %p17698_p7, %p18020_p0 }
  0xb2   : > { %p17701_p8 = pneg %p17700_p1 }
  0xb4   : > { %p17706_p11 = pnand %p17704_p3, %p17701_p8 }
  0xb6   : > { %17709 = shalt.err (!%p17706_p11)
}
  0xb7   : > { %s17710_s13 = scalar_lea.vmem %s18147_s5, 16  ;;  %s17717_s1 = scalar_lea.vmem %s18147_s5, 32 }
  0xb8   : > { %p17711_p5 = scmp.ne.s32.totalorder %s18147_s5, %s17710_s13  ;;  %p17718_p4 = scmp.lt.s32.totalorder %s18147_s5, %s18147_s5 }
  0xb9   : > { %p17719_p9 = scmp.lt.s32.totalorder %s17717_s1, %s17710_s13 }
  0xba   : > { %p17713_p13 = pnand %p17711_p5, %p18020_p0 }
  0xbb   : > { %p17720_p6 = por %p17719_p9, %p17718_p4 }
  0xbc   : > { %p17714_p2 = pneg %p17713_p13 }
  0xbe   : > { %p17721_p7 = pnand %p17720_p6, %p17714_p2 }
  0xc0   : > { %17724 = shalt.err (!%p17721_p7)
}
  0xc1   : > { %15231 = dma.hbm_to_vmem [thread:$0]  (!%p21609_p12), %s21564_s10, 16, %s18147_s5, [#allocation8]  }
  0xc2   : > { %s21610_s21 = sand.u32 1, %s17863_s23   ;;  %s14806_s7 = smul.u32 96, %s17867_s24 }
  0xc3   : > { %s15182_s12 = smul.u32 6, %s21610_s21  ;;  %p21611_p1 = pneg %p18108_p10 }
  0xc4   : > { %s18197_s4 = scalar_lea.hbm %s21562_s8, %s14806_s7  ;;  %s17730_s18 = scalar_lea.hbm %s21562_s8, 192 }
  0xc5   : > { %s434_s14 = scalar_lea.vmem [#allocation13], %s15182_s12  ;;  %s17725_s17 = scalar_lea.hbm %s18197_s4, 96 }
  0xc6   : > { %s442_s15 = sshll.u32 %s434_s14, 4  ;;  %p17726_p0 = scmp.ne.s32.totalorder %s18197_s4, %s17725_s17  ;;  %s443_s15 = int_to_ptr.vmem [resolvable:$true] %s442_s15 }
  0xc7   : > { %p17731_p3 = scmp.lt.u32.totalorder %s18197_s4, %s21562_s8  ;;  %p17732_p11 = scmp.lt.u32.totalorder %s17730_s18, %s17725_s17 }
  0xc8   : > { %p17728_p12 = pnand %p17726_p0, %p21611_p1  ;;  %p17734_p13 = scmp.lt.u32.totalorder %s17725_s17, %s18197_s4 }
  0xc9   : > { %p17733_p5 = por %p17732_p11, %p17731_p3 }
  0xca   : > { %p17729_p8 = pneg %p17728_p12 }
  0xcb   : > { %p17735_p2 = por %p17734_p13, %p17733_p5 }
  0xcd   : > { %p17736_p4 = pnand %p17735_p2, %p17729_p8 }
  0xcf   : > { %17739 = shalt.err (!%p17736_p4)
}
  0xd0   : > { %s17740_s1 = scalar_lea.vmem %s443_s15, 96  ;;  %p21612_p6 = pmov %p21611_p1 }
  0xd1   : > { %p17741_p9 = scmp.ne.s32.totalorder %s443_s15, %s17740_s1  ;;  %s17882_s3 = smov [#allocation13]  }
  0xd2   : > { %s17745_s2 = sshll.u32 %s17882_s3, 4  ;;  %s17746_s2 = int_to_ptr.vmem [resolvable:$false] %s17745_s2 }
  0xd3   : > { %p17743_p7 = pnand %p17741_p9, %p21612_p6  ;;  %s17747_s21 = scalar_lea.vmem %s17746_s2, 192 }
  0xd4   : > { %p17748_p1 = scmp.lt.s32.totalorder %s443_s15, %s17746_s2  ;;  %p17749_p12 = scmp.lt.s32.totalorder %s17747_s21, %s17740_s1 }
  0xd5   : > { %p17744_p0 = pneg %p17743_p7 }
  0xd6   : > { %p17750_p3 = por %p17749_p12, %p17748_p1 }
  0xd8   : > { %p17751_p11 = pnand %p17750_p3, %p17744_p0 }
  0xda   : > { %17754 = shalt.err (!%p17751_p11)
}
  0xdb   : > { %15238 = dma.hbm_to_vmem [thread:$0]  (!%p18108_p10), %s18197_s4, 96, %s443_s15, %s18119_s19  }
  0xdc   : > { %p21613_p8 = scmp.ne.s32.totalorder %s21597_s29, 0 }
  0xdd   : > { %p21614_p5 = scmp.eq.s32.totalorder (!%p21613_p8), %s17973_s25, 0 }
  0xde   : > { %460 = sbr.rel (%p21613_p8) target bundleno = 2716 (0xa9c), region = 64 }
  0xe5   : > { %17826 = dma.done.wait (%p21614_p5), [#allocation5], 1536   ;;  %p21615_p13 = pmov %p21614_p5 }
  0xe6   : > { %p21616_p2 = pmov %p21614_p5 }
  0xe7   : > { %17828 = vsyncadd (%p21615_p13), [#allocation5], 4294965760 }
  0xe8   : > { %17830 = dma.done.wait (%p21616_p2), [#allocation8], 6160   ;;  %p21617_p4 = pmov %p21616_p2 }
  0xe9   : > { %p21618_p9 = pmov %p21616_p2 }
  0xea   : > { %17832 = vsyncadd (%p21617_p4), [#allocation8], 4294961136 }
  0xeb   : > { %17834 = dma.done.wait (%p21618_p9), [#allocation11], 32   ;;  %p21619_p10 = pmov %p21616_p2 }
  0xec   : > { %s478_s29 = sand.u32 1, %s17973_s25   ;;  %s18235_s28 = sand.u32 1, %s17859_s22  }
  0xed   : > { %17836 = vsyncadd (%p21619_p10), [#allocation11], 4294967264  ;;  %s15183_s19 = smul.u32 9216, %s18235_s28  ;;  %s479_s12 = scalar_lea.sflag [#allocation5], %s478_s29 }
  0xee   : > { %p21620_p6 = scmp.ne.s32.totalorder %s21594_s27, 0 }
  0xef   : > { %s18238_s7 = scalar_lea.vmem [#allocation12], %s15183_s19 }
  0xf0   : > { %17838 = dma.done.wait (%p21620_p6), %s479_s12, 147552  }
  0xf1   : > { %17840 = vsyncadd (%p21620_p6), %s479_s12, 4294819744  ;;  %s15184_s20 = smul.u32 6, %s18235_s28  ;;  %p21621_p7 = pmov %p21616_p2 }
  0xf3   : > { %s18245_s11 = scalar_lea.vmem [#allocation13], %s15184_s20 }
  0xf4   : > { %17842 = dma.done.wait (%p21621_p7), [#allocation8], 16   ;;  %p21622_p0 = pmov %p21616_p2 }
  0xf5   : > { %s15185_s4 = smul.u32 48, %s18235_s28  ;;  %p21623_p12 = scmp.ne.s32.totalorder %s17973_s25, 0 }
  0xf6   : > { %17844 = vsyncadd (%p21622_p0), [#allocation8], 4294967280  ;;  %s548_s14 = smul.u32 96, %s17973_s25  ;;  %vm560_vm0 = vcmask (!%p21623_p12), 80896   ;;  %v15304_v0 = vld [vmem:[#allocation4] sm:$0xff] (!%p21623_p12)   ;;  %v17883_v1 = vmov (!%p21623_p12), 0.0  }
  0xf7   : > { %s18258_s16 = scalar_lea.vmem [#allocation16], %s15185_s4  ;;  %559 = sbr.rel (%p21623_p12) target bundleno = 1004 (0x3ec), region = 96  ;;  %561 = vst.msk [vmem:[#allocation3] sm:$0xff] (!%p21623_p12), %vm560_vm0, %v17883_v1  ;;  %v21583_v2 = vmov (!%p21623_p12), 0   ;;  %v15305_v3 = vld [vmem:[#allocation4 + $0x8] sm:$0xff] (!%p21623_p12)   ;;  %v15306_v4 = vld [vmem:[#allocation4 + $0x10] sm:$0xff] (!%p21623_p12)  }
  0xf8   : > { %p549_p1 = scmp.lt.s32.totalorder %s548_s14, 191  ;;  %841 = vmatprep.subr.bf16.mxu0 (!%p21623_p12), %v21583_v2  ;;  %1161 = vmatprep.subr.bf16.mxu1 (!%p21623_p12), %v21583_v2  ;;  %v15307_v5 = vld [vmem:[#allocation4 + $0x18] sm:$0xff] (!%p21623_p12)   ;;  %vm801_vm1 = vcmask (!%p21623_p12), 523264   ;;  %v15308_v7 = vld [vmem:[#allocation4 + $0x20] sm:$0xff] (!%p21623_p12)   ;;  %v15321_v8 = vld [vmem:[%s21554_s0 + $0xd4] ss:$8 sps:$4 sm:$0xff] (!%p21623_p12)  }
  0xf9   : > { %842 = vmatpush1.bf16.msra.mxu0 (!%p21623_p12), %v15304_v0  ;;  %1162 = vmatpush1.bf16.msra.mxu1 (!%p21623_p12), %v15304_v0  ;;  %v15318_v6 = vld [vmem:[%s21554_s0 + $0x4] ss:$8 sps:$4 sm:$0xff] (!%p21623_p12)   ;;  %v15309_v9 = vld [vmem:[#allocation4 + $0x28] sm:$0xff] (!%p21623_p12)   ;;  %v15310_v10 = vld [vmem:[#allocation4 + $0x30] sm:$0xff] (!%p21623_p12)   ;;  %s21624_s20 = sld [smem:[#allocation29_spill]] (!%p21623_p12)  ;;  %vm1903_vm13 = vcmask (!%p21623_p12), 1043456  }
  0xfa   : > { %s21732_s14 = smov (!%p549_p1, %s548_s14), 191  ;;  %843 = vmatprep.subr.bf16.mxu0 (!%p21623_p12), %v21583_v2  ;;  %1163 = vmatprep.subr.bf16.mxu1 (!%p21623_p12), %v21583_v2  ;;  %v15311_v11 = vld [vmem:[#allocation4 + $0x38] sm:$0xff] (!%p21623_p12)   ;;  %v15312_v12 = vld [vmem:[#allocation4 + $0x40] sm:$0xff] (!%p21623_p12)   ;;  %v15313_v13 = vld [vmem:[#allocation4 + $0x48] sm:$0xff] (!%p21623_p12)   ;;  %s21679_s21 = sld [smem:[#allocation30_spill]] (!%p21623_p12) }
  0xfb   : > { %s12387_s15 = sshll.u32 %s21732_s14, 3  ;;  %12427 = vmatprep.mubr.msk.bf16.mxu0 (!%p21623_p12), %vm801_vm1, %v15318_v6  ;;  %12492 = vmatprep.mubr.msk.bf16.mxu1 (!%p21623_p12), %vm801_vm1, %v15321_v8  ;;  %v15314_v14 = vld [vmem:[#allocation4 + $0x50] sm:$0xff] (!%p21623_p12)   ;;  %v15315_v15 = vld [vmem:[#allocation4 + $0x58] sm:$0xff] (!%p21623_p12)   ;;  %v15394_v20 = vld [vmem:[#allocation9] ss:$8 sps:$4 sm:$0xff] (!%p21623_p12)  }
  0xfc   : > { %s18256_s5 = scalar_lea.vmem %s21563_s9, %s12387_s15  ;;  %v15316_v16 = vld [vmem:[%s21554_s0] ss:$8 sps:$4 sm:$0xff] (!%p21623_p12)   ;;  %v15319_v17 = vld [vmem:[%s21554_s0 + $0xd0] ss:$8 sps:$4 sm:$0xff] (!%p21623_p12)   ;;  %v15322_v18 = vld [vmem:[%s21554_s0 + $0x14] ss:$8 sps:$4 sm:$0xff] (!%p21623_p12)  }
  0xfd   : > { %844 = vmatpush1.bf16.msra.mxu0 (!%p21623_p12), %v15305_v3  ;;  %1164 = vmatpush1.bf16.msra.mxu1 (!%p21623_p12), %v15305_v3  ;;  %v15324_v19 = vld [vmem:[%s21554_s0 + $0xe4] ss:$8 sps:$4 sm:$0xff] (!%p21623_p12)   ;;  %v15326_v25 = vld [vmem:[%s21554_s0 + $0x10] ss:$8 sps:$4 sm:$0xff] (!%p21623_p12)   ;;  %v15327_v26 = vld [vmem:[%s21554_s0 + $0xe0] ss:$8 sps:$4 sm:$0xff] (!%p21623_p12)  }
  0xfe   : > { %845 = vmatprep.subr.bf16.mxu0 %v21583_v2  ;;  %1165 = vmatprep.subr.bf16.mxu1 %v21583_v2  ;;  %v15396_v21 = vld [vmem:[#allocation9 + $0x4] ss:$8 sps:$4 sm:$0xff]   ;;  %v15397_v22 = vld [vmem:[#allocation9 + $0x100] ss:$8 sps:$4 sm:$0xff]   ;;  %v15402_v24 = vld [vmem:[#allocation9 + $0x14] ss:$8 sps:$4 sm:$0xff]  }
  0xff   : > { %v15399_v23 = vld [vmem:[#allocation9 + $0x104] ss:$8 sps:$4 sm:$0xff]   ;;  %v15400_v28 = vld [vmem:[#allocation9 + $0x10] ss:$8 sps:$4 sm:$0xff]   ;;  %v15408_v30 = vld [vmem:[#allocation9 + $0x114] ss:$8 sps:$4 sm:$0xff]  }
 0x100   : > { %v15328_v27 = vld [vmem:[%s21554_s0 + $0x24] ss:$8 sps:$4 sm:$0xff]   ;;  %v15330_v31 = vld [vmem:[%s21554_s0 + $0xf4] ss:$8 sps:$4 sm:$0xff]   ;;  %v15332_v38 = vld [vmem:[%s21554_s0 + $0x20] ss:$8 sps:$4 sm:$0xff]   ;;  %s21680_s29 = smov %s21679_s21 }
 0x101   : > { %846 = vmatpush1.bf16.msra.mxu0 %v15306_v4  ;;  %1166 = vmatpush1.bf16.msra.mxu1 %v15306_v4  ;;  %v15406_v29 = vld [vmem:[#allocation9 + $0x110] ss:$8 sps:$4 sm:$0xff]   ;;  %v15403_v32 = vld [vmem:[#allocation9 + $0x20] ss:$8 sps:$4 sm:$0xff]   ;;  %v15405_v33 = vld [vmem:[#allocation9 + $0x24] ss:$8 sps:$4 sm:$0xff]  }
 0x102   : > { %847 = vmatprep.subr.bf16.mxu0 %v21583_v2  ;;  %1167 = vmatprep.subr.bf16.mxu1 %v21583_v2  ;;  %v15411_v34 = vld [vmem:[#allocation9 + $0x34] ss:$8 sps:$4 sm:$0xff]   ;;  %v15415_v35 = vld [vmem:[#allocation9 + $0x120] ss:$8 sps:$4 sm:$0xff]   ;;  %v15417_v36 = vld [vmem:[#allocation9 + $0x124] ss:$8 sps:$4 sm:$0xff]  }
 0x103   : > { %v15409_v37 = vld [vmem:[#allocation9 + $0x30] ss:$8 sps:$4 sm:$0xff]   ;;  %v15414_v42 = vld [vmem:[#allocation9 + $0x44] ss:$8 sps:$4 sm:$0xff]   ;;  %v15412_v43 = vld [vmem:[#allocation9 + $0x40] ss:$8 sps:$4 sm:$0xff]  }
 0x104   : > { %v15333_v39 = vld [vmem:[%s21554_s0 + $0xf0] ss:$8 sps:$4 sm:$0xff]   ;;  %v15334_v40 = vld [vmem:[%s21554_s0 + $0x34] ss:$8 sps:$4 sm:$0xff]   ;;  %v15336_v41 = vld [vmem:[%s21554_s0 + $0x104] ss:$8 sps:$4 sm:$0xff]  }
 0x105   : > { %848 = vmatpush1.bf16.msra.mxu0 %v15307_v5  ;;  %1168 = vmatpush1.bf16.msra.mxu1 %v15307_v5  ;;  %v15420_v44 = vld [vmem:[#allocation9 + $0x54] ss:$8 sps:$4 sm:$0xff]   ;;  %v15418_v45 = vld [vmem:[#allocation9 + $0x50] ss:$8 sps:$4 sm:$0xff]  }
 0x106   : > { %849 = vmatprep.subr.bf16.mxu0 %v21583_v2  ;;  %1169 = vmatprep.subr.bf16.mxu1 %v21583_v2  ;;  %v15338_v46 = vld [vmem:[%s21554_s0 + $0x30] ss:$8 sps:$4 sm:$0xff]   ;;  %v15339_v47 = vld [vmem:[%s21554_s0 + $0x100] ss:$8 sps:$4 sm:$0xff]   ;;  %v15340_v48 = vld [vmem:[%s21554_s0 + $0x44] ss:$8 sps:$4 sm:$0xff]  }
 0x107   : > { %v15342_v49 = vld [vmem:[%s21554_s0 + $0x114] ss:$8 sps:$4 sm:$0xff]   ;;  %v15344_v50 = vld [vmem:[%s21554_s0 + $0x40] ss:$8 sps:$4 sm:$0xff]   ;;  %v15345_v51 = vld [vmem:[%s21554_s0 + $0x110] ss:$8 sps:$4 sm:$0xff]  }
 0x108   : > { %v15346_v52 = vld [vmem:[%s21554_s0 + $0x54] ss:$8 sps:$4 sm:$0xff]   ;;  %v15348_v53 = vld [vmem:[%s21554_s0 + $0x124] ss:$8 sps:$4 sm:$0xff]   ;;  %v15350_v54 = vld [vmem:[%s21554_s0 + $0x50] ss:$8 sps:$4 sm:$0xff]  }
 0x109   : > { %850 = vmatpush1.bf16.msra.mxu0 %v15308_v7  ;;  %1170 = vmatpush1.bf16.msra.mxu1 %v15308_v7  ;;  %v15351_v55 = vld [vmem:[%s21554_s0 + $0x120] ss:$8 sps:$4 sm:$0xff]   ;;  %v15352_v56 = vld [vmem:[%s21554_s0 + $0x64] ss:$8 sps:$4 sm:$0xff]   ;;  %v15354_v57 = vld [vmem:[%s21554_s0 + $0x134] ss:$8 sps:$4 sm:$0xff]  }
 0x10a   : > { %851 = vmatprep.subr.bf16.mxu0 %v21583_v2  ;;  %1171 = vmatprep.subr.bf16.mxu1 %v21583_v2  ;;  %v15356_v58 = vld [vmem:[%s21554_s0 + $0x60] ss:$8 sps:$4 sm:$0xff]   ;;  %v15357_v59 = vld [vmem:[%s21554_s0 + $0x130] ss:$8 sps:$4 sm:$0xff]   ;;  %v15358_v60 = vld [vmem:[%s21554_s0 + $0x74] ss:$8 sps:$4 sm:$0xff]  }
 0x10b   : > { %v15360_v61 = vld [vmem:[%s21554_s0 + $0x144] ss:$8 sps:$4 sm:$0xff]   ;;  %v15362_v62 = vld [vmem:[%s21554_s0 + $0x70] ss:$8 sps:$4 sm:$0xff]   ;;  %v15363_v63 = vld [vmem:[%s21554_s0 + $0x140] ss:$8 sps:$4 sm:$0xff]  }
 0x10c   : > { %v15364_v0 = vld [vmem:[%s21554_s0 + $0x84] ss:$8 sps:$4 sm:$0xff]   ;;  %v15366_v1 = vld [vmem:[%s21554_s0 + $0x154] ss:$8 sps:$4 sm:$0xff]   ;;  %v15368_v3 = vld [vmem:[%s21554_s0 + $0x80] ss:$8 sps:$4 sm:$0xff]  }
 0x10d   : > { %852 = vmatpush1.bf16.msra.mxu0 %v15309_v9  ;;  %1172 = vmatpush1.bf16.msra.mxu1 %v15309_v9  ;;  %v15369_v4 = vld [vmem:[%s21554_s0 + $0x150] ss:$8 sps:$4 sm:$0xff]   ;;  %v15370_v5 = vld [vmem:[%s21554_s0 + $0x94] ss:$8 sps:$4 sm:$0xff]   ;;  %v15372_v6 = vld [vmem:[%s21554_s0 + $0x164] ss:$8 sps:$4 sm:$0xff]  }
 0x10e   : > { %853 = vmatprep.subr.bf16.mxu0 %v21583_v2  ;;  %1173 = vmatprep.subr.bf16.mxu1 %v21583_v2  ;;  %v15374_v7 = vld [vmem:[%s21554_s0 + $0x90] ss:$8 sps:$4 sm:$0xff]   ;;  %v15375_v8 = vld [vmem:[%s21554_s0 + $0x160] ss:$8 sps:$4 sm:$0xff]   ;;  %v15376_v9 = vld [vmem:[%s21554_s0 + $0xa4] ss:$8 sps:$4 sm:$0xff]  }
 0x111   : > { %854 = vmatpush1.bf16.msra.mxu0 %v15310_v10  ;;  %1174 = vmatpush1.bf16.msra.mxu1 %v15310_v10  ;;  %v15378_v10 = vld [vmem:[%s21554_s0 + $0x174] ss:$8 sps:$4 sm:$0xff]  }
 0x112   : > { %855 = vmatprep.subr.bf16.mxu0 %v21583_v2  ;;  %1175 = vmatprep.subr.bf16.mxu1 %v21583_v2 }
 0x115   : > { %856 = vmatpush1.bf16.msra.mxu0 %v15311_v11  ;;  %1176 = vmatpush1.bf16.msra.mxu1 %v15311_v11  ;;  %v15380_v11 = vld [vmem:[%s21554_s0 + $0xa0] ss:$8 sps:$4 sm:$0xff]  }
 0x116   : > { %857 = vmatprep.subr.bf16.mxu0 %v21583_v2  ;;  %1177 = vmatprep.subr.bf16.mxu1 %v21583_v2 }
 0x119   : > { %858 = vmatpush1.bf16.msra.mxu0 %v15312_v12  ;;  %1178 = vmatpush1.bf16.msra.mxu1 %v15312_v12  ;;  %v15381_v12 = vld [vmem:[%s21554_s0 + $0x170] ss:$8 sps:$4 sm:$0xff]  }
 0x11a   : > { %859 = vmatprep.subr.bf16.mxu0 %v21583_v2  ;;  %1179 = vmatprep.subr.bf16.mxu1 %v21583_v2 }
 0x11d   : > { %860 = vmatpush1.bf16.msra.mxu0 %v15313_v13  ;;  %1180 = vmatpush1.bf16.msra.mxu1 %v15313_v13  ;;  %v15382_v13 = vld [vmem:[%s21554_s0 + $0xb4] ss:$8 sps:$4 sm:$0xff]  }
 0x11e   : > { %861 = vmatprep.subr.bf16.mxu0 %v21583_v2  ;;  %1181 = vmatprep.subr.bf16.mxu1 %v21583_v2 }
 0x121   : > { %862 = vmatpush1.bf16.msra.mxu0 %v15314_v14  ;;  %1182 = vmatpush1.bf16.msra.mxu1 %v15314_v14  ;;  %v15384_v14 = vld [vmem:[%s21554_s0 + $0x184] ss:$8 sps:$4 sm:$0xff]  }
 0x122   : > { %863 = vmatprep.subr.bf16.mxu0 %v21583_v2  ;;  %1183 = vmatprep.subr.bf16.mxu1 %v21583_v2 }
 0x125   : > { %864 = vmatpush1.bf16.msra.mxu0 %v15315_v15  ;;  %1184 = vmatpush1.bf16.msra.mxu1 %v15315_v15  ;;  %v15386_v15 = vld [vmem:[%s21554_s0 + $0xb0] ss:$8 sps:$4 sm:$0xff]  }
 0x126   : > { %2241 = vmatprep.subr.bf16.mxu1 %v15396_v21  ;;  %2394 = vmatprep.subr.bf16.mxu0 %v15399_v23  ;;  %v15423_v21 = vld [vmem:[#allocation9 + $0x64] ss:$8 sps:$4 sm:$0xff]   ;;  %v15429_v23 = vld [vmem:[#allocation9 + $0x74] ss:$8 sps:$4 sm:$0xff]  }
 0x128   : > { %874 = vmatmul.mubr.bf16.vlgmr.msra.gmra.mrb[0].mxu0 %v15316_v16  ;;  %1194 = vmatmul.mubr.bf16.vlgmr.msra.gmra.mrb[0].mxu1 %v15319_v17  ;;  %v15387_v16 = vld [vmem:[%s21554_s0 + $0x180] ss:$8 sps:$4 sm:$0xff]   ;;  %v15388_v17 = vld [vmem:[%s21554_s0 + $0xc4] ss:$8 sps:$4 sm:$0xff]  }
 0x129   : > { %12428 = vmatprep.mubr.msk.bf16.mxu0 %vm801_vm1, %v15322_v18  ;;  %12493 = vmatprep.mubr.msk.bf16.mxu1 %vm801_vm1, %v15324_v19  ;;  %v15390_v18 = vld [vmem:[%s21554_s0 + $0x194] ss:$8 sps:$4 sm:$0xff]   ;;  %v15392_v19 = vld [vmem:[%s21554_s0 + $0xc0] ss:$8 sps:$4 sm:$0xff]  }
 0x12a   : > { %2242 = vmatpush1.bf16.msra.mxu1 %v15394_v20  ;;  %2395 = vmatpush1.bf16.msra.mxu0 %v15397_v22  ;;  %v15393_v20 = vld [vmem:[%s21554_s0 + $0x190] ss:$8 sps:$4 sm:$0xff]  }
 0x12b   : > { %2243 = vmatprep.subr.bf16.mxu1 %v15402_v24  ;;  %2396 = vmatprep.subr.bf16.mxu0 %v15408_v30  ;;  %v15421_v22 = vld [vmem:[#allocation9 + $0x60] ss:$8 sps:$4 sm:$0xff]   ;;  %v15427_v24 = vld [vmem:[#allocation9 + $0x70] ss:$8 sps:$4 sm:$0xff]  }
 0x12c   : > { %v15424_v30 = vld [vmem:[#allocation9 + $0x130] ss:$8 sps:$4 sm:$0xff]  }
 0x12e   : > { %2244 = vmatpush1.bf16.msra.mxu1 %v15400_v28  ;;  %2397 = vmatpush1.bf16.msra.mxu0 %v15406_v29  ;;  %v15426_v28 = vld [vmem:[#allocation9 + $0x134] ss:$8 sps:$4 sm:$0xff]   ;;  %v15436_v29 = vld [vmem:[#allocation9 + $0x90] ss:$8 sps:$4 sm:$0xff]  }
 0x12f   : > { %2245 = vmatprep.subr.bf16.mxu1 %v15405_v33  ;;  %2398 = vmatprep.subr.bf16.mxu0 %v15417_v36  ;;  %v15441_v33 = vld [vmem:[#allocation9 + $0xa4] ss:$8 sps:$4 sm:$0xff]   ;;  %v15445_v36 = vld [vmem:[#allocation9 + $0xb0] ss:$8 sps:$4 sm:$0xff]  }
 0x130   : > { %882 = vmatmul.mubr.bf16.gmra.mrb[4].mxu0 %v15326_v25  ;;  %1202 = vmatmul.mubr.bf16.gmra.mrb[4].mxu1 %v15327_v26  ;;  %v15432_v25 = vld [vmem:[#allocation9 + $0x84] ss:$8 sps:$4 sm:$0xff]   ;;  %v15430_v26 = vld [vmem:[#allocation9 + $0x80] ss:$8 sps:$4 sm:$0xff]  }
 0x131   : > { %12429 = vmatprep.mubr.msk.bf16.mxu0 %vm801_vm1, %v15328_v27  ;;  %12494 = vmatprep.mubr.msk.bf16.mxu1 %vm801_vm1, %v15330_v31  ;;  %v15438_v27 = vld [vmem:[#allocation9 + $0x94] ss:$8 sps:$4 sm:$0xff]   ;;  %v15435_v31 = vld [vmem:[#allocation9 + $0x144] ss:$8 sps:$4 sm:$0xff]  }
 0x132   : > { %2246 = vmatpush1.bf16.msra.mxu1 %v15403_v32  ;;  %2399 = vmatpush1.bf16.msra.mxu0 %v15415_v35  ;;  %v15433_v32 = vld [vmem:[#allocation9 + $0x140] ss:$8 sps:$4 sm:$0xff]   ;;  %v15447_v35 = vld [vmem:[#allocation9 + $0xb4] ss:$8 sps:$4 sm:$0xff]  }
 0x133   : > { %2247 = vmatprep.subr.bf16.mxu1 %v15411_v34  ;;  %2400 = vmatprep.subr.bf16.mxu0 %v15426_v28  ;;  %v15439_v34 = vld [vmem:[#allocation9 + $0xa0] ss:$8 sps:$4 sm:$0xff]  }
 0x136   : > { %2248 = vmatpush1.bf16.msra.mxu1 %v15409_v37  ;;  %2401 = vmatpush1.bf16.msra.mxu0 %v15424_v30  ;;  %v15444_v37 = vld [vmem:[#allocation9 + $0x154] ss:$8 sps:$4 sm:$0xff]  }
 0x137   : > { %2249 = vmatprep.subr.bf16.mxu1 %v15414_v42  ;;  %2402 = vmatprep.subr.bf16.mxu0 %v15435_v31  ;;  %v15451_v42 = vld [vmem:[#allocation9 + $0x160] ss:$8 sps:$4 sm:$0xff]  }
 0x138   : > { %890 = vmatmul.mubr.bf16.gmra.mrb[8].mxu0 %v15332_v38  ;;  %1210 = vmatmul.mubr.bf16.gmra.mrb[8].mxu1 %v15333_v39  ;;  %v15450_v38 = vld [vmem:[#allocation9 + $0xc4] ss:$8 sps:$4 sm:$0xff]   ;;  %v15442_v39 = vld [vmem:[#allocation9 + $0x150] ss:$8 sps:$4 sm:$0xff]  }
 0x139   : > { %12430 = vmatprep.mubr.msk.bf16.mxu0 %vm801_vm1, %v15334_v40  ;;  %12495 = vmatprep.mubr.msk.bf16.mxu1 %vm801_vm1, %v15336_v41  ;;  %v15448_v40 = vld [vmem:[#allocation9 + $0xc0] ss:$8 sps:$4 sm:$0xff]   ;;  %v15453_v41 = vld [vmem:[#allocation9 + $0x164] ss:$8 sps:$4 sm:$0xff]  }
 0x13a   : > { %2250 = vmatpush1.bf16.msra.mxu1 %v15412_v43  ;;  %2403 = vmatpush1.bf16.msra.mxu0 %v15433_v32  ;;  %v15456_v43 = vld [vmem:[#allocation9 + $0xd4] ss:$8 sps:$4 sm:$0xff]  }
 0x13b   : > { %2251 = vmatprep.subr.bf16.mxu1 %v15420_v44  ;;  %2404 = vmatprep.subr.bf16.mxu0 %v15444_v37  ;;  %v15454_v44 = vld [vmem:[#allocation9 + $0xd0] ss:$8 sps:$4 sm:$0xff]  }
 0x13e   : > { %2252 = vmatpush1.bf16.msra.mxu1 %v15418_v45  ;;  %2405 = vmatpush1.bf16.msra.mxu0 %v15442_v39  ;;  %v15459_v45 = vld [vmem:[#allocation9 + $0xe4] ss:$8 sps:$4 sm:$0xff]  }
 0x13f   : > { %2253 = vmatprep.subr.bf16.mxu1 %v15423_v21  ;;  %2406 = vmatprep.subr.bf16.mxu0 %v15453_v41 }
 0x140   : > { %898 = vmatmul.mubr.bf16.gmra.mrb[12].mxu0 %v15338_v46  ;;  %1218 = vmatmul.mubr.bf16.gmra.mrb[12].mxu1 %v15339_v47  ;;  %v15457_v46 = vld [vmem:[#allocation9 + $0xe0] ss:$8 sps:$4 sm:$0xff]   ;;  %v15462_v47 = vld [vmem:[#allocation9 + $0x174] ss:$8 sps:$4 sm:$0xff]  }
 0x141   : > { %12431 = vmatprep.mubr.msk.bf16.mxu0 %vm801_vm1, %v15340_v48  ;;  %12496 = vmatprep.mubr.msk.bf16.mxu1 %vm801_vm1, %v15342_v49  ;;  %v15460_v48 = vld [vmem:[#allocation9 + $0x170] ss:$8 sps:$4 sm:$0xff]   ;;  %v15465_v49 = vld [vmem:[#allocation9 + $0xf4] ss:$8 sps:$4 sm:$0xff]  }
 0x142   : > { %2254 = vmatpush1.bf16.msra.mxu1 %v15421_v22  ;;  %2407 = vmatpush1.bf16.msra.mxu0 %v15451_v42  ;;  %v18510_v42 = vld [vmem:[%s21624_s20 + $0x10] sm:$0xff]  }
 0x143   : > { %2255 = vmatprep.subr.bf16.mxu1 %v15429_v23  ;;  %2408 = vmatprep.subr.bf16.mxu0 %v15462_v47  ;;  %v18519_v47 = vld [vmem:[%s21624_s20 + $0x18] sm:$0xff]  }
 0x146   : > { %2256 = vmatpush1.bf16.msra.mxu1 %v15427_v24  ;;  %2409 = vmatpush1.bf16.msra.mxu0 %v15460_v48 }
 0x147   : > { %2257 = vmatprep.subr.bf16.mxu1 %v15432_v25 }
 0x148   : > { %906 = vmatmul.mubr.bf16.gmra.mrb[16].mxu0 %v15344_v50  ;;  %1226 = vmatmul.mubr.bf16.gmra.mrb[16].mxu1 %v15345_v51  ;;  %v15463_v50 = vld [vmem:[#allocation9 + $0xf0] ss:$8 sps:$4 sm:$0xff]  }
 0x149   : > { %12432 = vmatprep.mubr.msk.bf16.mxu0 %vm801_vm1, %v15346_v52  ;;  %12497 = vmatprep.mubr.msk.bf16.mxu1 %vm801_vm1, %v15348_v53  ;;  %v18469_v53 = vld [vmem:[#allocation7] ss:$0 sm:$0xff] }
 0x14a   : > { %2258 = vmatpush1.bf16.msra.mxu1 %v15430_v26 }
 0x14b   : > { %2259 = vmatprep.subr.bf16.mxu1 %v15438_v27 }
 0x14e   : > { %2260 = vmatpush1.bf16.msra.mxu1 %v15436_v29 }
 0x14f   : > { %2261 = vmatprep.subr.bf16.mxu1 %v15441_v33 }
 0x150   : > { %914 = vmatmul.mubr.bf16.gmra.mrb[20].mxu0 %v15350_v54  ;;  %1234 = vmatmul.mubr.bf16.gmra.mrb[20].mxu1 %v15351_v55 }
 0x151   : > { %12433 = vmatprep.mubr.msk.bf16.mxu0 %vm801_vm1, %v15352_v56  ;;  %12498 = vmatprep.mubr.msk.bf16.mxu1 %vm801_vm1, %v15354_v57 }
 0x152   : > { %2262 = vmatpush1.bf16.msra.mxu1 %v15439_v34 }
 0x153   : > { %2263 = vmatprep.subr.bf16.mxu1 %v15447_v35 }
 0x156   : > { %2264 = vmatpush1.bf16.msra.mxu1 %v15445_v36  ;;  %v18493_v36 = vld [vmem:[%s21624_s20] sm:$0xff]  }
 0x157   : > { %2265 = vmatprep.subr.bf16.mxu1 %v15450_v38  ;;  %v18500_v38 = vld [vmem:[%s21624_s20 + $0x8] sm:$0xff]  }
 0x158   : > { %922 = vmatmul.mubr.bf16.gmra.mrb[24].mxu0 %v15356_v58  ;;  %1242 = vmatmul.mubr.bf16.gmra.mrb[24].mxu1 %v15357_v59 }
 0x159   : > { %12434 = vmatprep.mubr.msk.bf16.mxu0 %vm801_vm1, %v15358_v60  ;;  %12499 = vmatprep.mubr.msk.bf16.mxu1 %vm801_vm1, %v15360_v61 }
 0x15a   : > { %2266 = vmatpush1.bf16.msra.mxu1 %v15448_v40 }
 0x15b   : > { %2267 = vmatprep.subr.bf16.mxu1 %v15456_v43 }
 0x15e   : > { %2268 = vmatpush1.bf16.msra.mxu1 %v15454_v44  ;;  %v14822_v44 = vunpack.c.l.bf16 %v18493_v36 }
 0x15f   : > { %2269 = vmatprep.subr.bf16.mxu1 %v15459_v45 }
 0x160   : > { %930 = vmatmul.mubr.bf16.gmra.mrb[28].mxu0 %v15362_v62  ;;  %1250 = vmatmul.mubr.bf16.gmra.mrb[28].mxu1 %v15363_v63 }
 0x161   : > { %12435 = vmatprep.mubr.msk.bf16.mxu0 %vm801_vm1, %v15364_v0  ;;  %12500 = vmatprep.mubr.msk.bf16.mxu1 %vm801_vm1, %v15366_v1 }
 0x162   : > { %2270 = vmatpush1.bf16.msra.mxu1 %v15457_v46 }
 0x163   : > { %2271 = vmatprep.subr.bf16.mxu1 %v15465_v49  ;;  %v14823_v49 = vunpack.c.h.bf16 %v18493_v36 }
 0x166   : > { %2272 = vmatpush1.bf16.msra.mxu1 %v15463_v50  ;;  %v14826_v50 = vunpack.c.l.bf16 %v18500_v38 }
 0x168   : > { %938 = vmatmul.mubr.bf16.gmra.mrb[32].mxu0 %v15368_v3  ;;  %1258 = vmatmul.mubr.bf16.gmra.mrb[32].mxu1 %v15369_v4 }
 0x169   : > { %12436 = vmatprep.mubr.msk.bf16.mxu0 %vm801_vm1, %v15370_v5  ;;  %12501 = vmatprep.mubr.msk.bf16.mxu1 %vm801_vm1, %v15372_v6 }
 0x170   : > { %946 = vmatmul.mubr.bf16.gmra.mrb[36].mxu0 %v15374_v7  ;;  %1266 = vmatmul.mubr.bf16.gmra.mrb[36].mxu1 %v15375_v8 }
 0x171   : > { %12437 = vmatprep.mubr.msk.bf16.mxu0 %vm801_vm1, %v15376_v9  ;;  %12502 = vmatprep.mubr.msk.bf16.mxu1 %vm801_vm1, %v15378_v10 }
 0x178   : > { %954 = vmatmul.mubr.bf16.gmra.mrb[40].mxu0 %v15380_v11  ;;  %1274 = vmatmul.mubr.bf16.gmra.mrb[40].mxu1 %v15381_v12 }
 0x179   : > { %12438 = vmatprep.mubr.msk.bf16.mxu0 %vm801_vm1, %v15382_v13  ;;  %12503 = vmatprep.mubr.msk.bf16.mxu1 %vm801_vm1, %v15384_v14 }
 0x180   : > { %962 = vmatmul.mubr.bf16.gmra.mrb[44].mxu0 %v15386_v15  ;;  %1282 = vmatmul.mubr.bf16.gmra.mrb[44].mxu1 %v15387_v16 }
 0x181   : > { %12439 = vmatprep.mubr.msk.bf16.mxu0 %vm801_vm1, %v15388_v17  ;;  %12504 = vmatprep.mubr.msk.bf16.mxu1 %vm801_vm1, %v15390_v18 }
 0x188   : > { %970 = vmatmul.mubr.bf16.gmra.mrb[48].mxu0 %v15392_v19  ;;  %1290 = vmatmul.mubr.bf16.gmra.mrb[48].mxu1 %v15393_v20 }
 0x189   : > { %2426 = vmatprep.mubr.bf16.mxu0 %v21583_v2 }
 0x1fb   : > { %v875_v51 = vpop.f32.mrb[0].mxu0  ;;  %v1195_v52 = vpop.f32.mrb[0].mxu1 }
 0x1fc   : > { %v1298_v54 = vmax.f32 %v875_v51, %v1195_v52  ;;  %v877_v55 = vpop.f32.mrb[1].mxu0  ;;  %v1197_v56 = vpop.f32.mrb[1].mxu1 }
 0x1fd   : > { %v878_v57 = vpop.f32.mrb[2].mxu0  ;;  %v1198_v58 = vpop.f32.mrb[2].mxu1 }
 0x1fe   : > { %v18472_v59 = vadd.f32 %v18469_v53, %v1298_v54  ;;  %v1299_v60 = vmax.f32 %v878_v57, %v1198_v58  ;;  %v880_v61 = vpop.f32.mrb[3].mxu0  ;;  %v1200_v62 = vpop.f32.mrb[3].mxu1  ;;  %v14827_v54 = vunpack.c.h.bf16 %v18500_v38  ;;  %v18529_v58 = vld [vmem:[%s21624_s20 + $0x20] sm:$0xff]  }
 0x200   : > { %v1383_v63 = vand.u32 2147483647, %v18472_v59  ;;  %v18476_v0 = vadd.f32 %v18469_v53, %v1299_v60  ;;  %v18534_v60 = vld [vmem:[%s21624_s20 + $0x28] sm:$0xff]  }
 0x202   : > { %v1409_v1 = vsub.f32 0.0, %v1383_v63  ;;  %v1384_v3 = vand.u32 2147483647, %v18476_v0 }
 0x203   : > { %v883_v4 = vpop.f32.mrb[4].mxu0  ;;  %v1203_v5 = vpop.f32.mrb[4].mxu1 }
 0x204   : > { %v1435_v6 = vmul.f32 1.442695, %v1409_v1  ;;  %v1410_v7 = vsub.f32 0.0, %v1384_v3  ;;  %v1300_v8 = vmax.f32 %v883_v4, %v1203_v5  ;;  %v885_v9 = vpop.f32.mrb[5].mxu0  ;;  %v1205_v10 = vpop.f32.mrb[5].mxu1 }
 0x205   : > { %v886_v11 = vpop.f32.mrb[6].mxu0  ;;  %v1206_v12 = vpop.f32.mrb[6].mxu1 }
 0x206   : > { %15466 = vpow2.f32 %v1435_v6  ;;  %v1437_v13 = vmul.f32 1.442695, %v1410_v7  ;;  %v18480_v14 = vadd.f32 %v18469_v53, %v1300_v8  ;;  %v1301_v15 = vmax.f32 %v886_v11, %v1206_v12  ;;  %v888_v16 = vpop.f32.mrb[7].mxu0  ;;  %v1208_v17 = vpop.f32.mrb[7].mxu1  ;;  %v18543_v8 = vld [vmem:[%s21624_s20 + $0x30] sm:$0xff]  }
 0x208   : > { %15468 = vpow2.f32 %v1437_v13  ;;  %v1385_v18 = vand.u32 2147483647, %v18480_v14  ;;  %v18484_v19 = vadd.f32 %v18469_v53, %v1301_v15 }
 0x20a   : > { %v1411_v20 = vsub.f32 0.0, %v1385_v18  ;;  %v1386_v21 = vand.u32 2147483647, %v18484_v19 }
 0x20b   : > { %v891_v22 = vpop.f32.mrb[8].mxu0  ;;  %v1211_v23 = vpop.f32.mrb[8].mxu1 }
 0x20c   : > { %v1439_v24 = vmul.f32 1.442695, %v1411_v20  ;;  %v1412_v25 = vsub.f32 0.0, %v1386_v21  ;;  %v1302_v26 = vmax.f32 %v891_v22, %v1211_v23  ;;  %v893_v27 = vpop.f32.mrb[9].mxu0  ;;  %v1213_v28 = vpop.f32.mrb[9].mxu1  ;;  %v1357_v22 = vmax.f32 %v18472_v59, 0.0 }
 0x20d   : > { %v894_v29 = vpop.f32.mrb[10].mxu0  ;;  %v1214_v30 = vpop.f32.mrb[10].mxu1 }
 0x20e   : > { %15470 = vpow2.f32 %v1439_v24  ;;  %v1441_v31 = vmul.f32 1.442695, %v1412_v25  ;;  %v18488_v32 = vadd.f32 %v18469_v53, %v1302_v26  ;;  %v1303_v33 = vmax.f32 %v894_v29, %v1214_v30  ;;  %v896_v34 = vpop.f32.mrb[11].mxu0  ;;  %v1216_v35 = vpop.f32.mrb[11].mxu1  ;;  %v18562_v26 = vld [vmem:[%s21624_s20 + $0x38] sm:$0xff]  }
 0x20f   : > { %v1358_v29 = vmax.f32 %v18476_v0, 0.0 }
 0x210   : > { %v18495_v37 = vpop.eup %15466  ;;  %15472 = vpow2.f32 %v1441_v31  ;;  %v1387_v39 = vand.u32 2147483647, %v18488_v32  ;;  %v18504_v40 = vadd.f32 %v18469_v53, %v1303_v33  ;;  %v1359_v33 = vmax.f32 %v18480_v14, 0.0 }
 0x211   : > { %v1487_v41 = vadd.f32 1.0, %v18495_v37  ;;  %v1490_v4 = vmul.f32 -0.5, %v18495_v37  ;;  %v1493_v17 = vand.u32 2147483647, %v18495_v37 }
 0x212   : > { %v18512_v43 = vpop.eup %15468  ;;  %v1413_v45 = vsub.f32 0.0, %v1387_v39  ;;  %v1388_v46 = vand.u32 2147483647, %v18504_v40 }
 0x213   : > { %15474 = vlog2.f32 %v1487_v41  ;;  %v1496_v48 = vadd.f32 1.0, %v18512_v43  ;;  %v899_v51 = vpop.f32.mrb[12].mxu0  ;;  %v1219_v52 = vpop.f32.mrb[12].mxu1  ;;  %v1499_v18 = vmul.f32 -0.5, %v18512_v43  ;;  %v1491_v28 = vadd.f32 1.0, %v1490_v4 }
 0x214   : > { %v1443_v55 = vmul.f32 1.442695, %v1413_v45  ;;  %v1414_v56 = vsub.f32 0.0, %v1388_v46  ;;  %v1304_v61 = vmax.f32 %v899_v51, %v1219_v52  ;;  %v901_v62 = vpop.f32.mrb[13].mxu0  ;;  %v1221_v63 = vpop.f32.mrb[13].mxu1 }
 0x215   : > { %15476 = vlog2.f32 %v1496_v48  ;;  %v902_v6 = vpop.f32.mrb[14].mxu0  ;;  %v1222_v10 = vpop.f32.mrb[14].mxu1  ;;  %vm18574_vm2 = vcmp.lt.f32.partialorder %v1493_v17, 0.0004427343  ;;  %v1500_v46 = vadd.f32 1.0, %v1499_v18 }
 0x216   : > { %15478 = vpow2.f32 %v1443_v55  ;;  %v1445_v5 = vmul.f32 1.442695, %v1414_v56  ;;  %v18546_v9 = vadd.f32 %v18469_v53, %v1304_v61  ;;  %v904_v11 = vpop.f32.mrb[15].mxu0  ;;  %v1305_v20 = vmax.f32 %v902_v6, %v1222_v10  ;;  %v1224_v21 = vpop.f32.mrb[15].mxu1 }
 0x217   : > { %v1492_v6 = vmul.f32 %v18495_v37, %v1491_v28  ;;  %v1502_v10 = vand.u32 2147483647, %v18512_v43  ;;  %v1360_v11 = vmax.f32 %v18484_v19, 0.0  ;;  %v1501_v37 = vmul.f32 %v18512_v43, %v1500_v46 }
 0x218   : > { %v18551_v16 = vpop.eup %15470  ;;  %15480 = vpow2.f32 %v1445_v5  ;;  %v1389_v30 = vand.u32 2147483647, %v18546_v9  ;;  %v18569_v31 = vadd.f32 %v18469_v53, %v1305_v20 }
 0x219   : > { %v1505_v23 = vadd.f32 1.0, %v18551_v16  ;;  %v1508_v56 = vmul.f32 -0.5, %v18551_v16  ;;  %v1511_v28 = vand.u32 2147483647, %v18551_v16  ;;  %vm18602_vm3 = vcmp.lt.f32.partialorder %v1502_v10, 0.0004427343 }
 0x21a   : > { %v18564_v27 = vpop.eup %15472  ;;  %v1415_v48 = vsub.f32 0.0, %v1389_v30  ;;  %v1390_v61 = vand.u32 2147483647, %v18569_v31 }
 0x21b   : > { %15482 = vlog2.f32 %v1505_v23  ;;  %v1514_v34 = vadd.f32 1.0, %v18564_v27  ;;  %v907_v35 = vpop.f32.mrb[16].mxu0  ;;  %v1227_v39 = vpop.f32.mrb[16].mxu1  ;;  %v1517_v20 = vmul.f32 -0.5, %v18564_v27  ;;  %v1520_v43 = vand.u32 2147483647, %v18564_v27 }
 0x21c   : > { %v909_v51 = vpop.f32.mrb[17].mxu0  ;;  %v1306_v62 = vmax.f32 %v907_v35, %v1227_v39  ;;  %v1229_v63 = vpop.f32.mrb[17].mxu1  ;;  %v1447_v21 = vmul.f32 1.442695, %v1415_v48  ;;  %v1416_v23 = vsub.f32 0.0, %v1390_v61  ;;  %v18598_v61 = vld [vmem:[%s21624_s20 + $0x40] sm:$0xff]  }
 0x21d   : > { %v15475_v55 = vpop.eup %15474  ;;  %15484 = vlog2.f32 %v1514_v34  ;;  %v910_v4 = vpop.f32.mrb[18].mxu0  ;;  %v1509_v63 = vadd.f32 1.0, %v1508_v56  ;;  %v1518_v56 = vadd.f32 1.0, %v1517_v20  ;;  %vm18611_vm4 = vcmp.lt.f32.partialorder %v1511_v28, 0.0004427343 }
 0x21e   : > { %v1489_v5 = vmul.f32 0.6931472, %v15475_v55  ;;  %v1230_v17 = vpop.f32.mrb[18].mxu1  ;;  %v912_v34 = vpop.f32.mrb[19].mxu0  ;;  %v18593_v48 = vadd.f32 %v18469_v53, %v1306_v62  ;;  %15486 = vpow2.f32 %v1447_v21  ;;  %v1361_v62 = vmax.f32 %v18488_v32, 0.0 }
 0x21f   : > { %v15477_v18 = vpop.eup %15476  ;;  %v1307_v30 = vmax.f32 %v910_v4, %v1230_v17  ;;  %v1232_v51 = vpop.f32.mrb[19].mxu1  ;;  %v1510_v20 = vmul.f32 %v18551_v16, %v1509_v63  ;;  %vm18624_vm5 = vcmp.lt.f32.partialorder %v1520_v43, 0.0004427343  ;;  %v1519_v16 = vmul.f32 %v18564_v27, %v1518_v56 }
 0x220   : > { %v18585_v52 = vpop.eup %15478  ;;  %v1495_v35 = vsel %vm18574_vm2, %v1492_v6, %v1489_v5  ;;  %v1498_v39 = vmul.f32 0.6931472, %v15477_v18  ;;  %v1449_v5 = vmul.f32 1.442695, %v1416_v23  ;;  %v1362_v56 = vmax.f32 %v18504_v40, 0.0 }
 0x221   : > { %v1721_v55 = vadd.f32 %v1495_v35, %v1357_v22  ;;  %v1523_v25 = vadd.f32 1.0, %v18585_v52  ;;  %v18620_v23 = vadd.f32 %v18469_v53, %v1307_v30 }
 0x222   : > { %v18600_v4 = vpop.eup %15480  ;;  %v1504_v46 = vsel %vm18602_vm3, %v1501_v37, %v1498_v39  ;;  %v1391_v39 = vand.u32 2147483647, %v18593_v48 }
 0x223   : > { %v915_v6 = vpop.f32.mrb[20].mxu0  ;;  %v1235_v17 = vpop.f32.mrb[20].mxu1  ;;  %15488 = vlog2.f32 %v1523_v25  ;;  %v1532_v10 = vadd.f32 1.0, %v18600_v4  ;;  %v1722_v25 = vadd.f32 %v1504_v46, %v1358_v29  ;;  %v1392_v30 = vand.u32 2147483647, %v18620_v23 }
 0x224   : > { %v917_v34 = vpop.f32.mrb[21].mxu0  ;;  %v1237_v21 = vpop.f32.mrb[21].mxu1  ;;  %15490 = vtanh.f32 %v1721_v55  ;;  %v1417_v63 = vsub.f32 0.0, %v1391_v39  ;;  %v1526_v29 = vmul.f32 -0.5, %v18585_v52  ;;  %v1308_v43 = vmax.f32 %v915_v6, %v1235_v17 }
 0x225   : > { %v15483_v35 = vpop.eup %15482  ;;  %v918_v37 = vpop.f32.mrb[22].mxu0  ;;  %15492 = vlog2.f32 %v1532_v10  ;;  %v1535_v6 = vmul.f32 -0.5, %v18600_v4 }
 0x226   : > { %v1238_v28 = vpop.f32.mrb[22].mxu1  ;;  %v1507_v45 = vmul.f32 0.6931472, %v15483_v35  ;;  %v920_v21 = vpop.f32.mrb[23].mxu0  ;;  %15494 = vpow2.f32 %v1449_v5  ;;  %v1451_v10 = vmul.f32 1.442695, %v1417_v63  ;;  %v18639_v5 = vadd.f32 %v18469_v53, %v1308_v43 }
 0x227   : > { %v15485_v55 = vpop.eup %15484  ;;  %v1240_v51 = vpop.f32.mrb[23].mxu1  ;;  %v1418_v35 = vsub.f32 0.0, %v1392_v30  ;;  %v1309_v21 = vmax.f32 %v918_v37, %v1238_v28  ;;  %15496 = vtanh.f32 %v1722_v25  ;;  %v1527_v25 = vadd.f32 1.0, %v1526_v29 }
 0x228   : > { %v1513_v22 = vsel %vm18611_vm4, %v1510_v20, %v1507_v45  ;;  %v1516_v41 = vmul.f32 0.6931472, %v15485_v55  ;;  %v18644_v51 = vpop.eup %15486  ;;  %v1393_v20 = vand.u32 2147483647, %v18639_v5  ;;  %v1529_v45 = vand.u32 2147483647, %v18585_v52 }
 0x229   : > { %v1723_v46 = vadd.f32 %v1513_v22, %v1359_v33  ;;  %v1453_v17 = vmul.f32 1.442695, %v1418_v35  ;;  %v1541_v34 = vadd.f32 1.0, %v18644_v51  ;;  %v1538_v30 = vand.u32 2147483647, %v18600_v4 }
 0x22a   : > { %v1522_v27 = vsel %vm18624_vm5, %v1519_v16, %v1516_v41  ;;  %v18648_v41 = vadd.f32 %v18469_v53, %v1309_v21  ;;  %v1419_v43 = vsub.f32 0.0, %v1393_v20  ;;  %v1363_v29 = vmax.f32 %v18546_v9, 0.0 }
 0x22b   : > { %15498 = vtanh.f32 %v1723_v46  ;;  %v1724_v18 = vadd.f32 %v1522_v27, %v1360_v11  ;;  %v923_v33 = vpop.f32.mrb[24].mxu0  ;;  %v1243_v22 = vpop.f32.mrb[24].mxu1  ;;  %v18653_v11 = vld [vmem:[%s21624_s20 + $0x48] sm:$0xff]   ;;  %v1528_v20 = vmul.f32 %v18585_v52, %v1527_v25  ;;  %vm18670_vm6 = vcmp.lt.f32.partialorder %v1529_v45, 0.0004427343 }
 0x22c   : > { %15500 = vpow2.f32 %v1451_v10  ;;  %v1310_v39 = vmax.f32 %v923_v33, %v1243_v22  ;;  %v925_v37 = vpop.f32.mrb[25].mxu0  ;;  %v1245_v28 = vpop.f32.mrb[25].mxu1  ;;  %v1536_v22 = vadd.f32 1.0, %v1535_v6  ;;  %v1394_v24 = vand.u32 2147483647, %v18648_v41 }
 0x22d   : > { %15502 = vtanh.f32 %v1724_v18  ;;  %v18657_v55 = vpop.f32.mrb[26].mxu0  ;;  %v18659_v16 = vpop.f32.mrb[26].mxu1  ;;  %v1364_v37 = vmax.f32 %v18569_v31, 0.0  ;;  %v1455_v28 = vmul.f32 1.442695, %v1419_v43  ;;  %v1544_v43 = vmul.f32 -0.5, %v18644_v51 }
 0x22e   : > { %v15489_v63 = vpop.eup %15488  ;;  %15504 = vpow2.f32 %v1453_v17  ;;  %v928_v46 = vpop.f32.mrb[27].mxu0  ;;  %vm18678_vm7 = vcmp.lt.f32.partialorder %v1538_v30, 0.0004427343  ;;  %v1366_v18 = vmax.f32 %v18620_v23, 0.0  ;;  %v1547_v25 = vand.u32 2147483647, %v18644_v51 }
 0x22f   : > { %v1248_v10 = vpop.f32.mrb[27].mxu1  ;;  %v15491_v21 = vpop.eup %15490  ;;  %v1525_v27 = vmul.f32 0.6931472, %v15489_v63  ;;  %15506 = vlog2.f32 %v1541_v34  ;;  %v1365_v63 = vmax.f32 %v18593_v48, 0.0  ;;  %v18676_v34 = vadd.f32 %v18469_v53, %v1310_v39 }
 0x230   : > { %v15493_v33 = vpop.eup %15492  ;;  %15508 = vpow2.f32 %v1455_v28  ;;  %v1420_v45 = vsub.f32 0.0, %v1394_v24  ;;  %v1773_v15 = vmul.f32 %v15491_v21, %v18472_v59  ;;  %v1537_v12 = vmul.f32 %v18600_v4, %v1536_v22 }
 0x231   : > { %v18667_v17 = vpop.eup %15494  ;;  %v1531_v52 = vsel %vm18670_vm6, %v1528_v20, %v1525_v27  ;;  %v1534_v13 = vmul.f32 0.6931472, %v15493_v33  ;;  %v1367_v7 = vmax.f32 %v18639_v5, 0.0  ;;  %v1368_v27 = vmax.f32 %v18648_v41, 0.0 }
 0x232   : > { %v1550_v10 = vadd.f32 1.0, %v18667_v17  ;;  %v15497_v30 = vpop.eup %15496  ;;  %v1457_v28 = vmul.f32 1.442695, %v1420_v45  ;;  %v1395_v24 = vand.u32 2147483647, %v18676_v34  ;;  %v1725_v59 = vadd.f32 %v1531_v52, %v1361_v62 }
 0x233   : > { %v18688_v35 = vpop.f32.mrb[28].mxu0  ;;  %v18690_v39 = vpop.f32.mrb[28].mxu1  ;;  %v1545_v21 = vadd.f32 1.0, %v1544_v43  ;;  %v1311_v4 = vmax.f32 %v18657_v55, %v18659_v16  ;;  %v1774_v22 = vmul.f32 %v15497_v30, %v18476_v0  ;;  %vm18709_vm8 = vcmp.lt.f32.partialorder %v1547_v25, 0.0004427343 }
 0x234   : > { %v933_v3 = vpop.f32.mrb[29].mxu0  ;;  %v1253_v57 = vpop.f32.mrb[29].mxu1  ;;  %15510 = vlog2.f32 %v1550_v10  ;;  %v1540_v16 = vsel %vm18678_vm7, %v1537_v12, %v1534_v13  ;;  %v1553_v52 = vmul.f32 -0.5, %v18667_v17  ;;  %v1556_v25 = vand.u32 2147483647, %v18667_v17 }
 0x235   : > { %v15499_v46 = vpop.eup %15498  ;;  %v18704_v3 = vpop.f32.mrb[30].mxu0  ;;  %15512 = vpow2.f32 %v1457_v28  ;;  %v18723_v28 = vadd.f32 %v18469_v53, %v1311_v4  ;;  %v1546_v13 = vmul.f32 %v18644_v51, %v1545_v21 }
 0x236   : > { %v18697_v20 = vpop.eup %15500  ;;  %v1775_v1 = vmul.f32 %v15499_v46, %v18480_v14  ;;  %v18706_v57 = vpop.f32.mrb[30].mxu1  ;;  %v1421_v46 = vsub.f32 0.0, %v1395_v24  ;;  %vm18769_vm9 = vcmp.lt.f32.partialorder %v1556_v25, 0.0004427343 }
 0x237   : > { %v15503_v33 = vpop.eup %15502  ;;  %v1559_v14 = vadd.f32 1.0, %v18697_v20  ;;  %v936_v45 = vpop.f32.mrb[31].mxu0  ;;  %v1562_v6 = vmul.f32 -0.5, %v18697_v20  ;;  %v1396_v21 = vand.u32 2147483647, %v18723_v28 }
 0x238   : > { %v1256_v62 = vpop.f32.mrb[31].mxu1  ;;  %v18714_v43 = vpop.eup %15504  ;;  %v1776_v55 = vmul.f32 %v15503_v33, %v18484_v19  ;;  %v1853_v45 = vmul.f32 %v14826_v50, %v1775_v1  ;;  %v1459_v24 = vmul.f32 1.442695, %v1421_v46  ;;  %v1726_v50 = vadd.f32 %v1540_v16, %v1362_v56 }
 0x239   : > { %v15507_v0 = vpop.eup %15506  ;;  %15514 = vlog2.f32 %v1559_v14  ;;  %v1568_v30 = vadd.f32 1.0, %v18714_v43  ;;  %v1554_v1 = vadd.f32 1.0, %v1553_v52  ;;  %v1571_v38 = vmul.f32 -0.5, %v18714_v43 }
 0x23a   : > { %v1854_v19 = vmul.f32 %v14827_v54, %v1776_v55  ;;  %15516 = vtanh.f32 %v1725_v59  ;;  %v1543_v12 = vmul.f32 0.6931472, %v15507_v0  ;;  %v18740_v62 = vpop.eup %15508  ;;  %v1312_v55 = vmax.f32 %v18688_v35, %v18690_v39 }
 0x23b   : > { %15518 = vlog2.f32 %v1568_v30  ;;  %v18731_v33 = vpop.f32.mrb[32].mxu0  ;;  %v18733_v14 = vpop.f32.mrb[32].mxu1  ;;  %v18753_v56 = vmul.f32 %v14822_v44, %v1773_v15  ;;  %v18757_v16 = vmul.f32 %v14823_v49, %v1774_v22  ;;  %v1565_v10 = vand.u32 2147483647, %v18697_v20 }
 0x23c   : > { %v18735_v4 = vpack.c.bf16 %v1854_v19, %v1853_v45  ;;  %v941_v54 = vpop.f32.mrb[33].mxu0  ;;  %v1261_v59 = vpop.f32.mrb[33].mxu1  ;;  %v1549_v51 = vsel %vm18709_vm8, %v1546_v13, %v1543_v12  ;;  %15520 = vpow2.f32 %v1459_v24  ;;  %v1577_v52 = vadd.f32 1.0, %v18740_v62 }
 0x23d   : > { %v18747_v46 = vpop.f32.mrb[34].mxu0  ;;  %v18749_v0 = vpop.f32.mrb[34].mxu1  ;;  %v1563_v39 = vadd.f32 1.0, %v1562_v6  ;;  %v1369_v19 = vmax.f32 %v18676_v34, 0.0  ;;  %v1422_v12 = vsub.f32 0.0, %v1396_v21  ;;  %v18764_v44 = vadd.f32 %v18469_v53, %v1312_v55 }
 0x23e   : > { %v944_v30 = vpop.f32.mrb[35].mxu0  ;;  %v1264_v45 = vpop.f32.mrb[35].mxu1  ;;  %2427 = vmatmul.mubr.bf16.vlgmr.msra.gmra.mrb[52].mxu0 %v18735_v4  ;;  %v1727_v36 = vadd.f32 %v1549_v51, %v1363_v29  ;;  %v1572_v15 = vadd.f32 1.0, %v1571_v38  ;;  %15522 = vlog2.f32 %v1577_v52  ;;  %v1555_v13 = vmul.f32 %v18667_v17, %v1554_v1 }
 0x23f   : > { %v15511_v35 = vpop.eup %15510  ;;  %2436 = vmatprep.mubr.bf16.mxu0 %v21583_v2  ;;  %15524 = vtanh.f32 %v1726_v50  ;;  %v1461_v6 = vmul.f32 1.442695, %v1422_v12  ;;  %v1397_v24 = vand.u32 2147483647, %v18764_v44  ;;  %vm18777_vm10 = vcmp.lt.f32.partialorder %v1565_v10, 0.0004427343 }
 0x240   : > { %v18773_v22 = vpop.eup %15512  ;;  %v1552_v54 = vmul.f32 0.6931472, %v15511_v35  ;;  %v1580_v29 = vmul.f32 -0.5, %v18740_v62  ;;  %v1564_v38 = vmul.f32 %v18697_v20, %v1563_v39  ;;  %v1574_v21 = vand.u32 2147483647, %v18714_v43 }
 0x241   : > { %v1586_v25 = vadd.f32 1.0, %v18773_v22  ;;  %15526 = vpow2.f32 %v1461_v6  ;;  %v1423_v50 = vsub.f32 0.0, %v1397_v24  ;;  %v1573_v52 = vmul.f32 %v18714_v43, %v1572_v15 }
 0x242   : > { %15528 = vtanh.f32 %v1727_v36  ;;  %v1313_v30 = vmax.f32 %v18704_v3, %v18706_v57  ;;  %v1583_v20 = vand.u32 2147483647, %v18740_v62  ;;  %v1314_v6 = vmax.f32 %v18731_v33, %v18733_v14 }
 0x243   : > { %v15515_v51 = vpop.eup %15514  ;;  %v18785_v17 = vpop.f32.mrb[36].mxu0  ;;  %15530 = vlog2.f32 %v1586_v25  ;;  %v1463_v39 = vmul.f32 1.442695, %v1423_v50  ;;  %v1558_v43 = vsel %vm18769_vm9, %v1555_v13, %v1552_v54  ;;  %v1581_v15 = vadd.f32 1.0, %v1580_v29 }
 0x244   : > { %v18787_v1 = vpop.f32.mrb[36].mxu1  ;;  %v15517_v55 = vpop.eup %15516  ;;  %v1561_v10 = vmul.f32 0.6931472, %v15515_v51  ;;  %v18802_v3 = vadd.f32 %v18469_v53, %v1313_v30  ;;  %v1589_v33 = vmul.f32 -0.5, %v18773_v22  ;;  %v1315_v14 = vmax.f32 %v18747_v46, %v18749_v0 }
 0x245   : > { %v949_v45 = vpop.f32.mrb[37].mxu0  ;;  %v1269_v35 = vpop.f32.mrb[37].mxu1  ;;  %15532 = vpow2.f32 %v1463_v39  ;;  %vm18811_vm11 = vcmp.lt.f32.partialorder %v1574_v21, 0.0004427343  ;;  %v1370_v54 = vmax.f32 %v18723_v28, 0.0  ;;  %v18818_v29 = vadd.f32 %v18469_v53, %v1314_v6 }
 0x246   : > { %v15519_v12 = vpop.eup %15518  ;;  %v18795_v24 = vpop.f32.mrb[38].mxu0  ;;  %v1567_v25 = vsel %vm18777_vm10, %v1564_v38, %v1561_v10  ;;  %v18821_v59 = vmul.f32 %v15517_v55, %v18488_v32  ;;  %v1728_v38 = vadd.f32 %v1558_v43, %v1364_v37  ;;  %v1398_v0 = vand.u32 2147483647, %v18802_v3 }
 0x247   : > { %v18797_v2 = vpop.f32.mrb[38].mxu1  ;;  %v1570_v36 = vmul.f32 0.6931472, %v15519_v12  ;;  %v952_v57 = vpop.f32.mrb[39].mxu0  ;;  %v1729_v50 = vadd.f32 %v1567_v25, %v1365_v63  ;;  %vm18830_vm12 = vcmp.lt.f32.partialorder %v1583_v20, 0.0004427343  ;;  %v1582_v37 = vmul.f32 %v18740_v62, %v1581_v15 }
 0x248   : > { %v1272_v51 = vpop.f32.mrb[39].mxu1  ;;  %v18804_v45 = vpop.eup %15520  ;;  %v1592_v30 = vand.u32 2147483647, %v18773_v22  ;;  %v1590_v35 = vadd.f32 1.0, %v1589_v33  ;;  %v1424_v12 = vsub.f32 0.0, %v1398_v0  ;;  %v18846_v43 = vpack.c.bf16 %v18757_v16, %v18753_v56 }
 0x249   : > { %v1595_v13 = vadd.f32 1.0, %v18804_v45  ;;  %v1576_v46 = vsel %vm18811_vm11, %v1573_v52, %v1570_v36  ;;  %v15523_v21 = vpop.eup %15522  ;;  %v1598_v20 = vmul.f32 -0.5, %v18804_v45  ;;  %v1399_v6 = vand.u32 2147483647, %v18818_v29 }
 0x24a   : > { %v15525_v32 = vpop.eup %15524  ;;  %v1579_v55 = vmul.f32 0.6931472, %v15523_v21  ;;  %v1730_v63 = vadd.f32 %v1576_v46, %v1366_v18  ;;  %v1465_v57 = vmul.f32 1.442695, %v1424_v12  ;;  %v18851_v51 = vadd.f32 %v18469_v53, %v1315_v14 }
 0x24b   : > { %15534 = vlog2.f32 %v1595_v13  ;;  %v18836_v52 = vpop.f32.mrb[40].mxu0  ;;  %v18838_v39 = vpop.f32.mrb[40].mxu1  ;;  %v1316_v18 = vmax.f32 %v18785_v17, %v18787_v1  ;;  %v18860_v56 = vmul.f32 %v15525_v32, %v18504_v40  ;;  %v1371_v13 = vmax.f32 %v18764_v44, 0.0 }
 0x24c   : > { %v957_v36 = vpop.f32.mrb[41].mxu0  ;;  %v1277_v62 = vpop.f32.mrb[41].mxu1  ;;  %15536 = vtanh.f32 %v1728_v38  ;;  %v1585_v0 = vsel %vm18830_vm12, %v1582_v37, %v1579_v55  ;;  %v1601_v17 = vand.u32 2147483647, %v18804_v45  ;;  %v1425_v1 = vsub.f32 0.0, %v1399_v6 }
 0x24d   : > { %v18848_v15 = vpop.eup %15526  ;;  %v18855_v25 = vpop.f32.mrb[42].mxu0  ;;  %15538 = vtanh.f32 %v1729_v50  ;;  %v1591_v21 = vmul.f32 %v18773_v22, %v1590_v35  ;;  %vm18868_vm14 = vcmp.lt.f32.partialorder %v1592_v30, 0.0004427343  ;;  %v1599_v50 = vadd.f32 1.0, %v1598_v20 }
 0x24e   : > { %v18857_v33 = vpop.f32.mrb[42].mxu1  ;;  %v15529_v49 = vpop.eup %15528  ;;  %v1604_v16 = vadd.f32 1.0, %v18848_v15  ;;  %15540 = vpow2.f32 %v1465_v57  ;;  %v1467_v12 = vmul.f32 1.442695, %v1425_v1  ;;  %v1400_v36 = vand.u32 2147483647, %v18851_v51 }
 0x24f   : > { %v960_v38 = vpop.f32.mrb[43].mxu0  ;;  %v1280_v46 = vpop.f32.mrb[43].mxu1  ;;  %15542 = vtanh.f32 %v1730_v63  ;;  %v1905_v10 = vrot.slane %v18735_v4, 4  ;;  %v1731_v55 = vadd.f32 %v1585_v0, %v1367_v7  ;;  %v1607_v63 = vmul.f32 -0.5, %v18848_v15 }
 0x250   : > { %v15531_v14 = vpop.eup %15530  ;;  %15544 = vlog2.f32 %v1604_v16  ;;  %vm18880_vm15 = vcmp.lt.f32.partialorder %v1601_v17, 0.0004427343  ;;  %v1426_v20 = vsub.f32 0.0, %v1400_v36  ;;  %v18890_v7 = vmul.f32 %v15529_v49, %v18546_v9 }
 0x251   : > { %v18872_v32 = vpop.eup %15532  ;;  %v1588_v37 = vmul.f32 0.6931472, %v15531_v14  ;;  %15546 = vpow2.f32 %v1467_v12  ;;  %v1610_v16 = vand.u32 2147483647, %v18848_v15  ;;  %v1904_v38 = vrot.slane %v18846_v43, 4 }
 0x252   : > { %v1613_v22 = vadd.f32 1.0, %v18872_v32  ;;  %v18895_v46 = vadd.f32 %v18469_v53, %v1316_v18  ;;  %v1600_v17 = vmul.f32 %v18804_v45, %v1599_v50  ;;  %v1373_v1 = vmax.f32 %v18818_v29, 0.0 }
 0x253   : > { %v18885_v6 = vpop.f32.mrb[44].mxu0  ;;  %v18887_v62 = vpop.f32.mrb[44].mxu1  ;;  %v1469_v12 = vmul.f32 1.442695, %v1426_v20  ;;  %v1594_v9 = vsel %vm18868_vm14, %v1591_v21, %v1588_v37  ;;  %v1608_v49 = vadd.f32 1.0, %v1607_v63  ;;  %v1906_v36 = vsel %vm1903_vm13, %v1904_v38, %v1905_v10 }
 0x254   : > { %v965_v14 = vpop.f32.mrb[45].mxu0  ;;  %v1285_v0 = vpop.f32.mrb[45].mxu1  ;;  %15548 = vlog2.f32 %v1613_v22  ;;  %2273 = vmatprep.mubr.bf16.mxu1 %v1906_v36  ;;  %v1401_v45 = vand.u32 2147483647, %v18895_v46  ;;  %v1317_v50 = vmax.f32 %v18795_v24, %v18797_v2  ;;  %vm18911_vm0 = vcmp.lt.f32.partialorder %v1610_v16, 0.0004427343 }
 0x255   : > { %v15535_v57 = vpop.eup %15534  ;;  %15550 = vtanh.f32 %v1731_v55  ;;  %v18904_v35 = vpop.f32.mrb[46].mxu0  ;;  %v1616_v63 = vmul.f32 -0.5, %v18872_v32  ;;  %2274 = vmatmul.mubr.bf16.vlgmr.msra.gmra.mrb[52].mxu1 %v18846_v43  ;;  %v1318_v20 = vmax.f32 %v18836_v52, %v18838_v39  ;;  %v21653_v24 = vunpack.c.h.bf16 %v18510_v42 }
 0x256   : > { %v18906_v18 = vpop.f32.mrb[46].mxu1  ;;  %v15537_v14 = vpop.eup %15536  ;;  %v1597_v0 = vmul.f32 0.6931472, %v15535_v57  ;;  %15552 = vpow2.f32 %v1469_v12  ;;  %v1427_v38 = vsub.f32 0.0, %v1401_v45  ;;  %v18923_v2 = vadd.f32 %v18469_v53, %v1317_v50 }
 0x257   : > { %v968_v40 = vpop.f32.mrb[47].mxu0  ;;  %v1288_v21 = vpop.f32.mrb[47].mxu1  ;;  %v1856_v16 = vmul.f32 %v21653_v24, %v18860_v56  ;;  %v1319_v12 = vmax.f32 %v18855_v25, %v18857_v33  ;;  %v1732_v43 = vadd.f32 %v1594_v9, %v1368_v27  ;;  %v1619_v52 = vand.u32 2147483647, %v18872_v32 }
 0x258   : > { %v15539_v55 = vpop.eup %15538  ;;  %v1609_v40 = vmul.f32 %v18848_v15, %v1608_v49  ;;  %v1603_v50 = vsel %vm18880_vm15, %v1600_v17, %v1597_v0  ;;  %v1471_v21 = vmul.f32 1.442695, %v1427_v38  ;;  %v1402_v56 = vand.u32 2147483647, %v18923_v2 }
 0x259   : > { %v18920_v57 = vpop.eup %15540  ;;  %v21654_v25 = vunpack.c.l.bf16 %v18510_v42  ;;  %v1617_v9 = vadd.f32 1.0, %v1616_v63  ;;  %v18951_v0 = vadd.f32 %v18469_v53, %v1318_v20  ;;  %v1780_v38 = vmul.f32 %v15537_v14, %v18569_v31 }
 0x25a   : > { %v15543_v36 = vpop.eup %15542  ;;  %v1622_v39 = vadd.f32 1.0, %v18920_v57  ;;  %v1625_v15 = vmul.f32 -0.5, %v18920_v57  ;;  %v1428_v30 = vsub.f32 0.0, %v1402_v56  ;;  %v1733_v63 = vadd.f32 %v1603_v50, %v1369_v19 }
 0x25b   : > { %v15545_v45 = vpop.eup %15544  ;;  %v1855_v33 = vmul.f32 %v21654_v25, %v18821_v59  ;;  %v18941_v24 = vpop.f32.mrb[48].mxu0  ;;  %v18964_v53 = vmul.f32 %v15539_v55, %v18593_v48  ;;  %vm18966_vm1 = vcmp.lt.f32.partialorder %v1619_v52, 0.0004427343  ;;  %v1618_v50 = vmul.f32 %v18872_v32, %v1617_v9 }
 0x25c   : > { %v1606_v27 = vmul.f32 0.6931472, %v15545_v45  ;;  %15554 = vlog2.f32 %v1622_v39  ;;  %v18944_v49 = vpop.f32.mrb[48].mxu1  ;;  %v18946_v22 = vpop.eup %15546  ;;  %v1473_v31 = vmul.f32 1.442695, %v1428_v30  ;;  %v21657_v55 = vmov 0  }
 0x25d   : > { %15556 = vpow2.f32 %v1471_v21  ;;  %v18948_v17 = vpack.c.bf16 %v1856_v16, %v1855_v33  ;;  %v973_v42 = vpop.f32.mrb[49].mxu0  ;;  %v1293_v59 = vpop.f32.mrb[49].mxu1  ;;  %v1631_v45 = vadd.f32 1.0, %v18946_v22  ;;  %v1626_v56 = vadd.f32 1.0, %v1625_v15 }
 0x25e   : > { %v1612_v39 = vsel %vm18911_vm0, %v1609_v40, %v1606_v27  ;;  %v18959_v25 = vpop.f32.mrb[50].mxu0  ;;  %v18961_v21 = vpop.f32.mrb[50].mxu1  ;;  %15558 = vtanh.f32 %v1732_v43  ;;  %v18972_v40 = vmul.f32 %v15543_v36, %v18620_v23  ;;  %v1634_v33 = vmul.f32 -0.5, %v18946_v22 }
 0x25f   : > { %v15549_v16 = vpop.eup %15548  ;;  %2437 = vmatmul.mubr.bf16.gmra.mrb[56].mxu0 %v18948_v17  ;;  %v976_v19 = vpop.f32.mrb[51].mxu0  ;;  %15560 = vlog2.f32 %v1631_v45  ;;  %v1907_v48 = vrot.slane %v18948_v17, 4  ;;  %v1734_v52 = vadd.f32 %v1612_v39, %v1370_v54  ;;  %v1403_v27 = vand.u32 2147483647, %v18951_v0 }
 0x260   : > { %v1296_v14 = vpop.f32.mrb[51].mxu1  ;;  %v15551_v37 = vpop.eup %15550  ;;  %2446 = vmatprep.mubr.bf16.mxu0 %v21657_v55  ;;  %15562 = vtanh.f32 %v1733_v63  ;;  %v1615_v23 = vmul.f32 0.6931472, %v15549_v16  ;;  %v1375_v32 = vmax.f32 %v18895_v46, 0.0  ;;  %v1628_v9 = vand.u32 2147483647, %v18920_v57 }
 0x261   : > { %v18977_v43 = vpop.eup %15552  ;;  %15564 = vpow2.f32 %v1473_v31  ;;  %v1908_v30 = vsel %vm1903_vm13, %v1905_v10, %v1907_v48  ;;  %v21658_v54 = vunpack.c.l.bf16 %v18519_v47  ;;  %v18993_v42 = vmul.f32 %v15551_v37, %v18639_v5  ;;  %v18995_v63 = vld [vmem:[#allocation7] ss:$0 sm:$0xff] }
 0x262   : > { %v1640_v36 = vadd.f32 1.0, %v18977_v43  ;;  %2283 = vmatprep.mubr.bf16.mxu1 %v1908_v30  ;;  %v1429_v59 = vsub.f32 0.0, %v1403_v27  ;;  %v18998_v39 = vadd.f32 %v18995_v63, %v1319_v12  ;;  %v1627_v45 = vmul.f32 %v18920_v57, %v1626_v56 }
 0x263   : > { %v1857_v15 = vmul.f32 %v21658_v54, %v18890_v7  ;;  %v1635_v16 = vadd.f32 1.0, %v1634_v33  ;;  %2284 = vmatmul.mubr.bf16.gmra.mrb[56].mxu1 %v18735_v4  ;;  %v21659_v10 = vunpack.c.h.bf16 %v18519_v47  ;;  %v1621_v5 = vsel %vm18966_vm1, %v1618_v50, %v1615_v23 }
 0x264   : > { %15566 = vlog2.f32 %v1640_v36  ;;  %v1643_v19 = vmul.f32 -0.5, %v18977_v43  ;;  %v1475_v14 = vmul.f32 1.442695, %v1429_v59  ;;  %v1404_v37 = vand.u32 2147483647, %v18998_v39 }
 0x265   : > { %15568 = vtanh.f32 %v1734_v52  ;;  %v1858_v7 = vmul.f32 %v21659_v10, %v1780_v38  ;;  %v1320_v4 = vmax.f32 %v18885_v6, %v18887_v62  ;;  %v1321_v47 = vmax.f32 %v18904_v35, %v18906_v18 }
 0x266   : > { %v15555_v31 = vpop.eup %15554  ;;  %vm19016_vm2 = vcmp.lt.f32.partialorder %v1628_v9, 0.0004427343  ;;  %v1637_v38 = vand.u32 2147483647, %v18946_v22  ;;  %15570 = vpow2.f32 %v1475_v14  ;;  %v1430_v33 = vsub.f32 0.0, %v1404_v37 }
 0x267   : > { %v19008_v12 = vpop.eup %15556  ;;  %v1624_v52 = vmul.f32 0.6931472, %v15555_v31  ;;  %v19010_v27 = vpack.c.bf16 %v1858_v7, %v1857_v15  ;;  %v19027_v35 = vadd.f32 %v18995_v63, %v1320_v4  ;;  %v1735_v18 = vadd.f32 %v1621_v5, %v1371_v13 }
 0x268   : > { %v1649_v20 = vadd.f32 1.0, %v19008_v12  ;;  %v15559_v50 = vpop.eup %15558  ;;  %v1636_v23 = vmul.f32 %v18946_v22, %v1635_v16  ;;  %v1646_v36 = vand.u32 2147483647, %v18977_v43  ;;  %v1644_v30 = vadd.f32 1.0, %v1643_v19 }
 0x269   : > { %v1630_v56 = vsel %vm19016_vm2, %v1627_v45, %v1624_v52  ;;  %2447 = vmatmul.mubr.bf16.gmra.mrb[60].mxu0 %v19010_v27  ;;  %v1909_v6 = vrot.slane %v19010_v27, 4  ;;  %v15561_v62 = vpop.eup %15560  ;;  %v1477_v54 = vmul.f32 1.442695, %v1430_v33  ;;  %v21662_v45 = vmax.f32 %v18802_v3, 0.0 }
 0x26a   : > { %15572 = vlog2.f32 %v1649_v20  ;;  %2456 = vmatprep.mubr.bf16.mxu0 %v21657_v55  ;;  %v1633_v9 = vmul.f32 0.6931472, %v15561_v62  ;;  %v15563_v59 = vpop.eup %15562  ;;  %vm1638_vm3 = vcmp.lt.f32.partialorder %v1637_v38, 0.0004427343  ;;  %v1652_v13 = vmul.f32 -0.5, %v19008_v12 }
 0x26b   : > { %v1910_v15 = vsel %vm1903_vm13, %v1907_v48, %v1909_v6  ;;  %v1736_v10 = vadd.f32 %v1630_v56, %v21662_v45  ;;  %v1405_v22 = vand.u32 2147483647, %v19027_v35  ;;  %v19041_v16 = vpop.eup %15564  ;;  %v1376_v31 = vmax.f32 %v18923_v2, 0.0 }
 0x26c   : > { %2293 = vmatprep.mubr.bf16.mxu1 %v1910_v15  ;;  %v1639_v7 = vsel %vm1638_vm3, %v1636_v23, %v1633_v9  ;;  %15574 = vpow2.f32 %v1477_v54  ;;  %v19046_v48 = vadd.f32 %v18995_v63, %v1321_v47  ;;  %vm19050_vm4 = vcmp.lt.f32.partialorder %v1646_v36, 0.0004427343 }
 0x26d   : > { %2294 = vmatmul.mubr.bf16.gmra.mrb[60].mxu1 %v18948_v17  ;;  %15576 = vtanh.f32 %v1735_v18  ;;  %v1737_v19 = vadd.f32 %v1639_v7, %v1373_v1  ;;  %v1658_v37 = vadd.f32 1.0, %v19041_v16  ;;  %v1645_v57 = vmul.f32 %v18977_v43, %v1644_v30 }
 0x26e   : > { %v15567_v5 = vpop.eup %15566  ;;  %v1431_v38 = vsub.f32 0.0, %v1405_v22  ;;  %v1406_v17 = vand.u32 2147483647, %v19046_v48  ;;  %15578 = vtanh.f32 %v1736_v10  ;;  %v1653_v47 = vadd.f32 1.0, %v1652_v13 }
 0x26f   : > { %v15569_v52 = vpop.eup %15568  ;;  %v1642_v4 = vmul.f32 0.6931472, %v15567_v5  ;;  %v1655_v20 = vand.u32 2147483647, %v19008_v12  ;;  %v21665_v1 = vunpack.c.l.bf16 %v18529_v58  ;;  %15580 = vlog2.f32 %v1658_v37 }
 0x270   : > { %v1479_v62 = vmul.f32 1.442695, %v1431_v38  ;;  %v1432_v18 = vsub.f32 0.0, %v1406_v17  ;;  %v19063_v23 = vpop.eup %15570  ;;  %15582 = vtanh.f32 %v1737_v19  ;;  %v21666_v43 = vmax.f32 %v18851_v51, 0.0 }
 0x271   : > { %v1859_v56 = vmul.f32 %v21665_v1, %v18964_v53  ;;  %v1648_v33 = vsel %vm19050_vm4, %v1645_v57, %v1642_v4  ;;  %v21667_v9 = vunpack.c.h.bf16 %v18529_v58  ;;  %v1322_v54 = vmax.f32 %v18941_v24, %v18944_v49 }
 0x272   : > { %v1738_v36 = vadd.f32 %v1648_v33, %v21666_v43  ;;  %v1784_v53 = vmul.f32 %v15559_v50, %v18648_v41  ;;  %v1661_v15 = vmul.f32 -0.5, %v19041_v16  ;;  %v1667_v45 = vadd.f32 1.0, %v19063_v23 }
 0x273   : > { %v1860_v30 = vmul.f32 %v21667_v9, %v18972_v40  ;;  %15584 = vpow2.f32 %v1479_v62  ;;  %v1481_v13 = vmul.f32 1.442695, %v1432_v18  ;;  %v19078_v7 = vadd.f32 %v18995_v63, %v1322_v54 }
 0x274   : > { %v15573_v10 = vpop.eup %15572  ;;  %15586 = vtanh.f32 %v1738_v36  ;;  %v1654_v40 = vmul.f32 %v19008_v12, %v1653_v47  ;;  %vm1656_vm5 = vcmp.lt.f32.partialorder %v1655_v20, 0.0004427343  ;;  %v1670_v41 = vmul.f32 -0.5, %v19063_v23 }
 0x275   : > { %v19075_v22 = vpack.c.bf16 %v1860_v30, %v1859_v56  ;;  %v1651_v58 = vmul.f32 0.6931472, %v15573_v10  ;;  %15588 = vlog2.f32 %v1667_v45  ;;  %v1407_v49 = vand.u32 2147483647, %v19078_v7 }
 0x276   : > { %15590 = vpow2.f32 %v1481_v13  ;;  %v19085_v50 = vpop.eup %15574  ;;  %v1662_v19 = vadd.f32 1.0, %v1661_v15  ;;  %v1377_v14 = vmax.f32 %v18951_v0, 0.0  ;;  %v1323_v12 = vmax.f32 %v18959_v25, %v18961_v21 }
 0x277   : > { %2457 = vmatmul.mubr.bf16.gmra.mrb[64].mxu0 %v19075_v22  ;;  %v1911_v24 = vrot.slane %v19075_v22, 4  ;;  %v1657_v5 = vsel %vm1656_vm5, %v1654_v40, %v1651_v58  ;;  %v15577_v37 = vpop.eup %15576  ;;  %v1785_v4 = vmul.f32 %v15563_v59, %v18676_v34  ;;  %v1664_v38 = vand.u32 2147483647, %v19041_v16 }
 0x278   : > { %2466 = vmatprep.mubr.bf16.mxu0 %v21657_v55  ;;  %v1739_v57 = vadd.f32 %v1657_v5, %v1375_v32  ;;  %v1676_v17 = vadd.f32 1.0, %v19085_v50  ;;  %v1673_v47 = vand.u32 2147483647, %v19063_v23  ;;  %v1433_v21 = vsub.f32 0.0, %v1407_v49  ;;  %v15579_v34 = vpop.eup %15578 }
 0x279   : > { %v1912_v25 = vsel %vm1903_vm13, %v1909_v6, %v1911_v24  ;;  %v19103_v20 = vadd.f32 %v18995_v63, %v1323_v12  ;;  %v1786_v59 = vmul.f32 %v15569_v52, %v18723_v28  ;;  %v1671_v32 = vadd.f32 1.0, %v1670_v41  ;;  %v15581_v18 = vpop.eup %15580 }
 0x27a   : > { %2303 = vmatprep.mubr.bf16.mxu1 %v1912_v25  ;;  %v21668_v1 = vunpack.c.l.bf16 %v18534_v60  ;;  %v21669_v33 = vunpack.c.h.bf16 %v18534_v60  ;;  %v1663_v43 = vmul.f32 %v19041_v16, %v1662_v19  ;;  %15592 = vlog2.f32 %v1676_v17  ;;  %v15583_v36 = vpop.eup %15582 }
 0x27b   : > { %v1679_v6 = vmul.f32 -0.5, %v19085_v50  ;;  %2304 = vmatmul.mubr.bf16.gmra.mrb[64].mxu1 %v19010_v27  ;;  %v1483_v63 = vmul.f32 1.442695, %v1433_v21  ;;  %15594 = vtanh.f32 %v1739_v57  ;;  %v1660_v28 = vmul.f32 0.6931472, %v15581_v18 }
 0x27c   : > { %v1861_v56 = vmul.f32 %v21668_v1, %v18993_v42  ;;  %v1862_v62 = vmul.f32 %v21669_v33, %v1784_v53  ;;  %v1408_v52 = vand.u32 2147483647, %v19103_v20  ;;  %v1787_v60 = vmul.f32 %v15577_v37, %v18764_v44 }
 0x27d   : > { %v19117_v42 = vpop.eup %15584  ;;  %vm1665_vm6 = vcmp.lt.f32.partialorder %v1664_v38, 0.0004427343  ;;  %vm19120_vm7 = vcmp.lt.f32.partialorder %v1673_v47, 0.0004427343  ;;  %15596 = vpow2.f32 %v1483_v63  ;;  %v1788_v27 = vmul.f32 %v15579_v34, %v18802_v3 }
 0x27e   : > { %v19115_v9 = vpack.c.bf16 %v1862_v62, %v1861_v56  ;;  %v15587_v30 = vpop.eup %15586  ;;  %v1666_v54 = vsel %vm1665_vm6, %v1663_v43, %v1660_v28  ;;  %v1672_v53 = vmul.f32 %v19063_v23, %v1671_v32  ;;  %v1685_v15 = vadd.f32 1.0, %v19117_v42 }
 0x27f   : > { %v15589_v45 = vpop.eup %15588  ;;  %v1740_v44 = vadd.f32 %v1666_v54, %v1376_v31  ;;  %v1680_v10 = vadd.f32 1.0, %v1679_v6  ;;  %v1434_v13 = vsub.f32 0.0, %v1408_v52  ;;  %v1789_v3 = vmul.f32 %v15583_v36, %v18818_v29 }
 0x280   : > { %2467 = vmatmul.mubr.bf16.gmra.mrb[68].mxu0 %v19115_v9  ;;  %v1913_v58 = vrot.slane %v19115_v9, 4  ;;  %v19132_v40 = vpop.eup %15590  ;;  %v1669_v41 = vmul.f32 0.6931472, %v15589_v45  ;;  %15598 = vlog2.f32 %v1685_v15  ;;  %v21672_v23 = vunpack.c.h.bf16 %v18543_v8 }
 0x281   : > { %2476 = vmatprep.mubr.bf16.mxu0 %v21657_v55  ;;  %v1790_v5 = vmul.f32 %v15587_v30, %v18851_v51  ;;  %15600 = vtanh.f32 %v1740_v44  ;;  %v1694_v31 = vadd.f32 1.0, %v19132_v40  ;;  %v21673_v19 = vunpack.c.l.bf16 %v18543_v8 }
 0x282   : > { %v1864_v49 = vmul.f32 %v21672_v23, %v1786_v59  ;;  %v1675_v37 = vsel %vm19120_vm7, %v1672_v53, %v1669_v41  ;;  %v1688_v57 = vmul.f32 -0.5, %v19117_v42  ;;  %v1485_v38 = vmul.f32 1.442695, %v1434_v13 }
 0x283   : > { %v1863_v12 = vmul.f32 %v21673_v19, %v1785_v4  ;;  %v1914_v29 = vsel %vm1903_vm13, %v1911_v24, %v1913_v58  ;;  %v1741_v17 = vadd.f32 %v1675_v37, %v1377_v14  ;;  %v1682_v47 = vand.u32 2147483647, %v19085_v50 }
 0x284   : > { %15602 = vlog2.f32 %v1694_v31  ;;  %2313 = vmatprep.mubr.bf16.mxu1 %v1914_v29  ;;  %v21674_v51 = vunpack.c.l.bf16 %v18562_v26  ;;  %v1697_v8 = vmul.f32 -0.5, %v19132_v40  ;;  %v21675_v21 = vunpack.c.h.bf16 %v18562_v26  ;;  %v15593_v59 = vpop.eup %15592  ;;  %v14881_v29 = vld [vmem:[%s21624_s20 + $0x50] sm:$0xff]  }
 0x285   : > { %15604 = vpow2.f32 %v1485_v38  ;;  %2314 = vmatmul.mubr.bf16.gmra.mrb[68].mxu1 %v19075_v22  ;;  %v19152_v4 = vpack.c.bf16 %v1864_v49, %v1863_v12  ;;  %v1681_v24 = vmul.f32 %v19085_v50, %v1680_v10  ;;  %v21676_v14 = vunpack.c.l.bf16 %v18598_v61  ;;  %v15595_v62 = vpop.eup %15594 }
 0x286   : > { %v1865_v25 = vmul.f32 %v21674_v51, %v1787_v60  ;;  %v1866_v34 = vmul.f32 %v21675_v21, %v1788_v27  ;;  %v21677_v1 = vunpack.c.h.bf16 %v18598_v61  ;;  %v14859_v33 = vunpack.c.h.bf16 %v18653_v11 }
 0x287   : > { %v1867_v32 = vmul.f32 %v21676_v14, %v1789_v3  ;;  %v1678_v18 = vmul.f32 0.6931472, %v15593_v59  ;;  %v1689_v43 = vadd.f32 1.0, %v1688_v57  ;;  %v1915_v22 = vrot.slane %v19152_v4, 4  ;;  %v19166_v6 = vpop.eup %15596 }
 0x288   : > { %v1868_v56 = vmul.f32 %v21677_v1, %v1790_v5  ;;  %2477 = vmatmul.mubr.bf16.gmra.mrb[72].mxu0 %v19152_v4  ;;  %v19164_v26 = vpack.c.bf16 %v1866_v34, %v1865_v25  ;;  %15606 = vtanh.f32 %v1741_v17  ;;  %v1378_v50 = vmax.f32 %v18998_v39, 0.0 }
 0x289   : > { %vm1683_vm8 = vcmp.lt.f32.partialorder %v1682_v47, 0.0004427343  ;;  %2486 = vmatprep.mubr.bf16.mxu0 %v21657_v55  ;;  %v1691_v36 = vand.u32 2147483647, %v19117_v42  ;;  %v1698_v28 = vadd.f32 1.0, %v1697_v8  ;;  %v1703_v52 = vadd.f32 1.0, %v19166_v6 }
 0x28a   : > { %v19170_v61 = vpack.c.bf16 %v1868_v56, %v1867_v32  ;;  %v1684_v63 = vsel %vm1683_vm8, %v1681_v24, %v1678_v18  ;;  %v1916_v16 = vsel %vm1903_vm13, %v1913_v58, %v1915_v22  ;;  %v1917_v30 = vrot.slane %v19164_v26, 4  ;;  %v15599_v54 = vpop.eup %15598 }
 0x28b   : > { %v1742_v60 = vadd.f32 %v1684_v63, %v1378_v50  ;;  %v1791_v53 = vmul.f32 %v15595_v62, %v18895_v46  ;;  %v1690_v15 = vmul.f32 %v19117_v42, %v1689_v43  ;;  %v1700_v45 = vand.u32 2147483647, %v19132_v40  ;;  %2323 = vmatprep.mubr.bf16.mxu1 %v1916_v16  ;;  %v15601_v44 = vpop.eup %15600 }
 0x28c   : > { %v1919_v27 = vrot.slane %v19170_v61, 4  ;;  %15608 = vlog2.f32 %v1703_v52  ;;  %v1687_v10 = vmul.f32 0.6931472, %v15599_v54  ;;  %v1918_v13 = vsel %vm1903_vm13, %v1915_v22, %v1917_v30  ;;  %v14882_v22 = vld [vmem:[%s21624_s20 + $0x58] sm:$0xff]  }
 0x28d   : > { %15610 = vtanh.f32 %v1742_v60  ;;  %v1792_v3 = vmul.f32 %v15601_v44, %v18923_v2  ;;  %v1379_v41 = vmax.f32 %v19027_v35, 0.0  ;;  %vm1692_vm9 = vcmp.lt.f32.partialorder %v1691_v36, 0.0004427343  ;;  %2324 = vmatmul.mubr.bf16.gmra.mrb[72].mxu1 %v19115_v9 }
 0x28e   : > { %v1920_v58 = vsel %vm1903_vm13, %v1917_v30, %v1919_v27  ;;  %v15603_v46 = vpop.eup %15602  ;;  %v1693_v42 = vsel %vm1692_vm9, %v1690_v15, %v1687_v10  ;;  %v1699_v23 = vmul.f32 %v19132_v40, %v1698_v28  ;;  %v1706_v49 = vmul.f32 -0.5, %v19166_v6  ;;  %2333 = vmatprep.mubr.bf16.mxu1 %v1918_v13 }
 0x28f   : > { %v15605_v5 = vpop.eup %15604  ;;  %v1743_v31 = vadd.f32 %v1693_v42, %v1379_v41  ;;  %v1696_v19 = vmul.f32 0.6931472, %v15603_v46  ;;  %v21678_v12 = vunpack.c.l.bf16 %v18653_v11  ;;  %v1870_v37 = vmul.f32 %v14859_v33, %v1792_v3  ;;  %v14883_v41 = vld [vmem:[%s21624_s20 + $0x60] sm:$0xff]  }
 0x290   : > { %2487 = vmatmul.mubr.bf16.gmra.mrb[76].mxu0 %v19164_v26  ;;  %v1380_v57 = vmax.f32 %v19046_v48, 0.0  ;;  %vm1701_vm10 = vcmp.lt.f32.partialorder %v1700_v45, 0.0004427343  ;;  %v1712_v9 = vadd.f32 1.0, %v15605_v5  ;;  %v1707_v51 = vadd.f32 1.0, %v1706_v49 }
 0x291   : > { %v1869_v2 = vmul.f32 %v21678_v12, %v1791_v53  ;;  %2496 = vmatprep.mubr.bf16.mxu0 %v21657_v55  ;;  %15612 = vtanh.f32 %v1743_v31  ;;  %v1702_v40 = vsel %vm1701_vm10, %v1699_v23, %v1696_v19  ;;  %v1709_v11 = vand.u32 2147483647, %v19166_v6 }
 0x292   : > { %v15607_v17 = vpop.eup %15606  ;;  %v1744_v47 = vadd.f32 %v1702_v40, %v1380_v57  ;;  %15614 = vlog2.f32 %v1712_v9  ;;  %v14862_v8 = vunpack.c.l.bf16 %v14881_v29  ;;  %v1715_v59 = vmul.f32 -0.5, %v15605_v5 }
 0x293   : > { %v19192_v38 = vpack.c.bf16 %v1870_v37, %v1869_v2  ;;  %v1793_v34 = vmul.f32 %v15607_v17, %v18951_v0  ;;  %v14863_v14 = vunpack.c.h.bf16 %v14881_v29  ;;  %v1708_v56 = vmul.f32 %v19166_v6, %v1707_v51  ;;  %v1989_v29 = vld [vmem:[#allocation10] sm:$0x3] }
 0x294   : > { %15616 = vtanh.f32 %v1744_v47  ;;  %vm1710_vm11 = vcmp.lt.f32.partialorder %v1709_v11, 0.0004427343  ;;  %v1381_v62 = vmax.f32 %v19078_v7, 0.0  ;;  %v1716_v0 = vadd.f32 1.0, %v1715_v59 }
 0x295   : > { %v1921_v25 = vrot.slane %v19192_v38, 4  ;;  %2334 = vmatmul.mubr.bf16.gmra.mrb[76].mxu1 %v19152_v4  ;;  %v1871_v4 = vmul.f32 %v14862_v8, %v1793_v34  ;;  %v1718_v6 = vand.u32 2147483647, %v15605_v5  ;;  %v14866_v28 = vunpack.c.l.bf16 %v14882_v22 }
 0x296   : > { %v15609_v21 = vpop.eup %15608  ;;  %2343 = vmatprep.mubr.bf16.mxu1 %v1920_v58  ;;  %v14867_v52 = vunpack.c.h.bf16 %v14882_v22  ;;  %v1717_v30 = vmul.f32 %v15605_v5, %v1716_v0  ;;  %v1382_v53 = vmax.f32 %v19103_v20, 0.0  ;;  %v14870_v42 = vunpack.c.l.bf16 %v14883_v41 }
 0x297   : > { %v1922_v24 = vsel %vm1903_vm13, %v1919_v27, %v1921_v25  ;;  %v15611_v32 = vpop.eup %15610  ;;  %v1705_v1 = vmul.f32 0.6931472, %v15609_v21  ;;  %vm1719_vm12 = vcmp.lt.f32.partialorder %v1718_v6, 0.0004427343  ;;  %v14871_v23 = vunpack.c.h.bf16 %v14883_v41 }
 0x298   : > { %v1794_v33 = vmul.f32 %v15611_v32, %v18998_v39  ;;  %2497 = vmatmul.mubr.bf16.gmra.mrb[80].mxu0 %v19170_v61  ;;  %v1991_v9 = vlaneseq }
 0x299   : > { %v1711_v18 = vsel %vm1710_vm11, %v1708_v56, %v1705_v1  ;;  %2506 = vmatprep.mubr.bf16.mxu0 %v21657_v55 }
 0x29a   : > { %v1872_v43 = vmul.f32 %v14863_v14, %v1794_v33  ;;  %v1745_v50 = vadd.f32 %v1711_v18, %v1381_v62  ;;  %v1992_v40 = vshrl.u32 %v1991_v9, 7 }
 0x29b   : > { %v15613_v63 = vpop.eup %15612 }
 0x29c   : > { %v1887_v36 = vpack.c.bf16 %v1872_v43, %v1871_v4  ;;  %v15615_v39 = vpop.eup %15614  ;;  %v1795_v60 = vmul.f32 %v15613_v63, %v19027_v35  ;;  %15618 = vtanh.f32 %v1745_v50  ;;  %v1997_v17 = vsub.s32 1, %v1992_v40 }
 0x29d   : > { %v1714_v16 = vmul.f32 0.6931472, %v15615_v39  ;;  %2344 = vmatmul.mubr.bf16.gmra.mrb[80].mxu1 %v19164_v26 }
 0x29e   : > { %v1923_v27 = vrot.slane %v1887_v36, 4  ;;  %v15617_v54 = vpop.eup %15616  ;;  %2353 = vmatprep.mubr.bf16.mxu1 %v1922_v24  ;;  %v1873_v35 = vmul.f32 %v14866_v28, %v1795_v60 }
 0x29f   : > { %v1796_v15 = vmul.f32 %v15617_v54, %v19046_v48  ;;  %v1720_v45 = vsel %vm1719_vm12, %v1717_v30, %v1714_v16 }
 0x2a0   : > { %2507 = vmatmul.mubr.bf16.gmra.mrb[84].mxu0 %v19192_v38  ;;  %v1924_v44 = vsel %vm1903_vm13, %v1921_v25, %v1923_v27  ;;  %v1746_v10 = vadd.f32 %v1720_v45, %v1382_v53 }
 0x2a1   : > { %2516 = vmatprep.mubr.bf16.mxu0 %v21657_v55  ;;  %v1874_v13 = vmul.f32 %v14867_v52, %v1796_v15 }
 0x2a2   : > { %15620 = vtanh.f32 %v1746_v10 }
 0x2a3   : > { %v1888_v26 = vpack.c.bf16 %v1874_v13, %v1873_v35 }
 0x2a5   : > { %2354 = vmatmul.mubr.bf16.gmra.mrb[84].mxu1 %v19170_v61  ;;  %v1925_v58 = vrot.slane %v1888_v26, 4 }
 0x2a6   : > { %2363 = vmatprep.mubr.bf16.mxu1 %v1924_v44  ;;  %v15619_v48 = vpop.eup %15618 }
 0x2a7   : > { %v1926_v3 = vsel %vm1903_vm13, %v1923_v27, %v1925_v58  ;;  %v1797_v46 = vmul.f32 %v15619_v48, %v19078_v7 }
 0x2a8   : > { %2517 = vmatmul.mubr.bf16.gmra.mrb[88].mxu0 %v1887_v36 }
 0x2a9   : > { %2526 = vmatprep.mubr.bf16.mxu0 %v21657_v55  ;;  %v1875_v61 = vmul.f32 %v14870_v42, %v1797_v46 }
 0x2ac   : > { %v15621_v49 = vpop.eup %15620 }
 0x2ad   : > { %v1798_v5 = vmul.f32 %v15621_v49, %v19103_v20  ;;  %2364 = vmatmul.mubr.bf16.gmra.mrb[88].mxu1 %v19192_v38  ;;  %v1993_v38 = vsub.s32 0, %v1992_v40 }
 0x2ae   : > { %2373 = vmatprep.mubr.bf16.mxu1 %v1926_v3 }
 0x2af   : > { %v1876_v31 = vmul.f32 %v14871_v23, %v1798_v5  ;;  %v19228_v47 = vrot.slane %v1989_v29, %v1993_v38 }
 0x2b0   : > { %2527 = vmatmul.mubr.bf16.gmra.mrb[92].mxu0 %v1888_v26 }
 0x2b1   : > { %2536 = vmatprep.mubr.bf16.mxu0 %v21657_v55  ;;  %v1889_v19 = vpack.c.bf16 %v1876_v31, %v1875_v61  ;;  %v19230_v55 = vrot.slane %v1989_v29, %v1997_v17 }
 0x2b3   : > { %v1927_v12 = vrot.slane %v1889_v19, 4 }
 0x2b5   : > { %2374 = vmatmul.mubr.bf16.gmra.mrb[92].mxu1 %v1887_v36  ;;  %v1928_v2 = vsel %vm1903_vm13, %v1925_v58, %v1927_v12 }
 0x2b6   : > { %2383 = vmatprep.mubr.bf16.mxu1 %v1928_v2 }
 0x2b8   : > { %2537 = vmatmul.mubr.bf16.gmra.mrb[96].mxu0 %v1889_v19 }
 0x2bd   : > { %2384 = vmatmul.mubr.bf16.gmra.mrb[96].mxu1 %v1888_v26 }
 0x311   : > { %v2428_v7 = vpop.f32.mrb[52].mxu0 }
 0x312   : > { %v2430_v37 = vpop.f32.mrb[53].mxu0 }
 0x313   : > { %v2432_v57 = vpop.f32.mrb[54].mxu0 }
 0x314   : > { %v2434_v20 = vpop.f32.mrb[55].mxu0 }
 0x328   : > { %v2275_v51 = vpop.f32.mrb[52].mxu1 }
 0x329   : > { %v2276_v11 = vadd.f32 %v2275_v51, %v19228_v47  ;;  %v2277_v25 = vpop.f32.mrb[53].mxu1 }
 0x32a   : > { %v2278_v8 = vadd.f32 %v2277_v25, %v19230_v55  ;;  %v2279_v21 = vpop.f32.mrb[54].mxu1  ;;  %v19262_v25 = vld [vmem:[%s21679_s21] sm:$0xff] }
 0x32b   : > { %v2429_v34 = vadd.f32 %v2428_v7, %v2276_v11  ;;  %v2280_v59 = vadd.f32 %v2279_v21, %v19228_v47  ;;  %v2281_v24 = vpop.f32.mrb[55].mxu1 }
 0x32c   : > { %v2431_v14 = vadd.f32 %v2430_v37, %v2278_v8  ;;  %v2282_v32 = vadd.f32 %v2281_v24, %v19230_v55 }
 0x32d   : > { %v2433_v1 = vadd.f32 %v2432_v57, %v2280_v59  ;;  %v19269_v59 = vld [vmem:[%s21680_s29 + $0x8] sm:$0xff] }
 0x32e   : > { %v2435_v56 = vadd.f32 %v2434_v20, %v2282_v32 }
 0x32f   : > { %v19236_v33 = vmax.f32 %v2429_v34, %v2433_v1 }
 0x330   : > { %v19238_v18 = vmax.f32 %v2431_v14, %v2435_v56  ;;  %v19278_v56 = vld [vmem:[%s21680_s29 + $0x10] sm:$0xff] }
 0x331   : > { %v2595_v4 = vand.u32 2147483647, %v19236_v33 }
 0x332   : > { %v2438_v62 = vpop.f32.mrb[56].mxu0  ;;  %v2596_v22 = vand.u32 2147483647, %v19238_v18 }
 0x333   : > { %v2440_v0 = vpop.f32.mrb[57].mxu0  ;;  %v2619_v6 = vsub.f32 0.0, %v2595_v4 }
 0x334   : > { %v2442_v43 = vpop.f32.mrb[58].mxu0  ;;  %v2620_v63 = vsub.f32 0.0, %v2596_v22  ;;  %v2992_v22 = vunpack.c.h.bf16 %v19262_v25 }
 0x335   : > { %v2444_v50 = vpop.f32.mrb[59].mxu0  ;;  %v2643_v36 = vmul.f32 1.442695, %v2619_v6  ;;  %v2994_v6 = vunpack.c.h.bf16 %v19269_v59 }
 0x336   : > { %v2285_v39 = vpop.f32.mrb[56].mxu1  ;;  %v2645_v28 = vmul.f32 1.442695, %v2620_v63 }
 0x337   : > { %v2286_v52 = vadd.f32 %v2285_v39, %v19228_v47  ;;  %v2287_v60 = vpop.f32.mrb[57].mxu1  ;;  %15622 = vpow2.f32 %v2643_v36  ;;  %v2995_v39 = vunpack.c.l.bf16 %v19278_v56 }
 0x338   : > { %v2288_v16 = vadd.f32 %v2287_v60, %v19230_v55  ;;  %v2289_v30 = vpop.f32.mrb[58].mxu1  ;;  %15624 = vpow2.f32 %v2645_v28 }
 0x339   : > { %v2439_v27 = vadd.f32 %v2438_v62, %v2286_v52  ;;  %v2290_v54 = vadd.f32 %v2289_v30, %v19228_v47  ;;  %v2291_v53 = vpop.f32.mrb[59].mxu1  ;;  %v2996_v52 = vunpack.c.h.bf16 %v19278_v56 }
 0x33a   : > { %v2441_v15 = vadd.f32 %v2440_v0, %v2288_v16  ;;  %v2292_v45 = vadd.f32 %v2291_v53, %v19230_v55  ;;  %v2991_v0 = vunpack.c.l.bf16 %v19262_v25 }
 0x33b   : > { %v2443_v10 = vadd.f32 %v2442_v43, %v2290_v54 }
 0x33c   : > { %v2448_v44 = vpop.f32.mrb[60].mxu0  ;;  %v2445_v13 = vadd.f32 %v2444_v50, %v2292_v45  ;;  %v2993_v50 = vunpack.c.l.bf16 %v19269_v59 }
 0x33d   : > { %v2450_v35 = vpop.f32.mrb[61].mxu0  ;;  %v19246_v58 = vmax.f32 %v2439_v27, %v2443_v10 }
 0x33e   : > { %v2452_v26 = vpop.f32.mrb[62].mxu0  ;;  %v19248_v48 = vmax.f32 %v2441_v15, %v2445_v13  ;;  %v2571_v15 = vmax.f32 %v19236_v33, 0.0 }
 0x33f   : > { %v2454_v3 = vpop.f32.mrb[63].mxu0  ;;  %v2597_v46 = vand.u32 2147483647, %v19246_v58 }
 0x340   : > { %v2295_v41 = vpop.f32.mrb[60].mxu1  ;;  %v2598_v49 = vand.u32 2147483647, %v19248_v48 }
 0x341   : > { %v2296_v42 = vadd.f32 %v2295_v41, %v19228_v47  ;;  %v2297_v23 = vpop.f32.mrb[61].mxu1  ;;  %v2621_v31 = vsub.f32 0.0, %v2597_v46  ;;  %v15623_v7 = vpop.eup %15622 }
 0x342   : > { %v2298_v5 = vadd.f32 %v2297_v23, %v19230_v55  ;;  %v2299_v61 = vpop.f32.mrb[62].mxu1  ;;  %v2622_v37 = vsub.f32 0.0, %v2598_v49  ;;  %v19256_v9 = vpop.eup %15624  ;;  %v2691_v40 = vadd.f32 1.0, %v15623_v7  ;;  %v2694_v34 = vmul.f32 -0.5, %v15623_v7 }
 0x343   : > { %v2449_v19 = vadd.f32 %v2448_v44, %v2296_v42  ;;  %v2300_v12 = vadd.f32 %v2299_v61, %v19228_v47  ;;  %v2301_v2 = vpop.f32.mrb[63].mxu1  ;;  %v2647_v38 = vmul.f32 1.442695, %v2621_v31  ;;  %v2700_v29 = vadd.f32 1.0, %v19256_v9 }
 0x344   : > { %v2451_v57 = vadd.f32 %v2450_v35, %v2298_v5  ;;  %v2302_v20 = vadd.f32 %v2301_v2, %v19230_v55  ;;  %v2649_v17 = vmul.f32 1.442695, %v2622_v37  ;;  %15626 = vlog2.f32 %v2691_v40 }
 0x345   : > { %v2453_v51 = vadd.f32 %v2452_v26, %v2300_v12  ;;  %15628 = vlog2.f32 %v2700_v29  ;;  %v2703_v32 = vmul.f32 -0.5, %v19256_v9  ;;  %v2695_v36 = vadd.f32 1.0, %v2694_v34 }
 0x346   : > { %v2455_v11 = vadd.f32 %v2454_v3, %v2302_v20  ;;  %15630 = vpow2.f32 %v2647_v38  ;;  %v2697_v16 = vand.u32 2147483647, %v15623_v7  ;;  %v2706_v45 = vand.u32 2147483647, %v19256_v9 }
 0x347   : > { %v19264_v8 = vmax.f32 %v2449_v19, %v2453_v51  ;;  %15632 = vpow2.f32 %v2649_v17  ;;  %v2704_v30 = vadd.f32 1.0, %v2703_v32  ;;  %v2572_v26 = vmax.f32 %v19238_v18, 0.0 }
 0x348   : > { %v19271_v24 = vmax.f32 %v2451_v57, %v2455_v11  ;;  %v2696_v5 = vmul.f32 %v15623_v7, %v2695_v36  ;;  %vm2698_vm13 = vcmp.lt.f32.partialorder %v2697_v16, 0.0004427343  ;;  %v19299_v57 = vld [vmem:[%s21680_s29 + $0x18] sm:$0xff]  ;;  %vm2707_vm14 = vcmp.lt.f32.partialorder %v2706_v45, 0.0004427343 }
 0x349   : > { %v2599_v1 = vand.u32 2147483647, %v19264_v8  ;;  %v2705_v2 = vmul.f32 %v19256_v9, %v2704_v30  ;;  %v2997_v32 = vunpack.c.l.bf16 %v19299_v57  ;;  %v2573_v36 = vmax.f32 %v19246_v58, 0.0  ;;  %v19315_v30 = vld [vmem:[%s21680_s29 + $0x20] sm:$0xff] }
 0x34a   : > { %v2458_v21 = vpop.f32.mrb[64].mxu0  ;;  %v2600_v4 = vand.u32 2147483647, %v19271_v24 }
 0x34b   : > { %v2460_v14 = vpop.f32.mrb[65].mxu0  ;;  %v2623_v63 = vsub.f32 0.0, %v2599_v1 }
 0x34c   : > { %v2462_v62 = vpop.f32.mrb[66].mxu0  ;;  %v2624_v28 = vsub.f32 0.0, %v2600_v4 }
 0x34d   : > { %v2464_v43 = vpop.f32.mrb[67].mxu0  ;;  %v2651_v27 = vmul.f32 1.442695, %v2623_v63 }
 0x34e   : > { %v2305_v60 = vpop.f32.mrb[64].mxu1  ;;  %v2653_v44 = vmul.f32 1.442695, %v2624_v28  ;;  %v15627_v13 = vpop.eup %15626 }
 0x34f   : > { %v2306_v54 = vadd.f32 %v2305_v60, %v19228_v47  ;;  %v2307_v53 = vpop.f32.mrb[65].mxu1  ;;  %15634 = vpow2.f32 %v2651_v27  ;;  %v15629_v23 = vpop.eup %15628  ;;  %v2693_v49 = vmul.f32 0.6931472, %v15627_v13 }
 0x350   : > { %v2308_v10 = vadd.f32 %v2307_v53, %v19230_v55  ;;  %v2309_v35 = vpop.f32.mrb[66].mxu1  ;;  %15636 = vpow2.f32 %v2653_v44  ;;  %v15631_v19 = vpop.eup %15630  ;;  %v2702_v12 = vmul.f32 0.6931472, %v15629_v23  ;;  %v2575_v53 = vmax.f32 %v19264_v8, 0.0 }
 0x351   : > { %v2459_v3 = vadd.f32 %v2458_v21, %v2306_v54  ;;  %v2310_v41 = vadd.f32 %v2309_v35, %v19228_v47  ;;  %v2311_v46 = vpop.f32.mrb[67].mxu1  ;;  %v15633_v40 = vpop.eup %15632  ;;  %v2699_v38 = vsel %vm2698_vm13, %v2696_v5, %v2693_v49  ;;  %v2709_v7 = vadd.f32 1.0, %v15631_v19 }
 0x352   : > { %v2461_v61 = vadd.f32 %v2460_v14, %v2308_v10  ;;  %v2312_v29 = vadd.f32 %v2311_v46, %v19230_v55  ;;  %v2907_v51 = vadd.f32 %v2699_v38, %v2571_v15  ;;  %v2708_v11 = vsel %vm2707_vm14, %v2705_v2, %v2702_v12 }
 0x353   : > { %v2468_v42 = vpop.f32.mrb[68].mxu0  ;;  %v2463_v37 = vadd.f32 %v2462_v62, %v2310_v41  ;;  %v2712_v21 = vmul.f32 -0.5, %v15631_v19  ;;  %v2718_v9 = vadd.f32 1.0, %v15633_v40  ;;  %v2908_v34 = vadd.f32 %v2708_v11, %v2572_v26 }
 0x354   : > { %v19293_v31 = vpop.f32.mrb[69].mxu0  ;;  %15638 = vlog2.f32 %v2709_v7  ;;  %v2721_v14 = vmul.f32 -0.5, %v15633_v40  ;;  %v2715_v1 = vand.u32 2147483647, %v15631_v19  ;;  %v2465_v28 = vadd.f32 %v2464_v43, %v2312_v29 }
 0x355   : > { %v19301_v20 = vpop.f32.mrb[70].mxu0  ;;  %15640 = vtanh.f32 %v2907_v51  ;;  %v19307_v62 = vmax.f32 %v2459_v3, %v2463_v37  ;;  %v2713_v27 = vadd.f32 1.0, %v2712_v21  ;;  %v2574_v54 = vmax.f32 %v19248_v48, 0.0 }
 0x356   : > { %v19304_v17 = vpop.f32.mrb[71].mxu0  ;;  %15642 = vtanh.f32 %v2908_v34  ;;  %v2722_v44 = vadd.f32 1.0, %v2721_v14  ;;  %v19322_v10 = vmax.f32 %v2461_v61, %v2465_v28  ;;  %vm19328_vm15 = vcmp.lt.f32.partialorder %v2715_v1, 0.0004427343 }
 0x357   : > { %15644 = vlog2.f32 %v2718_v9  ;;  %v2601_v43 = vand.u32 2147483647, %v19307_v62  ;;  %v2724_v46 = vand.u32 2147483647, %v15633_v40  ;;  %v2576_v23 = vmax.f32 %v19271_v24, 0.0 }
 0x358   : > { %v2315_v63 = vpop.f32.mrb[68].mxu1  ;;  %v2714_v7 = vmul.f32 %v15631_v19, %v2713_v27  ;;  %v2723_v21 = vmul.f32 %v15633_v40, %v2722_v44  ;;  %v2602_v19 = vand.u32 2147483647, %v19322_v10 }
 0x359   : > { %v2316_v60 = vadd.f32 %v2315_v63, %v19228_v47  ;;  %v2317_v16 = vpop.f32.mrb[69].mxu1  ;;  %v19326_v3 = vpop.eup %15634  ;;  %v2625_v61 = vsub.f32 0.0, %v2601_v43  ;;  %vm19347_vm0 = vcmp.lt.f32.partialorder %v2724_v46, 0.0004427343 }
 0x35a   : > { %v2319_v15 = vpop.f32.mrb[70].mxu1  ;;  %v19336_v12 = vpop.eup %15636  ;;  %v2318_v2 = vadd.f32 %v2317_v16, %v19230_v55  ;;  %v2730_v29 = vmul.f32 -0.5, %v19326_v3  ;;  %v2733_v9 = vand.u32 2147483647, %v19326_v3 }
 0x35b   : > { %v19319_v45 = vpop.f32.mrb[72].mxu0  ;;  %v2469_v35 = vadd.f32 %v2468_v42, %v2316_v60  ;;  %v2321_v13 = vpop.f32.mrb[71].mxu1  ;;  %v2727_v42 = vadd.f32 1.0, %v19326_v3  ;;  %v2320_v37 = vadd.f32 %v2319_v15, %v19228_v47  ;;  %v2736_v51 = vadd.f32 1.0, %v19336_v12 }
 0x35c   : > { %v19324_v26 = vpop.f32.mrb[73].mxu0  ;;  %v2322_v11 = vadd.f32 %v2321_v13, %v19230_v55  ;;  %v2655_v34 = vmul.f32 1.442695, %v2625_v61  ;;  %v2739_v1 = vmul.f32 -0.5, %v19336_v12  ;;  %v2742_v60 = vand.u32 2147483647, %v19336_v12 }
 0x35d   : > { %v19334_v5 = vpop.f32.mrb[74].mxu0  ;;  %15646 = vlog2.f32 %v2727_v42  ;;  %v2471_v40 = vadd.f32 %v19293_v31, %v2318_v2  ;;  %v2473_v16 = vadd.f32 %v19301_v20, %v2320_v37  ;;  %v2731_v43 = vadd.f32 1.0, %v2730_v29 }
 0x35e   : > { %v19341_v38 = vpop.f32.mrb[75].mxu0  ;;  %15648 = vlog2.f32 %v2736_v51  ;;  %v15639_v28 = vpop.eup %15638  ;;  %v2626_v13 = vsub.f32 0.0, %v2602_v19  ;;  %v2475_v46 = vadd.f32 %v19304_v17, %v2322_v11  ;;  %vm19360_vm1 = vcmp.lt.f32.partialorder %v2733_v9, 0.0004427343 }
 0x35f   : > { %15650 = vpow2.f32 %v2655_v34  ;;  %v15641_v15 = vpop.eup %15640  ;;  %v2711_v44 = vmul.f32 0.6931472, %v15639_v28  ;;  %v19364_v31 = vmax.f32 %v2469_v35, %v2473_v16  ;;  %v2740_v16 = vadd.f32 1.0, %v2739_v1 }
 0x360   : > { %v2325_v63 = vpop.f32.mrb[72].mxu1  ;;  %v15643_v51 = vpop.eup %15642  ;;  %v2955_v49 = vmul.f32 %v15641_v15, %v19236_v33  ;;  %v2657_v33 = vmul.f32 1.442695, %v2626_v13  ;;  %v19373_v9 = vmax.f32 %v2471_v40, %v2475_v46  ;;  %vm19385_vm2 = vcmp.lt.f32.partialorder %v2742_v60, 0.0004427343 }
 0x361   : > { %v2327_v27 = vpop.f32.mrb[73].mxu1  ;;  %v2326_v20 = vadd.f32 %v2325_v63, %v19228_v47  ;;  %v15645_v17 = vpop.eup %15644  ;;  %v2956_v11 = vmul.f32 %v15643_v51, %v19238_v18  ;;  %v2717_v34 = vsel %vm19328_vm15, %v2714_v7, %v2711_v44  ;;  %v2603_v7 = vand.u32 2147483647, %v19364_v31 }
 0x362   : > { %v2329_v42 = vpop.f32.mrb[74].mxu1  ;;  %v2328_v2 = vadd.f32 %v2327_v27, %v19230_v55  ;;  %v3015_v35 = vmul.f32 %v2991_v0, %v2955_v49  ;;  %v2909_v63 = vadd.f32 %v2717_v34, %v2573_v36  ;;  %v2720_v28 = vmul.f32 0.6931472, %v15645_v17 }
 0x363   : > { %v19357_v61 = vpop.f32.mrb[76].mxu0  ;;  %v2331_v37 = vpop.f32.mrb[75].mxu1  ;;  %v3016_v18 = vmul.f32 %v2992_v22, %v2956_v11  ;;  %15652 = vpow2.f32 %v2657_v33  ;;  %v2604_v36 = vand.u32 2147483647, %v19373_v9  ;;  %v2479_v49 = vadd.f32 %v19319_v45, %v2326_v20 }
 0x364   : > { %v19368_v29 = vpop.f32.mrb[77].mxu0  ;;  %15654 = vtanh.f32 %v2909_v63  ;;  %v2726_v0 = vsel %vm19347_vm0, %v2723_v21, %v2720_v28  ;;  %v2627_v22 = vsub.f32 0.0, %v2603_v7  ;;  %v2481_v60 = vadd.f32 %v19324_v26, %v2328_v2 }
 0x365   : > { %v19375_v19 = vpop.f32.mrb[78].mxu0  ;;  %v14807_v1 = vpack.c.bf16 %v3016_v18, %v3015_v35  ;;  %v2910_v25 = vadd.f32 %v2726_v0, %v2574_v54  ;;  %v2732_v44 = vmul.f32 %v19326_v3, %v2731_v43  ;;  %v2628_v13 = vsub.f32 0.0, %v2604_v36  ;;  %v19409_v43 = vld [vmem:[%s21680_s29 + $0x28] sm:$0xff] }
 0x366   : > { %v19381_v27 = vpop.f32.mrb[79].mxu0  ;;  %v2330_v46 = vadd.f32 %v2329_v42, %v19228_v47  ;;  %v2332_v21 = vadd.f32 %v2331_v37, %v19230_v55  ;;  %v2741_v20 = vmul.f32 %v19336_v12, %v2740_v16  ;;  %v2659_v54 = vmul.f32 1.442695, %v2627_v22 }
 0x367   : > { %v15647_v15 = vpop.eup %15646  ;;  %3135 = vst [vmem:[#allocation2] sm:$0xff] %v14807_v1  ;;  %15656 = vtanh.f32 %v2910_v25  ;;  %v2661_v63 = vmul.f32 1.442695, %v2628_v13 }
 0x368   : > { %v2335_v40 = vpop.f32.mrb[76].mxu1  ;;  %v15649_v51 = vpop.eup %15648  ;;  %v2729_v45 = vmul.f32 0.6931472, %v15647_v15  ;;  %v2483_v3 = vadd.f32 %v19334_v5, %v2330_v46  ;;  %v2485_v42 = vadd.f32 %v19341_v38, %v2332_v21  ;;  %15658 = vpow2.f32 %v2659_v54 }
 0x369   : > { %v2337_v14 = vpop.f32.mrb[77].mxu1  ;;  %v19403_v26 = vpop.eup %15650  ;;  %v2738_v2 = vmul.f32 0.6931472, %v15649_v51  ;;  %v2336_v37 = vadd.f32 %v2335_v40, %v19228_v47  ;;  %v2579_v46 = vmax.f32 %v19364_v31, 0.0 }
 0x36a   : > { %v2339_v17 = vpop.f32.mrb[78].mxu1  ;;  %v2735_v33 = vsel %vm19360_vm1, %v2732_v44, %v2729_v45  ;;  %v2745_v35 = vadd.f32 1.0, %v19403_v26  ;;  %v2338_v5 = vadd.f32 %v2337_v14, %v19230_v55  ;;  %v19425_v18 = vmax.f32 %v2479_v49, %v2483_v3 }
 0x36b   : > { %v19401_v11 = vpop.f32.mrb[80].mxu0  ;;  %v2341_v34 = vpop.f32.mrb[79].mxu1  ;;  %v2911_v16 = vadd.f32 %v2735_v33, %v2575_v53  ;;  %v2744_v38 = vsel %vm19385_vm2, %v2741_v20, %v2738_v2  ;;  %v2748_v1 = vmul.f32 -0.5, %v19403_v26  ;;  %v19435_v41 = vmax.f32 %v2481_v60, %v2485_v42 }
 0x36c   : > { %v19413_v12 = vpop.f32.mrb[81].mxu0  ;;  %v2912_v4 = vadd.f32 %v2744_v38, %v2576_v23  ;;  %15660 = vlog2.f32 %v2745_v35  ;;  %v2605_v53 = vand.u32 2147483647, %v19425_v18  ;;  %v2577_v49 = vmax.f32 %v19307_v62, 0.0 }
 0x36d   : > { %v19419_v28 = vpop.f32.mrb[82].mxu0  ;;  %15662 = vtanh.f32 %v2911_v16  ;;  %v15653_v25 = vpop.eup %15652  ;;  %v2489_v22 = vadd.f32 %v19357_v61, %v2336_v37  ;;  %v19440_v23 = vadd.f32 %v19368_v29, %v2338_v5  ;;  %v2578_v44 = vmax.f32 %v19322_v10, 0.0 }
 0x36e   : > { %v19427_v7 = vpop.f32.mrb[83].mxu0  ;;  %15664 = vtanh.f32 %v2912_v4  ;;  %v15655_v15 = vpop.eup %15654  ;;  %v2754_v13 = vadd.f32 1.0, %v15653_v25  ;;  %v2757_v14 = vmul.f32 -0.5, %v15653_v25  ;;  %v2629_v51 = vsub.f32 0.0, %v2605_v53 }
 0x36f   : > { %15666 = vpow2.f32 %v2661_v63  ;;  %v2957_v60 = vmul.f32 %v15655_v15, %v19246_v58  ;;  %v2606_v45 = vand.u32 2147483647, %v19435_v41  ;;  %v2749_v20 = vadd.f32 1.0, %v2748_v1 }
 0x370   : > { %v2345_v40 = vpop.f32.mrb[80].mxu1  ;;  %v2751_v54 = vand.u32 2147483647, %v19403_v26  ;;  %15668 = vlog2.f32 %v2754_v13  ;;  %v2340_v2 = vadd.f32 %v2339_v17, %v19228_v47  ;;  %v2760_v58 = vand.u32 2147483647, %v15653_v25 }
 0x371   : > { %v19444_v21 = vpop.f32.mrb[81].mxu1  ;;  %v15657_v37 = vpop.eup %15656  ;;  %v2663_v33 = vmul.f32 1.442695, %v2629_v51  ;;  %v2630_v35 = vsub.f32 0.0, %v2606_v45  ;;  %v2342_v63 = vadd.f32 %v2341_v34, %v19230_v55  ;;  %v3017_v16 = vmul.f32 %v2993_v50, %v2957_v60 }
 0x372   : > { %v19448_v61 = vpop.f32.mrb[82].mxu1  ;;  %v2958_v38 = vmul.f32 %v15657_v37, %v19248_v48  ;;  %v2493_v4 = vadd.f32 %v19375_v19, %v2340_v2  ;;  %v2346_v17 = vadd.f32 %v2345_v40, %v19228_v47  ;;  %v2758_v53 = vadd.f32 1.0, %v2757_v14  ;;  %v19469_v51 = vpop.eup %15658 }
 0x373   : > { %v19450_v29 = vpop.f32.mrb[84].mxu0  ;;  %v19454_v3 = vpop.f32.mrb[83].mxu1  ;;  %15670 = vpow2.f32 %v2663_v33  ;;  %v2665_v15 = vmul.f32 1.442695, %v2630_v35  ;;  %v2495_v13 = vadd.f32 %v19381_v27, %v2342_v63  ;;  %v2580_v50 = vmax.f32 %v19373_v9, 0.0 }
 0x374   : > { %v19456_v42 = vpop.f32.mrb[85].mxu0  ;;  %v3018_v34 = vmul.f32 %v2994_v6, %v2958_v38  ;;  %v19474_v60 = vmax.f32 %v2489_v22, %v2493_v4  ;;  %v19477_v48 = vadd.f32 %v19401_v11, %v2346_v17  ;;  %vm19479_vm3 = vcmp.lt.f32.partialorder %v2751_v54, 0.0004427343 }
 0x375   : > { %v19459_v5 = vpop.f32.mrb[86].mxu0  ;;  %vm19483_vm4 = vcmp.lt.f32.partialorder %v2760_v58, 0.0004427343  ;;  %v2763_v27 = vadd.f32 1.0, %v19469_v51  ;;  %15672 = vpow2.f32 %v2665_v15  ;;  %v2750_v11 = vmul.f32 %v19403_v26, %v2749_v20 }
 0x376   : > { %v19466_v1 = vpop.f32.mrb[87].mxu0  ;;  %v15661_v19 = vpop.eup %15660  ;;  %v14808_v22 = vpack.c.bf16 %v3018_v34, %v3017_v16  ;;  %v2607_v2 = vand.u32 2147483647, %v19474_v60  ;;  %v2759_v33 = vmul.f32 %v15653_v25, %v2758_v53  ;;  %v2766_v35 = vmul.f32 -0.5, %v19469_v51 }
 0x377   : > { %v15663_v6 = vpop.eup %15662  ;;  %v2747_v45 = vmul.f32 0.6931472, %v15661_v19  ;;  %15674 = vlog2.f32 %v2763_v27  ;;  %v19504_v17 = vmax.f32 %v19440_v23, %v2495_v13 }
 0x378   : > { %v19488_v59 = vpop.f32.mrb[84].mxu1  ;;  %v15665_v37 = vpop.eup %15664  ;;  %v2959_v58 = vmul.f32 %v15663_v6, %v19264_v8  ;;  %3136 = vst [vmem:[#allocation2 + $0x8] sm:$0xff] %v14808_v22  ;;  %v2631_v20 = vsub.f32 0.0, %v2607_v2  ;;  %v2350_v6 = vadd.f32 %v19448_v61, %v19228_v47 }
 0x379   : > { %v19492_v54 = vpop.f32.mrb[85].mxu1  ;;  %v15667_v4 = vpop.eup %15666  ;;  %v2960_v16 = vmul.f32 %v15665_v37, %v19271_v24  ;;  %v2753_v26 = vsel %vm19479_vm3, %v2750_v11, %v2747_v45  ;;  %v2348_v24 = vadd.f32 %v19444_v21, %v19230_v55  ;;  %v2608_v45 = vand.u32 2147483647, %v19504_v17 }
 0x37a   : > { %v19496_v63 = vpop.f32.mrb[86].mxu1  ;;  %v3019_v53 = vmul.f32 %v2995_v39, %v2959_v58  ;;  %v2913_v15 = vadd.f32 %v2753_v26, %v2577_v49  ;;  %v2772_v34 = vadd.f32 1.0, %v15667_v4  ;;  %v15669_v40 = vpop.eup %15668  ;;  %v2775_v13 = vmul.f32 -0.5, %v15667_v4 }
 0x37b   : > { %v19498_v38 = vpop.f32.mrb[88].mxu0  ;;  %v19506_v8 = vpop.f32.mrb[87].mxu1  ;;  %v3020_v23 = vmul.f32 %v2996_v52, %v2960_v16  ;;  %v2667_v27 = vmul.f32 1.442695, %v2631_v20  ;;  %v2756_v39 = vmul.f32 0.6931472, %v15669_v40  ;;  %v2501_v61 = vadd.f32 %v19413_v12, %v2348_v24 }
 0x37c   : > { %v19508_v25 = vpop.f32.mrb[89].mxu0  ;;  %15676 = vtanh.f32 %v2913_v15  ;;  %v2769_v49 = vand.u32 2147483647, %v19469_v51  ;;  %v2767_v11 = vadd.f32 1.0, %v2766_v35  ;;  %v2778_v2 = vand.u32 2147483647, %v15667_v4 }
 0x37d   : > { %v19516_v19 = vpop.f32.mrb[90].mxu0  ;;  %v14809_v21 = vpack.c.bf16 %v3020_v23, %v3019_v53  ;;  %15678 = vlog2.f32 %v2772_v34  ;;  %v19526_v37 = vpop.eup %15670  ;;  %v2762_v56 = vsel %vm19483_vm4, %v2759_v33, %v2756_v39  ;;  %v2632_v52 = vsub.f32 0.0, %v2608_v45 }
 0x37e   : > { %v19522_v22 = vpop.f32.mrb[91].mxu0  ;;  %15680 = vpow2.f32 %v2667_v27  ;;  %v2914_v16 = vadd.f32 %v2762_v56, %v2578_v44  ;;  %v2776_v26 = vadd.f32 1.0, %v2775_v13  ;;  %v2781_v20 = vadd.f32 1.0, %v19526_v37 }
 0x37f   : > { %3137 = vst [vmem:[#allocation2 + $0x10] sm:$0xff] %v14809_v21  ;;  %v19539_v15 = vpop.eup %15672  ;;  %v2784_v14 = vmul.f32 -0.5, %v19526_v37  ;;  %v2669_v12 = vmul.f32 1.442695, %v2632_v52  ;;  %v2503_v34 = vadd.f32 %v19419_v28, %v2350_v6  ;;  %vm19548_vm5 = vcmp.lt.f32.partialorder %v2769_v49, 0.0004427343 }
 0x380   : > { %v19531_v58 = vpop.f32.mrb[88].mxu1  ;;  %15682 = vtanh.f32 %v2914_v16  ;;  %v2790_v23 = vadd.f32 1.0, %v19539_v15  ;;  %v2352_v13 = vadd.f32 %v19454_v3, %v19230_v55  ;;  %v2768_v28 = vmul.f32 %v19469_v51, %v2767_v11 }
 0x381   : > { %v19537_v53 = vpop.f32.mrb[89].mxu1  ;;  %v15675_v45 = vpop.eup %15674  ;;  %vm19560_vm6 = vcmp.lt.f32.partialorder %v2778_v2, 0.0004427343  ;;  %15684 = vlog2.f32 %v2781_v20  ;;  %v19565_v49 = vmax.f32 %v19477_v48, %v2503_v34  ;;  %v2777_v52 = vmul.f32 %v15667_v4, %v2776_v26 }
 0x382   : > { %v19544_v24 = vpop.f32.mrb[90].mxu1  ;;  %v2765_v56 = vmul.f32 0.6931472, %v15675_v45  ;;  %v2787_v3 = vand.u32 2147483647, %v19526_v37  ;;  %15686 = vlog2.f32 %v2790_v23  ;;  %v2785_v36 = vadd.f32 1.0, %v2784_v14 }
 0x383   : > { %v19546_v40 = vpop.f32.mrb[92].mxu0  ;;  %v19555_v27 = vpop.f32.mrb[91].mxu1  ;;  %v2793_v51 = vmul.f32 -0.5, %v19539_v15  ;;  %15688 = vpow2.f32 %v2669_v12  ;;  %v2609_v11 = vand.u32 2147483647, %v19565_v49  ;;  %v2505_v20 = vadd.f32 %v19427_v7, %v2352_v13 }
 0x384   : > { %v19557_v39 = vpop.f32.mrb[93].mxu0  ;;  %v2771_v2 = vsel %vm19548_vm5, %v2768_v28, %v2765_v56  ;;  %v2796_v48 = vand.u32 2147483647, %v19539_v15  ;;  %v2356_v4 = vadd.f32 %v19488_v59, %v19228_v47  ;;  %v2358_v12 = vadd.f32 %v19492_v54, %v19230_v55 }
 0x385   : > { %v19567_v21 = vpop.f32.mrb[94].mxu0  ;;  %v2915_v34 = vadd.f32 %v2771_v2, %v2579_v46  ;;  %v2633_v14 = vsub.f32 0.0, %v2609_v11  ;;  %v2360_v23 = vadd.f32 %v19496_v63, %v19228_v47  ;;  %v19589_v7 = vmax.f32 %v2501_v61, %v2505_v20 }
 0x386   : > { %v19570_v16 = vpop.f32.mrb[95].mxu0  ;;  %v15677_v26 = vpop.eup %15676  ;;  %v2509_v59 = vadd.f32 %v19450_v29, %v2356_v4  ;;  %v2362_v13 = vadd.f32 %v19506_v8, %v19230_v55  ;;  %v2511_v63 = vadd.f32 %v19456_v42, %v2358_v12  ;;  %vm19603_vm7 = vcmp.lt.f32.partialorder %v2787_v3, 0.0004427343 }
 0x387   : > { %v15679_v45 = vpop.eup %15678  ;;  %v2961_v28 = vmul.f32 %v15677_v26, %v19307_v62  ;;  %15690 = vtanh.f32 %v2915_v34  ;;  %v2671_v11 = vmul.f32 1.442695, %v2633_v14  ;;  %v2794_v29 = vadd.f32 1.0, %v2793_v51 }
 0x388   : > { %v19586_v44 = vpop.f32.mrb[92].mxu1  ;;  %v19596_v56 = vpop.eup %15680  ;;  %v2774_v54 = vmul.f32 0.6931472, %v15679_v45  ;;  %v2786_v26 = vmul.f32 %v19526_v37, %v2785_v36  ;;  %v2610_v3 = vand.u32 2147483647, %v19589_v7  ;;  %v21703_v62 = vmax.f32 %v19435_v41, 0.0 }
 0x389   : > { %v19594_v46 = vpop.f32.mrb[93].mxu1  ;;  %v2799_v61 = vadd.f32 1.0, %v19596_v56  ;;  %15692 = vpow2.f32 %v2671_v11  ;;  %v3021_v51 = vmul.f32 %v2997_v32, %v2961_v28  ;;  %vm19623_vm8 = vcmp.lt.f32.partialorder %v2796_v48, 0.0004427343 }
 0x38a   : > { %v19599_v2 = vpop.f32.mrb[94].mxu1  ;;  %v2780_v42 = vsel %vm19560_vm6, %v2777_v52, %v2774_v54  ;;  %v15683_v14 = vpop.eup %15682  ;;  %v2634_v52 = vsub.f32 0.0, %v2610_v3  ;;  %v2513_v54 = vadd.f32 %v19459_v5, %v2360_v23  ;;  %v2515_v11 = vadd.f32 %v19466_v1, %v2362_v13 }
 0x38b   : > { %v19601_v0 = vpop.f32.mrb[96].mxu0  ;;  %v19609_v20 = vpop.f32.mrb[95].mxu1  ;;  %v2916_v12 = vadd.f32 %v2780_v42, %v2580_v50  ;;  %15694 = vlog2.f32 %v2799_v61  ;;  %v2962_v37 = vmul.f32 %v15683_v14, %v19322_v10  ;;  %v2795_v50 = vmul.f32 %v19539_v15, %v2794_v29 }
 0x38c   : > { %v19611_v4 = vpop.f32.mrb[97].mxu0  ;;  %v15685_v36 = vpop.eup %15684  ;;  %v2802_v48 = vmul.f32 -0.5, %v19596_v56  ;;  %v21701_v61 = vunpack.c.h.bf16 %v19299_v57  ;;  %v2673_v35 = vmul.f32 1.442695, %v2634_v52  ;;  %v19638_v10 = vmax.f32 %v2509_v59, %v2513_v54 }
 0x38d   : > { %v19617_v34 = vpop.f32.mrb[98].mxu0  ;;  %v15687_v8 = vpop.eup %15686  ;;  %15696 = vtanh.f32 %v2916_v12  ;;  %v2783_v32 = vmul.f32 0.6931472, %v15685_v36  ;;  %v2805_v1 = vand.u32 2147483647, %v19596_v56  ;;  %v2366_v23 = vadd.f32 %v19531_v58, %v19228_v47 }
 0x38e   : > { %v19627_v6 = vpop.f32.mrb[99].mxu0  ;;  %v19634_v28 = vpop.eup %15688  ;;  %v3022_v42 = vmul.f32 %v21701_v61, %v2962_v37  ;;  %v2792_v33 = vmul.f32 0.6931472, %v15687_v8  ;;  %v21702_v29 = vmax.f32 %v19425_v18, 0.0  ;;  %15698 = vpow2.f32 %v2673_v35 }
 0x38f   : > { %v2789_v5 = vsel %vm19603_vm7, %v2786_v26, %v2783_v32  ;;  %v2808_v15 = vadd.f32 1.0, %v19634_v28  ;;  %v2803_v12 = vadd.f32 1.0, %v2802_v48  ;;  %v2811_v36 = vmul.f32 -0.5, %v19634_v28 }
 0x390   : > { %v19640_v3 = vpop.f32.mrb[96].mxu1  ;;  %v14810_v57 = vpack.c.bf16 %v3022_v42, %v3021_v51  ;;  %v2917_v8 = vadd.f32 %v2789_v5, %v21702_v29  ;;  %v2798_v59 = vsel %vm19623_vm8, %v2795_v50, %v2792_v33  ;;  %v2583_v51 = vmax.f32 %v19474_v60, 0.0 }
 0x391   : > { %v19648_v13 = vpop.f32.mrb[97].mxu1  ;;  %v2918_v26 = vadd.f32 %v2798_v59, %v21703_v62  ;;  %15700 = vlog2.f32 %v2808_v15  ;;  %v15691_v37 = vpop.eup %15690  ;;  %v2611_v45 = vand.u32 2147483647, %v19638_v10  ;;  %v19663_v33 = vmax.f32 %v2511_v63, %v2515_v11 }
 0x392   : > { %v19654_v14 = vpop.f32.mrb[98].mxu1  ;;  %3138 = vst [vmem:[#allocation2 + $0x18] sm:$0xff] %v14810_v57  ;;  %15702 = vtanh.f32 %v2917_v8  ;;  %v2963_v35 = vmul.f32 %v15691_v37, %v19364_v31  ;;  %v2584_v52 = vmax.f32 %v19504_v17, 0.0  ;;  %v2519_v54 = vadd.f32 %v19498_v38, %v2366_v23 }
 0x393   : > { %v19659_v58 = vpop.f32.mrb[99].mxu1  ;;  %15704 = vtanh.f32 %v2918_v26  ;;  %v15693_v32 = vpop.eup %15692  ;;  %v2585_v50 = vmax.f32 %v19565_v49, 0.0  ;;  %v2635_v48 = vsub.f32 0.0, %v2611_v45  ;;  %v2612_v61 = vand.u32 2147483647, %v19663_v33 }
 0x394   : > { %v2368_v42 = vadd.f32 %v19537_v53, %v19230_v55  ;;  %v2804_v63 = vmul.f32 %v19596_v56, %v2803_v12  ;;  %vm19673_vm9 = vcmp.lt.f32.partialorder %v2805_v1, 0.0004427343  ;;  %v2812_v31 = vadd.f32 1.0, %v2811_v36 }
 0x395   : > { %v15695_v5 = vpop.eup %15694  ;;  %v2817_v15 = vadd.f32 1.0, %v15693_v32  ;;  %v2675_v38 = vmul.f32 1.442695, %v2635_v48  ;;  %v2636_v23 = vsub.f32 0.0, %v2612_v61  ;;  %v21706_v59 = vunpack.c.l.bf16 %v19315_v30 }
 0x396   : > { %v2801_v57 = vmul.f32 0.6931472, %v15695_v5  ;;  %v2521_v29 = vadd.f32 %v19508_v25, %v2368_v42  ;;  %v2814_v53 = vand.u32 2147483647, %v19634_v28  ;;  %v2370_v56 = vadd.f32 %v19544_v24, %v19228_v47 }
 0x397   : > { %v15697_v8 = vpop.eup %15696  ;;  %v3023_v62 = vmul.f32 %v21706_v59, %v2963_v35  ;;  %15706 = vlog2.f32 %v2817_v15  ;;  %v2677_v12 = vmul.f32 1.442695, %v2636_v23  ;;  %v2820_v37 = vmul.f32 -0.5, %v15693_v32 }
 0x398   : > { %v2964_v1 = vmul.f32 %v15697_v8, %v19373_v9  ;;  %v2807_v26 = vsel %vm19673_vm9, %v2804_v63, %v2801_v57  ;;  %15708 = vpow2.f32 %v2675_v38  ;;  %v2523_v25 = vadd.f32 %v19516_v19, %v2370_v56  ;;  %v19689_v35 = vpop.eup %15698 }
 0x399   : > { %v2919_v36 = vadd.f32 %v2807_v26, %v2583_v51  ;;  %v2372_v45 = vadd.f32 %v19555_v27, %v19230_v55  ;;  %v21707_v48 = vunpack.c.h.bf16 %v19315_v30  ;;  %v2813_v24 = vmul.f32 %v19634_v28, %v2812_v31 }
 0x39a   : > { %v2823_v9 = vand.u32 2147483647, %v15693_v32  ;;  %15710 = vpow2.f32 %v2677_v12  ;;  %v2826_v5 = vadd.f32 1.0, %v19689_v35  ;;  %v2376_v51 = vadd.f32 %v19586_v44, %v19228_v47 }
 0x39b   : > { %v3024_v61 = vmul.f32 %v21707_v48, %v2964_v1  ;;  %v15701_v42 = vpop.eup %15700  ;;  %15712 = vtanh.f32 %v2919_v36  ;;  %v2378_v19 = vadd.f32 %v19594_v46, %v19230_v55  ;;  %v19699_v15 = vmax.f32 %v2519_v54, %v2523_v25 }
 0x39c   : > { %v15703_v27 = vpop.eup %15702  ;;  %v2810_v11 = vmul.f32 0.6931472, %v15701_v42  ;;  %v2525_v30 = vadd.f32 %v19522_v22, %v2372_v45  ;;  %vm2815_vm10 = vcmp.lt.f32.partialorder %v2814_v53, 0.0004427343  ;;  %v2821_v57 = vadd.f32 1.0, %v2820_v37 }
 0x39d   : > { %v14811_v63 = vpack.c.bf16 %v3024_v61, %v3023_v62  ;;  %v15705_v28 = vpop.eup %15704  ;;  %v2965_v31 = vmul.f32 %v15703_v27, %v19425_v18  ;;  %15714 = vlog2.f32 %v2826_v5  ;;  %vm19704_vm11 = vcmp.lt.f32.partialorder %v2823_v9, 0.0004427343 }
 0x39e   : > { %v2966_v38 = vmul.f32 %v15705_v28, %v19435_v41  ;;  %v2816_v44 = vsel %vm2815_vm10, %v2813_v24, %v2810_v11  ;;  %v2613_v46 = vand.u32 2147483647, %v19699_v15  ;;  %v21710_v54 = vunpack.c.l.bf16 %v19409_v43 }
 0x39f   : > { %3139 = vst [vmem:[#allocation2 + $0x20] sm:$0xff] %v14811_v63  ;;  %v2920_v22 = vadd.f32 %v2816_v44, %v2584_v52  ;;  %v2829_v59 = vmul.f32 -0.5, %v19689_v35  ;;  %v19712_v18 = vmax.f32 %v2521_v29, %v2525_v30  ;;  %v21711_v62 = vunpack.c.h.bf16 %v19409_v43 }
 0x3a0   : > { %v3025_v8 = vmul.f32 %v21710_v54, %v2965_v31  ;;  %v2637_v56 = vsub.f32 0.0, %v2613_v46  ;;  %v2529_v41 = vadd.f32 %v19546_v40, %v2376_v51  ;;  %v2531_v1 = vadd.f32 %v19557_v39, %v2378_v19  ;;  %v2985_v40 = vld [vmem:[%s21680_s29 + $0x30] sm:$0xff] }
 0x3a1   : > { %v3026_v53 = vmul.f32 %v21711_v62, %v2966_v38  ;;  %v15707_v26 = vpop.eup %15706  ;;  %15716 = vtanh.f32 %v2920_v22  ;;  %v2822_v12 = vmul.f32 %v15693_v32, %v2821_v57  ;;  %v2614_v36 = vand.u32 2147483647, %v19712_v18 }
 0x3a2   : > { %v2380_v52 = vadd.f32 %v19599_v2, %v19228_v47  ;;  %v19721_v37 = vpop.eup %15708  ;;  %v2819_v25 = vmul.f32 0.6931472, %v15707_v26  ;;  %v2679_v45 = vmul.f32 1.442695, %v2637_v56  ;;  %v2382_v43 = vadd.f32 %v19609_v20, %v19230_v55 }
 0x3a3   : > { %v14812_v29 = vpack.c.bf16 %v3026_v53, %v3025_v8  ;;  %v2830_v39 = vadd.f32 1.0, %v2829_v59  ;;  %v2832_v32 = vand.u32 2147483647, %v19689_v35  ;;  %v2835_v48 = vadd.f32 1.0, %v19721_v37 }
 0x3a4   : > { %v2638_v61 = vsub.f32 0.0, %v2614_v36  ;;  %v19730_v24 = vpop.eup %15710  ;;  %v2825_v2 = vsel %vm19704_vm11, %v2822_v12, %v2819_v25  ;;  %15718 = vpow2.f32 %v2679_v45  ;;  %v2533_v9 = vadd.f32 %v19567_v21, %v2380_v52 }
 0x3a5   : > { %3140 = vst [vmem:[#allocation2 + $0x28] sm:$0xff] %v14812_v29  ;;  %v2535_v20 = vadd.f32 %v19570_v16, %v2382_v43  ;;  %v15713_v42 = vpop.eup %15712  ;;  %v2921_v5 = vadd.f32 %v2825_v2, %v2585_v50  ;;  %15720 = vlog2.f32 %v2835_v48  ;;  %v2838_v51 = vmul.f32 -0.5, %v19721_v37 }
 0x3a6   : > { %v3003_v19 = vunpack.c.l.bf16 %v2985_v40  ;;  %v3004_v27 = vunpack.c.h.bf16 %v2985_v40  ;;  %v2586_v63 = vmax.f32 %v19589_v7, 0.0  ;;  %v2844_v11 = vadd.f32 1.0, %v19730_v24 }
 0x3a7   : > { %v15715_v30 = vpop.eup %15714  ;;  %15722 = vtanh.f32 %v2921_v5  ;;  %vm19741_vm12 = vcmp.lt.f32.partialorder %v2832_v32, 0.0004427343  ;;  %v2681_v21 = vmul.f32 1.442695, %v2638_v61  ;;  %v19745_v16 = vmax.f32 %v2529_v41, %v2533_v9 }
 0x3a8   : > { %v2967_v50 = vmul.f32 %v15713_v42, %v19474_v60  ;;  %v2828_v31 = vmul.f32 0.6931472, %v15715_v30  ;;  %v2831_v57 = vmul.f32 %v19689_v35, %v2830_v39  ;;  %15724 = vlog2.f32 %v2844_v11 }
 0x3a9   : > { %v2839_v38 = vadd.f32 1.0, %v2838_v51  ;;  %v2841_v44 = vand.u32 2147483647, %v19721_v37  ;;  %15726 = vpow2.f32 %v2681_v21  ;;  %v2615_v23 = vand.u32 2147483647, %v19745_v16 }
 0x3aa   : > { %v2834_v46 = vsel %vm19741_vm12, %v2831_v57, %v2828_v31  ;;  %v2847_v54 = vmul.f32 -0.5, %v19730_v24  ;;  %v19754_v8 = vmax.f32 %v2531_v1, %v2535_v20  ;;  %v2386_v60 = vadd.f32 %v19640_v3, %v19228_v47 }
 0x3ab   : > { %v15717_v22 = vpop.eup %15716  ;;  %v2922_v59 = vadd.f32 %v2834_v46, %v2586_v63  ;;  %v2639_v35 = vsub.f32 0.0, %v2615_v23  ;;  %v2388_v62 = vadd.f32 %v19648_v13, %v19230_v55  ;;  %v2390_v53 = vadd.f32 %v19654_v14, %v19228_v47 }
 0x3ac   : > { %v3027_v56 = vmul.f32 %v3003_v19, %v2967_v50  ;;  %v2968_v41 = vmul.f32 %v15717_v22, %v19504_v17  ;;  %v2616_v26 = vand.u32 2147483647, %v19754_v8  ;;  %v2539_v1 = vadd.f32 %v19601_v0, %v2386_v60  ;;  %v2986_v0 = vld [vmem:[%s21680_s29 + $0x38] sm:$0xff] }
 0x3ad   : > { %15728 = vtanh.f32 %v2922_v59  ;;  %v2683_v12 = vmul.f32 1.442695, %v2639_v35  ;;  %v2541_v3 = vadd.f32 %v19611_v4, %v2388_v62  ;;  %v2543_v36 = vadd.f32 %v19617_v34, %v2390_v53 }
 0x3ae   : > { %v19767_v52 = vpop.eup %15718  ;;  %v3028_v29 = vmul.f32 %v3004_v27, %v2968_v41  ;;  %v2850_v13 = vand.u32 2147483647, %v19730_v24  ;;  %v2640_v25 = vsub.f32 0.0, %v2616_v26  ;;  %v2392_v47 = vadd.f32 %v19659_v58, %v19230_v55 }
 0x3af   : > { %v15721_v17 = vpop.eup %15720  ;;  %v2840_v14 = vmul.f32 %v19721_v37, %v2839_v38  ;;  %v2848_v45 = vadd.f32 1.0, %v2847_v54  ;;  %v2853_v4 = vadd.f32 1.0, %v19767_v52  ;;  %15730 = vpow2.f32 %v2683_v12 }
 0x3b0   : > { %v14813_v34 = vpack.c.bf16 %v3028_v29, %v3027_v56  ;;  %v2837_v43 = vmul.f32 0.6931472, %v15721_v17  ;;  %v2685_v40 = vmul.f32 1.442695, %v2640_v25  ;;  %v19777_v39 = vmax.f32 %v2539_v1, %v2543_v36  ;;  %v2987_v56 = vld [vmem:[%s21680_s29 + $0x40] sm:$0xff] }
 0x3b1   : > { %v15723_v32 = vpop.eup %15722  ;;  %v2587_v48 = vmax.f32 %v19638_v10, 0.0  ;;  %vm2842_vm13 = vcmp.lt.f32.partialorder %v2841_v44, 0.0004427343  ;;  %15732 = vlog2.f32 %v2853_v4  ;;  %v2545_v55 = vadd.f32 %v19627_v6, %v2392_v47 }
 0x3b2   : > { %v15725_v58 = vpop.eup %15724  ;;  %3141 = vst [vmem:[#allocation2 + $0x30] sm:$0xff] %v14813_v34  ;;  %v3005_v61 = vunpack.c.l.bf16 %v2986_v0  ;;  %v2843_v37 = vsel %vm2842_vm13, %v2840_v14, %v2837_v43  ;;  %v2588_v2 = vmax.f32 %v19663_v33, 0.0  ;;  %15734 = vpow2.f32 %v2685_v40 }
 0x3b3   : > { %v15727_v9 = vpop.eup %15726  ;;  %v2923_v20 = vadd.f32 %v2843_v37, %v2587_v48  ;;  %v2846_v42 = vmul.f32 0.6931472, %v15725_v58  ;;  %v2849_v5 = vmul.f32 %v19730_v24, %v2848_v45  ;;  %v2617_v51 = vand.u32 2147483647, %v19777_v39 }
 0x3b4   : > { %v2969_v19 = vmul.f32 %v15723_v32, %v19565_v49  ;;  %vm2851_vm14 = vcmp.lt.f32.partialorder %v2850_v13, 0.0004427343  ;;  %v2856_v27 = vmul.f32 -0.5, %v19767_v52  ;;  %v2862_v6 = vadd.f32 1.0, %v15727_v9 }
 0x3b5   : > { %15736 = vtanh.f32 %v2923_v20  ;;  %v2852_v63 = vsel %vm2851_vm14, %v2849_v5, %v2846_v42  ;;  %v2641_v11 = vsub.f32 0.0, %v2617_v51  ;;  %v19786_v30 = vmax.f32 %v2541_v3, %v2545_v55 }
 0x3b6   : > { %v3006_v28 = vunpack.c.h.bf16 %v2986_v0  ;;  %v2924_v21 = vadd.f32 %v2852_v63, %v2588_v2  ;;  %15738 = vlog2.f32 %v2862_v6  ;;  %v3029_v57 = vmul.f32 %v3005_v61, %v2969_v19 }
 0x3b7   : > { %v15729_v50 = vpop.eup %15728  ;;  %v2687_v31 = vmul.f32 1.442695, %v2641_v11  ;;  %v2618_v24 = vand.u32 2147483647, %v19786_v30  ;;  %v2857_v49 = vadd.f32 1.0, %v2856_v27  ;;  %v2865_v46 = vmul.f32 -0.5, %v15727_v9 }
 0x3b8   : > { %v2970_v38 = vmul.f32 %v15729_v50, %v19589_v7  ;;  %15740 = vtanh.f32 %v2924_v21  ;;  %v2859_v23 = vand.u32 2147483647, %v19767_v52  ;;  %v2589_v26 = vmax.f32 %v19699_v15, 0.0 }
 0x3b9   : > { %v15731_v44 = vpop.eup %15730  ;;  %15742 = vpow2.f32 %v2687_v31  ;;  %v2642_v54 = vsub.f32 0.0, %v2618_v24  ;;  %v2858_v7 = vmul.f32 %v19767_v52, %v2857_v49  ;;  %v2866_v1 = vadd.f32 1.0, %v2865_v46 }
 0x3ba   : > { %v3030_v60 = vmul.f32 %v3006_v28, %v2970_v38  ;;  %v2871_v22 = vadd.f32 1.0, %v15731_v44  ;;  %vm2860_vm15 = vcmp.lt.f32.partialorder %v2859_v23, 0.0004427343  ;;  %v2868_v36 = vand.u32 2147483647, %v15727_v9  ;;  %v2988_v28 = vld [vmem:[%s21680_s29 + $0x48] sm:$0xff] }
 0x3bb   : > { %v15733_v59 = vpop.eup %15732  ;;  %v2689_v35 = vmul.f32 1.442695, %v2642_v54  ;;  %v3007_v13 = vunpack.c.l.bf16 %v2987_v56  ;;  %v2874_v47 = vmul.f32 -0.5, %v15731_v44  ;;  %v3008_v14 = vunpack.c.h.bf16 %v2987_v56 }
 0x3bc   : > { %v15735_v62 = vpop.eup %15734  ;;  %v14814_v53 = vpack.c.bf16 %v3030_v60, %v3029_v57  ;;  %v2855_v41 = vmul.f32 0.6931472, %v15733_v59  ;;  %15744 = vlog2.f32 %v2871_v22  ;;  %v2867_v45 = vmul.f32 %v15727_v9, %v2866_v1 }
 0x3bd   : > { %v2880_v12 = vadd.f32 1.0, %v15735_v62  ;;  %15746 = vpow2.f32 %v2689_v35  ;;  %v2590_v34 = vmax.f32 %v19712_v18, 0.0  ;;  %vm2869_vm0 = vcmp.lt.f32.partialorder %v2868_v36, 0.0004427343 }
 0x3be   : > { %3142 = vst [vmem:[#allocation2 + $0x38] sm:$0xff] %v14814_v53  ;;  %v2861_v3 = vsel %vm2860_vm15, %v2858_v7, %v2855_v41  ;;  %v2883_v43 = vmul.f32 -0.5, %v15735_v62  ;;  %v2875_v58 = vadd.f32 1.0, %v2874_v47  ;;  %v2877_v37 = vand.u32 2147483647, %v15731_v44 }
 0x3bf   : > { %v15737_v29 = vpop.eup %15736  ;;  %v2925_v25 = vadd.f32 %v2861_v3, %v2589_v26  ;;  %15748 = vlog2.f32 %v2880_v12  ;;  %v2886_v5 = vand.u32 2147483647, %v15735_v62  ;;  %v2591_v6 = vmax.f32 %v19745_v16, 0.0 }
 0x3c0   : > { %v15739_v17 = vpop.eup %15738  ;;  %v2971_v0 = vmul.f32 %v15737_v29, %v19638_v10  ;;  %v2884_v42 = vadd.f32 1.0, %v2883_v43  ;;  %v2876_v19 = vmul.f32 %v15731_v44, %v2875_v58  ;;  %vm2878_vm1 = vcmp.lt.f32.partialorder %v2877_v37, 0.0004427343  ;;  %v2990_v58 = vld [vmem:[%s21680_s29 + $0x58] sm:$0xff] }
 0x3c1   : > { %15750 = vtanh.f32 %v2925_v25  ;;  %v2864_v52 = vmul.f32 0.6931472, %v15739_v17  ;;  %v2592_v38 = vmax.f32 %v19754_v8, 0.0  ;;  %vm2887_vm2 = vcmp.lt.f32.partialorder %v2886_v5, 0.0004427343 }
 0x3c2   : > { %v15741_v4 = vpop.eup %15740  ;;  %v3031_v32 = vmul.f32 %v3007_v13, %v2971_v0  ;;  %v2885_v31 = vmul.f32 %v15735_v62, %v2884_v42  ;;  %v3009_v23 = vunpack.c.l.bf16 %v2988_v28  ;;  %v3010_v22 = vunpack.c.h.bf16 %v2988_v28 }
 0x3c3   : > { %v15743_v40 = vpop.eup %15742  ;;  %v2972_v48 = vmul.f32 %v15741_v4, %v19663_v33  ;;  %v2870_v55 = vsel %vm2869_vm0, %v2867_v45, %v2864_v52  ;;  %v2593_v12 = vmax.f32 %v19777_v39, 0.0  ;;  %v2594_v52 = vmax.f32 %v19786_v30, 0.0 }
 0x3c4   : > { %v2926_v61 = vadd.f32 %v2870_v55, %v2590_v34  ;;  %v2889_v2 = vadd.f32 1.0, %v15743_v40  ;;  %v2892_v24 = vmul.f32 -0.5, %v15743_v40  ;;  %v2895_v59 = vand.u32 2147483647, %v15743_v40 }
 0x3c5   : > { %v3032_v20 = vmul.f32 %v3008_v14, %v2972_v48  ;;  %v3013_v37 = vunpack.c.l.bf16 %v2990_v58 }
 0x3c6   : > { %v15745_v10 = vpop.eup %15744  ;;  %15752 = vtanh.f32 %v2926_v61  ;;  %v2893_v54 = vadd.f32 1.0, %v2892_v24  ;;  %vm2896_vm3 = vcmp.lt.f32.partialorder %v2895_v59, 0.0004427343 }
 0x3c7   : > { %v14815_v9 = vpack.c.bf16 %v3032_v20, %v3031_v32  ;;  %v2873_v51 = vmul.f32 0.6931472, %v15745_v10  ;;  %15754 = vlog2.f32 %v2889_v2  ;;  %v15747_v27 = vpop.eup %15746  ;;  %v3014_v2 = vunpack.c.h.bf16 %v2990_v58 }
 0x3c8   : > { %v2898_v11 = vadd.f32 1.0, %v15747_v27  ;;  %v2901_v60 = vmul.f32 -0.5, %v15747_v27  ;;  %v2894_v7 = vmul.f32 %v15743_v40, %v2893_v54  ;;  %v2904_v3 = vand.u32 2147483647, %v15747_v27 }
 0x3c9   : > { %v15749_v63 = vpop.eup %15748  ;;  %3143 = vst [vmem:[#allocation2 + $0x40] sm:$0xff] %v14815_v9  ;;  %v2879_v33 = vsel %vm2878_vm1, %v2876_v19, %v2873_v51 }
 0x3ca   : > { %v2927_v21 = vadd.f32 %v2879_v33, %v2591_v6  ;;  %v2882_v50 = vmul.f32 0.6931472, %v15749_v63  ;;  %15756 = vlog2.f32 %v2898_v11  ;;  %v2902_v26 = vadd.f32 1.0, %v2901_v60 }
 0x3cb   : > { %v15751_v57 = vpop.eup %15750  ;;  %vm2905_vm4 = vcmp.lt.f32.partialorder %v2904_v3, 0.0004427343 }
 0x3cc   : > { %15758 = vtanh.f32 %v2927_v21  ;;  %v2888_v49 = vsel %vm2887_vm2, %v2885_v31, %v2882_v50  ;;  %v2973_v44 = vmul.f32 %v15751_v57, %v19699_v15  ;;  %v2989_v15 = vld [vmem:[%s21680_s29 + $0x50] sm:$0xff] }
 0x3cd   : > { %v2928_v46 = vadd.f32 %v2888_v49, %v2592_v38  ;;  %v3011_v17 = vunpack.c.l.bf16 %v2989_v15  ;;  %v3012_v45 = vunpack.c.h.bf16 %v2989_v15 }
 0x3ce   : > { %v3033_v62 = vmul.f32 %v3009_v23, %v2973_v44 }
 0x3cf   : > { %15760 = vtanh.f32 %v2928_v46 }
 0x3d0   : > { %v15753_v35 = vpop.eup %15752 }
 0x3d1   : > { %v15755_v53 = vpop.eup %15754  ;;  %v2974_v56 = vmul.f32 %v15753_v35, %v19712_v18  ;;  %v2903_v18 = vmul.f32 %v15747_v27, %v2902_v26 }
 0x3d2   : > { %v2891_v41 = vmul.f32 0.6931472, %v15755_v53 }
 0x3d3   : > { %v3034_v1 = vmul.f32 %v3010_v22, %v2974_v56 }
 0x3d4   : > { %v2897_v36 = vsel %vm2896_vm3, %v2894_v7, %v2891_v41  ;;  %v15757_v29 = vpop.eup %15756 }
 0x3d5   : > { %v14816_v13 = vpack.c.bf16 %v3034_v1, %v3033_v62  ;;  %v2929_v25 = vadd.f32 %v2897_v36, %v2593_v12  ;;  %v2900_v0 = vmul.f32 0.6931472, %v15757_v29 }
 0x3d6   : > { %v15759_v47 = vpop.eup %15758 }
 0x3d7   : > { %3144 = vst [vmem:[#allocation2 + $0x48] sm:$0xff] %v14816_v13  ;;  %v2975_v14 = vmul.f32 %v15759_v47, %v19745_v16  ;;  %15762 = vtanh.f32 %v2929_v25  ;;  %v2906_v4 = vsel %vm2905_vm4, %v2903_v18, %v2900_v0 }
 0x3d8   : > { %v2930_v43 = vadd.f32 %v2906_v4, %v2594_v52 }
 0x3d9   : > { %v15761_v34 = vpop.eup %15760  ;;  %v3035_v40 = vmul.f32 %v3011_v17, %v2975_v14 }
 0x3da   : > { %v2976_v32 = vmul.f32 %v15761_v34, %v19754_v8  ;;  %15764 = vtanh.f32 %v2930_v43 }
 0x3dc   : > { %v3036_v48 = vmul.f32 %v3012_v45, %v2976_v32 }
 0x3de   : > { %v14817_v55 = vpack.c.bf16 %v3036_v48, %v3035_v40 }
 0x3e0   : > { %3145 = vst [vmem:[#allocation2 + $0x50] sm:$0xff] %v14817_v55 }
 0x3e1   : > { %v15763_v16 = vpop.eup %15762 }
 0x3e2   : > { %v2977_v61 = vmul.f32 %v15763_v16, %v19777_v39 }
 0x3e4   : > { %v15765_v20 = vpop.eup %15764  ;;  %v3037_v10 = vmul.f32 %v3013_v37, %v2977_v61 }
 0x3e5   : > { %v2978_v42 = vmul.f32 %v15765_v20, %v19786_v30 }
 0x3e7   : > { %v3038_v5 = vmul.f32 %v3014_v2, %v2978_v42 }
 0x3e9   : > { %v14818_v9 = vpack.c.bf16 %v3038_v5, %v3037_v10 }
 0x3eb   : > { %3146 = vst [vmem:[#allocation2 + $0x58] sm:$0xff] %v14818_v9 }
 0x3ec PF: > { %v15767_v8 = vld [vmem:[%s18238_s7 + $0x304] ss:$24 sps:$4 sm:$0xff]   ;;  %v15771_v30 = vld [vmem:[%s18238_s7 + $0x300] ss:$24 sps:$4 sm:$0xff]   ;;  %v15773_v19 = vld [vmem:[%s18238_s7 + $0x334] ss:$24 sps:$4 sm:$0xff]  }
 0x3ed   : > { %v15769_v39 = vld [vmem:[%s18238_s7 + $0x30c] ss:$24 sps:$4 sm:$0xff]   ;;  %3830 = vmatprep.subr.bf16.mxu0 %v15767_v8  ;;  %v15772_v51 = vld [vmem:[%s18238_s7 + $0x308] ss:$24 sps:$4 sm:$0xff]   ;;  %v15775_v27 = vld [vmem:[%s18238_s7 + $0x33c] ss:$24 sps:$4 sm:$0xff]  }
 0x3ee   : > { %3871 = vmatprep.subr.bf16.mxu1 %v15769_v39  ;;  %3831 = vmatpush1.bf16.msra.mxu0 %v15771_v30  ;;  %v15777_v6 = vld [vmem:[%s18238_s7 + $0x330] ss:$24 sps:$4 sm:$0xff]   ;;  %v15779_v33 = vld [vmem:[%s18238_s7 + $0x364] ss:$24 sps:$4 sm:$0xff]   ;;  %v15783_v28 = vld [vmem:[%s18238_s7 + $0x360] ss:$24 sps:$4 sm:$0xff]  }
 0x3ef   : > { %3872 = vmatpush1.bf16.msra.mxu1 %v15772_v51  ;;  %3832 = vmatprep.subr.bf16.mxu0 %v15773_v19  ;;  %v15778_v63 = vld [vmem:[%s18238_s7 + $0x338] ss:$24 sps:$4 sm:$0xff]   ;;  %v15781_v11 = vld [vmem:[%s18238_s7 + $0x36c] ss:$24 sps:$4 sm:$0xff]   ;;  %v15784_v21 = vld [vmem:[%s18238_s7 + $0x368] ss:$24 sps:$4 sm:$0xff]  }
 0x3f0   : > { %3873 = vmatprep.subr.bf16.mxu1 %v15775_v27  ;;  %v15785_v50 = vld [vmem:[%s18238_s7 + $0x394] ss:$24 sps:$4 sm:$0xff]   ;;  %v15789_v24 = vld [vmem:[%s18238_s7 + $0x390] ss:$24 sps:$4 sm:$0xff]   ;;  %v15791_v38 = vld [vmem:[%s18238_s7 + $0x3c4] ss:$24 sps:$4 sm:$0xff]  }
 0x3f1   : > { %v15787_v31 = vld [vmem:[%s18238_s7 + $0x39c] ss:$24 sps:$4 sm:$0xff]   ;;  %v15790_v57 = vld [vmem:[%s18238_s7 + $0x398] ss:$24 sps:$4 sm:$0xff]   ;;  %v15793_v49 = vld [vmem:[%s18238_s7 + $0x3cc] ss:$24 sps:$4 sm:$0xff]  }
 0x3f2   : > { %3833 = vmatpush1.bf16.msra.mxu0 %v15777_v6  ;;  %v15795_v44 = vld [vmem:[%s18238_s7 + $0x3c0] ss:$24 sps:$4 sm:$0xff]   ;;  %v15797_v46 = vld [vmem:[%s18238_s7 + $0x3f4] ss:$24 sps:$4 sm:$0xff]   ;;  %v15801_v60 = vld [vmem:[%s18238_s7 + $0x3f0] ss:$24 sps:$4 sm:$0xff]  }
 0x3f3   : > { %3874 = vmatpush1.bf16.msra.mxu1 %v15778_v63  ;;  %3834 = vmatprep.subr.bf16.mxu0 %v15779_v33  ;;  %v15796_v23 = vld [vmem:[%s18238_s7 + $0x3c8] ss:$24 sps:$4 sm:$0xff]   ;;  %v15799_v54 = vld [vmem:[%s18238_s7 + $0x3fc] ss:$24 sps:$4 sm:$0xff]   ;;  %v15802_v22 = vld [vmem:[%s18238_s7 + $0x3f8] ss:$24 sps:$4 sm:$0xff]  }
 0x3f4   : > { %3875 = vmatprep.subr.bf16.mxu1 %v15781_v11  ;;  %v15803_v59 = vld [vmem:[%s18238_s7 + $0x424] ss:$24 sps:$4 sm:$0xff]   ;;  %v15807_v53 = vld [vmem:[%s18238_s7 + $0x420] ss:$24 sps:$4 sm:$0xff]   ;;  %v15809_v56 = vld [vmem:[%s18238_s7 + $0x454] ss:$24 sps:$4 sm:$0xff]  }
 0x3f5   : > { %v15805_v35 = vld [vmem:[%s18238_s7 + $0x42c] ss:$24 sps:$4 sm:$0xff]   ;;  %v15808_v62 = vld [vmem:[%s18238_s7 + $0x428] ss:$24 sps:$4 sm:$0xff]   ;;  %v15811_v41 = vld [vmem:[%s18238_s7 + $0x45c] ss:$24 sps:$4 sm:$0xff]  }
 0x3f6   : > { %3835 = vmatpush1.bf16.msra.mxu0 %v15783_v28  ;;  %v15813_v7 = vld [vmem:[%s18238_s7 + $0x450] ss:$24 sps:$4 sm:$0xff]   ;;  %v15815_v1 = vld [vmem:[%s18238_s7 + $0x484] ss:$24 sps:$4 sm:$0xff]   ;;  %v15819_v12 = vld [vmem:[%s18238_s7 + $0x480] ss:$24 sps:$4 sm:$0xff]  }
 0x3f7   : > { %3876 = vmatpush1.bf16.msra.mxu1 %v15784_v21  ;;  %3836 = vmatprep.subr.bf16.mxu0 %v15785_v50  ;;  %v15814_v26 = vld [vmem:[%s18238_s7 + $0x458] ss:$24 sps:$4 sm:$0xff]   ;;  %v15817_v15 = vld [vmem:[%s18238_s7 + $0x48c] ss:$24 sps:$4 sm:$0xff]   ;;  %v15820_v3 = vld [vmem:[%s18238_s7 + $0x488] ss:$24 sps:$4 sm:$0xff]  }
 0x3f8   : > { %3877 = vmatprep.subr.bf16.mxu1 %v15787_v31  ;;  %v15821_v36 = vld [vmem:[%s18238_s7 + $0x4b4] ss:$24 sps:$4 sm:$0xff]   ;;  %v15825_v13 = vld [vmem:[%s18238_s7 + $0x4b0] ss:$24 sps:$4 sm:$0xff]   ;;  %v15827_v47 = vld [vmem:[%s18238_s7 + $0x4e4] ss:$24 sps:$4 sm:$0xff]  }
 0x3f9   : > { %v15823_v29 = vld [vmem:[%s18238_s7 + $0x4bc] ss:$24 sps:$4 sm:$0xff]   ;;  %v15826_v25 = vld [vmem:[%s18238_s7 + $0x4b8] ss:$24 sps:$4 sm:$0xff]   ;;  %v15829_v17 = vld [vmem:[%s18238_s7 + $0x4ec] ss:$24 sps:$4 sm:$0xff]  }
 0x3fa   : > { %3837 = vmatpush1.bf16.msra.mxu0 %v15789_v24  ;;  %v15831_v0 = vld [vmem:[%s18238_s7 + $0x4e0] ss:$24 sps:$4 sm:$0xff]   ;;  %v15833_v14 = vld [vmem:[%s18238_s7 + $0x514] ss:$24 sps:$4 sm:$0xff]   ;;  %v15837_v4 = vld [vmem:[%s18238_s7 + $0x510] ss:$24 sps:$4 sm:$0xff]  }
 0x3fb   : > { %3878 = vmatpush1.bf16.msra.mxu1 %v15790_v57  ;;  %3838 = vmatprep.subr.bf16.mxu0 %v15791_v38  ;;  %v15832_v18 = vld [vmem:[%s18238_s7 + $0x4e8] ss:$24 sps:$4 sm:$0xff]   ;;  %v15835_v52 = vld [vmem:[%s18238_s7 + $0x51c] ss:$24 sps:$4 sm:$0xff]   ;;  %v15838_v43 = vld [vmem:[%s18238_s7 + $0x518] ss:$24 sps:$4 sm:$0xff]  }
 0x3fc   : > { %3879 = vmatprep.subr.bf16.mxu1 %v15793_v49  ;;  %v3245_v45 = vld [vmem:[#allocation2 + $0x8] sm:$0xff]  ;;  %v15841_v32 = vld [vmem:[%s18238_s7 + $0x54c] ss:$24 sps:$4 sm:$0xff]   ;;  %v15849_v61 = vld [vmem:[%s18238_s7 + $0x570] ss:$24 sps:$4 sm:$0xff]   ;;  %vm12167_vm11 = vcmask 80896  }
 0x3fd   : > { %v12663_v34 = vcombine.high %v3245_v45, %v3245_v45  ;;  %v15839_v40 = vld [vmem:[%s18238_s7 + $0x544] ss:$24 sps:$4 sm:$0xff]   ;;  %v15843_v48 = vld [vmem:[%s18238_s7 + $0x540] ss:$24 sps:$4 sm:$0xff]   ;;  %v15845_v58 = vld [vmem:[%s18238_s7 + $0x574] ss:$24 sps:$4 sm:$0xff]   ;;  %v19884_v19 = vcombine.low %v3245_v45, %v3245_v45 }
 0x3fe   : > { %3839 = vmatpush1.bf16.msra.mxu0 %v15795_v44  ;;  %v15844_v55 = vld [vmem:[%s18238_s7 + $0x548] ss:$24 sps:$4 sm:$0xff]   ;;  %v15847_v16 = vld [vmem:[%s18238_s7 + $0x57c] ss:$24 sps:$4 sm:$0xff]   ;;  %v15850_v37 = vld [vmem:[%s18238_s7 + $0x578] ss:$24 sps:$4 sm:$0xff]  }
 0x3ff   : > { %3880 = vmatpush1.bf16.msra.mxu1 %v15796_v23  ;;  %3840 = vmatprep.subr.bf16.mxu0 %v15797_v46  ;;  %v15851_v2 = vld [vmem:[%s18238_s7 + $0x5a4] ss:$24 sps:$4 sm:$0xff]   ;;  %v15855_v10 = vld [vmem:[%s18238_s7 + $0x5a0] ss:$24 sps:$4 sm:$0xff]   ;;  %v15857_v5 = vld [vmem:[%s18238_s7 + $0x5d4] ss:$24 sps:$4 sm:$0xff]  }
 0x400   : > { %3881 = vmatprep.subr.bf16.mxu1 %v15799_v54  ;;  %3862 = vmatprep.mubr.bf16.mxu0 %v12663_v34  ;;  %v15853_v20 = vld [vmem:[%s18238_s7 + $0x5ac] ss:$24 sps:$4 sm:$0xff]   ;;  %v15856_v42 = vld [vmem:[%s18238_s7 + $0x5a8] ss:$24 sps:$4 sm:$0xff]   ;;  %v15859_v9 = vld [vmem:[%s18238_s7 + $0x5dc] ss:$24 sps:$4 sm:$0xff]  }
 0x401   : > { %3903 = vmatprep.mubr.bf16.mxu1 %v12663_v34  ;;  %v15861_v8 = vld [vmem:[%s18238_s7 + $0x5d0] ss:$24 sps:$4 sm:$0xff]   ;;  %v15867_v30 = vld [vmem:[%s18238_s7 + $0x314] ss:$24 sps:$4 sm:$0xff]   ;;  %v15870_v51 = vld [vmem:[%s18238_s7 + $0x4] ss:$24 sps:$4 sm:$0xff]  }
 0x402   : > { %3841 = vmatpush1.bf16.msra.mxu0 %v15801_v60  ;;  %v15862_v39 = vld [vmem:[%s18238_s7 + $0x5d8] ss:$24 sps:$4 sm:$0xff]   ;;  %v15873_v63 = vld [vmem:[%s18238_s7 + $0x344] ss:$24 sps:$4 sm:$0xff]   ;;  %v15876_v33 = vld [vmem:[%s18238_s7 + $0x34] ss:$24 sps:$4 sm:$0xff]  }
 0x403   : > { %3882 = vmatpush1.bf16.msra.mxu1 %v15802_v22  ;;  %3842 = vmatprep.subr.bf16.mxu0 %v15803_v59  ;;  %v15865_v27 = vld [vmem:[%s18238_s7 + $0x310] ss:$24 sps:$4 sm:$0xff]   ;;  %v15868_v6 = vld [vmem:[%s18238_s7] ss:$24 sps:$4 sm:$0xff]   ;;  %v15879_v21 = vld [vmem:[%s18238_s7 + $0x374] ss:$24 sps:$4 sm:$0xff]  }
 0x404   : > { %3883 = vmatprep.subr.bf16.mxu1 %v15805_v35  ;;  %v15871_v11 = vld [vmem:[%s18238_s7 + $0x340] ss:$24 sps:$4 sm:$0xff]   ;;  %v15874_v28 = vld [vmem:[%s18238_s7 + $0x30] ss:$24 sps:$4 sm:$0xff]   ;;  %v15882_v50 = vld [vmem:[%s18238_s7 + $0x64] ss:$24 sps:$4 sm:$0xff]  }
 0x405   : > { %v15877_v31 = vld [vmem:[%s18238_s7 + $0x370] ss:$24 sps:$4 sm:$0xff]   ;;  %v15880_v24 = vld [vmem:[%s18238_s7 + $0x60] ss:$24 sps:$4 sm:$0xff]   ;;  %v15885_v57 = vld [vmem:[%s18238_s7 + $0x3a4] ss:$24 sps:$4 sm:$0xff]  }
 0x406   : > { %3843 = vmatpush1.bf16.msra.mxu0 %v15807_v53  ;;  %v15888_v38 = vld [vmem:[%s18238_s7 + $0x94] ss:$24 sps:$4 sm:$0xff]   ;;  %v15883_v49 = vld [vmem:[%s18238_s7 + $0x3a0] ss:$24 sps:$4 sm:$0xff]   ;;  %v15886_v44 = vld [vmem:[%s18238_s7 + $0x90] ss:$24 sps:$4 sm:$0xff]  }
 0x407   : > { %3884 = vmatpush1.bf16.msra.mxu1 %v15808_v62  ;;  %3844 = vmatprep.subr.bf16.mxu0 %v15809_v56  ;;  %v15891_v23 = vld [vmem:[%s18238_s7 + $0x3d4] ss:$24 sps:$4 sm:$0xff]   ;;  %v15894_v46 = vld [vmem:[%s18238_s7 + $0xc4] ss:$24 sps:$4 sm:$0xff]   ;;  %v15889_v54 = vld [vmem:[%s18238_s7 + $0x3d0] ss:$24 sps:$4 sm:$0xff]  }
 0x408   : > { %3885 = vmatprep.subr.bf16.mxu1 %v15811_v41  ;;  %v15892_v60 = vld [vmem:[%s18238_s7 + $0xc0] ss:$24 sps:$4 sm:$0xff]   ;;  %v15897_v22 = vld [vmem:[%s18238_s7 + $0x404] ss:$24 sps:$4 sm:$0xff]   ;;  %v15900_v59 = vld [vmem:[%s18238_s7 + $0xf4] ss:$24 sps:$4 sm:$0xff]  }
 0x409   : > { %v15895_v35 = vld [vmem:[%s18238_s7 + $0x400] ss:$24 sps:$4 sm:$0xff]   ;;  %v15898_v53 = vld [vmem:[%s18238_s7 + $0xf0] ss:$24 sps:$4 sm:$0xff]   ;;  %v15903_v62 = vld [vmem:[%s18238_s7 + $0x434] ss:$24 sps:$4 sm:$0xff]  }
 0x40a   : > { %3845 = vmatpush1.bf16.msra.mxu0 %v15813_v7  ;;  %v15906_v56 = vld [vmem:[%s18238_s7 + $0x124] ss:$24 sps:$4 sm:$0xff]   ;;  %v19912_v41 = vld [vmem:[#allocation2] sm:$0xff]  ;;  %p14798_p3 = scmp.ne.s32.totalorder %s17973_s25, 1 }
 0x40b   : > { %3886 = vmatpush1.bf16.msra.mxu1 %v15814_v26  ;;  %3846 = vmatprep.subr.bf16.mxu0 %v15815_v1  ;;  %v19916_v7 = vcombine.high %v19912_v41, %v19912_v41  ;;  %v15901_v26 = vld [vmem:[%s18238_s7 + $0x430] ss:$24 sps:$4 sm:$0xff]   ;;  %v15904_v1 = vld [vmem:[%s18238_s7 + $0x120] ss:$24 sps:$4 sm:$0xff]   ;;  %v15930_v45 = vld [vmem:[%s18238_s7 + $0x1e4] ss:$24 sps:$4 sm:$0xff]  }
 0x40c   : > { %3887 = vmatprep.subr.bf16.mxu1 %v15817_v15  ;;  %v15909_v15 = vld [vmem:[%s18238_s7 + $0x464] ss:$24 sps:$4 sm:$0xff]  }
 0x40e   : > { %3847 = vmatpush1.bf16.msra.mxu0 %v15819_v12  ;;  %v15912_v12 = vld [vmem:[%s18238_s7 + $0x154] ss:$24 sps:$4 sm:$0xff]  }
 0x40f   : > { %3888 = vmatpush1.bf16.msra.mxu1 %v15820_v3  ;;  %3848 = vmatprep.subr.bf16.mxu0 %v15821_v36  ;;  %v15907_v3 = vld [vmem:[%s18238_s7 + $0x460] ss:$24 sps:$4 sm:$0xff]   ;;  %v15910_v36 = vld [vmem:[%s18238_s7 + $0x150] ss:$24 sps:$4 sm:$0xff]  }
 0x410   : > { %3889 = vmatprep.subr.bf16.mxu1 %v15823_v29  ;;  %v15915_v29 = vld [vmem:[%s18238_s7 + $0x494] ss:$24 sps:$4 sm:$0xff]  }
 0x412   : > { %3849 = vmatpush1.bf16.msra.mxu0 %v15825_v13  ;;  %v15918_v13 = vld [vmem:[%s18238_s7 + $0x184] ss:$24 sps:$4 sm:$0xff]  }
 0x413   : > { %3890 = vmatpush1.bf16.msra.mxu1 %v15826_v25  ;;  %3850 = vmatprep.subr.bf16.mxu0 %v15827_v47  ;;  %v15913_v25 = vld [vmem:[%s18238_s7 + $0x490] ss:$24 sps:$4 sm:$0xff]   ;;  %v15916_v47 = vld [vmem:[%s18238_s7 + $0x180] ss:$24 sps:$4 sm:$0xff]  }
 0x414   : > { %3891 = vmatprep.subr.bf16.mxu1 %v15829_v17  ;;  %v15921_v17 = vld [vmem:[%s18238_s7 + $0x4c4] ss:$24 sps:$4 sm:$0xff]  }
 0x416   : > { %3851 = vmatpush1.bf16.msra.mxu0 %v15831_v0  ;;  %v15924_v0 = vld [vmem:[%s18238_s7 + $0x1b4] ss:$24 sps:$4 sm:$0xff]  }
 0x417   : > { %3892 = vmatpush1.bf16.msra.mxu1 %v15832_v18  ;;  %3852 = vmatprep.subr.bf16.mxu0 %v15833_v14  ;;  %v15919_v18 = vld [vmem:[%s18238_s7 + $0x4c0] ss:$24 sps:$4 sm:$0xff]   ;;  %v15922_v14 = vld [vmem:[%s18238_s7 + $0x1b0] ss:$24 sps:$4 sm:$0xff]  }
 0x418   : > { %3893 = vmatprep.subr.bf16.mxu1 %v15835_v52  ;;  %v15927_v52 = vld [vmem:[%s18238_s7 + $0x4f4] ss:$24 sps:$4 sm:$0xff]  }
 0x41a   : > { %3853 = vmatpush1.bf16.msra.mxu0 %v15837_v4  ;;  %v15925_v4 = vld [vmem:[%s18238_s7 + $0x4f0] ss:$24 sps:$4 sm:$0xff]  }
 0x41b   : > { %3894 = vmatpush1.bf16.msra.mxu1 %v15838_v43  ;;  %3854 = vmatprep.subr.bf16.mxu0 %v15839_v40  ;;  %v15933_v43 = vld [vmem:[%s18238_s7 + $0x524] ss:$24 sps:$4 sm:$0xff]   ;;  %v15936_v40 = vld [vmem:[%s18238_s7 + $0x214] ss:$24 sps:$4 sm:$0xff]  }
 0x41c   : > { %3895 = vmatprep.subr.bf16.mxu1 %v15841_v32  ;;  %v15931_v32 = vld [vmem:[%s18238_s7 + $0x520] ss:$24 sps:$4 sm:$0xff]  }
 0x41e   : > { %3855 = vmatpush1.bf16.msra.mxu0 %v15843_v48  ;;  %v15934_v48 = vld [vmem:[%s18238_s7 + $0x210] ss:$24 sps:$4 sm:$0xff]  }
 0x41f   : > { %3896 = vmatpush1.bf16.msra.mxu1 %v15844_v55  ;;  %3856 = vmatprep.subr.bf16.mxu0 %v15845_v58  ;;  %v15939_v55 = vld [vmem:[%s18238_s7 + $0x554] ss:$24 sps:$4 sm:$0xff]   ;;  %v15942_v58 = vld [vmem:[%s18238_s7 + $0x244] ss:$24 sps:$4 sm:$0xff]  }
 0x420   : > { %3897 = vmatprep.subr.bf16.mxu1 %v15847_v16  ;;  %v15937_v16 = vld [vmem:[%s18238_s7 + $0x550] ss:$24 sps:$4 sm:$0xff]  }
 0x422   : > { %3857 = vmatpush1.bf16.msra.mxu0 %v15849_v61  ;;  %v15940_v61 = vld [vmem:[%s18238_s7 + $0x240] ss:$24 sps:$4 sm:$0xff]  }
 0x423   : > { %3898 = vmatpush1.bf16.msra.mxu1 %v15850_v37  ;;  %3858 = vmatprep.subr.bf16.mxu0 %v15851_v2  ;;  %v15945_v37 = vld [vmem:[%s18238_s7 + $0x584] ss:$24 sps:$4 sm:$0xff]   ;;  %v15948_v2 = vld [vmem:[%s18238_s7 + $0x274] ss:$24 sps:$4 sm:$0xff]  }
 0x424   : > { %3899 = vmatprep.subr.bf16.mxu1 %v15853_v20  ;;  %v15943_v20 = vld [vmem:[%s18238_s7 + $0x580] ss:$24 sps:$4 sm:$0xff]  }
 0x426   : > { %3859 = vmatpush1.bf16.msra.mxu0 %v15855_v10  ;;  %v15946_v10 = vld [vmem:[%s18238_s7 + $0x270] ss:$24 sps:$4 sm:$0xff]  }
 0x427   : > { %3900 = vmatpush1.bf16.msra.mxu1 %v15856_v42  ;;  %3860 = vmatprep.subr.bf16.mxu0 %v15857_v5  ;;  %v15951_v42 = vld [vmem:[%s18238_s7 + $0x5b4] ss:$24 sps:$4 sm:$0xff]   ;;  %v15954_v5 = vld [vmem:[%s18238_s7 + $0x2a4] ss:$24 sps:$4 sm:$0xff]  }
 0x428   : > { %3901 = vmatprep.subr.bf16.mxu1 %v15859_v9  ;;  %v15949_v9 = vld [vmem:[%s18238_s7 + $0x5b0] ss:$24 sps:$4 sm:$0xff]  }
 0x42a   : > { %3861 = vmatpush1.bf16.msra.mxu0 %v15861_v8  ;;  %v15952_v8 = vld [vmem:[%s18238_s7 + $0x2a0] ss:$24 sps:$4 sm:$0xff]  }
 0x42b   : > { %3902 = vmatpush1.bf16.msra.mxu1 %v15862_v39  ;;  %3912 = vmatprep.subr.bf16.mxu0 %v15867_v30  ;;  %v15957_v39 = vld [vmem:[%s18238_s7 + $0x5e4] ss:$24 sps:$4 sm:$0xff]   ;;  %v15960_v30 = vld [vmem:[%s18238_s7 + $0x2d4] ss:$24 sps:$4 sm:$0xff]  }
 0x42c   : > { %4440 = vmatprep.subr.bf16.mxu1 %v15870_v51  ;;  %v15955_v51 = vld [vmem:[%s18238_s7 + $0x5e0] ss:$24 sps:$4 sm:$0xff]  }
 0x42d   : > { %3863 = vmatmul.mubr.bf16.vlgmr.msra.gmra.mrb[0].mxu0 %v19884_v19 }
 0x42e   : > { %3904 = vmatmul.mubr.bf16.vlgmr.msra.gmra.mrb[0].mxu1 %v19884_v19  ;;  %3913 = vmatpush1.bf16.msra.mxu0 %v15865_v27  ;;  %v15958_v27 = vld [vmem:[%s18238_s7 + $0x2d0] ss:$24 sps:$4 sm:$0xff]  }
 0x42f   : > { %4441 = vmatpush1.bf16.msra.mxu1 %v15868_v6  ;;  %3914 = vmatprep.subr.bf16.mxu0 %v15873_v63  ;;  %v15965_v6 = vld [vmem:[%s18238_s7 + $0xc] ss:$24 sps:$4 sm:$0xff]  }
 0x430   : > { %4442 = vmatprep.subr.bf16.mxu1 %v15876_v33  ;;  %3944 = vmatprep.mubr.bf16.mxu0 %v12663_v34  ;;  %v15928_v34 = vld [vmem:[%s18238_s7 + $0x1e0] ss:$24 sps:$4 sm:$0xff]   ;;  %v15968_v63 = vld [vmem:[%s18238_s7 + $0x14] ss:$24 sps:$4 sm:$0xff]   ;;  %v19961_v33 = vcombine.low %v19912_v41, %v19912_v41 }
 0x431   : > { %4472 = vmatprep.mubr.bf16.mxu1 %v19916_v7  ;;  %v15996_v41 = vld [vmem:[%s18238_s7 + $0x100] ss:$24 sps:$4 sm:$0xff]  }
 0x432   : > { %3915 = vmatpush1.bf16.msra.mxu0 %v15871_v11  ;;  %v15963_v11 = vld [vmem:[%s18238_s7 + $0x8] ss:$24 sps:$4 sm:$0xff]  }
 0x433   : > { %4443 = vmatpush1.bf16.msra.mxu1 %v15874_v28  ;;  %3916 = vmatprep.subr.bf16.mxu0 %v15879_v21  ;;  %v15966_v28 = vld [vmem:[%s18238_s7 + $0x10] ss:$24 sps:$4 sm:$0xff]   ;;  %v15971_v21 = vld [vmem:[%s18238_s7 + $0x3c] ss:$24 sps:$4 sm:$0xff]  }
 0x434   : > { %4444 = vmatprep.subr.bf16.mxu1 %v15882_v50  ;;  %v15974_v50 = vld [vmem:[%s18238_s7 + $0x44] ss:$24 sps:$4 sm:$0xff]  }
 0x436   : > { %3917 = vmatpush1.bf16.msra.mxu0 %v15877_v31  ;;  %v15969_v31 = vld [vmem:[%s18238_s7 + $0x38] ss:$24 sps:$4 sm:$0xff]  }
 0x437   : > { %4445 = vmatpush1.bf16.msra.mxu1 %v15880_v24  ;;  %3918 = vmatprep.subr.bf16.mxu0 %v15885_v57  ;;  %v15972_v24 = vld [vmem:[%s18238_s7 + $0x40] ss:$24 sps:$4 sm:$0xff]   ;;  %v15977_v57 = vld [vmem:[%s18238_s7 + $0x6c] ss:$24 sps:$4 sm:$0xff]  }
 0x438   : > { %4446 = vmatprep.subr.bf16.mxu1 %v15888_v38  ;;  %v15980_v38 = vld [vmem:[%s18238_s7 + $0x74] ss:$24 sps:$4 sm:$0xff]  }
 0x43a   : > { %3919 = vmatpush1.bf16.msra.mxu0 %v15883_v49  ;;  %v15978_v49 = vld [vmem:[%s18238_s7 + $0x70] ss:$24 sps:$4 sm:$0xff]  }
 0x43b   : > { %4447 = vmatpush1.bf16.msra.mxu1 %v15886_v44  ;;  %3920 = vmatprep.subr.bf16.mxu0 %v15891_v23  ;;  %v15983_v44 = vld [vmem:[%s18238_s7 + $0x9c] ss:$24 sps:$4 sm:$0xff]  }
 0x43c   : > { %4448 = vmatprep.subr.bf16.mxu1 %v15894_v46  ;;  %v15986_v23 = vld [vmem:[%s18238_s7 + $0xa4] ss:$24 sps:$4 sm:$0xff]   ;;  %v15981_v46 = vld [vmem:[%s18238_s7 + $0x98] ss:$24 sps:$4 sm:$0xff]  }
 0x43e   : > { %3921 = vmatpush1.bf16.msra.mxu0 %v15889_v54  ;;  %v15984_v54 = vld [vmem:[%s18238_s7 + $0xa0] ss:$24 sps:$4 sm:$0xff]  }
 0x43f   : > { %4449 = vmatpush1.bf16.msra.mxu1 %v15892_v60  ;;  %3922 = vmatprep.subr.bf16.mxu0 %v15897_v22  ;;  %v15989_v60 = vld [vmem:[%s18238_s7 + $0xcc] ss:$24 sps:$4 sm:$0xff]  }
 0x440   : > { %4450 = vmatprep.subr.bf16.mxu1 %v15900_v59  ;;  %v15992_v22 = vld [vmem:[%s18238_s7 + $0xd4] ss:$24 sps:$4 sm:$0xff]   ;;  %v15987_v59 = vld [vmem:[%s18238_s7 + $0xc8] ss:$24 sps:$4 sm:$0xff]  }
 0x442   : > { %3923 = vmatpush1.bf16.msra.mxu0 %v15895_v35  ;;  %v15990_v35 = vld [vmem:[%s18238_s7 + $0xd0] ss:$24 sps:$4 sm:$0xff]  }
 0x443   : > { %4451 = vmatpush1.bf16.msra.mxu1 %v15898_v53  ;;  %3924 = vmatprep.subr.bf16.mxu0 %v15903_v62  ;;  %v15995_v53 = vld [vmem:[%s18238_s7 + $0xfc] ss:$24 sps:$4 sm:$0xff]  }
 0x444   : > { %4452 = vmatprep.subr.bf16.mxu1 %v15906_v56  ;;  %v15998_v62 = vld [vmem:[%s18238_s7 + $0x104] ss:$24 sps:$4 sm:$0xff]   ;;  %v15993_v56 = vld [vmem:[%s18238_s7 + $0xf8] ss:$24 sps:$4 sm:$0xff]  }
 0x446   : > { %3925 = vmatpush1.bf16.msra.mxu0 %v15901_v26  ;;  %v16004_v26 = vld [vmem:[%s18238_s7 + $0x134] ss:$24 sps:$4 sm:$0xff]  }
 0x447   : > { %4453 = vmatpush1.bf16.msra.mxu1 %v15904_v1  ;;  %3926 = vmatprep.subr.bf16.mxu0 %v15909_v15  ;;  %v15999_v1 = vld [vmem:[%s18238_s7 + $0x128] ss:$24 sps:$4 sm:$0xff]  }
 0x448   : > { %4454 = vmatprep.subr.bf16.mxu1 %v15912_v12  ;;  %v16002_v15 = vld [vmem:[%s18238_s7 + $0x130] ss:$24 sps:$4 sm:$0xff]   ;;  %v16007_v12 = vld [vmem:[%s18238_s7 + $0x15c] ss:$24 sps:$4 sm:$0xff]  }
 0x44a   : > { %3927 = vmatpush1.bf16.msra.mxu0 %v15907_v3  ;;  %v16010_v3 = vld [vmem:[%s18238_s7 + $0x164] ss:$24 sps:$4 sm:$0xff]  }
 0x44b   : > { %4455 = vmatpush1.bf16.msra.mxu1 %v15910_v36  ;;  %3928 = vmatprep.subr.bf16.mxu0 %v15915_v29  ;;  %v16005_v36 = vld [vmem:[%s18238_s7 + $0x158] ss:$24 sps:$4 sm:$0xff]  }
 0x44c   : > { %4456 = vmatprep.subr.bf16.mxu1 %v15918_v13  ;;  %v16008_v29 = vld [vmem:[%s18238_s7 + $0x160] ss:$24 sps:$4 sm:$0xff]   ;;  %v16013_v13 = vld [vmem:[%s18238_s7 + $0x18c] ss:$24 sps:$4 sm:$0xff]  }
 0x44e   : > { %3929 = vmatpush1.bf16.msra.mxu0 %v15913_v25  ;;  %v16016_v25 = vld [vmem:[%s18238_s7 + $0x194] ss:$24 sps:$4 sm:$0xff]  }
 0x44f   : > { %4457 = vmatpush1.bf16.msra.mxu1 %v15916_v47  ;;  %3930 = vmatprep.subr.bf16.mxu0 %v15921_v17  ;;  %v16011_v47 = vld [vmem:[%s18238_s7 + $0x188] ss:$24 sps:$4 sm:$0xff]  }
 0x450   : > { %4458 = vmatprep.subr.bf16.mxu1 %v15924_v0  ;;  %v16014_v17 = vld [vmem:[%s18238_s7 + $0x190] ss:$24 sps:$4 sm:$0xff]   ;;  %v16019_v0 = vld [vmem:[%s18238_s7 + $0x1bc] ss:$24 sps:$4 sm:$0xff]  }
 0x452   : > { %3931 = vmatpush1.bf16.msra.mxu0 %v15919_v18  ;;  %v16022_v18 = vld [vmem:[%s18238_s7 + $0x1c4] ss:$24 sps:$4 sm:$0xff]  }
 0x453   : > { %4459 = vmatpush1.bf16.msra.mxu1 %v15922_v14  ;;  %3932 = vmatprep.subr.bf16.mxu0 %v15927_v52  ;;  %v16017_v14 = vld [vmem:[%s18238_s7 + $0x1b8] ss:$24 sps:$4 sm:$0xff]  }
 0x454   : > { %4460 = vmatprep.subr.bf16.mxu1 %v15930_v45  ;;  %v16020_v52 = vld [vmem:[%s18238_s7 + $0x1c0] ss:$24 sps:$4 sm:$0xff]   ;;  %v16025_v45 = vld [vmem:[%s18238_s7 + $0x1ec] ss:$24 sps:$4 sm:$0xff]  }
 0x456   : > { %3933 = vmatpush1.bf16.msra.mxu0 %v15925_v4  ;;  %v16028_v4 = vld [vmem:[%s18238_s7 + $0x1f4] ss:$24 sps:$4 sm:$0xff]  }
 0x457   : > { %4461 = vmatpush1.bf16.msra.mxu1 %v15928_v34  ;;  %3934 = vmatprep.subr.bf16.mxu0 %v15933_v43  ;;  %v16023_v34 = vld [vmem:[%s18238_s7 + $0x1e8] ss:$24 sps:$4 sm:$0xff]  }
 0x458   : > { %4462 = vmatprep.subr.bf16.mxu1 %v15936_v40  ;;  %v16026_v43 = vld [vmem:[%s18238_s7 + $0x1f0] ss:$24 sps:$4 sm:$0xff]   ;;  %v16031_v40 = vld [vmem:[%s18238_s7 + $0x21c] ss:$24 sps:$4 sm:$0xff]  }
 0x45a   : > { %3935 = vmatpush1.bf16.msra.mxu0 %v15931_v32  ;;  %v16034_v32 = vld [vmem:[%s18238_s7 + $0x224] ss:$24 sps:$4 sm:$0xff]  }
 0x45b   : > { %4463 = vmatpush1.bf16.msra.mxu1 %v15934_v48  ;;  %3936 = vmatprep.subr.bf16.mxu0 %v15939_v55  ;;  %v16029_v48 = vld [vmem:[%s18238_s7 + $0x218] ss:$24 sps:$4 sm:$0xff]  }
 0x45c   : > { %4464 = vmatprep.subr.bf16.mxu1 %v15942_v58  ;;  %v16032_v55 = vld [vmem:[%s18238_s7 + $0x220] ss:$24 sps:$4 sm:$0xff]   ;;  %v16037_v58 = vld [vmem:[%s18238_s7 + $0x24c] ss:$24 sps:$4 sm:$0xff]  }
 0x45e   : > { %3937 = vmatpush1.bf16.msra.mxu0 %v15937_v16  ;;  %v16040_v16 = vld [vmem:[%s18238_s7 + $0x254] ss:$24 sps:$4 sm:$0xff]  }
 0x45f   : > { %4465 = vmatpush1.bf16.msra.mxu1 %v15940_v61  ;;  %3938 = vmatprep.subr.bf16.mxu0 %v15945_v37  ;;  %v16035_v61 = vld [vmem:[%s18238_s7 + $0x248] ss:$24 sps:$4 sm:$0xff]  }
 0x460   : > { %4466 = vmatprep.subr.bf16.mxu1 %v15948_v2  ;;  %v16038_v37 = vld [vmem:[%s18238_s7 + $0x250] ss:$24 sps:$4 sm:$0xff]   ;;  %v16043_v2 = vld [vmem:[%s18238_s7 + $0x27c] ss:$24 sps:$4 sm:$0xff]  }
 0x462   : > { %3939 = vmatpush1.bf16.msra.mxu0 %v15943_v20  ;;  %v16046_v20 = vld [vmem:[%s18238_s7 + $0x284] ss:$24 sps:$4 sm:$0xff]  }
 0x463   : > { %4467 = vmatpush1.bf16.msra.mxu1 %v15946_v10  ;;  %3940 = vmatprep.subr.bf16.mxu0 %v15951_v42  ;;  %v16041_v10 = vld [vmem:[%s18238_s7 + $0x278] ss:$24 sps:$4 sm:$0xff]  }
 0x464   : > { %4468 = vmatprep.subr.bf16.mxu1 %v15954_v5  ;;  %v16044_v42 = vld [vmem:[%s18238_s7 + $0x280] ss:$24 sps:$4 sm:$0xff]   ;;  %v16049_v5 = vld [vmem:[%s18238_s7 + $0x2ac] ss:$24 sps:$4 sm:$0xff]  }
 0x466   : > { %3941 = vmatpush1.bf16.msra.mxu0 %v15949_v9  ;;  %v16052_v9 = vld [vmem:[%s18238_s7 + $0x2b4] ss:$24 sps:$4 sm:$0xff]  }
 0x467   : > { %4469 = vmatpush1.bf16.msra.mxu1 %v15952_v8  ;;  %3942 = vmatprep.subr.bf16.mxu0 %v15957_v39  ;;  %v16047_v8 = vld [vmem:[%s18238_s7 + $0x2a8] ss:$24 sps:$4 sm:$0xff]  }
 0x468   : > { %4470 = vmatprep.subr.bf16.mxu1 %v15960_v30  ;;  %v16050_v39 = vld [vmem:[%s18238_s7 + $0x2b0] ss:$24 sps:$4 sm:$0xff]   ;;  %v16055_v30 = vld [vmem:[%s18238_s7 + $0x2dc] ss:$24 sps:$4 sm:$0xff]  }
 0x46a   : > { %3943 = vmatpush1.bf16.msra.mxu0 %v15955_v51  ;;  %v16058_v51 = vld [vmem:[%s18238_s7 + $0x2e4] ss:$24 sps:$4 sm:$0xff]  }
 0x46b   : > { %4471 = vmatpush1.bf16.msra.mxu1 %v15958_v27  ;;  %4481 = vmatprep.subr.bf16.mxu0 %v15965_v6  ;;  %v16053_v27 = vld [vmem:[%s18238_s7 + $0x2d8] ss:$24 sps:$4 sm:$0xff]  }
 0x46c   : > { %4522 = vmatprep.subr.bf16.mxu1 %v15968_v63  ;;  %v16056_v6 = vld [vmem:[%s18238_s7 + $0x2e0] ss:$24 sps:$4 sm:$0xff]   ;;  %v16061_v63 = vld [vmem:[%s18238_s7 + $0x604] ss:$24 sps:$4 sm:$0xff]  }
 0x46d   : > { %3945 = vmatmul.mubr.bf16.vlgmr.msra.gmra.mrb[4].mxu0 %v19884_v19  ;;  %v15975_v19 = vld [vmem:[%s18238_s7 + $0x68] ss:$24 sps:$4 sm:$0xff]  }
 0x46e   : > { %4473 = vmatmul.mubr.bf16.vlgmr.msra.gmra.mrb[4].mxu1 %v19961_v33  ;;  %4482 = vmatpush1.bf16.msra.mxu0 %v15963_v11  ;;  %v16064_v11 = vld [vmem:[%s18238_s7 + $0x60c] ss:$24 sps:$4 sm:$0xff]  }
 0x46f   : > { %4523 = vmatpush1.bf16.msra.mxu1 %v15966_v28  ;;  %4483 = vmatprep.subr.bf16.mxu0 %v15971_v21  ;;  %v16059_v28 = vld [vmem:[%s18238_s7 + $0x600] ss:$24 sps:$4 sm:$0xff]   ;;  %v20032_v21 = vld [vmem:[#allocation2 + $0x10] sm:$0xff] }
 0x470   : > { %4524 = vmatprep.subr.bf16.mxu1 %v15974_v50  ;;  %4513 = vmatprep.mubr.bf16.mxu0 %v19916_v7  ;;  %v16062_v50 = vld [vmem:[%s18238_s7 + $0x608] ss:$24 sps:$4 sm:$0xff]  }
 0x471   : > { %4554 = vmatprep.mubr.bf16.mxu1 %v19916_v7  ;;  %v16001_v7 = vld [vmem:[%s18238_s7 + $0x12c] ss:$24 sps:$4 sm:$0xff]  }
 0x472   : > { %4484 = vmatpush1.bf16.msra.mxu0 %v15969_v31  ;;  %v16067_v31 = vld [vmem:[%s18238_s7 + $0x634] ss:$24 sps:$4 sm:$0xff]  }
 0x473   : > { %4525 = vmatpush1.bf16.msra.mxu1 %v15972_v24  ;;  %4485 = vmatprep.subr.bf16.mxu0 %v15977_v57  ;;  %v16070_v24 = vld [vmem:[%s18238_s7 + $0x63c] ss:$24 sps:$4 sm:$0xff]   ;;  %v20039_v57 = vcombine.high %v20032_v21, %v20032_v21 }
 0x474   : > { %4526 = vmatprep.subr.bf16.mxu1 %v15980_v38  ;;  %v16065_v38 = vld [vmem:[%s18238_s7 + $0x630] ss:$24 sps:$4 sm:$0xff]  }
 0x476   : > { %4486 = vmatpush1.bf16.msra.mxu0 %v15975_v19  ;;  %v16068_v19 = vld [vmem:[%s18238_s7 + $0x638] ss:$24 sps:$4 sm:$0xff]  }
 0x477   : > { %4527 = vmatpush1.bf16.msra.mxu1 %v15978_v49  ;;  %4487 = vmatprep.subr.bf16.mxu0 %v15983_v44  ;;  %v16073_v49 = vld [vmem:[%s18238_s7 + $0x664] ss:$24 sps:$4 sm:$0xff]  }
 0x478   : > { %4528 = vmatprep.subr.bf16.mxu1 %v15986_v23  ;;  %v16076_v44 = vld [vmem:[%s18238_s7 + $0x66c] ss:$24 sps:$4 sm:$0xff]   ;;  %v16071_v23 = vld [vmem:[%s18238_s7 + $0x660] ss:$24 sps:$4 sm:$0xff]  }
 0x47a   : > { %4488 = vmatpush1.bf16.msra.mxu0 %v15981_v46  ;;  %v16079_v46 = vld [vmem:[%s18238_s7 + $0x694] ss:$24 sps:$4 sm:$0xff]  }
 0x47b   : > { %4529 = vmatpush1.bf16.msra.mxu1 %v15984_v54  ;;  %4489 = vmatprep.subr.bf16.mxu0 %v15989_v60  ;;  %v16082_v54 = vld [vmem:[%s18238_s7 + $0x69c] ss:$24 sps:$4 sm:$0xff]   ;;  %v16077_v60 = vld [vmem:[%s18238_s7 + $0x690] ss:$24 sps:$4 sm:$0xff]  }
 0x47c   : > { %4530 = vmatprep.subr.bf16.mxu1 %v15992_v22  ;;  %v16080_v22 = vld [vmem:[%s18238_s7 + $0x698] ss:$24 sps:$4 sm:$0xff]  }
 0x47e   : > { %4490 = vmatpush1.bf16.msra.mxu0 %v15987_v59  ;;  %v16085_v59 = vld [vmem:[%s18238_s7 + $0x6c4] ss:$24 sps:$4 sm:$0xff]  }
 0x47f   : > { %4531 = vmatpush1.bf16.msra.mxu1 %v15990_v35  ;;  %4491 = vmatprep.subr.bf16.mxu0 %v15995_v53  ;;  %v16088_v35 = vld [vmem:[%s18238_s7 + $0x6cc] ss:$24 sps:$4 sm:$0xff]   ;;  %v16083_v53 = vld [vmem:[%s18238_s7 + $0x6c0] ss:$24 sps:$4 sm:$0xff]  }
 0x480   : > { %4532 = vmatprep.subr.bf16.mxu1 %v15998_v62  ;;  %v16086_v62 = vld [vmem:[%s18238_s7 + $0x6c8] ss:$24 sps:$4 sm:$0xff]  }
 0x482   : > { %4492 = vmatpush1.bf16.msra.mxu0 %v15993_v56  ;;  %v16091_v56 = vld [vmem:[%s18238_s7 + $0x6f4] ss:$24 sps:$4 sm:$0xff]  }
 0x483   : > { %4533 = vmatpush1.bf16.msra.mxu1 %v15996_v41  ;;  %4493 = vmatprep.subr.bf16.mxu0 %v16001_v7  ;;  %v16094_v41 = vld [vmem:[%s18238_s7 + $0x6fc] ss:$24 sps:$4 sm:$0xff]   ;;  %v16089_v7 = vld [vmem:[%s18238_s7 + $0x6f0] ss:$24 sps:$4 sm:$0xff]  }
 0x484   : > { %4534 = vmatprep.subr.bf16.mxu1 %v16004_v26  ;;  %v16092_v26 = vld [vmem:[%s18238_s7 + $0x6f8] ss:$24 sps:$4 sm:$0xff]  }
 0x486   : > { %4494 = vmatpush1.bf16.msra.mxu0 %v15999_v1  ;;  %v16097_v1 = vld [vmem:[%s18238_s7 + $0x724] ss:$24 sps:$4 sm:$0xff]  }
 0x487   : > { %4535 = vmatpush1.bf16.msra.mxu1 %v16002_v15  ;;  %4495 = vmatprep.subr.bf16.mxu0 %v16007_v12  ;;  %v16100_v15 = vld [vmem:[%s18238_s7 + $0x72c] ss:$24 sps:$4 sm:$0xff]   ;;  %v16095_v12 = vld [vmem:[%s18238_s7 + $0x720] ss:$24 sps:$4 sm:$0xff]  }
 0x488   : > { %4536 = vmatprep.subr.bf16.mxu1 %v16010_v3  ;;  %v16098_v3 = vld [vmem:[%s18238_s7 + $0x728] ss:$24 sps:$4 sm:$0xff]  }
 0x48a   : > { %4496 = vmatpush1.bf16.msra.mxu0 %v16005_v36  ;;  %v16103_v36 = vld [vmem:[%s18238_s7 + $0x754] ss:$24 sps:$4 sm:$0xff]  }
 0x48b   : > { %4537 = vmatpush1.bf16.msra.mxu1 %v16008_v29  ;;  %4497 = vmatprep.subr.bf16.mxu0 %v16013_v13  ;;  %v16106_v29 = vld [vmem:[%s18238_s7 + $0x75c] ss:$24 sps:$4 sm:$0xff]   ;;  %v16101_v13 = vld [vmem:[%s18238_s7 + $0x750] ss:$24 sps:$4 sm:$0xff]  }
 0x48c   : > { %4538 = vmatprep.subr.bf16.mxu1 %v16016_v25  ;;  %v16104_v25 = vld [vmem:[%s18238_s7 + $0x758] ss:$24 sps:$4 sm:$0xff]  }
 0x48e   : > { %4498 = vmatpush1.bf16.msra.mxu0 %v16011_v47  ;;  %v16109_v47 = vld [vmem:[%s18238_s7 + $0x784] ss:$24 sps:$4 sm:$0xff]  }
 0x48f   : > { %4539 = vmatpush1.bf16.msra.mxu1 %v16014_v17  ;;  %4499 = vmatprep.subr.bf16.mxu0 %v16019_v0  ;;  %v16112_v17 = vld [vmem:[%s18238_s7 + $0x78c] ss:$24 sps:$4 sm:$0xff]   ;;  %v16107_v0 = vld [vmem:[%s18238_s7 + $0x780] ss:$24 sps:$4 sm:$0xff]  }
 0x490   : > { %4540 = vmatprep.subr.bf16.mxu1 %v16022_v18  ;;  %v16110_v18 = vld [vmem:[%s18238_s7 + $0x788] ss:$24 sps:$4 sm:$0xff]  }
 0x492   : > { %4500 = vmatpush1.bf16.msra.mxu0 %v16017_v14  ;;  %v16115_v14 = vld [vmem:[%s18238_s7 + $0x7b4] ss:$24 sps:$4 sm:$0xff]  }
 0x493   : > { %4541 = vmatpush1.bf16.msra.mxu1 %v16020_v52  ;;  %4501 = vmatprep.subr.bf16.mxu0 %v16025_v45  ;;  %v16118_v52 = vld [vmem:[%s18238_s7 + $0x7bc] ss:$24 sps:$4 sm:$0xff]   ;;  %v16113_v45 = vld [vmem:[%s18238_s7 + $0x7b0] ss:$24 sps:$4 sm:$0xff]  }
 0x494   : > { %4542 = vmatprep.subr.bf16.mxu1 %v16028_v4  ;;  %v16116_v4 = vld [vmem:[%s18238_s7 + $0x7b8] ss:$24 sps:$4 sm:$0xff]  }
 0x496   : > { %4502 = vmatpush1.bf16.msra.mxu0 %v16023_v34  ;;  %v16121_v34 = vld [vmem:[%s18238_s7 + $0x7e4] ss:$24 sps:$4 sm:$0xff]  }
 0x497   : > { %4543 = vmatpush1.bf16.msra.mxu1 %v16026_v43  ;;  %4503 = vmatprep.subr.bf16.mxu0 %v16031_v40  ;;  %v16124_v43 = vld [vmem:[%s18238_s7 + $0x7ec] ss:$24 sps:$4 sm:$0xff]   ;;  %v16119_v40 = vld [vmem:[%s18238_s7 + $0x7e0] ss:$24 sps:$4 sm:$0xff]  }
 0x498   : > { %4544 = vmatprep.subr.bf16.mxu1 %v16034_v32  ;;  %v16122_v32 = vld [vmem:[%s18238_s7 + $0x7e8] ss:$24 sps:$4 sm:$0xff]  }
 0x49a   : > { %4504 = vmatpush1.bf16.msra.mxu0 %v16029_v48  ;;  %v16127_v48 = vld [vmem:[%s18238_s7 + $0x814] ss:$24 sps:$4 sm:$0xff]  }
 0x49b   : > { %4545 = vmatpush1.bf16.msra.mxu1 %v16032_v55  ;;  %4505 = vmatprep.subr.bf16.mxu0 %v16037_v58  ;;  %v16130_v55 = vld [vmem:[%s18238_s7 + $0x81c] ss:$24 sps:$4 sm:$0xff]   ;;  %v16125_v58 = vld [vmem:[%s18238_s7 + $0x810] ss:$24 sps:$4 sm:$0xff]  }
 0x49c   : > { %4546 = vmatprep.subr.bf16.mxu1 %v16040_v16  ;;  %v16128_v16 = vld [vmem:[%s18238_s7 + $0x818] ss:$24 sps:$4 sm:$0xff]  }
 0x49e   : > { %4506 = vmatpush1.bf16.msra.mxu0 %v16035_v61  ;;  %v16133_v61 = vld [vmem:[%s18238_s7 + $0x844] ss:$24 sps:$4 sm:$0xff]  }
 0x49f   : > { %4547 = vmatpush1.bf16.msra.mxu1 %v16038_v37  ;;  %4507 = vmatprep.subr.bf16.mxu0 %v16043_v2  ;;  %v16136_v37 = vld [vmem:[%s18238_s7 + $0x84c] ss:$24 sps:$4 sm:$0xff]   ;;  %v16131_v2 = vld [vmem:[%s18238_s7 + $0x840] ss:$24 sps:$4 sm:$0xff]  }
 0x4a0   : > { %4548 = vmatprep.subr.bf16.mxu1 %v16046_v20  ;;  %v16134_v20 = vld [vmem:[%s18238_s7 + $0x848] ss:$24 sps:$4 sm:$0xff]  }
 0x4a2   : > { %4508 = vmatpush1.bf16.msra.mxu0 %v16041_v10  ;;  %v16139_v10 = vld [vmem:[%s18238_s7 + $0x874] ss:$24 sps:$4 sm:$0xff]  }
 0x4a3   : > { %4549 = vmatpush1.bf16.msra.mxu1 %v16044_v42  ;;  %4509 = vmatprep.subr.bf16.mxu0 %v16049_v5  ;;  %v16142_v42 = vld [vmem:[%s18238_s7 + $0x87c] ss:$24 sps:$4 sm:$0xff]   ;;  %v16137_v5 = vld [vmem:[%s18238_s7 + $0x870] ss:$24 sps:$4 sm:$0xff]  }
 0x4a4   : > { %4550 = vmatprep.subr.bf16.mxu1 %v16052_v9  ;;  %v16140_v9 = vld [vmem:[%s18238_s7 + $0x878] ss:$24 sps:$4 sm:$0xff]  }
 0x4a6   : > { %4510 = vmatpush1.bf16.msra.mxu0 %v16047_v8  ;;  %v16145_v8 = vld [vmem:[%s18238_s7 + $0x8a4] ss:$24 sps:$4 sm:$0xff]  }
 0x4a7   : > { %4551 = vmatpush1.bf16.msra.mxu1 %v16050_v39  ;;  %4511 = vmatprep.subr.bf16.mxu0 %v16055_v30  ;;  %v16148_v39 = vld [vmem:[%s18238_s7 + $0x8ac] ss:$24 sps:$4 sm:$0xff]   ;;  %v16143_v30 = vld [vmem:[%s18238_s7 + $0x8a0] ss:$24 sps:$4 sm:$0xff]  }
 0x4a8   : > { %4552 = vmatprep.subr.bf16.mxu1 %v16058_v51  ;;  %v16146_v51 = vld [vmem:[%s18238_s7 + $0x8a8] ss:$24 sps:$4 sm:$0xff]  }
 0x4aa   : > { %4512 = vmatpush1.bf16.msra.mxu0 %v16053_v27  ;;  %v16151_v27 = vld [vmem:[%s18238_s7 + $0x8d4] ss:$24 sps:$4 sm:$0xff]  }
 0x4ab   : > { %4553 = vmatpush1.bf16.msra.mxu1 %v16056_v6  ;;  %5149 = vmatprep.subr.bf16.mxu0 %v16061_v63  ;;  %v16154_v6 = vld [vmem:[%s18238_s7 + $0x8dc] ss:$24 sps:$4 sm:$0xff]   ;;  %v16149_v63 = vld [vmem:[%s18238_s7 + $0x8d0] ss:$24 sps:$4 sm:$0xff]  }
 0x4ac   : > { %5190 = vmatprep.subr.bf16.mxu1 %v16064_v11  ;;  %v16152_v11 = vld [vmem:[%s18238_s7 + $0x8d8] ss:$24 sps:$4 sm:$0xff]  }
 0x4ad   : > { %4514 = vmatmul.mubr.bf16.vlgmr.msra.gmra.mrb[8].mxu0 %v19961_v33 }
 0x4ae   : > { %4555 = vmatmul.mubr.bf16.vlgmr.msra.gmra.mrb[8].mxu1 %v19961_v33  ;;  %5150 = vmatpush1.bf16.msra.mxu0 %v16059_v28  ;;  %v16074_v33 = vld [vmem:[%s18238_s7 + $0x668] ss:$24 sps:$4 sm:$0xff]   ;;  %v16159_v28 = vld [vmem:[%s18238_s7 + $0x614] ss:$24 sps:$4 sm:$0xff]  }
 0x4af   : > { %5191 = vmatpush1.bf16.msra.mxu1 %v16062_v50  ;;  %5151 = vmatprep.subr.bf16.mxu0 %v16067_v31  ;;  %v16162_v50 = vld [vmem:[%s18238_s7 + $0x904] ss:$24 sps:$4 sm:$0xff]   ;;  %v16157_v31 = vld [vmem:[%s18238_s7 + $0x610] ss:$24 sps:$4 sm:$0xff]  }
 0x4b0   : > { %5192 = vmatprep.subr.bf16.mxu1 %v16070_v24  ;;  %5181 = vmatprep.mubr.bf16.mxu0 %v20039_v57  ;;  %v20108_v24 = vcombine.low %v20032_v21, %v20032_v21  ;;  %v16163_v21 = vld [vmem:[%s18238_s7 + $0x640] ss:$24 sps:$4 sm:$0xff]  }
 0x4b1   : > { %5222 = vmatprep.mubr.bf16.mxu1 %v20039_v57 }
 0x4b2   : > { %5152 = vmatpush1.bf16.msra.mxu0 %v16065_v38  ;;  %v16160_v38 = vld [vmem:[%s18238_s7 + $0x900] ss:$24 sps:$4 sm:$0xff]  }
 0x4b3   : > { %5193 = vmatpush1.bf16.msra.mxu1 %v16068_v19  ;;  %5153 = vmatprep.subr.bf16.mxu0 %v16073_v49  ;;  %v20111_v19 = vld [vmem:[#allocation2 + $0x18] sm:$0xff]  ;;  %v16165_v49 = vld [vmem:[%s18238_s7 + $0x644] ss:$24 sps:$4 sm:$0xff]  }
 0x4b4   : > { %5194 = vmatprep.subr.bf16.mxu1 %v16076_v44  ;;  %v16168_v44 = vld [vmem:[%s18238_s7 + $0x934] ss:$24 sps:$4 sm:$0xff]  }
 0x4b6   : > { %5154 = vmatpush1.bf16.msra.mxu0 %v16071_v23  ;;  %v20117_v23 = vcombine.high %v20111_v19, %v20111_v19 }
 0x4b7   : > { %5195 = vmatpush1.bf16.msra.mxu1 %v16074_v33  ;;  %5155 = vmatprep.subr.bf16.mxu0 %v16079_v46  ;;  %v16166_v33 = vld [vmem:[%s18238_s7 + $0x930] ss:$24 sps:$4 sm:$0xff]   ;;  %v16171_v46 = vld [vmem:[%s18238_s7 + $0x674] ss:$24 sps:$4 sm:$0xff]  }
 0x4b8   : > { %5196 = vmatprep.subr.bf16.mxu1 %v16082_v54  ;;  %v16174_v54 = vld [vmem:[%s18238_s7 + $0x964] ss:$24 sps:$4 sm:$0xff]  }
 0x4ba   : > { %5156 = vmatpush1.bf16.msra.mxu0 %v16077_v60  ;;  %v16169_v60 = vld [vmem:[%s18238_s7 + $0x670] ss:$24 sps:$4 sm:$0xff]  }
 0x4bb   : > { %5197 = vmatpush1.bf16.msra.mxu1 %v16080_v22  ;;  %5157 = vmatprep.subr.bf16.mxu0 %v16085_v59  ;;  %v16172_v22 = vld [vmem:[%s18238_s7 + $0x960] ss:$24 sps:$4 sm:$0xff]   ;;  %v16177_v59 = vld [vmem:[%s18238_s7 + $0x6a4] ss:$24 sps:$4 sm:$0xff]  }
 0x4bc   : > { %5198 = vmatprep.subr.bf16.mxu1 %v16088_v35  ;;  %v16180_v35 = vld [vmem:[%s18238_s7 + $0x994] ss:$24 sps:$4 sm:$0xff]  }
 0x4be   : > { %5158 = vmatpush1.bf16.msra.mxu0 %v16083_v53  ;;  %v16178_v53 = vld [vmem:[%s18238_s7 + $0x990] ss:$24 sps:$4 sm:$0xff]  }
 0x4bf   : > { %5199 = vmatpush1.bf16.msra.mxu1 %v16086_v62  ;;  %5159 = vmatprep.subr.bf16.mxu0 %v16091_v56  ;;  %v16183_v62 = vld [vmem:[%s18238_s7 + $0x6d4] ss:$24 sps:$4 sm:$0xff]   ;;  %v16186_v56 = vld [vmem:[%s18238_s7 + $0x9c4] ss:$24 sps:$4 sm:$0xff]  }
 0x4c0   : > { %5200 = vmatprep.subr.bf16.mxu1 %v16094_v41  ;;  %v16181_v41 = vld [vmem:[%s18238_s7 + $0x6d0] ss:$24 sps:$4 sm:$0xff]  }
 0x4c2   : > { %5160 = vmatpush1.bf16.msra.mxu0 %v16089_v7  ;;  %v16184_v7 = vld [vmem:[%s18238_s7 + $0x9c0] ss:$24 sps:$4 sm:$0xff]  }
 0x4c3   : > { %5201 = vmatpush1.bf16.msra.mxu1 %v16092_v26  ;;  %5161 = vmatprep.subr.bf16.mxu0 %v16097_v1  ;;  %v16189_v26 = vld [vmem:[%s18238_s7 + $0x704] ss:$24 sps:$4 sm:$0xff]   ;;  %v16192_v1 = vld [vmem:[%s18238_s7 + $0x9f4] ss:$24 sps:$4 sm:$0xff]  }
 0x4c4   : > { %5202 = vmatprep.subr.bf16.mxu1 %v16100_v15  ;;  %v16187_v15 = vld [vmem:[%s18238_s7 + $0x700] ss:$24 sps:$4 sm:$0xff]  }
 0x4c6   : > { %5162 = vmatpush1.bf16.msra.mxu0 %v16095_v12  ;;  %v16190_v12 = vld [vmem:[%s18238_s7 + $0x9f0] ss:$24 sps:$4 sm:$0xff]  }
 0x4c7   : > { %5203 = vmatpush1.bf16.msra.mxu1 %v16098_v3  ;;  %5163 = vmatprep.subr.bf16.mxu0 %v16103_v36  ;;  %v16195_v3 = vld [vmem:[%s18238_s7 + $0x734] ss:$24 sps:$4 sm:$0xff]   ;;  %v16198_v36 = vld [vmem:[%s18238_s7 + $0xa24] ss:$24 sps:$4 sm:$0xff]  }
 0x4c8   : > { %5204 = vmatprep.subr.bf16.mxu1 %v16106_v29 }
 0x4ca   : > { %5164 = vmatpush1.bf16.msra.mxu0 %v16101_v13 }
 0x4cb   : > { %5205 = vmatpush1.bf16.msra.mxu1 %v16104_v25  ;;  %5165 = vmatprep.subr.bf16.mxu0 %v16109_v47  ;;  %v16193_v25 = vld [vmem:[%s18238_s7 + $0x730] ss:$24 sps:$4 sm:$0xff]   ;;  %v16196_v47 = vld [vmem:[%s18238_s7 + $0xa20] ss:$24 sps:$4 sm:$0xff]  }
 0x4cc   : > { %5206 = vmatprep.subr.bf16.mxu1 %v16112_v17 }
 0x4ce   : > { %5166 = vmatpush1.bf16.msra.mxu0 %v16107_v0 }
 0x4cf   : > { %5207 = vmatpush1.bf16.msra.mxu1 %v16110_v18  ;;  %5167 = vmatprep.subr.bf16.mxu0 %v16115_v14 }
 0x4d0   : > { %5208 = vmatprep.subr.bf16.mxu1 %v16118_v52 }
 0x4d2   : > { %5168 = vmatpush1.bf16.msra.mxu0 %v16113_v45 }
 0x4d3   : > { %5209 = vmatpush1.bf16.msra.mxu1 %v16116_v4  ;;  %5169 = vmatprep.subr.bf16.mxu0 %v16121_v34  ;;  %v16201_v4 = vld [vmem:[%s18238_s7 + $0x764] ss:$24 sps:$4 sm:$0xff]   ;;  %v16204_v34 = vld [vmem:[%s18238_s7 + $0xa54] ss:$24 sps:$4 sm:$0xff]  }
 0x4d4   : > { %5210 = vmatprep.subr.bf16.mxu1 %v16124_v43  ;;  %v16199_v43 = vld [vmem:[%s18238_s7 + $0x760] ss:$24 sps:$4 sm:$0xff]  }
 0x4d6   : > { %5170 = vmatpush1.bf16.msra.mxu0 %v16119_v40  ;;  %v16202_v40 = vld [vmem:[%s18238_s7 + $0xa50] ss:$24 sps:$4 sm:$0xff]  }
 0x4d7   : > { %5211 = vmatpush1.bf16.msra.mxu1 %v16122_v32  ;;  %5171 = vmatprep.subr.bf16.mxu0 %v16127_v48  ;;  %v16207_v32 = vld [vmem:[%s18238_s7 + $0x794] ss:$24 sps:$4 sm:$0xff]   ;;  %v16210_v48 = vld [vmem:[%s18238_s7 + $0xa84] ss:$24 sps:$4 sm:$0xff]  }
 0x4d8   : > { %5212 = vmatprep.subr.bf16.mxu1 %v16130_v55  ;;  %v16205_v55 = vld [vmem:[%s18238_s7 + $0x790] ss:$24 sps:$4 sm:$0xff]  }
 0x4da   : > { %5172 = vmatpush1.bf16.msra.mxu0 %v16125_v58  ;;  %v16208_v58 = vld [vmem:[%s18238_s7 + $0xa80] ss:$24 sps:$4 sm:$0xff]  }
 0x4db   : > { %5213 = vmatpush1.bf16.msra.mxu1 %v16128_v16  ;;  %5173 = vmatprep.subr.bf16.mxu0 %v16133_v61  ;;  %v16213_v16 = vld [vmem:[%s18238_s7 + $0x7c4] ss:$24 sps:$4 sm:$0xff]   ;;  %v16216_v61 = vld [vmem:[%s18238_s7 + $0xab4] ss:$24 sps:$4 sm:$0xff]  }
 0x4dc   : > { %5214 = vmatprep.subr.bf16.mxu1 %v16136_v37  ;;  %v16211_v37 = vld [vmem:[%s18238_s7 + $0x7c0] ss:$24 sps:$4 sm:$0xff]  }
 0x4de   : > { %5174 = vmatpush1.bf16.msra.mxu0 %v16131_v2  ;;  %v16214_v2 = vld [vmem:[%s18238_s7 + $0xab0] ss:$24 sps:$4 sm:$0xff]  }
 0x4df   : > { %5215 = vmatpush1.bf16.msra.mxu1 %v16134_v20  ;;  %5175 = vmatprep.subr.bf16.mxu0 %v16139_v10  ;;  %v16219_v20 = vld [vmem:[%s18238_s7 + $0x7f4] ss:$24 sps:$4 sm:$0xff]   ;;  %v16222_v10 = vld [vmem:[%s18238_s7 + $0xae4] ss:$24 sps:$4 sm:$0xff]  }
 0x4e0   : > { %5216 = vmatprep.subr.bf16.mxu1 %v16142_v42  ;;  %v16217_v42 = vld [vmem:[%s18238_s7 + $0x7f0] ss:$24 sps:$4 sm:$0xff]  }
 0x4e2   : > { %5176 = vmatpush1.bf16.msra.mxu0 %v16137_v5  ;;  %v16220_v5 = vld [vmem:[%s18238_s7 + $0xae0] ss:$24 sps:$4 sm:$0xff]  }
 0x4e3   : > { %5217 = vmatpush1.bf16.msra.mxu1 %v16140_v9  ;;  %5177 = vmatprep.subr.bf16.mxu0 %v16145_v8  ;;  %v16225_v9 = vld [vmem:[%s18238_s7 + $0x824] ss:$24 sps:$4 sm:$0xff]   ;;  %v16228_v8 = vld [vmem:[%s18238_s7 + $0xb14] ss:$24 sps:$4 sm:$0xff]  }
 0x4e4   : > { %5218 = vmatprep.subr.bf16.mxu1 %v16148_v39  ;;  %v16223_v39 = vld [vmem:[%s18238_s7 + $0x820] ss:$24 sps:$4 sm:$0xff]  }
 0x4e6   : > { %5178 = vmatpush1.bf16.msra.mxu0 %v16143_v30  ;;  %v16226_v30 = vld [vmem:[%s18238_s7 + $0xb10] ss:$24 sps:$4 sm:$0xff]  }
 0x4e7   : > { %5219 = vmatpush1.bf16.msra.mxu1 %v16146_v51  ;;  %5179 = vmatprep.subr.bf16.mxu0 %v16151_v27  ;;  %v16231_v51 = vld [vmem:[%s18238_s7 + $0x854] ss:$24 sps:$4 sm:$0xff]   ;;  %v16234_v27 = vld [vmem:[%s18238_s7 + $0xb44] ss:$24 sps:$4 sm:$0xff]  }
 0x4e8   : > { %5220 = vmatprep.subr.bf16.mxu1 %v16154_v6  ;;  %v16229_v6 = vld [vmem:[%s18238_s7 + $0x850] ss:$24 sps:$4 sm:$0xff]  }
 0x4ea   : > { %5180 = vmatpush1.bf16.msra.mxu0 %v16149_v63  ;;  %v16232_v63 = vld [vmem:[%s18238_s7 + $0xb40] ss:$24 sps:$4 sm:$0xff]  }
 0x4eb   : > { %5221 = vmatpush1.bf16.msra.mxu1 %v16152_v11  ;;  %5231 = vmatprep.subr.bf16.mxu0 %v16159_v28  ;;  %v16237_v11 = vld [vmem:[%s18238_s7 + $0x884] ss:$24 sps:$4 sm:$0xff]   ;;  %v16240_v28 = vld [vmem:[%s18238_s7 + $0xb74] ss:$24 sps:$4 sm:$0xff]  }
 0x4ec   : > { %5864 = vmatprep.subr.bf16.mxu1 %v16162_v50  ;;  %v16235_v50 = vld [vmem:[%s18238_s7 + $0x880] ss:$24 sps:$4 sm:$0xff]  }
 0x4ed   : > { %5182 = vmatmul.mubr.bf16.vlgmr.msra.gmra.mrb[12].mxu0 %v20108_v24 }
 0x4ee   : > { %5223 = vmatmul.mubr.bf16.vlgmr.msra.gmra.mrb[12].mxu1 %v20108_v24  ;;  %5232 = vmatpush1.bf16.msra.mxu0 %v16157_v31  ;;  %v16238_v31 = vld [vmem:[%s18238_s7 + $0xb70] ss:$24 sps:$4 sm:$0xff]  }
 0x4ef   : > { %5865 = vmatpush1.bf16.msra.mxu1 %v16160_v38  ;;  %5233 = vmatprep.subr.bf16.mxu0 %v16165_v49  ;;  %v16243_v38 = vld [vmem:[%s18238_s7 + $0x8b4] ss:$24 sps:$4 sm:$0xff]   ;;  %v16246_v49 = vld [vmem:[%s18238_s7 + $0xba4] ss:$24 sps:$4 sm:$0xff]  }
 0x4f0   : > { %5866 = vmatprep.subr.bf16.mxu1 %v16168_v44  ;;  %5263 = vmatprep.mubr.bf16.mxu0 %v20039_v57  ;;  %v16175_v57 = vld [vmem:[%s18238_s7 + $0x6a0] ss:$24 sps:$4 sm:$0xff]   ;;  %v16241_v44 = vld [vmem:[%s18238_s7 + $0x8b0] ss:$24 sps:$4 sm:$0xff]  }
 0x4f1   : > { %5896 = vmatprep.mubr.bf16.mxu1 %v20117_v23 }
 0x4f2   : > { %5234 = vmatpush1.bf16.msra.mxu0 %v16163_v21  ;;  %v16244_v21 = vld [vmem:[%s18238_s7 + $0xba0] ss:$24 sps:$4 sm:$0xff]  }
 0x4f3   : > { %5867 = vmatpush1.bf16.msra.mxu1 %v16166_v33  ;;  %5235 = vmatprep.subr.bf16.mxu0 %v16171_v46  ;;  %v16249_v33 = vld [vmem:[%s18238_s7 + $0x8e4] ss:$24 sps:$4 sm:$0xff]   ;;  %v16252_v46 = vld [vmem:[%s18238_s7 + $0xbd4] ss:$24 sps:$4 sm:$0xff]  }
 0x4f4   : > { %5868 = vmatprep.subr.bf16.mxu1 %v16174_v54  ;;  %v16247_v54 = vld [vmem:[%s18238_s7 + $0x8e0] ss:$24 sps:$4 sm:$0xff]  }
 0x4f6   : > { %5236 = vmatpush1.bf16.msra.mxu0 %v16169_v60  ;;  %v16250_v60 = vld [vmem:[%s18238_s7 + $0xbd0] ss:$24 sps:$4 sm:$0xff]  }
 0x4f7   : > { %5869 = vmatpush1.bf16.msra.mxu1 %v16172_v22  ;;  %5237 = vmatprep.subr.bf16.mxu0 %v16177_v59  ;;  %v16257_v22 = vld [vmem:[%s18238_s7 + $0x90c] ss:$24 sps:$4 sm:$0xff]  }
 0x4f8   : > { %5870 = vmatprep.subr.bf16.mxu1 %v16180_v35  ;;  %v16260_v59 = vld [vmem:[%s18238_s7 + $0x914] ss:$24 sps:$4 sm:$0xff]   ;;  %v16255_v35 = vld [vmem:[%s18238_s7 + $0x908] ss:$24 sps:$4 sm:$0xff]  }
 0x4fa   : > { %5238 = vmatpush1.bf16.msra.mxu0 %v16175_v57  ;;  %v20194_v57 = vcombine.low %v20111_v19, %v20111_v19  ;;  %v16261_v19 = vld [vmem:[%s18238_s7 + $0x938] ss:$24 sps:$4 sm:$0xff]  }
 0x4fb   : > { %5871 = vmatpush1.bf16.msra.mxu1 %v16178_v53  ;;  %5239 = vmatprep.subr.bf16.mxu0 %v16183_v62  ;;  %v16258_v53 = vld [vmem:[%s18238_s7 + $0x910] ss:$24 sps:$4 sm:$0xff]   ;;  %v16263_v62 = vld [vmem:[%s18238_s7 + $0x93c] ss:$24 sps:$4 sm:$0xff]  }
 0x4fc   : > { %5872 = vmatprep.subr.bf16.mxu1 %v16186_v56  ;;  %v16266_v56 = vld [vmem:[%s18238_s7 + $0x944] ss:$24 sps:$4 sm:$0xff]  }
 0x4fe   : > { %5240 = vmatpush1.bf16.msra.mxu0 %v16181_v41  ;;  %v16264_v41 = vld [vmem:[%s18238_s7 + $0x940] ss:$24 sps:$4 sm:$0xff]  }
 0x4ff   : > { %5873 = vmatpush1.bf16.msra.mxu1 %v16184_v7  ;;  %5241 = vmatprep.subr.bf16.mxu0 %v16189_v26  ;;  %v16269_v7 = vld [vmem:[%s18238_s7 + $0x96c] ss:$24 sps:$4 sm:$0xff]  }
 0x500   : > { %5874 = vmatprep.subr.bf16.mxu1 %v16192_v1  ;;  %v20143_v29 = vpop.f32.mrb[0].mxu0  ;;  %v16272_v26 = vld [vmem:[%s18238_s7 + $0x974] ss:$24 sps:$4 sm:$0xff]   ;;  %v16270_v1 = vld [vmem:[%s18238_s7 + $0x970] ss:$24 sps:$4 sm:$0xff]  }
 0x501   : > { %v20145_v13 = vpop.f32.mrb[0].mxu1  ;;  %v20149_v17 = vpop.f32.mrb[1].mxu0 }
 0x502   : > { %v20151_v0 = vpop.f32.mrb[1].mxu1  ;;  %v3868_v18 = vpop.f32.mrb[2].mxu0  ;;  %5242 = vmatpush1.bf16.msra.mxu0 %v16187_v15  ;;  %v16275_v15 = vld [vmem:[%s18238_s7 + $0x99c] ss:$24 sps:$4 sm:$0xff]  }
 0x503   : > { %v3909_v14 = vpop.f32.mrb[2].mxu1  ;;  %5875 = vmatpush1.bf16.msra.mxu1 %v16190_v12  ;;  %v3869_v52 = vpop.f32.mrb[3].mxu0  ;;  %5243 = vmatprep.subr.bf16.mxu0 %v16195_v3  ;;  %v16278_v12 = vld [vmem:[%s18238_s7 + $0x9a4] ss:$24 sps:$4 sm:$0xff]   ;;  %v16273_v3 = vld [vmem:[%s18238_s7 + $0x998] ss:$24 sps:$4 sm:$0xff]  }
 0x504   : > { %v3910_v45 = vpop.f32.mrb[3].mxu1  ;;  %5876 = vmatprep.subr.bf16.mxu1 %v16198_v36  ;;  %v16276_v36 = vld [vmem:[%s18238_s7 + $0x9a0] ss:$24 sps:$4 sm:$0xff]   ;;  %v16282_v18 = vld [vmem:[%s18238_s7 + $0x9d0] ss:$24 sps:$4 sm:$0xff]  }
 0x505   : > { %v16287_v14 = vld [vmem:[%s18238_s7 + $0x9fc] ss:$24 sps:$4 sm:$0xff]   ;;  %v16285_v45 = vld [vmem:[%s18238_s7 + $0x9f8] ss:$24 sps:$4 sm:$0xff]  }
 0x506   : > { %5244 = vmatpush1.bf16.msra.mxu0 %v16193_v25  ;;  %v16284_v25 = vld [vmem:[%s18238_s7 + $0x9d4] ss:$24 sps:$4 sm:$0xff]   ;;  %v16290_v52 = vld [vmem:[%s18238_s7 + $0xa04] ss:$24 sps:$4 sm:$0xff]  }
 0x507   : > { %5877 = vmatpush1.bf16.msra.mxu1 %v16196_v47  ;;  %5245 = vmatprep.subr.bf16.mxu0 %v16201_v4  ;;  %v16279_v47 = vld [vmem:[%s18238_s7 + $0x9c8] ss:$24 sps:$4 sm:$0xff]  }
 0x508   : > { %5878 = vmatprep.subr.bf16.mxu1 %v16204_v34  ;;  %v16288_v4 = vld [vmem:[%s18238_s7 + $0xa00] ss:$24 sps:$4 sm:$0xff]   ;;  %v16293_v34 = vld [vmem:[%s18238_s7 + $0xa2c] ss:$24 sps:$4 sm:$0xff]  }
 0x50a   : > { %5246 = vmatpush1.bf16.msra.mxu0 %v16199_v43  ;;  %v16296_v43 = vld [vmem:[%s18238_s7 + $0xa34] ss:$24 sps:$4 sm:$0xff]  }
 0x50b   : > { %5879 = vmatpush1.bf16.msra.mxu1 %v16202_v40  ;;  %5247 = vmatprep.subr.bf16.mxu0 %v16207_v32 }
 0x50c   : > { %5880 = vmatprep.subr.bf16.mxu1 %v16210_v48  ;;  %v16291_v48 = vld [vmem:[%s18238_s7 + $0xa28] ss:$24 sps:$4 sm:$0xff]  }
 0x50e   : > { %5248 = vmatpush1.bf16.msra.mxu0 %v16205_v55  ;;  %v16294_v55 = vld [vmem:[%s18238_s7 + $0xa30] ss:$24 sps:$4 sm:$0xff]  }
 0x50f   : > { %5881 = vmatpush1.bf16.msra.mxu1 %v16208_v58  ;;  %5249 = vmatprep.subr.bf16.mxu0 %v16213_v16 }
 0x510   : > { %5882 = vmatprep.subr.bf16.mxu1 %v16216_v61 }
 0x512   : > { %5250 = vmatpush1.bf16.msra.mxu0 %v16211_v37 }
 0x513   : > { %5883 = vmatpush1.bf16.msra.mxu1 %v16214_v2  ;;  %5251 = vmatprep.subr.bf16.mxu0 %v16219_v20 }
 0x514   : > { %5884 = vmatprep.subr.bf16.mxu1 %v16222_v10 }
 0x516   : > { %5252 = vmatpush1.bf16.msra.mxu0 %v16217_v42 }
 0x517   : > { %5885 = vmatpush1.bf16.msra.mxu1 %v16220_v5  ;;  %5253 = vmatprep.subr.bf16.mxu0 %v16225_v9  ;;  %v16302_v5 = vld [vmem:[%s18238_s7 + $0xa64] ss:$24 sps:$4 sm:$0xff]   ;;  %v16300_v9 = vld [vmem:[%s18238_s7 + $0xa60] ss:$24 sps:$4 sm:$0xff]  }
 0x518   : > { %5886 = vmatprep.subr.bf16.mxu1 %v16228_v8  ;;  %v16305_v8 = vld [vmem:[%s18238_s7 + $0xa8c] ss:$24 sps:$4 sm:$0xff]  }
 0x51a   : > { %5254 = vmatpush1.bf16.msra.mxu0 %v16223_v39  ;;  %v16308_v39 = vld [vmem:[%s18238_s7 + $0xa94] ss:$24 sps:$4 sm:$0xff]  }
 0x51b   : > { %5887 = vmatpush1.bf16.msra.mxu1 %v16226_v30  ;;  %5255 = vmatprep.subr.bf16.mxu0 %v16231_v51  ;;  %v16303_v30 = vld [vmem:[%s18238_s7 + $0xa88] ss:$24 sps:$4 sm:$0xff]  }
 0x51c   : > { %5888 = vmatprep.subr.bf16.mxu1 %v16234_v27  ;;  %v16306_v51 = vld [vmem:[%s18238_s7 + $0xa90] ss:$24 sps:$4 sm:$0xff]   ;;  %v16311_v27 = vld [vmem:[%s18238_s7 + $0xabc] ss:$24 sps:$4 sm:$0xff]  }
 0x51e   : > { %5256 = vmatpush1.bf16.msra.mxu0 %v16229_v6  ;;  %v16314_v6 = vld [vmem:[%s18238_s7 + $0xac4] ss:$24 sps:$4 sm:$0xff]  }
 0x51f   : > { %5889 = vmatpush1.bf16.msra.mxu1 %v16232_v63  ;;  %5257 = vmatprep.subr.bf16.mxu0 %v16237_v11  ;;  %v16309_v63 = vld [vmem:[%s18238_s7 + $0xab8] ss:$24 sps:$4 sm:$0xff]  }
 0x520   : > { %5890 = vmatprep.subr.bf16.mxu1 %v16240_v28  ;;  %v16312_v11 = vld [vmem:[%s18238_s7 + $0xac0] ss:$24 sps:$4 sm:$0xff]   ;;  %v16317_v28 = vld [vmem:[%s18238_s7 + $0xaec] ss:$24 sps:$4 sm:$0xff]  }
 0x522   : > { %5258 = vmatpush1.bf16.msra.mxu0 %v16235_v50  ;;  %v16320_v50 = vld [vmem:[%s18238_s7 + $0xaf4] ss:$24 sps:$4 sm:$0xff]  }
 0x523   : > { %5891 = vmatpush1.bf16.msra.mxu1 %v16238_v31  ;;  %5259 = vmatprep.subr.bf16.mxu0 %v16243_v38  ;;  %v16315_v31 = vld [vmem:[%s18238_s7 + $0xae8] ss:$24 sps:$4 sm:$0xff]  }
 0x524   : > { %5892 = vmatprep.subr.bf16.mxu1 %v16246_v49  ;;  %v16318_v38 = vld [vmem:[%s18238_s7 + $0xaf0] ss:$24 sps:$4 sm:$0xff]   ;;  %v16323_v49 = vld [vmem:[%s18238_s7 + $0xb1c] ss:$24 sps:$4 sm:$0xff]  }
 0x526   : > { %5260 = vmatpush1.bf16.msra.mxu0 %v16241_v44  ;;  %v16326_v44 = vld [vmem:[%s18238_s7 + $0xb24] ss:$24 sps:$4 sm:$0xff]  }
 0x527   : > { %5893 = vmatpush1.bf16.msra.mxu1 %v16244_v21  ;;  %5261 = vmatprep.subr.bf16.mxu0 %v16249_v33  ;;  %v16321_v21 = vld [vmem:[%s18238_s7 + $0xb18] ss:$24 sps:$4 sm:$0xff]  }
 0x528   : > { %5894 = vmatprep.subr.bf16.mxu1 %v16252_v46  ;;  %v16324_v33 = vld [vmem:[%s18238_s7 + $0xb20] ss:$24 sps:$4 sm:$0xff]   ;;  %v16329_v46 = vld [vmem:[%s18238_s7 + $0xb4c] ss:$24 sps:$4 sm:$0xff]  }
 0x52a   : > { %5262 = vmatpush1.bf16.msra.mxu0 %v16247_v54  ;;  %v16332_v54 = vld [vmem:[%s18238_s7 + $0xb54] ss:$24 sps:$4 sm:$0xff]  }
 0x52b   : > { %5895 = vmatpush1.bf16.msra.mxu1 %v16250_v60  ;;  %5905 = vmatprep.subr.bf16.mxu0 %v16257_v22  ;;  %v16327_v60 = vld [vmem:[%s18238_s7 + $0xb48] ss:$24 sps:$4 sm:$0xff]  }
 0x52c   : > { %5946 = vmatprep.subr.bf16.mxu1 %v16260_v59  ;;  %v16330_v22 = vld [vmem:[%s18238_s7 + $0xb50] ss:$24 sps:$4 sm:$0xff]   ;;  %v16335_v59 = vld [vmem:[%s18238_s7 + $0xb7c] ss:$24 sps:$4 sm:$0xff]  }
 0x52d   : > { %5264 = vmatmul.mubr.bf16.vlgmr.msra.gmra.mrb[16].mxu0 %v20108_v24  ;;  %v16267_v24 = vld [vmem:[%s18238_s7 + $0x968] ss:$24 sps:$4 sm:$0xff]  }
 0x52e   : > { %5897 = vmatmul.mubr.bf16.vlgmr.msra.gmra.mrb[16].mxu1 %v20194_v57  ;;  %5906 = vmatpush1.bf16.msra.mxu0 %v16255_v35  ;;  %v16338_v35 = vld [vmem:[%s18238_s7 + $0xb84] ss:$24 sps:$4 sm:$0xff]  }
 0x52f   : > { %5947 = vmatpush1.bf16.msra.mxu1 %v16258_v53  ;;  %5907 = vmatprep.subr.bf16.mxu0 %v16263_v62  ;;  %v16333_v53 = vld [vmem:[%s18238_s7 + $0xb78] ss:$24 sps:$4 sm:$0xff]  }
 0x530   : > { %5948 = vmatprep.subr.bf16.mxu1 %v16266_v56  ;;  %5937 = vmatprep.mubr.bf16.mxu0 %v20117_v23  ;;  %v16336_v62 = vld [vmem:[%s18238_s7 + $0xb80] ss:$24 sps:$4 sm:$0xff]   ;;  %v16341_v56 = vld [vmem:[%s18238_s7 + $0xbac] ss:$24 sps:$4 sm:$0xff]  }
 0x531   : > { %5978 = vmatprep.mubr.bf16.mxu1 %v20117_v23  ;;  %v16281_v23 = vld [vmem:[%s18238_s7 + $0x9cc] ss:$24 sps:$4 sm:$0xff]  }
 0x532   : > { %5908 = vmatpush1.bf16.msra.mxu0 %v16261_v19  ;;  %v16344_v19 = vld [vmem:[%s18238_s7 + $0xbb4] ss:$24 sps:$4 sm:$0xff]  }
 0x533   : > { %5949 = vmatpush1.bf16.msra.mxu1 %v16264_v41  ;;  %5909 = vmatprep.subr.bf16.mxu0 %v16269_v7  ;;  %v16339_v41 = vld [vmem:[%s18238_s7 + $0xba8] ss:$24 sps:$4 sm:$0xff]  }
 0x534   : > { %5950 = vmatprep.subr.bf16.mxu1 %v16272_v26  ;;  %v16342_v7 = vld [vmem:[%s18238_s7 + $0xbb0] ss:$24 sps:$4 sm:$0xff]   ;;  %v16347_v26 = vld [vmem:[%s18238_s7 + $0xbdc] ss:$24 sps:$4 sm:$0xff]  }
 0x536   : > { %5910 = vmatpush1.bf16.msra.mxu0 %v16267_v24  ;;  %v16350_v24 = vld [vmem:[%s18238_s7 + $0xbe4] ss:$24 sps:$4 sm:$0xff]  }
 0x537   : > { %5951 = vmatpush1.bf16.msra.mxu1 %v16270_v1  ;;  %5911 = vmatprep.subr.bf16.mxu0 %v16275_v15  ;;  %v16345_v1 = vld [vmem:[%s18238_s7 + $0xbd8] ss:$24 sps:$4 sm:$0xff]  }
 0x538   : > { %5952 = vmatprep.subr.bf16.mxu1 %v16278_v12  ;;  %v16348_v15 = vld [vmem:[%s18238_s7 + $0xbe0] ss:$24 sps:$4 sm:$0xff]   ;;  %v16353_v12 = vld [vmem:[%s18238_s7 + $0xc04] ss:$24 sps:$4 sm:$0xff]  }
 0x53a   : > { %5912 = vmatpush1.bf16.msra.mxu0 %v16273_v3  ;;  %v16356_v3 = vld [vmem:[%s18238_s7 + $0xc0c] ss:$24 sps:$4 sm:$0xff]  }
 0x53b   : > { %5953 = vmatpush1.bf16.msra.mxu1 %v16276_v36  ;;  %5913 = vmatprep.subr.bf16.mxu0 %v16281_v23  ;;  %v16351_v36 = vld [vmem:[%s18238_s7 + $0xc00] ss:$24 sps:$4 sm:$0xff]  }
 0x53c   : > { %5954 = vmatprep.subr.bf16.mxu1 %v16284_v25  ;;  %v16354_v23 = vld [vmem:[%s18238_s7 + $0xc08] ss:$24 sps:$4 sm:$0xff]   ;;  %v20275_v25 = vld [vmem:[#allocation2 + $0x20] sm:$0xff] }
 0x53e   : > { %5914 = vmatpush1.bf16.msra.mxu0 %v16279_v47  ;;  %v16359_v47 = vld [vmem:[%s18238_s7 + $0xc34] ss:$24 sps:$4 sm:$0xff]  }
 0x53f   : > { %5955 = vmatpush1.bf16.msra.mxu1 %v16282_v18  ;;  %5915 = vmatprep.subr.bf16.mxu0 %v16287_v14  ;;  %v16362_v18 = vld [vmem:[%s18238_s7 + $0xc3c] ss:$24 sps:$4 sm:$0xff]   ;;  %v20281_v14 = vcombine.high %v20275_v25, %v20275_v25 }
 0x540   : > { %5956 = vmatprep.subr.bf16.mxu1 %v16290_v52  ;;  %v20223_v40 = vpop.f32.mrb[4].mxu0  ;;  %v16357_v52 = vld [vmem:[%s18238_s7 + $0xc30] ss:$24 sps:$4 sm:$0xff]  }
 0x541   : > { %v4474_v32 = vpop.f32.mrb[4].mxu1  ;;  %v20230_v16 = vpop.f32.mrb[5].mxu0 }
 0x542   : > { %v20228_v58 = vadd.f32 %v4474_v32, %v20143_v29  ;;  %v4476_v61 = vpop.f32.mrb[5].mxu1  ;;  %v3950_v2 = vpop.f32.mrb[6].mxu0  ;;  %5916 = vmatpush1.bf16.msra.mxu0 %v16285_v45  ;;  %v16299_v29 = vld [vmem:[%s18238_s7 + $0xa5c] ss:$24 sps:$4 sm:$0xff]   ;;  %v16360_v45 = vld [vmem:[%s18238_s7 + $0xc38] ss:$24 sps:$4 sm:$0xff]  }
 0x543   : > { %v20233_v37 = vadd.f32 %v4476_v61, %v20149_v17  ;;  %v4478_v20 = vpop.f32.mrb[6].mxu1  ;;  %5957 = vmatpush1.bf16.msra.mxu1 %v16288_v4  ;;  %v3951_v10 = vpop.f32.mrb[7].mxu0  ;;  %5917 = vmatprep.subr.bf16.mxu0 %v16293_v34  ;;  %v16297_v17 = vld [vmem:[%s18238_s7 + $0xa58] ss:$24 sps:$4 sm:$0xff]   ;;  %v16365_v4 = vld [vmem:[%s18238_s7 + $0xc64] ss:$24 sps:$4 sm:$0xff]  }
 0x544   : > { %v4479_v42 = vpop.f32.mrb[7].mxu1  ;;  %5958 = vmatprep.subr.bf16.mxu1 %v16296_v43  ;;  %v16368_v34 = vld [vmem:[%s18238_s7 + $0xc6c] ss:$24 sps:$4 sm:$0xff]   ;;  %v16366_v43 = vld [vmem:[%s18238_s7 + $0xc68] ss:$24 sps:$4 sm:$0xff]  }
 0x545   : > { %v16371_v32 = vld [vmem:[%s18238_s7 + $0xc94] ss:$24 sps:$4 sm:$0xff]   ;;  %v16372_v61 = vld [vmem:[%s18238_s7 + $0xc98] ss:$24 sps:$4 sm:$0xff]   ;;  %v16377_v2 = vld [vmem:[%s18238_s7 + $0xcc4] ss:$24 sps:$4 sm:$0xff]  }
 0x546   : > { %5918 = vmatpush1.bf16.msra.mxu0 %v16291_v48  ;;  %v16374_v48 = vld [vmem:[%s18238_s7 + $0xc9c] ss:$24 sps:$4 sm:$0xff]   ;;  %v16380_v20 = vld [vmem:[%s18238_s7 + $0xccc] ss:$24 sps:$4 sm:$0xff]   ;;  %v16375_v10 = vld [vmem:[%s18238_s7 + $0xcc0] ss:$24 sps:$4 sm:$0xff]  }
 0x547   : > { %5959 = vmatpush1.bf16.msra.mxu1 %v16294_v55  ;;  %5919 = vmatprep.subr.bf16.mxu0 %v16299_v29  ;;  %v16369_v55 = vld [vmem:[%s18238_s7 + $0xc90] ss:$24 sps:$4 sm:$0xff]   ;;  %v16383_v29 = vld [vmem:[%s18238_s7 + $0xcf4] ss:$24 sps:$4 sm:$0xff]  }
 0x548   : > { %5960 = vmatprep.subr.bf16.mxu1 %v16302_v5  ;;  %v16378_v42 = vld [vmem:[%s18238_s7 + $0xcc8] ss:$24 sps:$4 sm:$0xff]   ;;  %v16386_v5 = vld [vmem:[%s18238_s7 + $0xcfc] ss:$24 sps:$4 sm:$0xff]  }
 0x54a   : > { %5920 = vmatpush1.bf16.msra.mxu0 %v16297_v17  ;;  %v16381_v17 = vld [vmem:[%s18238_s7 + $0xcf0] ss:$24 sps:$4 sm:$0xff]  }
 0x54b   : > { %5961 = vmatpush1.bf16.msra.mxu1 %v16300_v9  ;;  %5921 = vmatprep.subr.bf16.mxu0 %v16305_v8  ;;  %v16384_v9 = vld [vmem:[%s18238_s7 + $0xcf8] ss:$24 sps:$4 sm:$0xff]   ;;  %v16389_v8 = vld [vmem:[%s18238_s7 + $0xd24] ss:$24 sps:$4 sm:$0xff]  }
 0x54c   : > { %5962 = vmatprep.subr.bf16.mxu1 %v16308_v39  ;;  %v16392_v39 = vld [vmem:[%s18238_s7 + $0xd2c] ss:$24 sps:$4 sm:$0xff]  }
 0x54e   : > { %5922 = vmatpush1.bf16.msra.mxu0 %v16303_v30 }
 0x54f   : > { %5963 = vmatpush1.bf16.msra.mxu1 %v16306_v51  ;;  %5923 = vmatprep.subr.bf16.mxu0 %v16311_v27  ;;  %v16387_v27 = vld [vmem:[%s18238_s7 + $0xd20] ss:$24 sps:$4 sm:$0xff]  }
 0x550   : > { %5964 = vmatprep.subr.bf16.mxu1 %v16314_v6  ;;  %v16390_v6 = vld [vmem:[%s18238_s7 + $0xd28] ss:$24 sps:$4 sm:$0xff]  }
 0x552   : > { %5924 = vmatpush1.bf16.msra.mxu0 %v16309_v63 }
 0x553   : > { %5965 = vmatpush1.bf16.msra.mxu1 %v16312_v11  ;;  %5925 = vmatprep.subr.bf16.mxu0 %v16317_v28 }
 0x554   : > { %5966 = vmatprep.subr.bf16.mxu1 %v16320_v50 }
 0x556   : > { %5926 = vmatpush1.bf16.msra.mxu0 %v16315_v31 }
 0x557   : > { %5967 = vmatpush1.bf16.msra.mxu1 %v16318_v38  ;;  %5927 = vmatprep.subr.bf16.mxu0 %v16323_v49 }
 0x558   : > { %5968 = vmatprep.subr.bf16.mxu1 %v16326_v44 }
 0x55a   : > { %5928 = vmatpush1.bf16.msra.mxu0 %v16321_v21  ;;  %v16395_v21 = vld [vmem:[%s18238_s7 + $0xd54] ss:$24 sps:$4 sm:$0xff]  }
 0x55b   : > { %5969 = vmatpush1.bf16.msra.mxu1 %v16324_v33  ;;  %5929 = vmatprep.subr.bf16.mxu0 %v16329_v46  ;;  %v16398_v33 = vld [vmem:[%s18238_s7 + $0xd5c] ss:$24 sps:$4 sm:$0xff]  }
 0x55c   : > { %5970 = vmatprep.subr.bf16.mxu1 %v16332_v54  ;;  %v16401_v46 = vld [vmem:[%s18238_s7 + $0xd84] ss:$24 sps:$4 sm:$0xff]  }
 0x55d   : > { %v16404_v54 = vld [vmem:[%s18238_s7 + $0xd8c] ss:$24 sps:$4 sm:$0xff]  }
 0x55e   : > { %5930 = vmatpush1.bf16.msra.mxu0 %v16327_v60  ;;  %v16399_v60 = vld [vmem:[%s18238_s7 + $0xd80] ss:$24 sps:$4 sm:$0xff]  }
 0x55f   : > { %5971 = vmatpush1.bf16.msra.mxu1 %v16330_v22  ;;  %5931 = vmatprep.subr.bf16.mxu0 %v16335_v59  ;;  %v16402_v22 = vld [vmem:[%s18238_s7 + $0xd88] ss:$24 sps:$4 sm:$0xff]   ;;  %v16407_v59 = vld [vmem:[%s18238_s7 + $0xdb4] ss:$24 sps:$4 sm:$0xff]  }
 0x560   : > { %5972 = vmatprep.subr.bf16.mxu1 %v16338_v35  ;;  %v16410_v35 = vld [vmem:[%s18238_s7 + $0xdbc] ss:$24 sps:$4 sm:$0xff]  }
 0x562   : > { %5932 = vmatpush1.bf16.msra.mxu0 %v16333_v53  ;;  %v16405_v53 = vld [vmem:[%s18238_s7 + $0xdb0] ss:$24 sps:$4 sm:$0xff]  }
 0x563   : > { %5973 = vmatpush1.bf16.msra.mxu1 %v16336_v62  ;;  %5933 = vmatprep.subr.bf16.mxu0 %v16341_v56  ;;  %v16408_v62 = vld [vmem:[%s18238_s7 + $0xdb8] ss:$24 sps:$4 sm:$0xff]   ;;  %v16413_v56 = vld [vmem:[%s18238_s7 + $0xde4] ss:$24 sps:$4 sm:$0xff]  }
 0x564   : > { %5974 = vmatprep.subr.bf16.mxu1 %v16344_v19  ;;  %v16416_v19 = vld [vmem:[%s18238_s7 + $0xdec] ss:$24 sps:$4 sm:$0xff]  }
 0x566   : > { %5934 = vmatpush1.bf16.msra.mxu0 %v16339_v41  ;;  %v16411_v41 = vld [vmem:[%s18238_s7 + $0xde0] ss:$24 sps:$4 sm:$0xff]  }
 0x567   : > { %5975 = vmatpush1.bf16.msra.mxu1 %v16342_v7  ;;  %5935 = vmatprep.subr.bf16.mxu0 %v16347_v26  ;;  %v16414_v7 = vld [vmem:[%s18238_s7 + $0xde8] ss:$24 sps:$4 sm:$0xff]   ;;  %v16419_v26 = vld [vmem:[%s18238_s7 + $0xe14] ss:$24 sps:$4 sm:$0xff]  }
 0x568   : > { %5976 = vmatprep.subr.bf16.mxu1 %v16350_v24  ;;  %v16422_v24 = vld [vmem:[%s18238_s7 + $0xe1c] ss:$24 sps:$4 sm:$0xff]  }
 0x56a   : > { %5936 = vmatpush1.bf16.msra.mxu0 %v16345_v1  ;;  %v16417_v1 = vld [vmem:[%s18238_s7 + $0xe10] ss:$24 sps:$4 sm:$0xff]  }
 0x56b   : > { %5977 = vmatpush1.bf16.msra.mxu1 %v16348_v15  ;;  %6579 = vmatprep.subr.bf16.mxu0 %v16353_v12  ;;  %v16420_v15 = vld [vmem:[%s18238_s7 + $0xe18] ss:$24 sps:$4 sm:$0xff]   ;;  %v16425_v12 = vld [vmem:[%s18238_s7 + $0xe44] ss:$24 sps:$4 sm:$0xff]  }
 0x56c   : > { %6620 = vmatprep.subr.bf16.mxu1 %v16356_v3  ;;  %v16428_v3 = vld [vmem:[%s18238_s7 + $0xe4c] ss:$24 sps:$4 sm:$0xff]  }
 0x56d   : > { %5938 = vmatmul.mubr.bf16.vlgmr.msra.gmra.mrb[20].mxu0 %v20194_v57 }
 0x56e   : > { %5979 = vmatmul.mubr.bf16.vlgmr.msra.gmra.mrb[20].mxu1 %v20194_v57  ;;  %6580 = vmatpush1.bf16.msra.mxu0 %v16351_v36  ;;  %v16363_v57 = vld [vmem:[%s18238_s7 + $0xc60] ss:$24 sps:$4 sm:$0xff]  }
 0x56f   : > { %6621 = vmatpush1.bf16.msra.mxu1 %v16354_v23  ;;  %6581 = vmatprep.subr.bf16.mxu0 %v16359_v47  ;;  %v16423_v36 = vld [vmem:[%s18238_s7 + $0xe40] ss:$24 sps:$4 sm:$0xff]   ;;  %v16431_v47 = vld [vmem:[%s18238_s7 + $0xe74] ss:$24 sps:$4 sm:$0xff]  }
 0x570   : > { %6622 = vmatprep.subr.bf16.mxu1 %v16362_v18  ;;  %6611 = vmatprep.mubr.bf16.mxu0 %v20281_v14  ;;  %v16426_v23 = vld [vmem:[%s18238_s7 + $0xe48] ss:$24 sps:$4 sm:$0xff]   ;;  %v16434_v18 = vld [vmem:[%s18238_s7 + $0xe7c] ss:$24 sps:$4 sm:$0xff]  }
 0x571   : > { %6652 = vmatprep.mubr.bf16.mxu1 %v20281_v14 }
 0x572   : > { %6582 = vmatpush1.bf16.msra.mxu0 %v16357_v52  ;;  %v16429_v52 = vld [vmem:[%s18238_s7 + $0xe70] ss:$24 sps:$4 sm:$0xff]  }
 0x573   : > { %6623 = vmatpush1.bf16.msra.mxu1 %v16360_v45  ;;  %6583 = vmatprep.subr.bf16.mxu0 %v16365_v4  ;;  %v16432_v45 = vld [vmem:[%s18238_s7 + $0xe78] ss:$24 sps:$4 sm:$0xff]   ;;  %v16437_v4 = vld [vmem:[%s18238_s7 + $0xea4] ss:$24 sps:$4 sm:$0xff]  }
 0x574   : > { %6624 = vmatprep.subr.bf16.mxu1 %v16368_v34  ;;  %v16440_v34 = vld [vmem:[%s18238_s7 + $0xeac] ss:$24 sps:$4 sm:$0xff]  }
 0x576   : > { %6584 = vmatpush1.bf16.msra.mxu0 %v16363_v57  ;;  %v16435_v57 = vld [vmem:[%s18238_s7 + $0xea0] ss:$24 sps:$4 sm:$0xff]  }
 0x577   : > { %6625 = vmatpush1.bf16.msra.mxu1 %v16366_v43  ;;  %6585 = vmatprep.subr.bf16.mxu0 %v16371_v32  ;;  %v16438_v43 = vld [vmem:[%s18238_s7 + $0xea8] ss:$24 sps:$4 sm:$0xff]   ;;  %v16443_v32 = vld [vmem:[%s18238_s7 + $0xed4] ss:$24 sps:$4 sm:$0xff]  }
 0x578   : > { %6626 = vmatprep.subr.bf16.mxu1 %v16374_v48  ;;  %v16446_v48 = vld [vmem:[%s18238_s7 + $0xedc] ss:$24 sps:$4 sm:$0xff]  }
 0x57a   : > { %6586 = vmatpush1.bf16.msra.mxu0 %v16369_v55  ;;  %v16441_v55 = vld [vmem:[%s18238_s7 + $0xed0] ss:$24 sps:$4 sm:$0xff]  }
 0x57b   : > { %6627 = vmatpush1.bf16.msra.mxu1 %v16372_v61  ;;  %6587 = vmatprep.subr.bf16.mxu0 %v16377_v2  ;;  %v16444_v61 = vld [vmem:[%s18238_s7 + $0xed8] ss:$24 sps:$4 sm:$0xff]   ;;  %v16451_v2 = vld [vmem:[%s18238_s7 + $0xc14] ss:$24 sps:$4 sm:$0xff]  }
 0x57c   : > { %6628 = vmatprep.subr.bf16.mxu1 %v16380_v20  ;;  %v16454_v20 = vld [vmem:[%s18238_s7 + $0xf04] ss:$24 sps:$4 sm:$0xff]  }
 0x57e   : > { %6588 = vmatpush1.bf16.msra.mxu0 %v16375_v10  ;;  %v20359_v10 = vld [vmem:[#allocation2 + $0x28] sm:$0xff] }
 0x57f   : > { %6629 = vmatpush1.bf16.msra.mxu1 %v16378_v42  ;;  %6589 = vmatprep.subr.bf16.mxu0 %v16383_v29  ;;  %v16449_v42 = vld [vmem:[%s18238_s7 + $0xc10] ss:$24 sps:$4 sm:$0xff]   ;;  %v16452_v29 = vld [vmem:[%s18238_s7 + $0xf00] ss:$24 sps:$4 sm:$0xff]  }
 0x580   : > { %6630 = vmatprep.subr.bf16.mxu1 %v16386_v5  ;;  %v4515_v30 = vpop.f32.mrb[8].mxu0  ;;  %v20365_v5 = vcombine.low %v20275_v25, %v20275_v25  ;;  %v16455_v25 = vld [vmem:[%s18238_s7 + $0xc40] ss:$24 sps:$4 sm:$0xff]  }
 0x581   : > { %v4556_v51 = vpop.f32.mrb[8].mxu1  ;;  %v20310_v63 = vadd.f32 %v4515_v30, %v20145_v13  ;;  %v4517_v28 = vpop.f32.mrb[9].mxu0  ;;  %v16463_v30 = vld [vmem:[%s18238_s7 + $0xc74] ss:$24 sps:$4 sm:$0xff]  }
 0x582   : > { %v20313_v11 = vadd.f32 %v4556_v51, %v20223_v40  ;;  %v4558_v50 = vpop.f32.mrb[9].mxu1  ;;  %v20316_v31 = vadd.f32 %v4517_v28, %v20151_v0  ;;  %v4519_v49 = vpop.f32.mrb[10].mxu0  ;;  %6590 = vmatpush1.bf16.msra.mxu0 %v16381_v17  ;;  %v16393_v0 = vld [vmem:[%s18238_s7 + $0xd50] ss:$24 sps:$4 sm:$0xff]   ;;  %v16457_v17 = vld [vmem:[%s18238_s7 + $0xc44] ss:$24 sps:$4 sm:$0xff]  }
 0x583   : > { %v20319_v38 = vadd.f32 %v4558_v50, %v20230_v16  ;;  %v4560_v44 = vpop.f32.mrb[10].mxu1  ;;  %6631 = vmatpush1.bf16.msra.mxu1 %v16384_v9  ;;  %v4520_v13 = vpop.f32.mrb[11].mxu0  ;;  %6591 = vmatprep.subr.bf16.mxu0 %v16389_v8  ;;  %v16396_v16 = vld [vmem:[%s18238_s7 + $0xd58] ss:$24 sps:$4 sm:$0xff]   ;;  %v16460_v9 = vld [vmem:[%s18238_s7 + $0xf34] ss:$24 sps:$4 sm:$0xff]   ;;  %v20371_v8 = vcombine.high %v20359_v10, %v20359_v10 }
 0x584   : > { %v4561_v40 = vpop.f32.mrb[11].mxu1  ;;  %6632 = vmatprep.subr.bf16.mxu1 %v16392_v39  ;;  %v16458_v39 = vld [vmem:[%s18238_s7 + $0xf30] ss:$24 sps:$4 sm:$0xff]   ;;  %v16466_v51 = vld [vmem:[%s18238_s7 + $0xf64] ss:$24 sps:$4 sm:$0xff]  }
 0x585   : > { %v16469_v28 = vld [vmem:[%s18238_s7 + $0xca4] ss:$24 sps:$4 sm:$0xff]   ;;  %v16472_v50 = vld [vmem:[%s18238_s7 + $0xf94] ss:$24 sps:$4 sm:$0xff]   ;;  %v16470_v49 = vld [vmem:[%s18238_s7 + $0xf90] ss:$24 sps:$4 sm:$0xff]  }
 0x586   : > { %6592 = vmatpush1.bf16.msra.mxu0 %v16387_v27  ;;  %v16461_v27 = vld [vmem:[%s18238_s7 + $0xc70] ss:$24 sps:$4 sm:$0xff]   ;;  %v16475_v44 = vld [vmem:[%s18238_s7 + $0xcd4] ss:$24 sps:$4 sm:$0xff]   ;;  %v16478_v13 = vld [vmem:[%s18238_s7 + $0xfc4] ss:$24 sps:$4 sm:$0xff]  }
 0x587   : > { %6633 = vmatpush1.bf16.msra.mxu1 %v16390_v6  ;;  %6593 = vmatprep.subr.bf16.mxu0 %v16395_v21  ;;  %v16464_v6 = vld [vmem:[%s18238_s7 + $0xf60] ss:$24 sps:$4 sm:$0xff]   ;;  %v16473_v40 = vld [vmem:[%s18238_s7 + $0xcd0] ss:$24 sps:$4 sm:$0xff]  }
 0x588   : > { %6634 = vmatprep.subr.bf16.mxu1 %v16398_v33  ;;  %v16476_v21 = vld [vmem:[%s18238_s7 + $0xfc0] ss:$24 sps:$4 sm:$0xff]   ;;  %v16481_v33 = vld [vmem:[%s18238_s7 + $0xd04] ss:$24 sps:$4 sm:$0xff]  }
 0x58a   : > { %6594 = vmatpush1.bf16.msra.mxu0 %v16393_v0  ;;  %v16484_v0 = vld [vmem:[%s18238_s7 + $0xff4] ss:$24 sps:$4 sm:$0xff]  }
 0x58b   : > { %6635 = vmatpush1.bf16.msra.mxu1 %v16396_v16  ;;  %6595 = vmatprep.subr.bf16.mxu0 %v16401_v46  ;;  %v16479_v16 = vld [vmem:[%s18238_s7 + $0xd00] ss:$24 sps:$4 sm:$0xff]   ;;  %v16482_v46 = vld [vmem:[%s18238_s7 + $0xff0] ss:$24 sps:$4 sm:$0xff]  }
 0x58c   : > { %6636 = vmatprep.subr.bf16.mxu1 %v16404_v54  ;;  %v16487_v54 = vld [vmem:[%s18238_s7 + $0xd34] ss:$24 sps:$4 sm:$0xff]  }
 0x58e   : > { %6596 = vmatpush1.bf16.msra.mxu0 %v16399_v60  ;;  %v16490_v60 = vld [vmem:[%s18238_s7 + $0x1024] ss:$24 sps:$4 sm:$0xff]  }
 0x58f   : > { %6637 = vmatpush1.bf16.msra.mxu1 %v16402_v22  ;;  %6597 = vmatprep.subr.bf16.mxu0 %v16407_v59 }
 0x590   : > { %6638 = vmatprep.subr.bf16.mxu1 %v16410_v35  ;;  %v16485_v35 = vld [vmem:[%s18238_s7 + $0xd30] ss:$24 sps:$4 sm:$0xff]  }
 0x592   : > { %6598 = vmatpush1.bf16.msra.mxu0 %v16405_v53  ;;  %v16488_v53 = vld [vmem:[%s18238_s7 + $0x1020] ss:$24 sps:$4 sm:$0xff]  }
 0x593   : > { %6639 = vmatpush1.bf16.msra.mxu1 %v16408_v62  ;;  %6599 = vmatprep.subr.bf16.mxu0 %v16413_v56 }
 0x594   : > { %6640 = vmatprep.subr.bf16.mxu1 %v16416_v19 }
 0x596   : > { %6600 = vmatpush1.bf16.msra.mxu0 %v16411_v41 }
 0x597   : > { %6641 = vmatpush1.bf16.msra.mxu1 %v16414_v7  ;;  %6601 = vmatprep.subr.bf16.mxu0 %v16419_v26 }
 0x598   : > { %6642 = vmatprep.subr.bf16.mxu1 %v16422_v24 }
 0x59a   : > { %6602 = vmatpush1.bf16.msra.mxu0 %v16417_v1 }
 0x59b   : > { %6643 = vmatpush1.bf16.msra.mxu1 %v16420_v15  ;;  %6603 = vmatprep.subr.bf16.mxu0 %v16425_v12  ;;  %v16493_v15 = vld [vmem:[%s18238_s7 + $0xd64] ss:$24 sps:$4 sm:$0xff]   ;;  %v16496_v12 = vld [vmem:[%s18238_s7 + $0x1054] ss:$24 sps:$4 sm:$0xff]  }
 0x59c   : > { %6644 = vmatprep.subr.bf16.mxu1 %v16428_v3  ;;  %v16499_v3 = vld [vmem:[%s18238_s7 + $0xd94] ss:$24 sps:$4 sm:$0xff]  }
 0x59e   : > { %6604 = vmatpush1.bf16.msra.mxu0 %v16423_v36  ;;  %v16502_v36 = vld [vmem:[%s18238_s7 + $0x1084] ss:$24 sps:$4 sm:$0xff]  }
 0x59f   : > { %6645 = vmatpush1.bf16.msra.mxu1 %v16426_v23  ;;  %6605 = vmatprep.subr.bf16.mxu0 %v16431_v47  ;;  %v16497_v23 = vld [vmem:[%s18238_s7 + $0xd90] ss:$24 sps:$4 sm:$0xff]   ;;  %v16500_v47 = vld [vmem:[%s18238_s7 + $0x1080] ss:$24 sps:$4 sm:$0xff]  }
 0x5a0   : > { %6646 = vmatprep.subr.bf16.mxu1 %v16434_v18  ;;  %v16505_v18 = vld [vmem:[%s18238_s7 + $0xdc4] ss:$24 sps:$4 sm:$0xff]  }
 0x5a2   : > { %6606 = vmatpush1.bf16.msra.mxu0 %v16429_v52  ;;  %v16508_v52 = vld [vmem:[%s18238_s7 + $0x10b4] ss:$24 sps:$4 sm:$0xff]  }
 0x5a3   : > { %6647 = vmatpush1.bf16.msra.mxu1 %v16432_v45  ;;  %6607 = vmatprep.subr.bf16.mxu0 %v16437_v4  ;;  %v16503_v45 = vld [vmem:[%s18238_s7 + $0xdc0] ss:$24 sps:$4 sm:$0xff]   ;;  %v16506_v4 = vld [vmem:[%s18238_s7 + $0x10b0] ss:$24 sps:$4 sm:$0xff]  }
 0x5a4   : > { %6648 = vmatprep.subr.bf16.mxu1 %v16440_v34  ;;  %v16511_v34 = vld [vmem:[%s18238_s7 + $0xdf4] ss:$24 sps:$4 sm:$0xff]  }
 0x5a6   : > { %6608 = vmatpush1.bf16.msra.mxu0 %v16435_v57  ;;  %v16514_v57 = vld [vmem:[%s18238_s7 + $0x10e4] ss:$24 sps:$4 sm:$0xff]  }
 0x5a7   : > { %6649 = vmatpush1.bf16.msra.mxu1 %v16438_v43  ;;  %6609 = vmatprep.subr.bf16.mxu0 %v16443_v32  ;;  %v16509_v43 = vld [vmem:[%s18238_s7 + $0xdf0] ss:$24 sps:$4 sm:$0xff]   ;;  %v16512_v32 = vld [vmem:[%s18238_s7 + $0x10e0] ss:$24 sps:$4 sm:$0xff]  }
 0x5a8   : > { %6650 = vmatprep.subr.bf16.mxu1 %v16446_v48  ;;  %v16517_v48 = vld [vmem:[%s18238_s7 + $0xe24] ss:$24 sps:$4 sm:$0xff]  }
 0x5aa   : > { %6610 = vmatpush1.bf16.msra.mxu0 %v16441_v55  ;;  %v16520_v55 = vld [vmem:[%s18238_s7 + $0x1114] ss:$24 sps:$4 sm:$0xff]  }
 0x5ab   : > { %6651 = vmatpush1.bf16.msra.mxu1 %v16444_v61  ;;  %6661 = vmatprep.subr.bf16.mxu0 %v16451_v2  ;;  %v16515_v61 = vld [vmem:[%s18238_s7 + $0xe20] ss:$24 sps:$4 sm:$0xff]   ;;  %v16518_v2 = vld [vmem:[%s18238_s7 + $0x1110] ss:$24 sps:$4 sm:$0xff]  }
 0x5ac   : > { %7294 = vmatprep.subr.bf16.mxu1 %v16454_v20  ;;  %v16523_v20 = vld [vmem:[%s18238_s7 + $0xe54] ss:$24 sps:$4 sm:$0xff]  }
 0x5ad   : > { %6612 = vmatmul.mubr.bf16.vlgmr.msra.gmra.mrb[24].mxu0 %v20365_v5 }
 0x5ae   : > { %6653 = vmatmul.mubr.bf16.vlgmr.msra.gmra.mrb[24].mxu1 %v20365_v5  ;;  %6662 = vmatpush1.bf16.msra.mxu0 %v16449_v42  ;;  %v16526_v42 = vld [vmem:[%s18238_s7 + $0x1144] ss:$24 sps:$4 sm:$0xff]  }
 0x5af   : > { %7295 = vmatpush1.bf16.msra.mxu1 %v16452_v29  ;;  %6663 = vmatprep.subr.bf16.mxu0 %v16457_v17  ;;  %v16521_v29 = vld [vmem:[%s18238_s7 + $0xe50] ss:$24 sps:$4 sm:$0xff]   ;;  %v16524_v17 = vld [vmem:[%s18238_s7 + $0x1140] ss:$24 sps:$4 sm:$0xff]  }
 0x5b0   : > { %7296 = vmatprep.subr.bf16.mxu1 %v16460_v9  ;;  %6693 = vmatprep.mubr.bf16.mxu0 %v20281_v14  ;;  %v16467_v14 = vld [vmem:[%s18238_s7 + $0xca0] ss:$24 sps:$4 sm:$0xff]   ;;  %v16529_v9 = vld [vmem:[%s18238_s7 + $0xe84] ss:$24 sps:$4 sm:$0xff]  }
 0x5b1   : > { %7326 = vmatprep.mubr.bf16.mxu1 %v20371_v8 }
 0x5b2   : > { %6664 = vmatpush1.bf16.msra.mxu0 %v16455_v25  ;;  %v16532_v25 = vld [vmem:[%s18238_s7 + $0x1174] ss:$24 sps:$4 sm:$0xff]  }
 0x5b3   : > { %7297 = vmatpush1.bf16.msra.mxu1 %v16458_v39  ;;  %6665 = vmatprep.subr.bf16.mxu0 %v16463_v30  ;;  %v16527_v39 = vld [vmem:[%s18238_s7 + $0xe80] ss:$24 sps:$4 sm:$0xff]   ;;  %v16530_v30 = vld [vmem:[%s18238_s7 + $0x1170] ss:$24 sps:$4 sm:$0xff]  }
 0x5b4   : > { %7298 = vmatprep.subr.bf16.mxu1 %v16466_v51  ;;  %v16535_v51 = vld [vmem:[%s18238_s7 + $0xeb4] ss:$24 sps:$4 sm:$0xff]  }
 0x5b6   : > { %6666 = vmatpush1.bf16.msra.mxu0 %v16461_v27  ;;  %v16538_v27 = vld [vmem:[%s18238_s7 + $0x11a4] ss:$24 sps:$4 sm:$0xff]  }
 0x5b7   : > { %7299 = vmatpush1.bf16.msra.mxu1 %v16464_v6  ;;  %6667 = vmatprep.subr.bf16.mxu0 %v16469_v28  ;;  %v16533_v6 = vld [vmem:[%s18238_s7 + $0xeb0] ss:$24 sps:$4 sm:$0xff]   ;;  %v16536_v28 = vld [vmem:[%s18238_s7 + $0x11a0] ss:$24 sps:$4 sm:$0xff]  }
 0x5b8   : > { %7300 = vmatprep.subr.bf16.mxu1 %v16472_v50  ;;  %v16541_v50 = vld [vmem:[%s18238_s7 + $0xee4] ss:$24 sps:$4 sm:$0xff]  }
 0x5ba   : > { %6668 = vmatpush1.bf16.msra.mxu0 %v16467_v14  ;;  %v16544_v14 = vld [vmem:[%s18238_s7 + $0x11d4] ss:$24 sps:$4 sm:$0xff]  }
 0x5bb   : > { %7301 = vmatpush1.bf16.msra.mxu1 %v16470_v49  ;;  %6669 = vmatprep.subr.bf16.mxu0 %v16475_v44  ;;  %v16539_v49 = vld [vmem:[%s18238_s7 + $0xee0] ss:$24 sps:$4 sm:$0xff]   ;;  %v16542_v44 = vld [vmem:[%s18238_s7 + $0x11d0] ss:$24 sps:$4 sm:$0xff]  }
 0x5bc   : > { %7302 = vmatprep.subr.bf16.mxu1 %v16478_v13  ;;  %v16549_v13 = vld [vmem:[%s18238_s7 + $0xf0c] ss:$24 sps:$4 sm:$0xff]  }
 0x5be   : > { %6670 = vmatpush1.bf16.msra.mxu0 %v16473_v40  ;;  %v16552_v40 = vld [vmem:[%s18238_s7 + $0xf14] ss:$24 sps:$4 sm:$0xff]  }
 0x5bf   : > { %7303 = vmatpush1.bf16.msra.mxu1 %v16476_v21  ;;  %6671 = vmatprep.subr.bf16.mxu0 %v16481_v33  ;;  %v16547_v21 = vld [vmem:[%s18238_s7 + $0xf08] ss:$24 sps:$4 sm:$0xff]   ;;  %v20452_v33 = vcombine.low %v20359_v10, %v20359_v10  ;;  %v16553_v10 = vld [vmem:[%s18238_s7 + $0xf38] ss:$24 sps:$4 sm:$0xff]  }
 0x5c0   : > { %7304 = vmatprep.subr.bf16.mxu1 %v16484_v0  ;;  %v5183_v22 = vpop.f32.mrb[12].mxu0  ;;  %v16550_v0 = vld [vmem:[%s18238_s7 + $0xf10] ss:$24 sps:$4 sm:$0xff]  }
 0x5c1   : > { %v5224_v59 = vpop.f32.mrb[12].mxu1  ;;  %v20400_v62 = vadd.f32 %v5183_v22, %v20228_v58  ;;  %v5185_v19 = vpop.f32.mrb[13].mxu0  ;;  %v16564_v22 = vld [vmem:[%s18238_s7 + $0xf74] ss:$24 sps:$4 sm:$0xff]  }
 0x5c2   : > { %v20403_v56 = vadd.f32 %v5224_v59, %v20310_v63  ;;  %v5226_v41 = vpop.f32.mrb[13].mxu1  ;;  %v20406_v7 = vadd.f32 %v5185_v19, %v20233_v37  ;;  %v5187_v24 = vpop.f32.mrb[14].mxu0  ;;  %6672 = vmatpush1.bf16.msra.mxu0 %v16479_v16  ;;  %v16491_v37 = vld [vmem:[%s18238_s7 + $0xd60] ss:$24 sps:$4 sm:$0xff]   ;;  %v16555_v16 = vld [vmem:[%s18238_s7 + $0xf3c] ss:$24 sps:$4 sm:$0xff]  }
 0x5c3   : > { %v20409_v26 = vadd.f32 %v5226_v41, %v20316_v31  ;;  %v5228_v1 = vpop.f32.mrb[14].mxu1  ;;  %7305 = vmatpush1.bf16.msra.mxu1 %v16482_v46  ;;  %v5188_v58 = vpop.f32.mrb[15].mxu0  ;;  %6673 = vmatprep.subr.bf16.mxu0 %v16487_v54  ;;  %v16494_v31 = vld [vmem:[%s18238_s7 + $0x1050] ss:$24 sps:$4 sm:$0xff]   ;;  %v16558_v46 = vld [vmem:[%s18238_s7 + $0xf44] ss:$24 sps:$4 sm:$0xff]  }
 0x5c4   : > { %v5229_v63 = vpop.f32.mrb[15].mxu1  ;;  %7306 = vmatprep.subr.bf16.mxu1 %v16490_v60  ;;  %v16556_v54 = vld [vmem:[%s18238_s7 + $0xf40] ss:$24 sps:$4 sm:$0xff]   ;;  %v16561_v60 = vld [vmem:[%s18238_s7 + $0xf6c] ss:$24 sps:$4 sm:$0xff]  }
 0x5c5   : > { %v16562_v59 = vld [vmem:[%s18238_s7 + $0xf70] ss:$24 sps:$4 sm:$0xff]   ;;  %v16568_v41 = vld [vmem:[%s18238_s7 + $0xfa0] ss:$24 sps:$4 sm:$0xff]   ;;  %v16576_v24 = vld [vmem:[%s18238_s7 + $0xfd4] ss:$24 sps:$4 sm:$0xff]  }
 0x5c6   : > { %6674 = vmatpush1.bf16.msra.mxu0 %v16485_v35  ;;  %v16567_v35 = vld [vmem:[%s18238_s7 + $0xf9c] ss:$24 sps:$4 sm:$0xff]   ;;  %v16565_v19 = vld [vmem:[%s18238_s7 + $0xf98] ss:$24 sps:$4 sm:$0xff]   ;;  %v16571_v1 = vld [vmem:[%s18238_s7 + $0xfc8] ss:$24 sps:$4 sm:$0xff]  }
 0x5c7   : > { %7307 = vmatpush1.bf16.msra.mxu1 %v16488_v53  ;;  %6675 = vmatprep.subr.bf16.mxu0 %v16493_v15  ;;  %v16570_v53 = vld [vmem:[%s18238_s7 + $0xfa4] ss:$24 sps:$4 sm:$0xff]   ;;  %v16574_v58 = vld [vmem:[%s18238_s7 + $0xfd0] ss:$24 sps:$4 sm:$0xff]  }
 0x5c8   : > { %7308 = vmatprep.subr.bf16.mxu1 %v16496_v12  ;;  %v16579_v63 = vld [vmem:[%s18238_s7 + $0xffc] ss:$24 sps:$4 sm:$0xff]   ;;  %v16577_v12 = vld [vmem:[%s18238_s7 + $0xff8] ss:$24 sps:$4 sm:$0xff]  }
 0x5c9   : > { %v16582_v15 = vld [vmem:[%s18238_s7 + $0x1004] ss:$24 sps:$4 sm:$0xff]  }
 0x5ca   : > { %6676 = vmatpush1.bf16.msra.mxu0 %v16491_v37  ;;  %v16580_v37 = vld [vmem:[%s18238_s7 + $0x1000] ss:$24 sps:$4 sm:$0xff]  }
 0x5cb   : > { %7309 = vmatpush1.bf16.msra.mxu1 %v16494_v31  ;;  %6677 = vmatprep.subr.bf16.mxu0 %v16499_v3  ;;  %v16585_v31 = vld [vmem:[%s18238_s7 + $0x102c] ss:$24 sps:$4 sm:$0xff]  }
 0x5cc   : > { %7310 = vmatprep.subr.bf16.mxu1 %v16502_v36  ;;  %v16588_v3 = vld [vmem:[%s18238_s7 + $0x1034] ss:$24 sps:$4 sm:$0xff]  }
 0x5ce   : > { %6678 = vmatpush1.bf16.msra.mxu0 %v16497_v23 }
 0x5cf   : > { %7311 = vmatpush1.bf16.msra.mxu1 %v16500_v47  ;;  %6679 = vmatprep.subr.bf16.mxu0 %v16505_v18  ;;  %v16583_v47 = vld [vmem:[%s18238_s7 + $0x1028] ss:$24 sps:$4 sm:$0xff]  }
 0x5d0   : > { %7312 = vmatprep.subr.bf16.mxu1 %v16508_v52  ;;  %v16586_v18 = vld [vmem:[%s18238_s7 + $0x1030] ss:$24 sps:$4 sm:$0xff]  }
 0x5d2   : > { %6680 = vmatpush1.bf16.msra.mxu0 %v16503_v45 }
 0x5d3   : > { %7313 = vmatpush1.bf16.msra.mxu1 %v16506_v4  ;;  %6681 = vmatprep.subr.bf16.mxu0 %v16511_v34 }
 0x5d4   : > { %7314 = vmatprep.subr.bf16.mxu1 %v16514_v57 }
 0x5d6   : > { %6682 = vmatpush1.bf16.msra.mxu0 %v16509_v43 }
 0x5d7   : > { %7315 = vmatpush1.bf16.msra.mxu1 %v16512_v32  ;;  %6683 = vmatprep.subr.bf16.mxu0 %v16517_v48 }
 0x5d8   : > { %7316 = vmatprep.subr.bf16.mxu1 %v16520_v55  ;;  %v16591_v55 = vld [vmem:[%s18238_s7 + $0x105c] ss:$24 sps:$4 sm:$0xff]  }
 0x5da   : > { %6684 = vmatpush1.bf16.msra.mxu0 %v16515_v61  ;;  %v16594_v61 = vld [vmem:[%s18238_s7 + $0x1064] ss:$24 sps:$4 sm:$0xff]  }
 0x5db   : > { %7317 = vmatpush1.bf16.msra.mxu1 %v16518_v2  ;;  %6685 = vmatprep.subr.bf16.mxu0 %v16523_v20  ;;  %v16597_v2 = vld [vmem:[%s18238_s7 + $0x108c] ss:$24 sps:$4 sm:$0xff]  }
 0x5dc   : > { %7318 = vmatprep.subr.bf16.mxu1 %v16526_v42  ;;  %v16600_v20 = vld [vmem:[%s18238_s7 + $0x1094] ss:$24 sps:$4 sm:$0xff]   ;;  %v16595_v42 = vld [vmem:[%s18238_s7 + $0x1088] ss:$24 sps:$4 sm:$0xff]  }
 0x5de   : > { %6686 = vmatpush1.bf16.msra.mxu0 %v16521_v29  ;;  %v16598_v29 = vld [vmem:[%s18238_s7 + $0x1090] ss:$24 sps:$4 sm:$0xff]  }
 0x5df   : > { %7319 = vmatpush1.bf16.msra.mxu1 %v16524_v17  ;;  %6687 = vmatprep.subr.bf16.mxu0 %v16529_v9  ;;  %v16603_v17 = vld [vmem:[%s18238_s7 + $0x10bc] ss:$24 sps:$4 sm:$0xff]  }
 0x5e0   : > { %7320 = vmatprep.subr.bf16.mxu1 %v16532_v25  ;;  %v16606_v9 = vld [vmem:[%s18238_s7 + $0x10c4] ss:$24 sps:$4 sm:$0xff]   ;;  %v16601_v25 = vld [vmem:[%s18238_s7 + $0x10b8] ss:$24 sps:$4 sm:$0xff]  }
 0x5e2   : > { %6688 = vmatpush1.bf16.msra.mxu0 %v16527_v39  ;;  %v16604_v39 = vld [vmem:[%s18238_s7 + $0x10c0] ss:$24 sps:$4 sm:$0xff]  }
 0x5e3   : > { %7321 = vmatpush1.bf16.msra.mxu1 %v16530_v30  ;;  %6689 = vmatprep.subr.bf16.mxu0 %v16535_v51  ;;  %v16609_v30 = vld [vmem:[%s18238_s7 + $0x10ec] ss:$24 sps:$4 sm:$0xff]  }
 0x5e4   : > { %7322 = vmatprep.subr.bf16.mxu1 %v16538_v27  ;;  %v16612_v51 = vld [vmem:[%s18238_s7 + $0x10f4] ss:$24 sps:$4 sm:$0xff]   ;;  %v16607_v27 = vld [vmem:[%s18238_s7 + $0x10e8] ss:$24 sps:$4 sm:$0xff]  }
 0x5e6   : > { %6690 = vmatpush1.bf16.msra.mxu0 %v16533_v6  ;;  %v16610_v6 = vld [vmem:[%s18238_s7 + $0x10f0] ss:$24 sps:$4 sm:$0xff]  }
 0x5e7   : > { %7323 = vmatpush1.bf16.msra.mxu1 %v16536_v28  ;;  %6691 = vmatprep.subr.bf16.mxu0 %v16541_v50  ;;  %v16615_v28 = vld [vmem:[%s18238_s7 + $0x111c] ss:$24 sps:$4 sm:$0xff]  }
 0x5e8   : > { %7324 = vmatprep.subr.bf16.mxu1 %v16544_v14  ;;  %v16618_v50 = vld [vmem:[%s18238_s7 + $0x1124] ss:$24 sps:$4 sm:$0xff]   ;;  %v16613_v14 = vld [vmem:[%s18238_s7 + $0x1118] ss:$24 sps:$4 sm:$0xff]  }
 0x5ea   : > { %6692 = vmatpush1.bf16.msra.mxu0 %v16539_v49  ;;  %v16616_v49 = vld [vmem:[%s18238_s7 + $0x1120] ss:$24 sps:$4 sm:$0xff]  }
 0x5eb   : > { %7325 = vmatpush1.bf16.msra.mxu1 %v16542_v44  ;;  %7335 = vmatprep.subr.bf16.mxu0 %v16549_v13  ;;  %v16621_v44 = vld [vmem:[%s18238_s7 + $0x114c] ss:$24 sps:$4 sm:$0xff]  }
 0x5ec   : > { %7376 = vmatprep.subr.bf16.mxu1 %v16552_v40  ;;  %v16624_v13 = vld [vmem:[%s18238_s7 + $0x1154] ss:$24 sps:$4 sm:$0xff]   ;;  %v16619_v40 = vld [vmem:[%s18238_s7 + $0x1148] ss:$24 sps:$4 sm:$0xff]  }
 0x5ed   : > { %6694 = vmatmul.mubr.bf16.vlgmr.msra.gmra.mrb[28].mxu0 %v20365_v5  ;;  %v16559_v5 = vld [vmem:[%s18238_s7 + $0xf68] ss:$24 sps:$4 sm:$0xff]  }
 0x5ee   : > { %7327 = vmatmul.mubr.bf16.vlgmr.msra.gmra.mrb[28].mxu1 %v20452_v33  ;;  %7336 = vmatpush1.bf16.msra.mxu0 %v16547_v21  ;;  %v16622_v21 = vld [vmem:[%s18238_s7 + $0x1150] ss:$24 sps:$4 sm:$0xff]  }
 0x5ef   : > { %7377 = vmatpush1.bf16.msra.mxu1 %v16550_v0  ;;  %7337 = vmatprep.subr.bf16.mxu0 %v16555_v16  ;;  %v16627_v0 = vld [vmem:[%s18238_s7 + $0x117c] ss:$24 sps:$4 sm:$0xff]  }
 0x5f0   : > { %7378 = vmatprep.subr.bf16.mxu1 %v16558_v46  ;;  %7367 = vmatprep.mubr.bf16.mxu0 %v20371_v8  ;;  %v16630_v16 = vld [vmem:[%s18238_s7 + $0x1184] ss:$24 sps:$4 sm:$0xff]   ;;  %v16625_v46 = vld [vmem:[%s18238_s7 + $0x1178] ss:$24 sps:$4 sm:$0xff]  }
 0x5f1   : > { %7408 = vmatprep.mubr.bf16.mxu1 %v20371_v8  ;;  %v16573_v8 = vld [vmem:[%s18238_s7 + $0xfcc] ss:$24 sps:$4 sm:$0xff]  }
 0x5f2   : > { %7338 = vmatpush1.bf16.msra.mxu0 %v16553_v10  ;;  %v16628_v10 = vld [vmem:[%s18238_s7 + $0x1180] ss:$24 sps:$4 sm:$0xff]  }
 0x5f3   : > { %7379 = vmatpush1.bf16.msra.mxu1 %v16556_v54  ;;  %7339 = vmatprep.subr.bf16.mxu0 %v16561_v60  ;;  %v16633_v54 = vld [vmem:[%s18238_s7 + $0x11ac] ss:$24 sps:$4 sm:$0xff]  }
 0x5f4   : > { %7380 = vmatprep.subr.bf16.mxu1 %v16564_v22  ;;  %v16636_v60 = vld [vmem:[%s18238_s7 + $0x11b4] ss:$24 sps:$4 sm:$0xff]   ;;  %v16631_v22 = vld [vmem:[%s18238_s7 + $0x11a8] ss:$24 sps:$4 sm:$0xff]  }
 0x5f6   : > { %7340 = vmatpush1.bf16.msra.mxu0 %v16559_v5  ;;  %v16634_v5 = vld [vmem:[%s18238_s7 + $0x11b0] ss:$24 sps:$4 sm:$0xff]  }
 0x5f7   : > { %7381 = vmatpush1.bf16.msra.mxu1 %v16562_v59  ;;  %7341 = vmatprep.subr.bf16.mxu0 %v16567_v35  ;;  %v16639_v59 = vld [vmem:[%s18238_s7 + $0x11dc] ss:$24 sps:$4 sm:$0xff]  }
 0x5f8   : > { %7382 = vmatprep.subr.bf16.mxu1 %v16570_v53  ;;  %v16642_v35 = vld [vmem:[%s18238_s7 + $0x11e4] ss:$24 sps:$4 sm:$0xff]   ;;  %v16637_v53 = vld [vmem:[%s18238_s7 + $0x11d8] ss:$24 sps:$4 sm:$0xff]  }
 0x5fa   : > { %7342 = vmatpush1.bf16.msra.mxu0 %v16565_v19  ;;  %v16640_v19 = vld [vmem:[%s18238_s7 + $0x11e0] ss:$24 sps:$4 sm:$0xff]  }
 0x5fb   : > { %7383 = vmatpush1.bf16.msra.mxu1 %v16568_v41  ;;  %7343 = vmatprep.subr.bf16.mxu0 %v16573_v8  ;;  %v16645_v41 = vld [vmem:[%s18238_s7 + $0x1204] ss:$24 sps:$4 sm:$0xff]  }
 0x5fc   : > { %7384 = vmatprep.subr.bf16.mxu1 %v16576_v24  ;;  %v16648_v8 = vld [vmem:[%s18238_s7 + $0x120c] ss:$24 sps:$4 sm:$0xff]   ;;  %v16643_v24 = vld [vmem:[%s18238_s7 + $0x1200] ss:$24 sps:$4 sm:$0xff]  }
 0x5fe   : > { %7344 = vmatpush1.bf16.msra.mxu0 %v16571_v1  ;;  %v16646_v1 = vld [vmem:[%s18238_s7 + $0x1208] ss:$24 sps:$4 sm:$0xff]  }
 0x5ff   : > { %7385 = vmatpush1.bf16.msra.mxu1 %v16574_v58  ;;  %7345 = vmatprep.subr.bf16.mxu0 %v16579_v63  ;;  %v20535_v58 = vld [vmem:[#allocation2 + $0x30] sm:$0xff]  ;;  %v16651_v63 = vld [vmem:[%s18238_s7 + $0x1234] ss:$24 sps:$4 sm:$0xff]  }
 0x600   : > { %7386 = vmatprep.subr.bf16.mxu1 %v16582_v15  ;;  %v5265_v36 = vpop.f32.mrb[16].mxu0  ;;  %v16654_v15 = vld [vmem:[%s18238_s7 + $0x123c] ss:$24 sps:$4 sm:$0xff]  }
 0x601   : > { %v5898_v23 = vpop.f32.mrb[16].mxu1  ;;  %v20484_v52 = vadd.f32 %v5265_v36, %v20313_v11  ;;  %v5267_v4 = vpop.f32.mrb[17].mxu0  ;;  %v16660_v36 = vld [vmem:[%s18238_s7 + $0x126c] ss:$24 sps:$4 sm:$0xff]  }
 0x602   : > { %v20487_v45 = vadd.f32 %v5898_v23, %v20400_v62  ;;  %v5900_v34 = vpop.f32.mrb[17].mxu1  ;;  %v20490_v57 = vadd.f32 %v5267_v4, %v20319_v38  ;;  %v5269_v32 = vpop.f32.mrb[18].mxu0  ;;  %7346 = vmatpush1.bf16.msra.mxu0 %v16577_v12  ;;  %v16589_v38 = vld [vmem:[%s18238_s7 + $0x1058] ss:$24 sps:$4 sm:$0xff]   ;;  %v20541_v12 = vcombine.high %v20535_v58, %v20535_v58  ;;  %v16658_v23 = vld [vmem:[%s18238_s7 + $0x1268] ss:$24 sps:$4 sm:$0xff]  }
 0x603   : > { %v20493_v43 = vadd.f32 %v5900_v34, %v20406_v7  ;;  %v5902_v48 = vpop.f32.mrb[18].mxu1  ;;  %7387 = vmatpush1.bf16.msra.mxu1 %v16580_v37  ;;  %v5270_v11 = vpop.f32.mrb[19].mxu0  ;;  %7347 = vmatprep.subr.bf16.mxu0 %v16585_v31  ;;  %v16592_v7 = vld [vmem:[%s18238_s7 + $0x1060] ss:$24 sps:$4 sm:$0xff]   ;;  %v16649_v37 = vld [vmem:[%s18238_s7 + $0x1230] ss:$24 sps:$4 sm:$0xff]  }
 0x604   : > { %v5903_v62 = vpop.f32.mrb[19].mxu1  ;;  %7388 = vmatprep.subr.bf16.mxu1 %v16588_v3  ;;  %v16652_v31 = vld [vmem:[%s18238_s7 + $0x1238] ss:$24 sps:$4 sm:$0xff]   ;;  %v16657_v3 = vld [vmem:[%s18238_s7 + $0x1264] ss:$24 sps:$4 sm:$0xff]  }
 0x605   : > { %v16661_v4 = vld [vmem:[%s18238_s7 + $0x1290] ss:$24 sps:$4 sm:$0xff]   ;;  %v16669_v32 = vld [vmem:[%s18238_s7 + $0x12c4] ss:$24 sps:$4 sm:$0xff]   ;;  %v16667_v11 = vld [vmem:[%s18238_s7 + $0x12c0] ss:$24 sps:$4 sm:$0xff]  }
 0x606   : > { %7348 = vmatpush1.bf16.msra.mxu0 %v16583_v47  ;;  %v16663_v47 = vld [vmem:[%s18238_s7 + $0x1294] ss:$24 sps:$4 sm:$0xff]   ;;  %v16664_v34 = vld [vmem:[%s18238_s7 + $0x1298] ss:$24 sps:$4 sm:$0xff]   ;;  %v16670_v62 = vld [vmem:[%s18238_s7 + $0x12c8] ss:$24 sps:$4 sm:$0xff]  }
 0x607   : > { %7389 = vmatpush1.bf16.msra.mxu1 %v16586_v18  ;;  %7349 = vmatprep.subr.bf16.mxu0 %v16591_v55  ;;  %v16666_v18 = vld [vmem:[%s18238_s7 + $0x129c] ss:$24 sps:$4 sm:$0xff]   ;;  %v16672_v48 = vld [vmem:[%s18238_s7 + $0x12cc] ss:$24 sps:$4 sm:$0xff]  }
 0x608   : > { %7390 = vmatprep.subr.bf16.mxu1 %v16594_v61  ;;  %v16675_v55 = vld [vmem:[%s18238_s7 + $0x12f4] ss:$24 sps:$4 sm:$0xff]  }
 0x609   : > { %v16678_v61 = vld [vmem:[%s18238_s7 + $0x12fc] ss:$24 sps:$4 sm:$0xff]  }
 0x60a   : > { %7350 = vmatpush1.bf16.msra.mxu0 %v16589_v38  ;;  %v16673_v38 = vld [vmem:[%s18238_s7 + $0x12f0] ss:$24 sps:$4 sm:$0xff]  }
 0x60b   : > { %7391 = vmatpush1.bf16.msra.mxu1 %v16592_v7  ;;  %7351 = vmatprep.subr.bf16.mxu0 %v16597_v2  ;;  %v16676_v7 = vld [vmem:[%s18238_s7 + $0x12f8] ss:$24 sps:$4 sm:$0xff]   ;;  %v16681_v2 = vld [vmem:[%s18238_s7 + $0x1324] ss:$24 sps:$4 sm:$0xff]  }
 0x60c   : > { %7392 = vmatprep.subr.bf16.mxu1 %v16600_v20  ;;  %v16684_v20 = vld [vmem:[%s18238_s7 + $0x132c] ss:$24 sps:$4 sm:$0xff]  }
 0x60e   : > { %7352 = vmatpush1.bf16.msra.mxu0 %v16595_v42 }
 0x60f   : > { %7393 = vmatpush1.bf16.msra.mxu1 %v16598_v29  ;;  %7353 = vmatprep.subr.bf16.mxu0 %v16603_v17  ;;  %v16679_v17 = vld [vmem:[%s18238_s7 + $0x1320] ss:$24 sps:$4 sm:$0xff]  }
 0x610   : > { %7394 = vmatprep.subr.bf16.mxu1 %v16606_v9  ;;  %v16682_v9 = vld [vmem:[%s18238_s7 + $0x1328] ss:$24 sps:$4 sm:$0xff]  }
 0x612   : > { %7354 = vmatpush1.bf16.msra.mxu0 %v16601_v25 }
 0x613   : > { %7395 = vmatpush1.bf16.msra.mxu1 %v16604_v39  ;;  %7355 = vmatprep.subr.bf16.mxu0 %v16609_v30 }
 0x614   : > { %7396 = vmatprep.subr.bf16.mxu1 %v16612_v51 }
 0x616   : > { %7356 = vmatpush1.bf16.msra.mxu0 %v16607_v27 }
 0x617   : > { %7397 = vmatpush1.bf16.msra.mxu1 %v16610_v6  ;;  %7357 = vmatprep.subr.bf16.mxu0 %v16615_v28 }
 0x618   : > { %7398 = vmatprep.subr.bf16.mxu1 %v16618_v50 }
 0x61a   : > { %7358 = vmatpush1.bf16.msra.mxu0 %v16613_v14  ;;  %v16687_v14 = vld [vmem:[%s18238_s7 + $0x1354] ss:$24 sps:$4 sm:$0xff]  }
 0x61b   : > { %7399 = vmatpush1.bf16.msra.mxu1 %v16616_v49  ;;  %7359 = vmatprep.subr.bf16.mxu0 %v16621_v44  ;;  %v16690_v49 = vld [vmem:[%s18238_s7 + $0x135c] ss:$24 sps:$4 sm:$0xff]  }
 0x61c   : > { %7400 = vmatprep.subr.bf16.mxu1 %v16624_v13  ;;  %v16693_v44 = vld [vmem:[%s18238_s7 + $0x1384] ss:$24 sps:$4 sm:$0xff]  }
 0x61d   : > { %v16696_v13 = vld [vmem:[%s18238_s7 + $0x138c] ss:$24 sps:$4 sm:$0xff]  }
 0x61e   : > { %7360 = vmatpush1.bf16.msra.mxu0 %v16619_v40  ;;  %v16691_v40 = vld [vmem:[%s18238_s7 + $0x1380] ss:$24 sps:$4 sm:$0xff]  }
 0x61f   : > { %7401 = vmatpush1.bf16.msra.mxu1 %v16622_v21  ;;  %7361 = vmatprep.subr.bf16.mxu0 %v16627_v0  ;;  %v16694_v21 = vld [vmem:[%s18238_s7 + $0x1388] ss:$24 sps:$4 sm:$0xff]   ;;  %v16699_v0 = vld [vmem:[%s18238_s7 + $0x13b4] ss:$24 sps:$4 sm:$0xff]  }
 0x620   : > { %7402 = vmatprep.subr.bf16.mxu1 %v16630_v16  ;;  %v16702_v16 = vld [vmem:[%s18238_s7 + $0x13bc] ss:$24 sps:$4 sm:$0xff]  }
 0x622   : > { %7362 = vmatpush1.bf16.msra.mxu0 %v16625_v46  ;;  %v16697_v46 = vld [vmem:[%s18238_s7 + $0x13b0] ss:$24 sps:$4 sm:$0xff]  }
 0x623   : > { %7403 = vmatpush1.bf16.msra.mxu1 %v16628_v10  ;;  %7363 = vmatprep.subr.bf16.mxu0 %v16633_v54  ;;  %v16700_v10 = vld [vmem:[%s18238_s7 + $0x13b8] ss:$24 sps:$4 sm:$0xff]   ;;  %v16705_v54 = vld [vmem:[%s18238_s7 + $0x13e4] ss:$24 sps:$4 sm:$0xff]  }
 0x624   : > { %7404 = vmatprep.subr.bf16.mxu1 %v16636_v60  ;;  %v16708_v60 = vld [vmem:[%s18238_s7 + $0x13ec] ss:$24 sps:$4 sm:$0xff]  }
 0x626   : > { %7364 = vmatpush1.bf16.msra.mxu0 %v16631_v22  ;;  %v16703_v22 = vld [vmem:[%s18238_s7 + $0x13e0] ss:$24 sps:$4 sm:$0xff]  }
 0x627   : > { %7405 = vmatpush1.bf16.msra.mxu1 %v16634_v5  ;;  %7365 = vmatprep.subr.bf16.mxu0 %v16639_v59  ;;  %v16706_v5 = vld [vmem:[%s18238_s7 + $0x13e8] ss:$24 sps:$4 sm:$0xff]   ;;  %v16711_v59 = vld [vmem:[%s18238_s7 + $0x1414] ss:$24 sps:$4 sm:$0xff]  }
 0x628   : > { %7406 = vmatprep.subr.bf16.mxu1 %v16642_v35  ;;  %v16714_v35 = vld [vmem:[%s18238_s7 + $0x141c] ss:$24 sps:$4 sm:$0xff]  }
 0x62a   : > { %7366 = vmatpush1.bf16.msra.mxu0 %v16637_v53  ;;  %v16709_v53 = vld [vmem:[%s18238_s7 + $0x1410] ss:$24 sps:$4 sm:$0xff]  }
 0x62b   : > { %7407 = vmatpush1.bf16.msra.mxu1 %v16640_v19  ;;  %8009 = vmatprep.subr.bf16.mxu0 %v16645_v41  ;;  %v16712_v19 = vld [vmem:[%s18238_s7 + $0x1418] ss:$24 sps:$4 sm:$0xff]   ;;  %v16717_v41 = vld [vmem:[%s18238_s7 + $0x1444] ss:$24 sps:$4 sm:$0xff]  }
 0x62c   : > { %8050 = vmatprep.subr.bf16.mxu1 %v16648_v8  ;;  %v16720_v8 = vld [vmem:[%s18238_s7 + $0x144c] ss:$24 sps:$4 sm:$0xff]  }
 0x62d   : > { %7368 = vmatmul.mubr.bf16.vlgmr.msra.gmra.mrb[32].mxu0 %v20452_v33 }
 0x62e   : > { %7409 = vmatmul.mubr.bf16.vlgmr.msra.gmra.mrb[32].mxu1 %v20452_v33  ;;  %8010 = vmatpush1.bf16.msra.mxu0 %v16643_v24  ;;  %v16655_v33 = vld [vmem:[%s18238_s7 + $0x1260] ss:$24 sps:$4 sm:$0xff]  }
 0x62f   : > { %8051 = vmatpush1.bf16.msra.mxu1 %v16646_v1  ;;  %8011 = vmatprep.subr.bf16.mxu0 %v16651_v63  ;;  %v16715_v24 = vld [vmem:[%s18238_s7 + $0x1440] ss:$24 sps:$4 sm:$0xff]   ;;  %v16723_v63 = vld [vmem:[%s18238_s7 + $0x1474] ss:$24 sps:$4 sm:$0xff]  }
 0x630   : > { %8052 = vmatprep.subr.bf16.mxu1 %v16654_v15  ;;  %8041 = vmatprep.mubr.bf16.mxu0 %v20541_v12  ;;  %v16718_v1 = vld [vmem:[%s18238_s7 + $0x1448] ss:$24 sps:$4 sm:$0xff]   ;;  %v16726_v15 = vld [vmem:[%s18238_s7 + $0x147c] ss:$24 sps:$4 sm:$0xff]  }
 0x631   : > { %8082 = vmatprep.mubr.bf16.mxu1 %v20541_v12 }
 0x632   : > { %8012 = vmatpush1.bf16.msra.mxu0 %v16649_v37  ;;  %v16721_v37 = vld [vmem:[%s18238_s7 + $0x1470] ss:$24 sps:$4 sm:$0xff]  }
 0x633   : > { %8053 = vmatpush1.bf16.msra.mxu1 %v16652_v31  ;;  %8013 = vmatprep.subr.bf16.mxu0 %v16657_v3  ;;  %v16724_v31 = vld [vmem:[%s18238_s7 + $0x1478] ss:$24 sps:$4 sm:$0xff]   ;;  %v16729_v3 = vld [vmem:[%s18238_s7 + $0x14a4] ss:$24 sps:$4 sm:$0xff]  }
 0x634   : > { %8054 = vmatprep.subr.bf16.mxu1 %v16660_v36  ;;  %v16732_v36 = vld [vmem:[%s18238_s7 + $0x14ac] ss:$24 sps:$4 sm:$0xff]  }
 0x636   : > { %8014 = vmatpush1.bf16.msra.mxu0 %v16655_v33  ;;  %v16727_v33 = vld [vmem:[%s18238_s7 + $0x14a0] ss:$24 sps:$4 sm:$0xff]  }
 0x637   : > { %8055 = vmatpush1.bf16.msra.mxu1 %v16658_v23  ;;  %8015 = vmatprep.subr.bf16.mxu0 %v16663_v47  ;;  %v16730_v23 = vld [vmem:[%s18238_s7 + $0x14a8] ss:$24 sps:$4 sm:$0xff]   ;;  %v16735_v47 = vld [vmem:[%s18238_s7 + $0x14d4] ss:$24 sps:$4 sm:$0xff]  }
 0x638   : > { %8056 = vmatprep.subr.bf16.mxu1 %v16666_v18  ;;  %v16738_v18 = vld [vmem:[%s18238_s7 + $0x14dc] ss:$24 sps:$4 sm:$0xff]  }
 0x63a   : > { %8016 = vmatpush1.bf16.msra.mxu0 %v16661_v4  ;;  %v16733_v4 = vld [vmem:[%s18238_s7 + $0x14d0] ss:$24 sps:$4 sm:$0xff]  }
 0x63b   : > { %8057 = vmatpush1.bf16.msra.mxu1 %v16664_v34  ;;  %8017 = vmatprep.subr.bf16.mxu0 %v16669_v32  ;;  %v16736_v34 = vld [vmem:[%s18238_s7 + $0x14d8] ss:$24 sps:$4 sm:$0xff]   ;;  %v16743_v32 = vld [vmem:[%s18238_s7 + $0x1214] ss:$24 sps:$4 sm:$0xff]  }
 0x63c   : > { %8058 = vmatprep.subr.bf16.mxu1 %v16672_v48  ;;  %v16746_v48 = vld [vmem:[%s18238_s7 + $0x1504] ss:$24 sps:$4 sm:$0xff]  }
 0x63e   : > { %8018 = vmatpush1.bf16.msra.mxu0 %v16667_v11  ;;  %v20619_v11 = vld [vmem:[#allocation2 + $0x38] sm:$0xff] }
 0x63f   : > { %8059 = vmatpush1.bf16.msra.mxu1 %v16670_v62  ;;  %8019 = vmatprep.subr.bf16.mxu0 %v16675_v55  ;;  %v16741_v62 = vld [vmem:[%s18238_s7 + $0x1210] ss:$24 sps:$4 sm:$0xff]   ;;  %v16744_v55 = vld [vmem:[%s18238_s7 + $0x1500] ss:$24 sps:$4 sm:$0xff]  }
 0x640   : > { %8060 = vmatprep.subr.bf16.mxu1 %v16678_v61  ;;  %v5939_v42 = vpop.f32.mrb[20].mxu0  ;;  %v20625_v61 = vcombine.low %v20535_v58, %v20535_v58  ;;  %v16747_v58 = vld [vmem:[%s18238_s7 + $0x1240] ss:$24 sps:$4 sm:$0xff]  }
 0x641   : > { %v5980_v29 = vpop.f32.mrb[20].mxu1  ;;  %v20570_v25 = vadd.f32 %v5939_v42, %v20403_v56  ;;  %v5941_v30 = vpop.f32.mrb[21].mxu0  ;;  %v16755_v42 = vld [vmem:[%s18238_s7 + $0x1274] ss:$24 sps:$4 sm:$0xff]  }
 0x642   : > { %v20573_v39 = vadd.f32 %v5980_v29, %v20484_v52  ;;  %v5982_v51 = vpop.f32.mrb[21].mxu1  ;;  %v20576_v27 = vadd.f32 %v5941_v30, %v20409_v26  ;;  %v5943_v28 = vpop.f32.mrb[22].mxu0  ;;  %8020 = vmatpush1.bf16.msra.mxu0 %v16673_v38  ;;  %v16685_v26 = vld [vmem:[%s18238_s7 + $0x1350] ss:$24 sps:$4 sm:$0xff]   ;;  %v16749_v38 = vld [vmem:[%s18238_s7 + $0x1244] ss:$24 sps:$4 sm:$0xff]  }
 0x643   : > { %v20579_v6 = vadd.f32 %v5982_v51, %v20490_v57  ;;  %v5984_v50 = vpop.f32.mrb[22].mxu1  ;;  %8061 = vmatpush1.bf16.msra.mxu1 %v16676_v7  ;;  %v5944_v56 = vpop.f32.mrb[23].mxu0  ;;  %8021 = vmatprep.subr.bf16.mxu0 %v16681_v2  ;;  %v16688_v57 = vld [vmem:[%s18238_s7 + $0x1358] ss:$24 sps:$4 sm:$0xff]   ;;  %v16752_v7 = vld [vmem:[%s18238_s7 + $0x1534] ss:$24 sps:$4 sm:$0xff]   ;;  %v20631_v2 = vcombine.high %v20619_v11, %v20619_v11 }
 0x644   : > { %v5985_v52 = vpop.f32.mrb[23].mxu1  ;;  %8062 = vmatprep.subr.bf16.mxu1 %v16684_v20  ;;  %v16750_v20 = vld [vmem:[%s18238_s7 + $0x1530] ss:$24 sps:$4 sm:$0xff]   ;;  %v16758_v29 = vld [vmem:[%s18238_s7 + $0x1564] ss:$24 sps:$4 sm:$0xff]  }
 0x645   : > { %v16761_v30 = vld [vmem:[%s18238_s7 + $0x12a4] ss:$24 sps:$4 sm:$0xff]   ;;  %v16764_v51 = vld [vmem:[%s18238_s7 + $0x1594] ss:$24 sps:$4 sm:$0xff]   ;;  %v16759_v28 = vld [vmem:[%s18238_s7 + $0x12a0] ss:$24 sps:$4 sm:$0xff]  }
 0x646   : > { %8022 = vmatpush1.bf16.msra.mxu0 %v16679_v17  ;;  %v16753_v17 = vld [vmem:[%s18238_s7 + $0x1270] ss:$24 sps:$4 sm:$0xff]   ;;  %v16767_v50 = vld [vmem:[%s18238_s7 + $0x12d4] ss:$24 sps:$4 sm:$0xff]   ;;  %v16770_v56 = vld [vmem:[%s18238_s7 + $0x15c4] ss:$24 sps:$4 sm:$0xff]  }
 0x647   : > { %8063 = vmatpush1.bf16.msra.mxu1 %v16682_v9  ;;  %8023 = vmatprep.subr.bf16.mxu0 %v16687_v14  ;;  %v16756_v9 = vld [vmem:[%s18238_s7 + $0x1560] ss:$24 sps:$4 sm:$0xff]   ;;  %v16765_v52 = vld [vmem:[%s18238_s7 + $0x12d0] ss:$24 sps:$4 sm:$0xff]  }
 0x648   : > { %8064 = vmatprep.subr.bf16.mxu1 %v16690_v49  ;;  %v16768_v14 = vld [vmem:[%s18238_s7 + $0x15c0] ss:$24 sps:$4 sm:$0xff]   ;;  %v16773_v49 = vld [vmem:[%s18238_s7 + $0x1304] ss:$24 sps:$4 sm:$0xff]  }
 0x64a   : > { %8024 = vmatpush1.bf16.msra.mxu0 %v16685_v26  ;;  %v16776_v26 = vld [vmem:[%s18238_s7 + $0x15f4] ss:$24 sps:$4 sm:$0xff]  }
 0x64b   : > { %8065 = vmatpush1.bf16.msra.mxu1 %v16688_v57  ;;  %8025 = vmatprep.subr.bf16.mxu0 %v16693_v44  ;;  %v16771_v57 = vld [vmem:[%s18238_s7 + $0x1300] ss:$24 sps:$4 sm:$0xff]   ;;  %v16774_v44 = vld [vmem:[%s18238_s7 + $0x15f0] ss:$24 sps:$4 sm:$0xff]  }
 0x64c   : > { %8066 = vmatprep.subr.bf16.mxu1 %v16696_v13  ;;  %v16779_v13 = vld [vmem:[%s18238_s7 + $0x1334] ss:$24 sps:$4 sm:$0xff]  }
 0x64e   : > { %8026 = vmatpush1.bf16.msra.mxu0 %v16691_v40  ;;  %v16782_v40 = vld [vmem:[%s18238_s7 + $0x1624] ss:$24 sps:$4 sm:$0xff]  }
 0x64f   : > { %8067 = vmatpush1.bf16.msra.mxu1 %v16694_v21  ;;  %8027 = vmatprep.subr.bf16.mxu0 %v16699_v0 }
 0x650   : > { %8068 = vmatprep.subr.bf16.mxu1 %v16702_v16 }
 0x652   : > { %8028 = vmatpush1.bf16.msra.mxu0 %v16697_v46 }
 0x653   : > { %8069 = vmatpush1.bf16.msra.mxu1 %v16700_v10  ;;  %8029 = vmatprep.subr.bf16.mxu0 %v16705_v54 }
 0x654   : > { %8070 = vmatprep.subr.bf16.mxu1 %v16708_v60 }
 0x656   : > { %8030 = vmatpush1.bf16.msra.mxu0 %v16703_v22 }
 0x657   : > { %8071 = vmatpush1.bf16.msra.mxu1 %v16706_v5  ;;  %8031 = vmatprep.subr.bf16.mxu0 %v16711_v59 }
 0x658   : > { %8072 = vmatprep.subr.bf16.mxu1 %v16714_v35 }
 0x65a   : > { %8032 = vmatpush1.bf16.msra.mxu0 %v16709_v53 }
 0x65b   : > { %8073 = vmatpush1.bf16.msra.mxu1 %v16712_v19  ;;  %8033 = vmatprep.subr.bf16.mxu0 %v16717_v41  ;;  %v16788_v19 = vld [vmem:[%s18238_s7 + $0x1654] ss:$24 sps:$4 sm:$0xff]   ;;  %v16786_v41 = vld [vmem:[%s18238_s7 + $0x1650] ss:$24 sps:$4 sm:$0xff]  }
 0x65c   : > { %8074 = vmatprep.subr.bf16.mxu1 %v16720_v8  ;;  %v16791_v8 = vld [vmem:[%s18238_s7 + $0x1394] ss:$24 sps:$4 sm:$0xff]  }
 0x65e   : > { %8034 = vmatpush1.bf16.msra.mxu0 %v16715_v24  ;;  %v16794_v24 = vld [vmem:[%s18238_s7 + $0x1684] ss:$24 sps:$4 sm:$0xff]  }
 0x65f   : > { %8075 = vmatpush1.bf16.msra.mxu1 %v16718_v1  ;;  %8035 = vmatprep.subr.bf16.mxu0 %v16723_v63  ;;  %v16789_v1 = vld [vmem:[%s18238_s7 + $0x1390] ss:$24 sps:$4 sm:$0xff]   ;;  %v16792_v63 = vld [vmem:[%s18238_s7 + $0x1680] ss:$24 sps:$4 sm:$0xff]  }
 0x660   : > { %8076 = vmatprep.subr.bf16.mxu1 %v16726_v15  ;;  %v16797_v15 = vld [vmem:[%s18238_s7 + $0x13c4] ss:$24 sps:$4 sm:$0xff]  }
 0x662   : > { %8036 = vmatpush1.bf16.msra.mxu0 %v16721_v37  ;;  %v16800_v37 = vld [vmem:[%s18238_s7 + $0x16b4] ss:$24 sps:$4 sm:$0xff]  }
 0x663   : > { %8077 = vmatpush1.bf16.msra.mxu1 %v16724_v31  ;;  %8037 = vmatprep.subr.bf16.mxu0 %v16729_v3  ;;  %v16795_v31 = vld [vmem:[%s18238_s7 + $0x13c0] ss:$24 sps:$4 sm:$0xff]   ;;  %v16798_v3 = vld [vmem:[%s18238_s7 + $0x16b0] ss:$24 sps:$4 sm:$0xff]  }
 0x664   : > { %8078 = vmatprep.subr.bf16.mxu1 %v16732_v36  ;;  %v16803_v36 = vld [vmem:[%s18238_s7 + $0x13f4] ss:$24 sps:$4 sm:$0xff]  }
 0x666   : > { %8038 = vmatpush1.bf16.msra.mxu0 %v16727_v33  ;;  %v16806_v33 = vld [vmem:[%s18238_s7 + $0x16e4] ss:$24 sps:$4 sm:$0xff]  }
 0x667   : > { %8079 = vmatpush1.bf16.msra.mxu1 %v16730_v23  ;;  %8039 = vmatprep.subr.bf16.mxu0 %v16735_v47  ;;  %v16801_v23 = vld [vmem:[%s18238_s7 + $0x13f0] ss:$24 sps:$4 sm:$0xff]   ;;  %v16804_v47 = vld [vmem:[%s18238_s7 + $0x16e0] ss:$24 sps:$4 sm:$0xff]  }
 0x668   : > { %8080 = vmatprep.subr.bf16.mxu1 %v16738_v18  ;;  %v16809_v18 = vld [vmem:[%s18238_s7 + $0x1424] ss:$24 sps:$4 sm:$0xff]  }
 0x66a   : > { %8040 = vmatpush1.bf16.msra.mxu0 %v16733_v4  ;;  %v16812_v4 = vld [vmem:[%s18238_s7 + $0x1714] ss:$24 sps:$4 sm:$0xff]  }
 0x66b   : > { %8081 = vmatpush1.bf16.msra.mxu1 %v16736_v34  ;;  %8091 = vmatprep.subr.bf16.mxu0 %v16743_v32  ;;  %v16807_v34 = vld [vmem:[%s18238_s7 + $0x1420] ss:$24 sps:$4 sm:$0xff]   ;;  %v16810_v32 = vld [vmem:[%s18238_s7 + $0x1710] ss:$24 sps:$4 sm:$0xff]  }
 0x66c   : > { %8724 = vmatprep.subr.bf16.mxu1 %v16746_v48  ;;  %v16815_v48 = vld [vmem:[%s18238_s7 + $0x1454] ss:$24 sps:$4 sm:$0xff]  }
 0x66d   : > { %8042 = vmatmul.mubr.bf16.vlgmr.msra.gmra.mrb[36].mxu0 %v20625_v61 }
 0x66e   : > { %8083 = vmatmul.mubr.bf16.vlgmr.msra.gmra.mrb[36].mxu1 %v20625_v61  ;;  %8092 = vmatpush1.bf16.msra.mxu0 %v16741_v62  ;;  %v16818_v62 = vld [vmem:[%s18238_s7 + $0x1744] ss:$24 sps:$4 sm:$0xff]  }
 0x66f   : > { %8725 = vmatpush1.bf16.msra.mxu1 %v16744_v55  ;;  %8093 = vmatprep.subr.bf16.mxu0 %v16749_v38  ;;  %v16813_v55 = vld [vmem:[%s18238_s7 + $0x1450] ss:$24 sps:$4 sm:$0xff]   ;;  %v16816_v38 = vld [vmem:[%s18238_s7 + $0x1740] ss:$24 sps:$4 sm:$0xff]  }
 0x670   : > { %8726 = vmatprep.subr.bf16.mxu1 %v16752_v7  ;;  %8123 = vmatprep.mubr.bf16.mxu0 %v20541_v12  ;;  %v16762_v12 = vld [vmem:[%s18238_s7 + $0x1590] ss:$24 sps:$4 sm:$0xff]   ;;  %v16821_v7 = vld [vmem:[%s18238_s7 + $0x1484] ss:$24 sps:$4 sm:$0xff]  }
 0x671   : > { %8756 = vmatprep.mubr.bf16.mxu1 %v20631_v2 }
 0x672   : > { %8094 = vmatpush1.bf16.msra.mxu0 %v16747_v58  ;;  %v16824_v58 = vld [vmem:[%s18238_s7 + $0x1774] ss:$24 sps:$4 sm:$0xff]  }
 0x673   : > { %8727 = vmatpush1.bf16.msra.mxu1 %v16750_v20  ;;  %8095 = vmatprep.subr.bf16.mxu0 %v16755_v42  ;;  %v16819_v20 = vld [vmem:[%s18238_s7 + $0x1480] ss:$24 sps:$4 sm:$0xff]   ;;  %v16822_v42 = vld [vmem:[%s18238_s7 + $0x1770] ss:$24 sps:$4 sm:$0xff]  }
 0x674   : > { %8728 = vmatprep.subr.bf16.mxu1 %v16758_v29  ;;  %v16827_v29 = vld [vmem:[%s18238_s7 + $0x14b4] ss:$24 sps:$4 sm:$0xff]  }
 0x676   : > { %8096 = vmatpush1.bf16.msra.mxu0 %v16753_v17  ;;  %v16830_v17 = vld [vmem:[%s18238_s7 + $0x17a4] ss:$24 sps:$4 sm:$0xff]  }
 0x677   : > { %8729 = vmatpush1.bf16.msra.mxu1 %v16756_v9  ;;  %8097 = vmatprep.subr.bf16.mxu0 %v16761_v30  ;;  %v16825_v9 = vld [vmem:[%s18238_s7 + $0x14b0] ss:$24 sps:$4 sm:$0xff]   ;;  %v16828_v30 = vld [vmem:[%s18238_s7 + $0x17a0] ss:$24 sps:$4 sm:$0xff]  }
 0x678   : > { %8730 = vmatprep.subr.bf16.mxu1 %v16764_v51  ;;  %v16833_v51 = vld [vmem:[%s18238_s7 + $0x14e4] ss:$24 sps:$4 sm:$0xff]  }
 0x67a   : > { %8098 = vmatpush1.bf16.msra.mxu0 %v16759_v28  ;;  %v16836_v28 = vld [vmem:[%s18238_s7 + $0x17d4] ss:$24 sps:$4 sm:$0xff]  }
 0x67b   : > { %8731 = vmatpush1.bf16.msra.mxu1 %v16762_v12  ;;  %8099 = vmatprep.subr.bf16.mxu0 %v16767_v50  ;;  %v16831_v12 = vld [vmem:[%s18238_s7 + $0x14e0] ss:$24 sps:$4 sm:$0xff]   ;;  %v16834_v50 = vld [vmem:[%s18238_s7 + $0x17d0] ss:$24 sps:$4 sm:$0xff]  }
 0x67c   : > { %8732 = vmatprep.subr.bf16.mxu1 %v16770_v56  ;;  %v16841_v56 = vld [vmem:[%s18238_s7 + $0x150c] ss:$24 sps:$4 sm:$0xff]  }
 0x67e   : > { %8100 = vmatpush1.bf16.msra.mxu0 %v16765_v52  ;;  %v16844_v52 = vld [vmem:[%s18238_s7 + $0x1514] ss:$24 sps:$4 sm:$0xff]  }
 0x67f   : > { %8733 = vmatpush1.bf16.msra.mxu1 %v16768_v14  ;;  %8101 = vmatprep.subr.bf16.mxu0 %v16773_v49  ;;  %v20711_v14 = vcombine.low %v20619_v11, %v20619_v11  ;;  %v16839_v49 = vld [vmem:[%s18238_s7 + $0x1508] ss:$24 sps:$4 sm:$0xff]   ;;  %v16845_v11 = vld [vmem:[%s18238_s7 + $0x1538] ss:$24 sps:$4 sm:$0xff]  }
 0x680   : > { %8734 = vmatprep.subr.bf16.mxu1 %v16776_v26  ;;  %v6613_v21 = vpop.f32.mrb[24].mxu0  ;;  %v16842_v26 = vld [vmem:[%s18238_s7 + $0x1510] ss:$24 sps:$4 sm:$0xff]  }
 0x681   : > { %v6654_v0 = vpop.f32.mrb[24].mxu1  ;;  %v20658_v16 = vadd.f32 %v6613_v21, %v20487_v45  ;;  %v6615_v10 = vpop.f32.mrb[25].mxu0  ;;  %v16777_v45 = vld [vmem:[%s18238_s7 + $0x1330] ss:$24 sps:$4 sm:$0xff]   ;;  %v16856_v21 = vld [vmem:[%s18238_s7 + $0x1574] ss:$24 sps:$4 sm:$0xff]  }
 0x682   : > { %v20661_v46 = vadd.f32 %v6654_v0, %v20570_v25  ;;  %v6656_v54 = vpop.f32.mrb[25].mxu1  ;;  %v20664_v60 = vadd.f32 %v6615_v10, %v20493_v43  ;;  %v6617_v5 = vpop.f32.mrb[26].mxu0  ;;  %8102 = vmatpush1.bf16.msra.mxu0 %v16771_v57  ;;  %v16780_v25 = vld [vmem:[%s18238_s7 + $0x1620] ss:$24 sps:$4 sm:$0xff]   ;;  %v16785_v43 = vld [vmem:[%s18238_s7 + $0x1364] ss:$24 sps:$4 sm:$0xff]  }
 0x683   : > { %v20667_v22 = vadd.f32 %v6656_v54, %v20576_v27  ;;  %v6658_v59 = vpop.f32.mrb[26].mxu1  ;;  %8735 = vmatpush1.bf16.msra.mxu1 %v16774_v44  ;;  %v6618_v35 = vpop.f32.mrb[27].mxu0  ;;  %8103 = vmatprep.subr.bf16.mxu0 %v16779_v13  ;;  %v16783_v27 = vld [vmem:[%s18238_s7 + $0x1360] ss:$24 sps:$4 sm:$0xff]   ;;  %v16847_v57 = vld [vmem:[%s18238_s7 + $0x153c] ss:$24 sps:$4 sm:$0xff]  }
 0x684   : > { %v6659_v53 = vpop.f32.mrb[27].mxu1  ;;  %8736 = vmatprep.subr.bf16.mxu1 %v16782_v40  ;;  %v16850_v44 = vld [vmem:[%s18238_s7 + $0x1544] ss:$24 sps:$4 sm:$0xff]   ;;  %v16848_v13 = vld [vmem:[%s18238_s7 + $0x1540] ss:$24 sps:$4 sm:$0xff]  }
 0x685   : > { %v16853_v40 = vld [vmem:[%s18238_s7 + $0x156c] ss:$24 sps:$4 sm:$0xff]   ;;  %v16854_v0 = vld [vmem:[%s18238_s7 + $0x1570] ss:$24 sps:$4 sm:$0xff]   ;;  %v16859_v10 = vld [vmem:[%s18238_s7 + $0x159c] ss:$24 sps:$4 sm:$0xff]  }
 0x686   : > { %8104 = vmatpush1.bf16.msra.mxu0 %v16777_v45  ;;  %v16862_v54 = vld [vmem:[%s18238_s7 + $0x15a4] ss:$24 sps:$4 sm:$0xff]   ;;  %v16857_v5 = vld [vmem:[%s18238_s7 + $0x1598] ss:$24 sps:$4 sm:$0xff]   ;;  %v16868_v45 = vld [vmem:[%s18238_s7 + $0x15d4] ss:$24 sps:$4 sm:$0xff]  }
 0x687   : > { %8737 = vmatpush1.bf16.msra.mxu1 %v16780_v25  ;;  %8105 = vmatprep.subr.bf16.mxu0 %v16785_v43  ;;  %v16860_v59 = vld [vmem:[%s18238_s7 + $0x15a0] ss:$24 sps:$4 sm:$0xff]   ;;  %v16866_v35 = vld [vmem:[%s18238_s7 + $0x15d0] ss:$24 sps:$4 sm:$0xff]   ;;  %v16871_v53 = vld [vmem:[%s18238_s7 + $0x15fc] ss:$24 sps:$4 sm:$0xff]  }
 0x688   : > { %8738 = vmatprep.subr.bf16.mxu1 %v16788_v19  ;;  %v16863_v25 = vld [vmem:[%s18238_s7 + $0x15c8] ss:$24 sps:$4 sm:$0xff]   ;;  %v16874_v43 = vld [vmem:[%s18238_s7 + $0x1604] ss:$24 sps:$4 sm:$0xff]   ;;  %v16869_v19 = vld [vmem:[%s18238_s7 + $0x15f8] ss:$24 sps:$4 sm:$0xff]  }
 0x68a   : > { %8106 = vmatpush1.bf16.msra.mxu0 %v16783_v27  ;;  %v16872_v27 = vld [vmem:[%s18238_s7 + $0x1600] ss:$24 sps:$4 sm:$0xff]  }
 0x68b   : > { %8739 = vmatpush1.bf16.msra.mxu1 %v16786_v41  ;;  %8107 = vmatprep.subr.bf16.mxu0 %v16791_v8  ;;  %v16877_v41 = vld [vmem:[%s18238_s7 + $0x162c] ss:$24 sps:$4 sm:$0xff]  }
 0x68c   : > { %8740 = vmatprep.subr.bf16.mxu1 %v16794_v24  ;;  %v16880_v8 = vld [vmem:[%s18238_s7 + $0x1634] ss:$24 sps:$4 sm:$0xff]  }
 0x68e   : > { %8108 = vmatpush1.bf16.msra.mxu0 %v16789_v1 }
 0x68f   : > { %8741 = vmatpush1.bf16.msra.mxu1 %v16792_v63  ;;  %8109 = vmatprep.subr.bf16.mxu0 %v16797_v15 }
 0x690   : > { %8742 = vmatprep.subr.bf16.mxu1 %v16800_v37 }
 0x692   : > { %8110 = vmatpush1.bf16.msra.mxu0 %v16795_v31 }
 0x693   : > { %8743 = vmatpush1.bf16.msra.mxu1 %v16798_v3  ;;  %8111 = vmatprep.subr.bf16.mxu0 %v16803_v36 }
 0x694   : > { %8744 = vmatprep.subr.bf16.mxu1 %v16806_v33 }
 0x696   : > { %8112 = vmatpush1.bf16.msra.mxu0 %v16801_v23 }
 0x697   : > { %8745 = vmatpush1.bf16.msra.mxu1 %v16804_v47  ;;  %8113 = vmatprep.subr.bf16.mxu0 %v16809_v18 }
 0x698   : > { %8746 = vmatprep.subr.bf16.mxu1 %v16812_v4  ;;  %v16886_v4 = vld [vmem:[%s18238_s7 + $0x1664] ss:$24 sps:$4 sm:$0xff]  }
 0x69a   : > { %8114 = vmatpush1.bf16.msra.mxu0 %v16807_v34  ;;  %v16884_v34 = vld [vmem:[%s18238_s7 + $0x1660] ss:$24 sps:$4 sm:$0xff]  }
 0x69b   : > { %8747 = vmatpush1.bf16.msra.mxu1 %v16810_v32  ;;  %8115 = vmatprep.subr.bf16.mxu0 %v16815_v48  ;;  %v16889_v32 = vld [vmem:[%s18238_s7 + $0x168c] ss:$24 sps:$4 sm:$0xff]  }
 0x69c   : > { %8748 = vmatprep.subr.bf16.mxu1 %v16818_v62  ;;  %v16892_v48 = vld [vmem:[%s18238_s7 + $0x1694] ss:$24 sps:$4 sm:$0xff]   ;;  %v16887_v62 = vld [vmem:[%s18238_s7 + $0x1688] ss:$24 sps:$4 sm:$0xff]  }
 0x69e   : > { %8116 = vmatpush1.bf16.msra.mxu0 %v16813_v55  ;;  %v16890_v55 = vld [vmem:[%s18238_s7 + $0x1690] ss:$24 sps:$4 sm:$0xff]  }
 0x69f   : > { %8749 = vmatpush1.bf16.msra.mxu1 %v16816_v38  ;;  %8117 = vmatprep.subr.bf16.mxu0 %v16821_v7  ;;  %v16895_v38 = vld [vmem:[%s18238_s7 + $0x16bc] ss:$24 sps:$4 sm:$0xff]  }
 0x6a0   : > { %8750 = vmatprep.subr.bf16.mxu1 %v16824_v58  ;;  %v16898_v7 = vld [vmem:[%s18238_s7 + $0x16c4] ss:$24 sps:$4 sm:$0xff]   ;;  %v16893_v58 = vld [vmem:[%s18238_s7 + $0x16b8] ss:$24 sps:$4 sm:$0xff]  }
 0x6a2   : > { %8118 = vmatpush1.bf16.msra.mxu0 %v16819_v20  ;;  %v16896_v20 = vld [vmem:[%s18238_s7 + $0x16c0] ss:$24 sps:$4 sm:$0xff]  }
 0x6a3   : > { %8751 = vmatpush1.bf16.msra.mxu1 %v16822_v42  ;;  %8119 = vmatprep.subr.bf16.mxu0 %v16827_v29  ;;  %v16901_v42 = vld [vmem:[%s18238_s7 + $0x16ec] ss:$24 sps:$4 sm:$0xff]  }
 0x6a4   : > { %8752 = vmatprep.subr.bf16.mxu1 %v16830_v17  ;;  %v16904_v29 = vld [vmem:[%s18238_s7 + $0x16f4] ss:$24 sps:$4 sm:$0xff]   ;;  %v16899_v17 = vld [vmem:[%s18238_s7 + $0x16e8] ss:$24 sps:$4 sm:$0xff]  }
 0x6a6   : > { %8120 = vmatpush1.bf16.msra.mxu0 %v16825_v9  ;;  %v16902_v9 = vld [vmem:[%s18238_s7 + $0x16f0] ss:$24 sps:$4 sm:$0xff]  }
 0x6a7   : > { %8753 = vmatpush1.bf16.msra.mxu1 %v16828_v30  ;;  %8121 = vmatprep.subr.bf16.mxu0 %v16833_v51  ;;  %v16907_v30 = vld [vmem:[%s18238_s7 + $0x171c] ss:$24 sps:$4 sm:$0xff]  }
 0x6a8   : > { %8754 = vmatprep.subr.bf16.mxu1 %v16836_v28  ;;  %v16910_v51 = vld [vmem:[%s18238_s7 + $0x1724] ss:$24 sps:$4 sm:$0xff]   ;;  %v16905_v28 = vld [vmem:[%s18238_s7 + $0x1718] ss:$24 sps:$4 sm:$0xff]  }
 0x6aa   : > { %8122 = vmatpush1.bf16.msra.mxu0 %v16831_v12  ;;  %v16908_v12 = vld [vmem:[%s18238_s7 + $0x1720] ss:$24 sps:$4 sm:$0xff]  }
 0x6ab   : > { %8755 = vmatpush1.bf16.msra.mxu1 %v16834_v50  ;;  %8765 = vmatprep.subr.bf16.mxu0 %v16841_v56  ;;  %v16913_v50 = vld [vmem:[%s18238_s7 + $0x174c] ss:$24 sps:$4 sm:$0xff]  }
 0x6ac   : > { %8806 = vmatprep.subr.bf16.mxu1 %v16844_v52  ;;  %v16916_v56 = vld [vmem:[%s18238_s7 + $0x1754] ss:$24 sps:$4 sm:$0xff]   ;;  %v16911_v52 = vld [vmem:[%s18238_s7 + $0x1748] ss:$24 sps:$4 sm:$0xff]  }
 0x6ad   : > { %8124 = vmatmul.mubr.bf16.vlgmr.msra.gmra.mrb[40].mxu0 %v20625_v61  ;;  %v16851_v61 = vld [vmem:[%s18238_s7 + $0x1568] ss:$24 sps:$4 sm:$0xff]  }
 0x6ae   : > { %8757 = vmatmul.mubr.bf16.vlgmr.msra.gmra.mrb[40].mxu1 %v20711_v14  ;;  %8766 = vmatpush1.bf16.msra.mxu0 %v16839_v49  ;;  %v16914_v49 = vld [vmem:[%s18238_s7 + $0x1750] ss:$24 sps:$4 sm:$0xff]  }
 0x6af   : > { %8807 = vmatpush1.bf16.msra.mxu1 %v16842_v26  ;;  %8767 = vmatprep.subr.bf16.mxu0 %v16847_v57  ;;  %v16919_v26 = vld [vmem:[%s18238_s7 + $0x177c] ss:$24 sps:$4 sm:$0xff]  }
 0x6b0   : > { %8808 = vmatprep.subr.bf16.mxu1 %v16850_v44  ;;  %8797 = vmatprep.mubr.bf16.mxu0 %v20631_v2  ;;  %v16922_v57 = vld [vmem:[%s18238_s7 + $0x1784] ss:$24 sps:$4 sm:$0xff]   ;;  %v16917_v44 = vld [vmem:[%s18238_s7 + $0x1778] ss:$24 sps:$4 sm:$0xff]  }
 0x6b1   : > { %8838 = vmatprep.mubr.bf16.mxu1 %v20631_v2  ;;  %v16865_v2 = vld [vmem:[%s18238_s7 + $0x15cc] ss:$24 sps:$4 sm:$0xff]  }
 0x6b2   : > { %8768 = vmatpush1.bf16.msra.mxu0 %v16845_v11  ;;  %v16920_v11 = vld [vmem:[%s18238_s7 + $0x1780] ss:$24 sps:$4 sm:$0xff]  }
 0x6b3   : > { %8809 = vmatpush1.bf16.msra.mxu1 %v16848_v13  ;;  %8769 = vmatprep.subr.bf16.mxu0 %v16853_v40  ;;  %v16925_v13 = vld [vmem:[%s18238_s7 + $0x17ac] ss:$24 sps:$4 sm:$0xff]  }
 0x6b4   : > { %8810 = vmatprep.subr.bf16.mxu1 %v16856_v21  ;;  %v16928_v40 = vld [vmem:[%s18238_s7 + $0x17b4] ss:$24 sps:$4 sm:$0xff]   ;;  %v16923_v21 = vld [vmem:[%s18238_s7 + $0x17a8] ss:$24 sps:$4 sm:$0xff]  }
 0x6b6   : > { %8770 = vmatpush1.bf16.msra.mxu0 %v16851_v61  ;;  %v16926_v61 = vld [vmem:[%s18238_s7 + $0x17b0] ss:$24 sps:$4 sm:$0xff]  }
 0x6b7   : > { %8811 = vmatpush1.bf16.msra.mxu1 %v16854_v0  ;;  %8771 = vmatprep.subr.bf16.mxu0 %v16859_v10  ;;  %v16931_v0 = vld [vmem:[%s18238_s7 + $0x17dc] ss:$24 sps:$4 sm:$0xff]  }
 0x6b8   : > { %8812 = vmatprep.subr.bf16.mxu1 %v16862_v54  ;;  %v16934_v10 = vld [vmem:[%s18238_s7 + $0x17e4] ss:$24 sps:$4 sm:$0xff]   ;;  %v16929_v54 = vld [vmem:[%s18238_s7 + $0x17d8] ss:$24 sps:$4 sm:$0xff]  }
 0x6ba   : > { %8772 = vmatpush1.bf16.msra.mxu0 %v16857_v5  ;;  %v16932_v5 = vld [vmem:[%s18238_s7 + $0x17e0] ss:$24 sps:$4 sm:$0xff]  }
 0x6bb   : > { %8813 = vmatpush1.bf16.msra.mxu1 %v16860_v59  ;;  %8773 = vmatprep.subr.bf16.mxu0 %v16865_v2  ;;  %v16937_v59 = vld [vmem:[%s18238_s7 + $0x1804] ss:$24 sps:$4 sm:$0xff]  }
 0x6bc   : > { %8814 = vmatprep.subr.bf16.mxu1 %v16868_v45  ;;  %v16940_v2 = vld [vmem:[%s18238_s7 + $0x180c] ss:$24 sps:$4 sm:$0xff]   ;;  %v20793_v45 = vld [vmem:[#allocation2 + $0x40] sm:$0xff] }
 0x6be   : > { %8774 = vmatpush1.bf16.msra.mxu0 %v16863_v25  ;;  %v16935_v25 = vld [vmem:[%s18238_s7 + $0x1800] ss:$24 sps:$4 sm:$0xff]  }
 0x6bf   : > { %8815 = vmatpush1.bf16.msra.mxu1 %v16866_v35  ;;  %8775 = vmatprep.subr.bf16.mxu0 %v16871_v53  ;;  %v16938_v35 = vld [vmem:[%s18238_s7 + $0x1808] ss:$24 sps:$4 sm:$0xff]   ;;  %v16943_v53 = vld [vmem:[%s18238_s7 + $0x1834] ss:$24 sps:$4 sm:$0xff]  }
 0x6c0   : > { %8816 = vmatprep.subr.bf16.mxu1 %v16874_v43  ;;  %v6695_v24 = vpop.f32.mrb[28].mxu0  ;;  %v16946_v43 = vld [vmem:[%s18238_s7 + $0x183c] ss:$24 sps:$4 sm:$0xff]  }
 0x6c1   : > { %v7328_v1 = vpop.f32.mrb[28].mxu1  ;;  %v20742_v63 = vadd.f32 %v6695_v24, %v20573_v39  ;;  %v6697_v37 = vpop.f32.mrb[29].mxu0  ;;  %v16875_v39 = vld [vmem:[%s18238_s7 + $0x1628] ss:$24 sps:$4 sm:$0xff]   ;;  %v16952_v24 = vld [vmem:[%s18238_s7 + $0x186c] ss:$24 sps:$4 sm:$0xff]  }
 0x6c2   : > { %v20745_v15 = vadd.f32 %v7328_v1, %v20658_v16  ;;  %v7330_v31 = vpop.f32.mrb[29].mxu1  ;;  %v20748_v3 = vadd.f32 %v6697_v37, %v20579_v6  ;;  %v6699_v33 = vpop.f32.mrb[30].mxu0  ;;  %8776 = vmatpush1.bf16.msra.mxu0 %v16869_v19  ;;  %v16878_v16 = vld [vmem:[%s18238_s7 + $0x1630] ss:$24 sps:$4 sm:$0xff]   ;;  %v16883_v6 = vld [vmem:[%s18238_s7 + $0x165c] ss:$24 sps:$4 sm:$0xff]   ;;  %v20801_v19 = vcombine.high %v20793_v45, %v20793_v45 }
 0x6c3   : > { %v20751_v36 = vadd.f32 %v7330_v31, %v20664_v60  ;;  %v7332_v23 = vpop.f32.mrb[30].mxu1  ;;  %8817 = vmatpush1.bf16.msra.mxu1 %v16872_v27  ;;  %v6700_v47 = vpop.f32.mrb[31].mxu0  ;;  %8777 = vmatprep.subr.bf16.mxu0 %v16877_v41  ;;  %v16881_v60 = vld [vmem:[%s18238_s7 + $0x1658] ss:$24 sps:$4 sm:$0xff]   ;;  %v16950_v1 = vld [vmem:[%s18238_s7 + $0x1868] ss:$24 sps:$4 sm:$0xff]  }
 0x6c4   : > { %v7333_v18 = vpop.f32.mrb[31].mxu1  ;;  %8818 = vmatprep.subr.bf16.mxu1 %v16880_v8  ;;  %v16941_v27 = vld [vmem:[%s18238_s7 + $0x1830] ss:$24 sps:$4 sm:$0xff]   ;;  %v16949_v8 = vld [vmem:[%s18238_s7 + $0x1864] ss:$24 sps:$4 sm:$0xff]  }
 0x6c5   : > { %v16944_v41 = vld [vmem:[%s18238_s7 + $0x1838] ss:$24 sps:$4 sm:$0xff]   ;;  %v16955_v37 = vld [vmem:[%s18238_s7 + $0x1894] ss:$24 sps:$4 sm:$0xff]   ;;  %v16962_v18 = vld [vmem:[%s18238_s7 + $0x18c8] ss:$24 sps:$4 sm:$0xff]  }
 0x6c6   : > { %8778 = vmatpush1.bf16.msra.mxu0 %v16875_v39  ;;  %v16958_v31 = vld [vmem:[%s18238_s7 + $0x189c] ss:$24 sps:$4 sm:$0xff]   ;;  %v16953_v33 = vld [vmem:[%s18238_s7 + $0x1890] ss:$24 sps:$4 sm:$0xff]   ;;  %v16959_v47 = vld [vmem:[%s18238_s7 + $0x18c0] ss:$24 sps:$4 sm:$0xff]  }
 0x6c7   : > { %8819 = vmatpush1.bf16.msra.mxu1 %v16878_v16  ;;  %8779 = vmatprep.subr.bf16.mxu0 %v16883_v6  ;;  %v16956_v23 = vld [vmem:[%s18238_s7 + $0x1898] ss:$24 sps:$4 sm:$0xff]   ;;  %v16961_v39 = vld [vmem:[%s18238_s7 + $0x18c4] ss:$24 sps:$4 sm:$0xff]   ;;  %v16967_v6 = vld [vmem:[%s18238_s7 + $0x18f4] ss:$24 sps:$4 sm:$0xff]  }
 0x6c8   : > { %8820 = vmatprep.subr.bf16.mxu1 %v16886_v4  ;;  %v16964_v16 = vld [vmem:[%s18238_s7 + $0x18cc] ss:$24 sps:$4 sm:$0xff]   ;;  %v16970_v4 = vld [vmem:[%s18238_s7 + $0x18fc] ss:$24 sps:$4 sm:$0xff]  }
 0x6ca   : > { %8780 = vmatpush1.bf16.msra.mxu0 %v16881_v60  ;;  %v16965_v60 = vld [vmem:[%s18238_s7 + $0x18f0] ss:$24 sps:$4 sm:$0xff]  }
 0x6cb   : > { %8821 = vmatpush1.bf16.msra.mxu1 %v16884_v34  ;;  %8781 = vmatprep.subr.bf16.mxu0 %v16889_v32  ;;  %v16968_v34 = vld [vmem:[%s18238_s7 + $0x18f8] ss:$24 sps:$4 sm:$0xff]   ;;  %v16973_v32 = vld [vmem:[%s18238_s7 + $0x1924] ss:$24 sps:$4 sm:$0xff]  }
 0x6cc   : > { %8822 = vmatprep.subr.bf16.mxu1 %v16892_v48  ;;  %v16976_v48 = vld [vmem:[%s18238_s7 + $0x192c] ss:$24 sps:$4 sm:$0xff]  }
 0x6ce   : > { %8782 = vmatpush1.bf16.msra.mxu0 %v16887_v62 }
 0x6cf   : > { %8823 = vmatpush1.bf16.msra.mxu1 %v16890_v55  ;;  %8783 = vmatprep.subr.bf16.mxu0 %v16895_v38 }
 0x6d0   : > { %8824 = vmatprep.subr.bf16.mxu1 %v16898_v7 }
 0x6d2   : > { %8784 = vmatpush1.bf16.msra.mxu0 %v16893_v58 }
 0x6d3   : > { %8825 = vmatpush1.bf16.msra.mxu1 %v16896_v20  ;;  %8785 = vmatprep.subr.bf16.mxu0 %v16901_v42 }
 0x6d4   : > { %8826 = vmatprep.subr.bf16.mxu1 %v16904_v29 }
 0x6d6   : > { %8786 = vmatpush1.bf16.msra.mxu0 %v16899_v17 }
 0x6d7   : > { %8827 = vmatpush1.bf16.msra.mxu1 %v16902_v9  ;;  %8787 = vmatprep.subr.bf16.mxu0 %v16907_v30 }
 0x6d8   : > { %8828 = vmatprep.subr.bf16.mxu1 %v16910_v51 }
 0x6da   : > { %8788 = vmatpush1.bf16.msra.mxu0 %v16905_v28  ;;  %v16982_v28 = vld [vmem:[%s18238_s7 + $0x195c] ss:$24 sps:$4 sm:$0xff]  }
 0x6db   : > { %8829 = vmatpush1.bf16.msra.mxu1 %v16908_v12  ;;  %8789 = vmatprep.subr.bf16.mxu0 %v16913_v50  ;;  %v16980_v12 = vld [vmem:[%s18238_s7 + $0x1958] ss:$24 sps:$4 sm:$0xff]   ;;  %v16985_v50 = vld [vmem:[%s18238_s7 + $0x1984] ss:$24 sps:$4 sm:$0xff]  }
 0x6dc   : > { %8830 = vmatprep.subr.bf16.mxu1 %v16916_v56  ;;  %v16988_v56 = vld [vmem:[%s18238_s7 + $0x198c] ss:$24 sps:$4 sm:$0xff]  }
 0x6de   : > { %8790 = vmatpush1.bf16.msra.mxu0 %v16911_v52  ;;  %v16983_v52 = vld [vmem:[%s18238_s7 + $0x1980] ss:$24 sps:$4 sm:$0xff]  }
 0x6df   : > { %8831 = vmatpush1.bf16.msra.mxu1 %v16914_v49  ;;  %8791 = vmatprep.subr.bf16.mxu0 %v16919_v26  ;;  %v16986_v49 = vld [vmem:[%s18238_s7 + $0x1988] ss:$24 sps:$4 sm:$0xff]   ;;  %v16991_v26 = vld [vmem:[%s18238_s7 + $0x19b4] ss:$24 sps:$4 sm:$0xff]  }
 0x6e0   : > { %8832 = vmatprep.subr.bf16.mxu1 %v16922_v57  ;;  %v16994_v57 = vld [vmem:[%s18238_s7 + $0x19bc] ss:$24 sps:$4 sm:$0xff]  }
 0x6e2   : > { %8792 = vmatpush1.bf16.msra.mxu0 %v16917_v44  ;;  %v16989_v44 = vld [vmem:[%s18238_s7 + $0x19b0] ss:$24 sps:$4 sm:$0xff]  }
 0x6e3   : > { %8833 = vmatpush1.bf16.msra.mxu1 %v16920_v11  ;;  %8793 = vmatprep.subr.bf16.mxu0 %v16925_v13  ;;  %v16992_v11 = vld [vmem:[%s18238_s7 + $0x19b8] ss:$24 sps:$4 sm:$0xff]   ;;  %v16997_v13 = vld [vmem:[%s18238_s7 + $0x19e4] ss:$24 sps:$4 sm:$0xff]  }
 0x6e4   : > { %8834 = vmatprep.subr.bf16.mxu1 %v16928_v40  ;;  %v17000_v40 = vld [vmem:[%s18238_s7 + $0x19ec] ss:$24 sps:$4 sm:$0xff]  }
 0x6e6   : > { %8794 = vmatpush1.bf16.msra.mxu0 %v16923_v21  ;;  %v16995_v21 = vld [vmem:[%s18238_s7 + $0x19e0] ss:$24 sps:$4 sm:$0xff]  }
 0x6e7   : > { %8835 = vmatpush1.bf16.msra.mxu1 %v16926_v61  ;;  %8795 = vmatprep.subr.bf16.mxu0 %v16931_v0  ;;  %v16998_v61 = vld [vmem:[%s18238_s7 + $0x19e8] ss:$24 sps:$4 sm:$0xff]   ;;  %v17003_v0 = vld [vmem:[%s18238_s7 + $0x1a14] ss:$24 sps:$4 sm:$0xff]  }
 0x6e8   : > { %8836 = vmatprep.subr.bf16.mxu1 %v16934_v10  ;;  %v17006_v10 = vld [vmem:[%s18238_s7 + $0x1a1c] ss:$24 sps:$4 sm:$0xff]  }
 0x6ea   : > { %8796 = vmatpush1.bf16.msra.mxu0 %v16929_v54  ;;  %v17001_v54 = vld [vmem:[%s18238_s7 + $0x1a10] ss:$24 sps:$4 sm:$0xff]  }
 0x6eb   : > { %8837 = vmatpush1.bf16.msra.mxu1 %v16932_v5  ;;  %9439 = vmatprep.subr.bf16.mxu0 %v16937_v59  ;;  %v17004_v5 = vld [vmem:[%s18238_s7 + $0x1a18] ss:$24 sps:$4 sm:$0xff]   ;;  %v17009_v59 = vld [vmem:[%s18238_s7 + $0x1a44] ss:$24 sps:$4 sm:$0xff]  }
 0x6ec   : > { %9480 = vmatprep.subr.bf16.mxu1 %v16940_v2  ;;  %v17012_v2 = vld [vmem:[%s18238_s7 + $0x1a4c] ss:$24 sps:$4 sm:$0xff]  }
 0x6ed   : > { %8798 = vmatmul.mubr.bf16.vlgmr.msra.gmra.mrb[44].mxu0 %v20711_v14 }
 0x6ee   : > { %8839 = vmatmul.mubr.bf16.vlgmr.msra.gmra.mrb[44].mxu1 %v20711_v14  ;;  %9440 = vmatpush1.bf16.msra.mxu0 %v16935_v25  ;;  %v16947_v14 = vld [vmem:[%s18238_s7 + $0x1860] ss:$24 sps:$4 sm:$0xff]  }
 0x6ef   : > { %9481 = vmatpush1.bf16.msra.mxu1 %v16938_v35  ;;  %9441 = vmatprep.subr.bf16.mxu0 %v16943_v53  ;;  %v17007_v25 = vld [vmem:[%s18238_s7 + $0x1a40] ss:$24 sps:$4 sm:$0xff]   ;;  %v17015_v53 = vld [vmem:[%s18238_s7 + $0x1a74] ss:$24 sps:$4 sm:$0xff]  }
 0x6f0   : > { %9482 = vmatprep.subr.bf16.mxu1 %v16946_v43  ;;  %9471 = vmatprep.mubr.bf16.mxu0 %v20801_v19  ;;  %v17010_v35 = vld [vmem:[%s18238_s7 + $0x1a48] ss:$24 sps:$4 sm:$0xff]   ;;  %v17018_v43 = vld [vmem:[%s18238_s7 + $0x1a7c] ss:$24 sps:$4 sm:$0xff]  }
 0x6f1   : > { %9512 = vmatprep.mubr.bf16.mxu1 %v20801_v19 }
 0x6f2   : > { %9442 = vmatpush1.bf16.msra.mxu0 %v16941_v27  ;;  %v17013_v27 = vld [vmem:[%s18238_s7 + $0x1a70] ss:$24 sps:$4 sm:$0xff]  }
 0x6f3   : > { %9483 = vmatpush1.bf16.msra.mxu1 %v16944_v41  ;;  %9443 = vmatprep.subr.bf16.mxu0 %v16949_v8  ;;  %v17016_v41 = vld [vmem:[%s18238_s7 + $0x1a78] ss:$24 sps:$4 sm:$0xff]   ;;  %v17021_v8 = vld [vmem:[%s18238_s7 + $0x1aa4] ss:$24 sps:$4 sm:$0xff]  }
 0x6f4   : > { %9484 = vmatprep.subr.bf16.mxu1 %v16952_v24  ;;  %v17024_v24 = vld [vmem:[%s18238_s7 + $0x1aac] ss:$24 sps:$4 sm:$0xff]  }
 0x6f6   : > { %9444 = vmatpush1.bf16.msra.mxu0 %v16947_v14  ;;  %v17019_v14 = vld [vmem:[%s18238_s7 + $0x1aa0] ss:$24 sps:$4 sm:$0xff]  }
 0x6f7   : > { %9485 = vmatpush1.bf16.msra.mxu1 %v16950_v1  ;;  %9445 = vmatprep.subr.bf16.mxu0 %v16955_v37  ;;  %v17022_v1 = vld [vmem:[%s18238_s7 + $0x1aa8] ss:$24 sps:$4 sm:$0xff]   ;;  %v17027_v37 = vld [vmem:[%s18238_s7 + $0x1ad4] ss:$24 sps:$4 sm:$0xff]  }
 0x6f8   : > { %9486 = vmatprep.subr.bf16.mxu1 %v16958_v31  ;;  %v17030_v31 = vld [vmem:[%s18238_s7 + $0x1adc] ss:$24 sps:$4 sm:$0xff]  }
 0x6fa   : > { %9446 = vmatpush1.bf16.msra.mxu0 %v16953_v33  ;;  %v17025_v33 = vld [vmem:[%s18238_s7 + $0x1ad0] ss:$24 sps:$4 sm:$0xff]  }
 0x6fb   : > { %9487 = vmatpush1.bf16.msra.mxu1 %v16956_v23  ;;  %9447 = vmatprep.subr.bf16.mxu0 %v16961_v39  ;;  %v17028_v23 = vld [vmem:[%s18238_s7 + $0x1ad8] ss:$24 sps:$4 sm:$0xff]   ;;  %v17035_v39 = vld [vmem:[%s18238_s7 + $0x1814] ss:$24 sps:$4 sm:$0xff]  }
 0x6fc   : > { %9488 = vmatprep.subr.bf16.mxu1 %v16964_v16  ;;  %v17038_v16 = vld [vmem:[%s18238_s7 + $0x1b04] ss:$24 sps:$4 sm:$0xff]  }
 0x6fe   : > { %9448 = vmatpush1.bf16.msra.mxu0 %v16959_v47  ;;  %v20881_v47 = vcombine.low %v20793_v45, %v20793_v45  ;;  %v17039_v45 = vld [vmem:[%s18238_s7 + $0x1840] ss:$24 sps:$4 sm:$0xff]  }
 0x6ff   : > { %9489 = vmatpush1.bf16.msra.mxu1 %v16962_v18  ;;  %9449 = vmatprep.subr.bf16.mxu0 %v16967_v6  ;;  %v20883_v18 = vld [vmem:[#allocation2 + $0x48] sm:$0xff]  ;;  %v17033_v6 = vld [vmem:[%s18238_s7 + $0x1810] ss:$24 sps:$4 sm:$0xff]  }
 0x700   : > { %9490 = vmatprep.subr.bf16.mxu1 %v16970_v4  ;;  %v7369_v62 = vpop.f32.mrb[32].mxu0  ;;  %v17036_v4 = vld [vmem:[%s18238_s7 + $0x1b00] ss:$24 sps:$4 sm:$0xff]  }
 0x701   : > { %v7410_v55 = vpop.f32.mrb[32].mxu1  ;;  %v20828_v38 = vadd.f32 %v7369_v62, %v20661_v46  ;;  %v7371_v58 = vpop.f32.mrb[33].mxu0  ;;  %v16971_v46 = vld [vmem:[%s18238_s7 + $0x1920] ss:$24 sps:$4 sm:$0xff]   ;;  %v17047_v62 = vld [vmem:[%s18238_s7 + $0x1874] ss:$24 sps:$4 sm:$0xff]  }
 0x702   : > { %v20831_v7 = vadd.f32 %v7410_v55, %v20742_v63  ;;  %v7412_v20 = vpop.f32.mrb[33].mxu1  ;;  %v20834_v42 = vadd.f32 %v7371_v58, %v20667_v22  ;;  %v7373_v17 = vpop.f32.mrb[34].mxu0  ;;  %9450 = vmatpush1.bf16.msra.mxu0 %v16965_v60  ;;  %v16974_v63 = vld [vmem:[%s18238_s7 + $0x1928] ss:$24 sps:$4 sm:$0xff]   ;;  %v16979_v22 = vld [vmem:[%s18238_s7 + $0x1954] ss:$24 sps:$4 sm:$0xff]  }
 0x703   : > { %v20837_v29 = vadd.f32 %v7412_v20, %v20748_v3  ;;  %v7414_v9 = vpop.f32.mrb[34].mxu1  ;;  %9491 = vmatpush1.bf16.msra.mxu1 %v16968_v34  ;;  %v7374_v30 = vpop.f32.mrb[35].mxu0  ;;  %9451 = vmatprep.subr.bf16.mxu0 %v16973_v32  ;;  %v16977_v3 = vld [vmem:[%s18238_s7 + $0x1950] ss:$24 sps:$4 sm:$0xff]   ;;  %v17041_v60 = vld [vmem:[%s18238_s7 + $0x1844] ss:$24 sps:$4 sm:$0xff]   ;;  %v20891_v32 = vcombine.high %v20883_v18, %v20883_v18 }
 0x704   : > { %v7415_v51 = vpop.f32.mrb[35].mxu1  ;;  %9492 = vmatprep.subr.bf16.mxu1 %v16976_v48  ;;  %v17044_v34 = vld [vmem:[%s18238_s7 + $0x1b34] ss:$24 sps:$4 sm:$0xff]   ;;  %v17042_v48 = vld [vmem:[%s18238_s7 + $0x1b30] ss:$24 sps:$4 sm:$0xff]  }
 0x705   : > { %v17050_v55 = vld [vmem:[%s18238_s7 + $0x1b64] ss:$24 sps:$4 sm:$0xff]   ;;  %v17045_v58 = vld [vmem:[%s18238_s7 + $0x1870] ss:$24 sps:$4 sm:$0xff]   ;;  %v17048_v20 = vld [vmem:[%s18238_s7 + $0x1b60] ss:$24 sps:$4 sm:$0xff]  }
 0x706   : > { %9452 = vmatpush1.bf16.msra.mxu0 %v16971_v46  ;;  %v17053_v17 = vld [vmem:[%s18238_s7 + $0x18a4] ss:$24 sps:$4 sm:$0xff]   ;;  %v17056_v9 = vld [vmem:[%s18238_s7 + $0x1b94] ss:$24 sps:$4 sm:$0xff]   ;;  %v17051_v46 = vld [vmem:[%s18238_s7 + $0x18a0] ss:$24 sps:$4 sm:$0xff]  }
 0x707   : > { %9493 = vmatpush1.bf16.msra.mxu1 %v16974_v63  ;;  %9453 = vmatprep.subr.bf16.mxu0 %v16979_v22  ;;  %v17059_v63 = vld [vmem:[%s18238_s7 + $0x18d4] ss:$24 sps:$4 sm:$0xff]   ;;  %v17062_v30 = vld [vmem:[%s18238_s7 + $0x1bc4] ss:$24 sps:$4 sm:$0xff]   ;;  %v17057_v51 = vld [vmem:[%s18238_s7 + $0x18d0] ss:$24 sps:$4 sm:$0xff]  }
 0x708   : > { %9494 = vmatprep.subr.bf16.mxu1 %v16982_v28  ;;  %v17060_v22 = vld [vmem:[%s18238_s7 + $0x1bc0] ss:$24 sps:$4 sm:$0xff]   ;;  %v17065_v28 = vld [vmem:[%s18238_s7 + $0x1904] ss:$24 sps:$4 sm:$0xff]  }
 0x70a   : > { %9454 = vmatpush1.bf16.msra.mxu0 %v16977_v3  ;;  %v17068_v3 = vld [vmem:[%s18238_s7 + $0x1bf4] ss:$24 sps:$4 sm:$0xff]  }
 0x70b   : > { %9495 = vmatpush1.bf16.msra.mxu1 %v16980_v12  ;;  %9455 = vmatprep.subr.bf16.mxu0 %v16985_v50  ;;  %v17063_v12 = vld [vmem:[%s18238_s7 + $0x1900] ss:$24 sps:$4 sm:$0xff]   ;;  %v17066_v50 = vld [vmem:[%s18238_s7 + $0x1bf0] ss:$24 sps:$4 sm:$0xff]  }
 0x70c   : > { %9496 = vmatprep.subr.bf16.mxu1 %v16988_v56  ;;  %v17071_v56 = vld [vmem:[%s18238_s7 + $0x1934] ss:$24 sps:$4 sm:$0xff]  }
 0x70e   : > { %9456 = vmatpush1.bf16.msra.mxu0 %v16983_v52  ;;  %v17074_v52 = vld [vmem:[%s18238_s7 + $0x1c24] ss:$24 sps:$4 sm:$0xff]  }
 0x70f   : > { %9497 = vmatpush1.bf16.msra.mxu1 %v16986_v49  ;;  %9457 = vmatprep.subr.bf16.mxu0 %v16991_v26 }
 0x710   : > { %9498 = vmatprep.subr.bf16.mxu1 %v16994_v57 }
 0x712   : > { %9458 = vmatpush1.bf16.msra.mxu0 %v16989_v44 }
 0x713   : > { %9499 = vmatpush1.bf16.msra.mxu1 %v16992_v11  ;;  %9459 = vmatprep.subr.bf16.mxu0 %v16997_v13 }
 0x714   : > { %9500 = vmatprep.subr.bf16.mxu1 %v17000_v40 }
 0x716   : > { %9460 = vmatpush1.bf16.msra.mxu0 %v16995_v21 }
 0x717   : > { %9501 = vmatpush1.bf16.msra.mxu1 %v16998_v61  ;;  %9461 = vmatprep.subr.bf16.mxu0 %v17003_v0 }
 0x718   : > { %9502 = vmatprep.subr.bf16.mxu1 %v17006_v10 }
 0x71a   : > { %9462 = vmatpush1.bf16.msra.mxu0 %v17001_v54 }
 0x71b   : > { %9503 = vmatpush1.bf16.msra.mxu1 %v17004_v5  ;;  %9463 = vmatprep.subr.bf16.mxu0 %v17009_v59  ;;  %v17080_v5 = vld [vmem:[%s18238_s7 + $0x1c54] ss:$24 sps:$4 sm:$0xff]   ;;  %v17078_v59 = vld [vmem:[%s18238_s7 + $0x1c50] ss:$24 sps:$4 sm:$0xff]  }
 0x71c   : > { %9504 = vmatprep.subr.bf16.mxu1 %v17012_v2  ;;  %v17083_v2 = vld [vmem:[%s18238_s7 + $0x1994] ss:$24 sps:$4 sm:$0xff]  }
 0x71e   : > { %9464 = vmatpush1.bf16.msra.mxu0 %v17007_v25  ;;  %v17086_v25 = vld [vmem:[%s18238_s7 + $0x1c84] ss:$24 sps:$4 sm:$0xff]  }
 0x71f   : > { %9505 = vmatpush1.bf16.msra.mxu1 %v17010_v35  ;;  %9465 = vmatprep.subr.bf16.mxu0 %v17015_v53  ;;  %v17081_v35 = vld [vmem:[%s18238_s7 + $0x1990] ss:$24 sps:$4 sm:$0xff]   ;;  %v17084_v53 = vld [vmem:[%s18238_s7 + $0x1c80] ss:$24 sps:$4 sm:$0xff]  }
 0x720   : > { %9506 = vmatprep.subr.bf16.mxu1 %v17018_v43  ;;  %v17089_v43 = vld [vmem:[%s18238_s7 + $0x19c4] ss:$24 sps:$4 sm:$0xff]  }
 0x722   : > { %9466 = vmatpush1.bf16.msra.mxu0 %v17013_v27  ;;  %v17092_v27 = vld [vmem:[%s18238_s7 + $0x1cb4] ss:$24 sps:$4 sm:$0xff]  }
 0x723   : > { %9507 = vmatpush1.bf16.msra.mxu1 %v17016_v41  ;;  %9467 = vmatprep.subr.bf16.mxu0 %v17021_v8  ;;  %v17087_v41 = vld [vmem:[%s18238_s7 + $0x19c0] ss:$24 sps:$4 sm:$0xff]   ;;  %v17090_v8 = vld [vmem:[%s18238_s7 + $0x1cb0] ss:$24 sps:$4 sm:$0xff]  }
 0x724   : > { %9508 = vmatprep.subr.bf16.mxu1 %v17024_v24  ;;  %v17095_v24 = vld [vmem:[%s18238_s7 + $0x19f4] ss:$24 sps:$4 sm:$0xff]  }
 0x726   : > { %9468 = vmatpush1.bf16.msra.mxu0 %v17019_v14  ;;  %v17098_v14 = vld [vmem:[%s18238_s7 + $0x1ce4] ss:$24 sps:$4 sm:$0xff]  }
 0x727   : > { %9509 = vmatpush1.bf16.msra.mxu1 %v17022_v1  ;;  %9469 = vmatprep.subr.bf16.mxu0 %v17027_v37  ;;  %v17093_v1 = vld [vmem:[%s18238_s7 + $0x19f0] ss:$24 sps:$4 sm:$0xff]   ;;  %v17096_v37 = vld [vmem:[%s18238_s7 + $0x1ce0] ss:$24 sps:$4 sm:$0xff]  }
 0x728   : > { %9510 = vmatprep.subr.bf16.mxu1 %v17030_v31  ;;  %v17101_v31 = vld [vmem:[%s18238_s7 + $0x1a24] ss:$24 sps:$4 sm:$0xff]  }
 0x72a   : > { %9470 = vmatpush1.bf16.msra.mxu0 %v17025_v33  ;;  %v17104_v33 = vld [vmem:[%s18238_s7 + $0x1d14] ss:$24 sps:$4 sm:$0xff]  }
 0x72b   : > { %9511 = vmatpush1.bf16.msra.mxu1 %v17028_v23  ;;  %9521 = vmatprep.subr.bf16.mxu0 %v17035_v39  ;;  %v17099_v23 = vld [vmem:[%s18238_s7 + $0x1a20] ss:$24 sps:$4 sm:$0xff]   ;;  %v17102_v39 = vld [vmem:[%s18238_s7 + $0x1d10] ss:$24 sps:$4 sm:$0xff]  }
 0x72c   : > { %10154 = vmatprep.subr.bf16.mxu1 %v17038_v16  ;;  %v17107_v16 = vld [vmem:[%s18238_s7 + $0x1a54] ss:$24 sps:$4 sm:$0xff]  }
 0x72d   : > { %9472 = vmatmul.mubr.bf16.vlgmr.msra.gmra.mrb[48].mxu0 %v20881_v47 }
 0x72e   : > { %9513 = vmatmul.mubr.bf16.vlgmr.msra.gmra.mrb[48].mxu1 %v20881_v47  ;;  %9522 = vmatpush1.bf16.msra.mxu0 %v17033_v6  ;;  %v17110_v6 = vld [vmem:[%s18238_s7 + $0x1d44] ss:$24 sps:$4 sm:$0xff]  }
 0x72f   : > { %10155 = vmatpush1.bf16.msra.mxu1 %v17036_v4  ;;  %9523 = vmatprep.subr.bf16.mxu0 %v17041_v60  ;;  %v17105_v4 = vld [vmem:[%s18238_s7 + $0x1a50] ss:$24 sps:$4 sm:$0xff]   ;;  %v17108_v60 = vld [vmem:[%s18238_s7 + $0x1d40] ss:$24 sps:$4 sm:$0xff]  }
 0x730   : > { %10156 = vmatprep.subr.bf16.mxu1 %v17044_v34  ;;  %9553 = vmatprep.mubr.bf16.mxu0 %v20801_v19  ;;  %v17054_v19 = vld [vmem:[%s18238_s7 + $0x1b90] ss:$24 sps:$4 sm:$0xff]   ;;  %v17113_v34 = vld [vmem:[%s18238_s7 + $0x1a84] ss:$24 sps:$4 sm:$0xff]  }
 0x731   : > { %10186 = vmatprep.mubr.bf16.mxu1 %v20891_v32 }
 0x732   : > { %9524 = vmatpush1.bf16.msra.mxu0 %v17039_v45  ;;  %v17116_v45 = vld [vmem:[%s18238_s7 + $0x1d74] ss:$24 sps:$4 sm:$0xff]  }
 0x733   : > { %10157 = vmatpush1.bf16.msra.mxu1 %v17042_v48  ;;  %9525 = vmatprep.subr.bf16.mxu0 %v17047_v62  ;;  %v17111_v48 = vld [vmem:[%s18238_s7 + $0x1a80] ss:$24 sps:$4 sm:$0xff]   ;;  %v17114_v62 = vld [vmem:[%s18238_s7 + $0x1d70] ss:$24 sps:$4 sm:$0xff]  }
 0x734   : > { %10158 = vmatprep.subr.bf16.mxu1 %v17050_v55  ;;  %v17119_v55 = vld [vmem:[%s18238_s7 + $0x1ab4] ss:$24 sps:$4 sm:$0xff]  }
 0x736   : > { %9526 = vmatpush1.bf16.msra.mxu0 %v17045_v58  ;;  %v17122_v58 = vld [vmem:[%s18238_s7 + $0x1da4] ss:$24 sps:$4 sm:$0xff]  }
 0x737   : > { %10159 = vmatpush1.bf16.msra.mxu1 %v17048_v20  ;;  %9527 = vmatprep.subr.bf16.mxu0 %v17053_v17  ;;  %v17117_v20 = vld [vmem:[%s18238_s7 + $0x1ab0] ss:$24 sps:$4 sm:$0xff]   ;;  %v17120_v17 = vld [vmem:[%s18238_s7 + $0x1da0] ss:$24 sps:$4 sm:$0xff]  }
 0x738   : > { %10160 = vmatprep.subr.bf16.mxu1 %v17056_v9  ;;  %v17125_v9 = vld [vmem:[%s18238_s7 + $0x1ae4] ss:$24 sps:$4 sm:$0xff]  }
 0x73a   : > { %9528 = vmatpush1.bf16.msra.mxu0 %v17051_v46  ;;  %v17128_v46 = vld [vmem:[%s18238_s7 + $0x1dd4] ss:$24 sps:$4 sm:$0xff]  }
 0x73b   : > { %10161 = vmatpush1.bf16.msra.mxu1 %v17054_v19  ;;  %9529 = vmatprep.subr.bf16.mxu0 %v17059_v63  ;;  %v17123_v19 = vld [vmem:[%s18238_s7 + $0x1ae0] ss:$24 sps:$4 sm:$0xff]   ;;  %v17126_v63 = vld [vmem:[%s18238_s7 + $0x1dd0] ss:$24 sps:$4 sm:$0xff]  }
 0x73c   : > { %10162 = vmatprep.subr.bf16.mxu1 %v17062_v30  ;;  %v17133_v30 = vld [vmem:[%s18238_s7 + $0x1b0c] ss:$24 sps:$4 sm:$0xff]  }
 0x73e   : > { %9530 = vmatpush1.bf16.msra.mxu0 %v17057_v51  ;;  %v17136_v51 = vld [vmem:[%s18238_s7 + $0x1b14] ss:$24 sps:$4 sm:$0xff]  }
 0x73f   : > { %10163 = vmatpush1.bf16.msra.mxu1 %v17060_v22  ;;  %9531 = vmatprep.subr.bf16.mxu0 %v17065_v28  ;;  %v20971_v22 = vcombine.low %v20883_v18, %v20883_v18  ;;  %v17131_v28 = vld [vmem:[%s18238_s7 + $0x1b08] ss:$24 sps:$4 sm:$0xff]   ;;  %v17137_v18 = vld [vmem:[%s18238_s7 + $0x1b38] ss:$24 sps:$4 sm:$0xff]  }
 0x740   : > { %10164 = vmatprep.subr.bf16.mxu1 %v17068_v3  ;;  %v8043_v49 = vpop.f32.mrb[36].mxu0  ;;  %v17134_v3 = vld [vmem:[%s18238_s7 + $0x1b10] ss:$24 sps:$4 sm:$0xff]  }
 0x741   : > { %v8084_v26 = vpop.f32.mrb[36].mxu1  ;;  %v20918_v57 = vadd.f32 %v8043_v49, %v20745_v15  ;;  %v8045_v11 = vpop.f32.mrb[37].mxu0  ;;  %v17069_v15 = vld [vmem:[%s18238_s7 + $0x1930] ss:$24 sps:$4 sm:$0xff]   ;;  %v17148_v49 = vld [vmem:[%s18238_s7 + $0x1b74] ss:$24 sps:$4 sm:$0xff]  }
 0x742   : > { %v20921_v44 = vadd.f32 %v8084_v26, %v20828_v38  ;;  %v8086_v13 = vpop.f32.mrb[37].mxu1  ;;  %v20924_v40 = vadd.f32 %v8045_v11, %v20751_v36  ;;  %v8047_v61 = vpop.f32.mrb[38].mxu0  ;;  %9532 = vmatpush1.bf16.msra.mxu0 %v17063_v12  ;;  %v17072_v38 = vld [vmem:[%s18238_s7 + $0x1c20] ss:$24 sps:$4 sm:$0xff]   ;;  %v17077_v36 = vld [vmem:[%s18238_s7 + $0x1964] ss:$24 sps:$4 sm:$0xff]  }
 0x743   : > { %v20927_v21 = vadd.f32 %v8086_v13, %v20834_v42  ;;  %v8088_v0 = vpop.f32.mrb[38].mxu1  ;;  %10165 = vmatpush1.bf16.msra.mxu1 %v17066_v50  ;;  %v8048_v10 = vpop.f32.mrb[39].mxu0  ;;  %9533 = vmatprep.subr.bf16.mxu0 %v17071_v56  ;;  %v17075_v42 = vld [vmem:[%s18238_s7 + $0x1960] ss:$24 sps:$4 sm:$0xff]   ;;  %v17139_v12 = vld [vmem:[%s18238_s7 + $0x1b3c] ss:$24 sps:$4 sm:$0xff]  }
 0x744   : > { %v8089_v54 = vpop.f32.mrb[39].mxu1  ;;  %10166 = vmatprep.subr.bf16.mxu1 %v17074_v52  ;;  %v17142_v50 = vld [vmem:[%s18238_s7 + $0x1b44] ss:$24 sps:$4 sm:$0xff]   ;;  %v17140_v56 = vld [vmem:[%s18238_s7 + $0x1b40] ss:$24 sps:$4 sm:$0xff]  }
 0x745   : > { %v17145_v52 = vld [vmem:[%s18238_s7 + $0x1b6c] ss:$24 sps:$4 sm:$0xff]   ;;  %v17146_v26 = vld [vmem:[%s18238_s7 + $0x1b70] ss:$24 sps:$4 sm:$0xff]   ;;  %v17151_v11 = vld [vmem:[%s18238_s7 + $0x1b9c] ss:$24 sps:$4 sm:$0xff]  }
 0x746   : > { %9534 = vmatpush1.bf16.msra.mxu0 %v17069_v15  ;;  %v17154_v13 = vld [vmem:[%s18238_s7 + $0x1ba4] ss:$24 sps:$4 sm:$0xff]   ;;  %v17149_v61 = vld [vmem:[%s18238_s7 + $0x1b98] ss:$24 sps:$4 sm:$0xff]   ;;  %v17160_v15 = vld [vmem:[%s18238_s7 + $0x1bd4] ss:$24 sps:$4 sm:$0xff]  }
 0x747   : > { %10167 = vmatpush1.bf16.msra.mxu1 %v17072_v38  ;;  %9535 = vmatprep.subr.bf16.mxu0 %v17077_v36  ;;  %v17152_v0 = vld [vmem:[%s18238_s7 + $0x1ba0] ss:$24 sps:$4 sm:$0xff]   ;;  %v17158_v10 = vld [vmem:[%s18238_s7 + $0x1bd0] ss:$24 sps:$4 sm:$0xff]   ;;  %v17163_v54 = vld [vmem:[%s18238_s7 + $0x1bfc] ss:$24 sps:$4 sm:$0xff]  }
 0x748   : > { %10168 = vmatprep.subr.bf16.mxu1 %v17080_v5  ;;  %v17155_v38 = vld [vmem:[%s18238_s7 + $0x1bc8] ss:$24 sps:$4 sm:$0xff]   ;;  %v17166_v36 = vld [vmem:[%s18238_s7 + $0x1c04] ss:$24 sps:$4 sm:$0xff]   ;;  %v17161_v5 = vld [vmem:[%s18238_s7 + $0x1bf8] ss:$24 sps:$4 sm:$0xff]  }
 0x74a   : > { %9536 = vmatpush1.bf16.msra.mxu0 %v17075_v42  ;;  %v17164_v42 = vld [vmem:[%s18238_s7 + $0x1c00] ss:$24 sps:$4 sm:$0xff]  }
 0x74b   : > { %10169 = vmatpush1.bf16.msra.mxu1 %v17078_v59  ;;  %9537 = vmatprep.subr.bf16.mxu0 %v17083_v2  ;;  %v17169_v59 = vld [vmem:[%s18238_s7 + $0x1c2c] ss:$24 sps:$4 sm:$0xff]  }
 0x74c   : > { %10170 = vmatprep.subr.bf16.mxu1 %v17086_v25  ;;  %v17172_v2 = vld [vmem:[%s18238_s7 + $0x1c34] ss:$24 sps:$4 sm:$0xff]  }
 0x74e   : > { %9538 = vmatpush1.bf16.msra.mxu0 %v17081_v35 }
 0x74f   : > { %10171 = vmatpush1.bf16.msra.mxu1 %v17084_v53  ;;  %9539 = vmatprep.subr.bf16.mxu0 %v17089_v43 }
 0x750   : > { %10172 = vmatprep.subr.bf16.mxu1 %v17092_v27 }
 0x752   : > { %9540 = vmatpush1.bf16.msra.mxu0 %v17087_v41 }
 0x753   : > { %10173 = vmatpush1.bf16.msra.mxu1 %v17090_v8  ;;  %9541 = vmatprep.subr.bf16.mxu0 %v17095_v24 }
 0x754   : > { %10174 = vmatprep.subr.bf16.mxu1 %v17098_v14 }
 0x756   : > { %9542 = vmatpush1.bf16.msra.mxu0 %v17093_v1 }
 0x757   : > { %10175 = vmatpush1.bf16.msra.mxu1 %v17096_v37  ;;  %9543 = vmatprep.subr.bf16.mxu0 %v17101_v31 }
 0x758   : > { %10176 = vmatprep.subr.bf16.mxu1 %v17104_v33  ;;  %v17178_v33 = vld [vmem:[%s18238_s7 + $0x1c64] ss:$24 sps:$4 sm:$0xff]  }
 0x75a   : > { %9544 = vmatpush1.bf16.msra.mxu0 %v17099_v23  ;;  %v17176_v23 = vld [vmem:[%s18238_s7 + $0x1c60] ss:$24 sps:$4 sm:$0xff]  }
 0x75b   : > { %10177 = vmatpush1.bf16.msra.mxu1 %v17102_v39  ;;  %9545 = vmatprep.subr.bf16.mxu0 %v17107_v16  ;;  %v17181_v39 = vld [vmem:[%s18238_s7 + $0x1c8c] ss:$24 sps:$4 sm:$0xff]  }
 0x75c   : > { %10178 = vmatprep.subr.bf16.mxu1 %v17110_v6  ;;  %v17184_v16 = vld [vmem:[%s18238_s7 + $0x1c94] ss:$24 sps:$4 sm:$0xff]   ;;  %v17179_v6 = vld [vmem:[%s18238_s7 + $0x1c88] ss:$24 sps:$4 sm:$0xff]  }
 0x75e   : > { %9546 = vmatpush1.bf16.msra.mxu0 %v17105_v4  ;;  %v17182_v4 = vld [vmem:[%s18238_s7 + $0x1c90] ss:$24 sps:$4 sm:$0xff]  }
 0x75f   : > { %10179 = vmatpush1.bf16.msra.mxu1 %v17108_v60  ;;  %9547 = vmatprep.subr.bf16.mxu0 %v17113_v34  ;;  %v17187_v60 = vld [vmem:[%s18238_s7 + $0x1cbc] ss:$24 sps:$4 sm:$0xff]  }
 0x760   : > { %10180 = vmatprep.subr.bf16.mxu1 %v17116_v45  ;;  %v17190_v34 = vld [vmem:[%s18238_s7 + $0x1cc4] ss:$24 sps:$4 sm:$0xff]   ;;  %v17185_v45 = vld [vmem:[%s18238_s7 + $0x1cb8] ss:$24 sps:$4 sm:$0xff]  }
 0x762   : > { %9548 = vmatpush1.bf16.msra.mxu0 %v17111_v48  ;;  %v17188_v48 = vld [vmem:[%s18238_s7 + $0x1cc0] ss:$24 sps:$4 sm:$0xff]  }
 0x763   : > { %10181 = vmatpush1.bf16.msra.mxu1 %v17114_v62  ;;  %9549 = vmatprep.subr.bf16.mxu0 %v17119_v55  ;;  %v17193_v62 = vld [vmem:[%s18238_s7 + $0x1cec] ss:$24 sps:$4 sm:$0xff]  }
 0x764   : > { %10182 = vmatprep.subr.bf16.mxu1 %v17122_v58  ;;  %v17196_v55 = vld [vmem:[%s18238_s7 + $0x1cf4] ss:$24 sps:$4 sm:$0xff]   ;;  %v17191_v58 = vld [vmem:[%s18238_s7 + $0x1ce8] ss:$24 sps:$4 sm:$0xff]  }
 0x766   : > { %9550 = vmatpush1.bf16.msra.mxu0 %v17117_v20  ;;  %v17194_v20 = vld [vmem:[%s18238_s7 + $0x1cf0] ss:$24 sps:$4 sm:$0xff]  }
 0x767   : > { %10183 = vmatpush1.bf16.msra.mxu1 %v17120_v17  ;;  %9551 = vmatprep.subr.bf16.mxu0 %v17125_v9  ;;  %v17199_v17 = vld [vmem:[%s18238_s7 + $0x1d1c] ss:$24 sps:$4 sm:$0xff]  }
 0x768   : > { %10184 = vmatprep.subr.bf16.mxu1 %v17128_v46  ;;  %v17202_v9 = vld [vmem:[%s18238_s7 + $0x1d24] ss:$24 sps:$4 sm:$0xff]   ;;  %v17197_v46 = vld [vmem:[%s18238_s7 + $0x1d18] ss:$24 sps:$4 sm:$0xff]  }
 0x76a   : > { %9552 = vmatpush1.bf16.msra.mxu0 %v17123_v19  ;;  %v17200_v19 = vld [vmem:[%s18238_s7 + $0x1d20] ss:$24 sps:$4 sm:$0xff]  }
 0x76b   : > { %10185 = vmatpush1.bf16.msra.mxu1 %v17126_v63  ;;  %10195 = vmatprep.subr.bf16.mxu0 %v17133_v30  ;;  %v17205_v63 = vld [vmem:[%s18238_s7 + $0x1d4c] ss:$24 sps:$4 sm:$0xff]  }
 0x76c   : > { %10236 = vmatprep.subr.bf16.mxu1 %v17136_v51  ;;  %v17208_v30 = vld [vmem:[%s18238_s7 + $0x1d54] ss:$24 sps:$4 sm:$0xff]   ;;  %v17203_v51 = vld [vmem:[%s18238_s7 + $0x1d48] ss:$24 sps:$4 sm:$0xff]  }
 0x76d   : > { %9554 = vmatmul.mubr.bf16.vlgmr.msra.gmra.mrb[52].mxu0 %v20881_v47  ;;  %v17143_v47 = vld [vmem:[%s18238_s7 + $0x1b68] ss:$24 sps:$4 sm:$0xff]  }
 0x76e   : > { %10187 = vmatmul.mubr.bf16.vlgmr.msra.gmra.mrb[52].mxu1 %v20971_v22  ;;  %10196 = vmatpush1.bf16.msra.mxu0 %v17131_v28  ;;  %v17206_v28 = vld [vmem:[%s18238_s7 + $0x1d50] ss:$24 sps:$4 sm:$0xff]  }
 0x76f   : > { %10237 = vmatpush1.bf16.msra.mxu1 %v17134_v3  ;;  %10197 = vmatprep.subr.bf16.mxu0 %v17139_v12  ;;  %v17211_v3 = vld [vmem:[%s18238_s7 + $0x1d7c] ss:$24 sps:$4 sm:$0xff]  }
 0x770   : > { %10238 = vmatprep.subr.bf16.mxu1 %v17142_v50  ;;  %10227 = vmatprep.mubr.bf16.mxu0 %v20891_v32  ;;  %v17214_v12 = vld [vmem:[%s18238_s7 + $0x1d84] ss:$24 sps:$4 sm:$0xff]   ;;  %v17209_v50 = vld [vmem:[%s18238_s7 + $0x1d78] ss:$24 sps:$4 sm:$0xff]  }
 0x771   : > { %10268 = vmatprep.mubr.bf16.mxu1 %v20891_v32  ;;  %v17157_v32 = vld [vmem:[%s18238_s7 + $0x1bcc] ss:$24 sps:$4 sm:$0xff]  }
 0x772   : > { %10198 = vmatpush1.bf16.msra.mxu0 %v17137_v18  ;;  %v17212_v18 = vld [vmem:[%s18238_s7 + $0x1d80] ss:$24 sps:$4 sm:$0xff]  }
 0x773   : > { %10239 = vmatpush1.bf16.msra.mxu1 %v17140_v56  ;;  %10199 = vmatprep.subr.bf16.mxu0 %v17145_v52  ;;  %v17217_v56 = vld [vmem:[%s18238_s7 + $0x1dac] ss:$24 sps:$4 sm:$0xff]  }
 0x774   : > { %10240 = vmatprep.subr.bf16.mxu1 %v17148_v49  ;;  %v17220_v52 = vld [vmem:[%s18238_s7 + $0x1db4] ss:$24 sps:$4 sm:$0xff]   ;;  %v17215_v49 = vld [vmem:[%s18238_s7 + $0x1da8] ss:$24 sps:$4 sm:$0xff]  }
 0x776   : > { %10200 = vmatpush1.bf16.msra.mxu0 %v17143_v47  ;;  %v17218_v47 = vld [vmem:[%s18238_s7 + $0x1db0] ss:$24 sps:$4 sm:$0xff]  }
 0x777   : > { %10241 = vmatpush1.bf16.msra.mxu1 %v17146_v26  ;;  %10201 = vmatprep.subr.bf16.mxu0 %v17151_v11  ;;  %v17223_v26 = vld [vmem:[%s18238_s7 + $0x1ddc] ss:$24 sps:$4 sm:$0xff]  }
 0x778   : > { %10242 = vmatprep.subr.bf16.mxu1 %v17154_v13  ;;  %v17226_v11 = vld [vmem:[%s18238_s7 + $0x1de4] ss:$24 sps:$4 sm:$0xff]   ;;  %v17221_v13 = vld [vmem:[%s18238_s7 + $0x1dd8] ss:$24 sps:$4 sm:$0xff]  }
 0x77a   : > { %10202 = vmatpush1.bf16.msra.mxu0 %v17149_v61  ;;  %v17224_v61 = vld [vmem:[%s18238_s7 + $0x1de0] ss:$24 sps:$4 sm:$0xff]  }
 0x77b   : > { %10243 = vmatpush1.bf16.msra.mxu1 %v17152_v0  ;;  %10203 = vmatprep.subr.bf16.mxu0 %v17157_v32  ;;  %v17229_v0 = vld [vmem:[%s18238_s7 + $0x1e04] ss:$24 sps:$4 sm:$0xff]  }
 0x77c   : > { %10244 = vmatprep.subr.bf16.mxu1 %v17160_v15  ;;  %v17232_v32 = vld [vmem:[%s18238_s7 + $0x1e0c] ss:$24 sps:$4 sm:$0xff]  }
 0x77d   : > { %v21053_v15 = vld [vmem:[#allocation2 + $0x50] sm:$0xff] }
 0x77e   : > { %10204 = vmatpush1.bf16.msra.mxu0 %v17155_v38  ;;  %v17227_v38 = vld [vmem:[%s18238_s7 + $0x1e00] ss:$24 sps:$4 sm:$0xff]  }
 0x77f   : > { %10245 = vmatpush1.bf16.msra.mxu1 %v17158_v10  ;;  %10205 = vmatprep.subr.bf16.mxu0 %v17163_v54  ;;  %v17230_v10 = vld [vmem:[%s18238_s7 + $0x1e08] ss:$24 sps:$4 sm:$0xff]   ;;  %v17235_v54 = vld [vmem:[%s18238_s7 + $0x1e34] ss:$24 sps:$4 sm:$0xff]  }
 0x780   : > { %10246 = vmatprep.subr.bf16.mxu1 %v17166_v36  ;;  %v8125_v25 = vpop.f32.mrb[40].mxu0  ;;  %v17238_v36 = vld [vmem:[%s18238_s7 + $0x1e3c] ss:$24 sps:$4 sm:$0xff]  }
 0x781   : > { %v8758_v35 = vpop.f32.mrb[40].mxu1  ;;  %v21002_v53 = vadd.f32 %v8125_v25, %v20831_v7  ;;  %v8127_v27 = vpop.f32.mrb[41].mxu0  ;;  %v17167_v7 = vld [vmem:[%s18238_s7 + $0x1c28] ss:$24 sps:$4 sm:$0xff]   ;;  %v17244_v25 = vld [vmem:[%s18238_s7 + $0x1e6c] ss:$24 sps:$4 sm:$0xff]  }
 0x782   : > { %v21005_v43 = vadd.f32 %v8758_v35, %v20918_v57  ;;  %v8760_v41 = vpop.f32.mrb[41].mxu1  ;;  %v21008_v8 = vadd.f32 %v8127_v27, %v20837_v29  ;;  %v8129_v14 = vpop.f32.mrb[42].mxu0  ;;  %10206 = vmatpush1.bf16.msra.mxu0 %v17161_v5  ;;  %v17170_v57 = vld [vmem:[%s18238_s7 + $0x1c30] ss:$24 sps:$4 sm:$0xff]   ;;  %v17175_v29 = vld [vmem:[%s18238_s7 + $0x1c5c] ss:$24 sps:$4 sm:$0xff]   ;;  %v21061_v5 = vcombine.high %v21053_v15, %v21053_v15 }
 0x783   : > { %v21011_v24 = vadd.f32 %v8760_v41, %v20924_v40  ;;  %v8762_v1 = vpop.f32.mrb[42].mxu1  ;;  %10247 = vmatpush1.bf16.msra.mxu1 %v17164_v42  ;;  %v8130_v37 = vpop.f32.mrb[43].mxu0  ;;  %10207 = vmatprep.subr.bf16.mxu0 %v17169_v59  ;;  %v17173_v40 = vld [vmem:[%s18238_s7 + $0x1c58] ss:$24 sps:$4 sm:$0xff]   ;;  %v17242_v35 = vld [vmem:[%s18238_s7 + $0x1e68] ss:$24 sps:$4 sm:$0xff]  }
 0x784   : > { %v8763_v31 = vpop.f32.mrb[43].mxu1  ;;  %10248 = vmatprep.subr.bf16.mxu1 %v17172_v2  ;;  %v17233_v42 = vld [vmem:[%s18238_s7 + $0x1e30] ss:$24 sps:$4 sm:$0xff]   ;;  %v17241_v2 = vld [vmem:[%s18238_s7 + $0x1e64] ss:$24 sps:$4 sm:$0xff]  }
 0x785   : > { %v17236_v59 = vld [vmem:[%s18238_s7 + $0x1e38] ss:$24 sps:$4 sm:$0xff]   ;;  %v17247_v27 = vld [vmem:[%s18238_s7 + $0x1e94] ss:$24 sps:$4 sm:$0xff]   ;;  %v17254_v31 = vld [vmem:[%s18238_s7 + $0x1ec8] ss:$24 sps:$4 sm:$0xff]  }
 0x786   : > { %10208 = vmatpush1.bf16.msra.mxu0 %v17167_v7  ;;  %v17250_v41 = vld [vmem:[%s18238_s7 + $0x1e9c] ss:$24 sps:$4 sm:$0xff]   ;;  %v17245_v14 = vld [vmem:[%s18238_s7 + $0x1e90] ss:$24 sps:$4 sm:$0xff]   ;;  %v17251_v37 = vld [vmem:[%s18238_s7 + $0x1ec0] ss:$24 sps:$4 sm:$0xff]  }
 0x787   : > { %10249 = vmatpush1.bf16.msra.mxu1 %v17170_v57  ;;  %10209 = vmatprep.subr.bf16.mxu0 %v17175_v29  ;;  %v17248_v1 = vld [vmem:[%s18238_s7 + $0x1e98] ss:$24 sps:$4 sm:$0xff]   ;;  %v17253_v7 = vld [vmem:[%s18238_s7 + $0x1ec4] ss:$24 sps:$4 sm:$0xff]   ;;  %v17259_v29 = vld [vmem:[%s18238_s7 + $0x1ef4] ss:$24 sps:$4 sm:$0xff]  }
 0x788   : > { %10250 = vmatprep.subr.bf16.mxu1 %v17178_v33  ;;  %v17256_v57 = vld [vmem:[%s18238_s7 + $0x1ecc] ss:$24 sps:$4 sm:$0xff]   ;;  %v17262_v33 = vld [vmem:[%s18238_s7 + $0x1efc] ss:$24 sps:$4 sm:$0xff]  }
 0x78a   : > { %10210 = vmatpush1.bf16.msra.mxu0 %v17173_v40  ;;  %v17257_v40 = vld [vmem:[%s18238_s7 + $0x1ef0] ss:$24 sps:$4 sm:$0xff]  }
 0x78b   : > { %10251 = vmatpush1.bf16.msra.mxu1 %v17176_v23  ;;  %10211 = vmatprep.subr.bf16.mxu0 %v17181_v39  ;;  %v17260_v23 = vld [vmem:[%s18238_s7 + $0x1ef8] ss:$24 sps:$4 sm:$0xff]   ;;  %v17265_v39 = vld [vmem:[%s18238_s7 + $0x1f24] ss:$24 sps:$4 sm:$0xff]  }
 0x78c   : > { %10252 = vmatprep.subr.bf16.mxu1 %v17184_v16  ;;  %v17268_v16 = vld [vmem:[%s18238_s7 + $0x1f2c] ss:$24 sps:$4 sm:$0xff]  }
 0x78e   : > { %10212 = vmatpush1.bf16.msra.mxu0 %v17179_v6 }
 0x78f   : > { %10253 = vmatpush1.bf16.msra.mxu1 %v17182_v4  ;;  %10213 = vmatprep.subr.bf16.mxu0 %v17187_v60 }
 0x790   : > { %10254 = vmatprep.subr.bf16.mxu1 %v17190_v34 }
 0x792   : > { %10214 = vmatpush1.bf16.msra.mxu0 %v17185_v45 }
 0x793   : > { %10255 = vmatpush1.bf16.msra.mxu1 %v17188_v48  ;;  %10215 = vmatprep.subr.bf16.mxu0 %v17193_v62 }
 0x794   : > { %10256 = vmatprep.subr.bf16.mxu1 %v17196_v55 }
 0x796   : > { %10216 = vmatpush1.bf16.msra.mxu0 %v17191_v58 }
 0x797   : > { %10257 = vmatpush1.bf16.msra.mxu1 %v17194_v20  ;;  %10217 = vmatprep.subr.bf16.mxu0 %v17199_v17 }
 0x798   : > { %10258 = vmatprep.subr.bf16.mxu1 %v17202_v9 }
 0x79a   : > { %10218 = vmatpush1.bf16.msra.mxu0 %v17197_v46  ;;  %v17274_v46 = vld [vmem:[%s18238_s7 + $0x1f5c] ss:$24 sps:$4 sm:$0xff]  }
 0x79b   : > { %10259 = vmatpush1.bf16.msra.mxu1 %v17200_v19  ;;  %10219 = vmatprep.subr.bf16.mxu0 %v17205_v63  ;;  %v17272_v19 = vld [vmem:[%s18238_s7 + $0x1f58] ss:$24 sps:$4 sm:$0xff]   ;;  %v17277_v63 = vld [vmem:[%s18238_s7 + $0x1f84] ss:$24 sps:$4 sm:$0xff]  }
 0x79c   : > { %10260 = vmatprep.subr.bf16.mxu1 %v17208_v30  ;;  %v17280_v30 = vld [vmem:[%s18238_s7 + $0x1f8c] ss:$24 sps:$4 sm:$0xff]  }
 0x79e   : > { %10220 = vmatpush1.bf16.msra.mxu0 %v17203_v51  ;;  %v17275_v51 = vld [vmem:[%s18238_s7 + $0x1f80] ss:$24 sps:$4 sm:$0xff]  }
 0x79f   : > { %10261 = vmatpush1.bf16.msra.mxu1 %v17206_v28  ;;  %10221 = vmatprep.subr.bf16.mxu0 %v17211_v3  ;;  %v17278_v28 = vld [vmem:[%s18238_s7 + $0x1f88] ss:$24 sps:$4 sm:$0xff]   ;;  %v17283_v3 = vld [vmem:[%s18238_s7 + $0x1fb4] ss:$24 sps:$4 sm:$0xff]  }
 0x7a0   : > { %10262 = vmatprep.subr.bf16.mxu1 %v17214_v12  ;;  %v17286_v12 = vld [vmem:[%s18238_s7 + $0x1fbc] ss:$24 sps:$4 sm:$0xff]  }
 0x7a2   : > { %10222 = vmatpush1.bf16.msra.mxu0 %v17209_v50  ;;  %v17281_v50 = vld [vmem:[%s18238_s7 + $0x1fb0] ss:$24 sps:$4 sm:$0xff]  }
 0x7a3   : > { %10263 = vmatpush1.bf16.msra.mxu1 %v17212_v18  ;;  %10223 = vmatprep.subr.bf16.mxu0 %v17217_v56  ;;  %v17284_v18 = vld [vmem:[%s18238_s7 + $0x1fb8] ss:$24 sps:$4 sm:$0xff]   ;;  %v17289_v56 = vld [vmem:[%s18238_s7 + $0x1fe4] ss:$24 sps:$4 sm:$0xff]  }
 0x7a4   : > { %10264 = vmatprep.subr.bf16.mxu1 %v17220_v52  ;;  %v17292_v52 = vld [vmem:[%s18238_s7 + $0x1fec] ss:$24 sps:$4 sm:$0xff]  }
 0x7a6   : > { %10224 = vmatpush1.bf16.msra.mxu0 %v17215_v49  ;;  %v17287_v49 = vld [vmem:[%s18238_s7 + $0x1fe0] ss:$24 sps:$4 sm:$0xff]  }
 0x7a7   : > { %10265 = vmatpush1.bf16.msra.mxu1 %v17218_v47  ;;  %10225 = vmatprep.subr.bf16.mxu0 %v17223_v26  ;;  %v17290_v47 = vld [vmem:[%s18238_s7 + $0x1fe8] ss:$24 sps:$4 sm:$0xff]   ;;  %v17295_v26 = vld [vmem:[%s18238_s7 + $0x2014] ss:$24 sps:$4 sm:$0xff]  }
 0x7a8   : > { %10266 = vmatprep.subr.bf16.mxu1 %v17226_v11  ;;  %v17298_v11 = vld [vmem:[%s18238_s7 + $0x201c] ss:$24 sps:$4 sm:$0xff]  }
 0x7aa   : > { %10226 = vmatpush1.bf16.msra.mxu0 %v17221_v13  ;;  %v17293_v13 = vld [vmem:[%s18238_s7 + $0x2010] ss:$24 sps:$4 sm:$0xff]  }
 0x7ab   : > { %10267 = vmatpush1.bf16.msra.mxu1 %v17224_v61  ;;  %10869 = vmatprep.subr.bf16.mxu0 %v17229_v0  ;;  %v17296_v61 = vld [vmem:[%s18238_s7 + $0x2018] ss:$24 sps:$4 sm:$0xff]   ;;  %v17301_v0 = vld [vmem:[%s18238_s7 + $0x2044] ss:$24 sps:$4 sm:$0xff]  }
 0x7ac   : > { %10910 = vmatprep.subr.bf16.mxu1 %v17232_v32  ;;  %v17304_v32 = vld [vmem:[%s18238_s7 + $0x204c] ss:$24 sps:$4 sm:$0xff]  }
 0x7ad   : > { %10228 = vmatmul.mubr.bf16.vlgmr.msra.gmra.mrb[56].mxu0 %v20971_v22 }
 0x7ae   : > { %10269 = vmatmul.mubr.bf16.vlgmr.msra.gmra.mrb[56].mxu1 %v20971_v22  ;;  %10870 = vmatpush1.bf16.msra.mxu0 %v17227_v38  ;;  %v17239_v22 = vld [vmem:[%s18238_s7 + $0x1e60] ss:$24 sps:$4 sm:$0xff]  }
 0x7af   : > { %10911 = vmatpush1.bf16.msra.mxu1 %v17230_v10  ;;  %10871 = vmatprep.subr.bf16.mxu0 %v17235_v54  ;;  %v17299_v38 = vld [vmem:[%s18238_s7 + $0x2040] ss:$24 sps:$4 sm:$0xff]   ;;  %v17307_v54 = vld [vmem:[%s18238_s7 + $0x2074] ss:$24 sps:$4 sm:$0xff]  }
 0x7b0   : > { %10912 = vmatprep.subr.bf16.mxu1 %v17238_v36  ;;  %10901 = vmatprep.mubr.bf16.mxu0 %v21061_v5  ;;  %v17302_v10 = vld [vmem:[%s18238_s7 + $0x2048] ss:$24 sps:$4 sm:$0xff]   ;;  %v17310_v36 = vld [vmem:[%s18238_s7 + $0x207c] ss:$24 sps:$4 sm:$0xff]  }
 0x7b1   : > { %10942 = vmatprep.mubr.bf16.mxu1 %v21061_v5 }
 0x7b2   : > { %10872 = vmatpush1.bf16.msra.mxu0 %v17233_v42  ;;  %v17305_v42 = vld [vmem:[%s18238_s7 + $0x2070] ss:$24 sps:$4 sm:$0xff]  }
 0x7b3   : > { %10913 = vmatpush1.bf16.msra.mxu1 %v17236_v59  ;;  %10873 = vmatprep.subr.bf16.mxu0 %v17241_v2  ;;  %v17308_v59 = vld [vmem:[%s18238_s7 + $0x2078] ss:$24 sps:$4 sm:$0xff]   ;;  %v17313_v2 = vld [vmem:[%s18238_s7 + $0x20a4] ss:$24 sps:$4 sm:$0xff]  }
 0x7b4   : > { %10914 = vmatprep.subr.bf16.mxu1 %v17244_v25  ;;  %v17316_v25 = vld [vmem:[%s18238_s7 + $0x20ac] ss:$24 sps:$4 sm:$0xff]  }
 0x7b6   : > { %10874 = vmatpush1.bf16.msra.mxu0 %v17239_v22  ;;  %v17311_v22 = vld [vmem:[%s18238_s7 + $0x20a0] ss:$24 sps:$4 sm:$0xff]  }
 0x7b7   : > { %10915 = vmatpush1.bf16.msra.mxu1 %v17242_v35  ;;  %10875 = vmatprep.subr.bf16.mxu0 %v17247_v27  ;;  %v17314_v35 = vld [vmem:[%s18238_s7 + $0x20a8] ss:$24 sps:$4 sm:$0xff]   ;;  %v17319_v27 = vld [vmem:[%s18238_s7 + $0x20d4] ss:$24 sps:$4 sm:$0xff]  }
 0x7b8   : > { %10916 = vmatprep.subr.bf16.mxu1 %v17250_v41  ;;  %v17322_v41 = vld [vmem:[%s18238_s7 + $0x20dc] ss:$24 sps:$4 sm:$0xff]  }
 0x7ba   : > { %10876 = vmatpush1.bf16.msra.mxu0 %v17245_v14  ;;  %v17317_v14 = vld [vmem:[%s18238_s7 + $0x20d0] ss:$24 sps:$4 sm:$0xff]  }
 0x7bb   : > { %10917 = vmatpush1.bf16.msra.mxu1 %v17248_v1  ;;  %10877 = vmatprep.subr.bf16.mxu0 %v17253_v7  ;;  %v17320_v1 = vld [vmem:[%s18238_s7 + $0x20d8] ss:$24 sps:$4 sm:$0xff]   ;;  %v17327_v7 = vld [vmem:[%s18238_s7 + $0x1e14] ss:$24 sps:$4 sm:$0xff]  }
 0x7bc   : > { %10918 = vmatprep.subr.bf16.mxu1 %v17256_v57  ;;  %v17330_v57 = vld [vmem:[%s18238_s7 + $0x2104] ss:$24 sps:$4 sm:$0xff]  }
 0x7be   : > { %10878 = vmatpush1.bf16.msra.mxu0 %v17251_v37  ;;  %v21141_v37 = vcombine.low %v21053_v15, %v21053_v15  ;;  %v17331_v15 = vld [vmem:[%s18238_s7 + $0x1e40] ss:$24 sps:$4 sm:$0xff]  }
 0x7bf   : > { %10919 = vmatpush1.bf16.msra.mxu1 %v17254_v31  ;;  %10879 = vmatprep.subr.bf16.mxu0 %v17259_v29  ;;  %v21143_v31 = vld [vmem:[#allocation2 + $0x58] sm:$0xff] }
 0x7c0   : > { %10920 = vmatprep.subr.bf16.mxu1 %v17262_v33  ;;  %v8799_v6 = vpop.f32.mrb[44].mxu0  ;;  %v17325_v29 = vld [vmem:[%s18238_s7 + $0x1e10] ss:$24 sps:$4 sm:$0xff]   ;;  %v17328_v33 = vld [vmem:[%s18238_s7 + $0x2100] ss:$24 sps:$4 sm:$0xff]  }
 0x7c1   : > { %v8840_v4 = vpop.f32.mrb[44].mxu1  ;;  %v21088_v60 = vadd.f32 %v8799_v6, %v20921_v44  ;;  %v8801_v45 = vpop.f32.mrb[45].mxu0  ;;  %v17263_v44 = vld [vmem:[%s18238_s7 + $0x1f20] ss:$24 sps:$4 sm:$0xff]   ;;  %v17339_v6 = vld [vmem:[%s18238_s7 + $0x1e74] ss:$24 sps:$4 sm:$0xff]  }
 0x7c2   : > { %v21091_v34 = vadd.f32 %v8840_v4, %v21002_v53  ;;  %v8842_v48 = vpop.f32.mrb[45].mxu1  ;;  %v21094_v62 = vadd.f32 %v8801_v45, %v20927_v21  ;;  %v8803_v58 = vpop.f32.mrb[46].mxu0  ;;  %10880 = vmatpush1.bf16.msra.mxu0 %v17257_v40  ;;  %v17266_v53 = vld [vmem:[%s18238_s7 + $0x1f28] ss:$24 sps:$4 sm:$0xff]   ;;  %v17271_v21 = vld [vmem:[%s18238_s7 + $0x1f54] ss:$24 sps:$4 sm:$0xff]  }
 0x7c3   : > { %v21097_v55 = vadd.f32 %v8842_v48, %v21008_v8  ;;  %v8844_v20 = vpop.f32.mrb[46].mxu1  ;;  %10921 = vmatpush1.bf16.msra.mxu1 %v17260_v23  ;;  %v8804_v17 = vpop.f32.mrb[47].mxu0  ;;  %10881 = vmatprep.subr.bf16.mxu0 %v17265_v39  ;;  %v17269_v8 = vld [vmem:[%s18238_s7 + $0x1f50] ss:$24 sps:$4 sm:$0xff]   ;;  %v17333_v40 = vld [vmem:[%s18238_s7 + $0x1e44] ss:$24 sps:$4 sm:$0xff]   ;;  %v21151_v39 = vcombine.high %v21143_v31, %v21143_v31 }
 0x7c4   : > { %v8845_v9 = vpop.f32.mrb[47].mxu1  ;;  %10922 = vmatprep.subr.bf16.mxu1 %v17268_v16  ;;  %v17336_v23 = vld [vmem:[%s18238_s7 + $0x2134] ss:$24 sps:$4 sm:$0xff]   ;;  %v17334_v16 = vld [vmem:[%s18238_s7 + $0x2130] ss:$24 sps:$4 sm:$0xff]  }
 0x7c5   : > { %v17342_v4 = vld [vmem:[%s18238_s7 + $0x2164] ss:$24 sps:$4 sm:$0xff]   ;;  %v17337_v45 = vld [vmem:[%s18238_s7 + $0x1e70] ss:$24 sps:$4 sm:$0xff]   ;;  %v17340_v48 = vld [vmem:[%s18238_s7 + $0x2160] ss:$24 sps:$4 sm:$0xff]  }
 0x7c6   : > { %10882 = vmatpush1.bf16.msra.mxu0 %v17263_v44  ;;  %v17345_v58 = vld [vmem:[%s18238_s7 + $0x1ea4] ss:$24 sps:$4 sm:$0xff]   ;;  %v17348_v20 = vld [vmem:[%s18238_s7 + $0x2194] ss:$24 sps:$4 sm:$0xff]   ;;  %v17343_v44 = vld [vmem:[%s18238_s7 + $0x1ea0] ss:$24 sps:$4 sm:$0xff]  }
 0x7c7   : > { %10923 = vmatpush1.bf16.msra.mxu1 %v17266_v53  ;;  %10883 = vmatprep.subr.bf16.mxu0 %v17271_v21  ;;  %v17351_v53 = vld [vmem:[%s18238_s7 + $0x1ed4] ss:$24 sps:$4 sm:$0xff]   ;;  %v17354_v17 = vld [vmem:[%s18238_s7 + $0x21c4] ss:$24 sps:$4 sm:$0xff]   ;;  %v17349_v9 = vld [vmem:[%s18238_s7 + $0x1ed0] ss:$24 sps:$4 sm:$0xff]  }
 0x7c8   : > { %10924 = vmatprep.subr.bf16.mxu1 %v17274_v46  ;;  %v17352_v21 = vld [vmem:[%s18238_s7 + $0x21c0] ss:$24 sps:$4 sm:$0xff]   ;;  %v17357_v46 = vld [vmem:[%s18238_s7 + $0x1f04] ss:$24 sps:$4 sm:$0xff]  }
 0x7ca   : > { %10884 = vmatpush1.bf16.msra.mxu0 %v17269_v8  ;;  %v17360_v8 = vld [vmem:[%s18238_s7 + $0x21f4] ss:$24 sps:$4 sm:$0xff]  }
 0x7cb   : > { %10925 = vmatpush1.bf16.msra.mxu1 %v17272_v19  ;;  %10885 = vmatprep.subr.bf16.mxu0 %v17277_v63  ;;  %v17355_v19 = vld [vmem:[%s18238_s7 + $0x1f00] ss:$24 sps:$4 sm:$0xff]   ;;  %v17358_v63 = vld [vmem:[%s18238_s7 + $0x21f0] ss:$24 sps:$4 sm:$0xff]  }
 0x7cc   : > { %10926 = vmatprep.subr.bf16.mxu1 %v17280_v30  ;;  %v17363_v30 = vld [vmem:[%s18238_s7 + $0x1f34] ss:$24 sps:$4 sm:$0xff]  }
 0x7ce   : > { %10886 = vmatpush1.bf16.msra.mxu0 %v17275_v51  ;;  %v17366_v51 = vld [vmem:[%s18238_s7 + $0x2224] ss:$24 sps:$4 sm:$0xff]  }
 0x7cf   : > { %10927 = vmatpush1.bf16.msra.mxu1 %v17278_v28  ;;  %10887 = vmatprep.subr.bf16.mxu0 %v17283_v3 }
 0x7d0   : > { %10928 = vmatprep.subr.bf16.mxu1 %v17286_v12 }
 0x7d2   : > { %10888 = vmatpush1.bf16.msra.mxu0 %v17281_v50 }
 0x7d3   : > { %10929 = vmatpush1.bf16.msra.mxu1 %v17284_v18  ;;  %10889 = vmatprep.subr.bf16.mxu0 %v17289_v56 }
 0x7d4   : > { %10930 = vmatprep.subr.bf16.mxu1 %v17292_v52 }
 0x7d6   : > { %10890 = vmatpush1.bf16.msra.mxu0 %v17287_v49 }
 0x7d7   : > { %10931 = vmatpush1.bf16.msra.mxu1 %v17290_v47  ;;  %10891 = vmatprep.subr.bf16.mxu0 %v17295_v26 }
 0x7d8   : > { %10932 = vmatprep.subr.bf16.mxu1 %v17298_v11 }
 0x7da   : > { %10892 = vmatpush1.bf16.msra.mxu0 %v17293_v13 }
 0x7db   : > { %10933 = vmatpush1.bf16.msra.mxu1 %v17296_v61  ;;  %10893 = vmatprep.subr.bf16.mxu0 %v17301_v0  ;;  %v17372_v61 = vld [vmem:[%s18238_s7 + $0x2254] ss:$24 sps:$4 sm:$0xff]   ;;  %v17370_v0 = vld [vmem:[%s18238_s7 + $0x2250] ss:$24 sps:$4 sm:$0xff]  }
 0x7dc   : > { %10934 = vmatprep.subr.bf16.mxu1 %v17304_v32  ;;  %v17375_v32 = vld [vmem:[%s18238_s7 + $0x1f94] ss:$24 sps:$4 sm:$0xff]  }
 0x7de   : > { %10894 = vmatpush1.bf16.msra.mxu0 %v17299_v38  ;;  %v17378_v38 = vld [vmem:[%s18238_s7 + $0x2284] ss:$24 sps:$4 sm:$0xff]  }
 0x7df   : > { %10935 = vmatpush1.bf16.msra.mxu1 %v17302_v10  ;;  %10895 = vmatprep.subr.bf16.mxu0 %v17307_v54  ;;  %v17373_v10 = vld [vmem:[%s18238_s7 + $0x1f90] ss:$24 sps:$4 sm:$0xff]   ;;  %v17376_v54 = vld [vmem:[%s18238_s7 + $0x2280] ss:$24 sps:$4 sm:$0xff]  }
 0x7e0   : > { %10936 = vmatprep.subr.bf16.mxu1 %v17310_v36  ;;  %v17381_v36 = vld [vmem:[%s18238_s7 + $0x1fc4] ss:$24 sps:$4 sm:$0xff]  }
 0x7e2   : > { %10896 = vmatpush1.bf16.msra.mxu0 %v17305_v42  ;;  %v17384_v42 = vld [vmem:[%s18238_s7 + $0x22b4] ss:$24 sps:$4 sm:$0xff]  }
 0x7e3   : > { %10937 = vmatpush1.bf16.msra.mxu1 %v17308_v59  ;;  %10897 = vmatprep.subr.bf16.mxu0 %v17313_v2  ;;  %v17379_v59 = vld [vmem:[%s18238_s7 + $0x1fc0] ss:$24 sps:$4 sm:$0xff]   ;;  %v17382_v2 = vld [vmem:[%s18238_s7 + $0x22b0] ss:$24 sps:$4 sm:$0xff]  }
 0x7e4   : > { %10938 = vmatprep.subr.bf16.mxu1 %v17316_v25  ;;  %v17387_v25 = vld [vmem:[%s18238_s7 + $0x1ff4] ss:$24 sps:$4 sm:$0xff]  }
 0x7e6   : > { %10898 = vmatpush1.bf16.msra.mxu0 %v17311_v22  ;;  %v17390_v22 = vld [vmem:[%s18238_s7 + $0x22e4] ss:$24 sps:$4 sm:$0xff]  }
 0x7e7   : > { %10939 = vmatpush1.bf16.msra.mxu1 %v17314_v35  ;;  %10899 = vmatprep.subr.bf16.mxu0 %v17319_v27  ;;  %v17385_v35 = vld [vmem:[%s18238_s7 + $0x1ff0] ss:$24 sps:$4 sm:$0xff]   ;;  %v17388_v27 = vld [vmem:[%s18238_s7 + $0x22e0] ss:$24 sps:$4 sm:$0xff]  }
 0x7e8   : > { %10940 = vmatprep.subr.bf16.mxu1 %v17322_v41  ;;  %v17393_v41 = vld [vmem:[%s18238_s7 + $0x2024] ss:$24 sps:$4 sm:$0xff]  }
 0x7ea   : > { %10900 = vmatpush1.bf16.msra.mxu0 %v17317_v14  ;;  %v17396_v14 = vld [vmem:[%s18238_s7 + $0x2314] ss:$24 sps:$4 sm:$0xff]  }
 0x7eb   : > { %10941 = vmatpush1.bf16.msra.mxu1 %v17320_v1  ;;  %10951 = vmatprep.subr.bf16.mxu0 %v17327_v7  ;;  %v17391_v1 = vld [vmem:[%s18238_s7 + $0x2020] ss:$24 sps:$4 sm:$0xff]   ;;  %v17394_v7 = vld [vmem:[%s18238_s7 + $0x2310] ss:$24 sps:$4 sm:$0xff]  }
 0x7ec   : > { %11584 = vmatprep.subr.bf16.mxu1 %v17330_v57  ;;  %v17399_v57 = vld [vmem:[%s18238_s7 + $0x2054] ss:$24 sps:$4 sm:$0xff]  }
 0x7ed   : > { %10902 = vmatmul.mubr.bf16.vlgmr.msra.gmra.mrb[60].mxu0 %v21141_v37 }
 0x7ee   : > { %10943 = vmatmul.mubr.bf16.vlgmr.msra.gmra.mrb[60].mxu1 %v21141_v37  ;;  %10952 = vmatpush1.bf16.msra.mxu0 %v17325_v29  ;;  %v17402_v29 = vld [vmem:[%s18238_s7 + $0x2344] ss:$24 sps:$4 sm:$0xff]  }
 0x7ef   : > { %11585 = vmatpush1.bf16.msra.mxu1 %v17328_v33  ;;  %10953 = vmatprep.subr.bf16.mxu0 %v17333_v40  ;;  %v17397_v33 = vld [vmem:[%s18238_s7 + $0x2050] ss:$24 sps:$4 sm:$0xff]   ;;  %v17400_v40 = vld [vmem:[%s18238_s7 + $0x2340] ss:$24 sps:$4 sm:$0xff]  }
 0x7f0   : > { %11586 = vmatprep.subr.bf16.mxu1 %v17336_v23  ;;  %10983 = vmatprep.mubr.bf16.mxu0 %v21061_v5  ;;  %v17346_v5 = vld [vmem:[%s18238_s7 + $0x2190] ss:$24 sps:$4 sm:$0xff]   ;;  %v17405_v23 = vld [vmem:[%s18238_s7 + $0x2084] ss:$24 sps:$4 sm:$0xff]  }
 0x7f1   : > { %11616 = vmatprep.mubr.bf16.mxu1 %v21151_v39 }
 0x7f2   : > { %10954 = vmatpush1.bf16.msra.mxu0 %v17331_v15  ;;  %v17408_v15 = vld [vmem:[%s18238_s7 + $0x2374] ss:$24 sps:$4 sm:$0xff]  }
 0x7f3   : > { %11587 = vmatpush1.bf16.msra.mxu1 %v17334_v16  ;;  %10955 = vmatprep.subr.bf16.mxu0 %v17339_v6  ;;  %v17403_v16 = vld [vmem:[%s18238_s7 + $0x2080] ss:$24 sps:$4 sm:$0xff]   ;;  %v17406_v6 = vld [vmem:[%s18238_s7 + $0x2370] ss:$24 sps:$4 sm:$0xff]  }
 0x7f4   : > { %11588 = vmatprep.subr.bf16.mxu1 %v17342_v4  ;;  %v17411_v4 = vld [vmem:[%s18238_s7 + $0x20b4] ss:$24 sps:$4 sm:$0xff]  }
 0x7f6   : > { %10956 = vmatpush1.bf16.msra.mxu0 %v17337_v45  ;;  %v17414_v45 = vld [vmem:[%s18238_s7 + $0x23a4] ss:$24 sps:$4 sm:$0xff]  }
 0x7f7   : > { %11589 = vmatpush1.bf16.msra.mxu1 %v17340_v48  ;;  %10957 = vmatprep.subr.bf16.mxu0 %v17345_v58  ;;  %v17409_v48 = vld [vmem:[%s18238_s7 + $0x20b0] ss:$24 sps:$4 sm:$0xff]   ;;  %v17412_v58 = vld [vmem:[%s18238_s7 + $0x23a0] ss:$24 sps:$4 sm:$0xff]  }
 0x7f8   : > { %11590 = vmatprep.subr.bf16.mxu1 %v17348_v20  ;;  %v17417_v20 = vld [vmem:[%s18238_s7 + $0x20e4] ss:$24 sps:$4 sm:$0xff]  }
 0x7fa   : > { %10958 = vmatpush1.bf16.msra.mxu0 %v17343_v44  ;;  %v17420_v44 = vld [vmem:[%s18238_s7 + $0x23d4] ss:$24 sps:$4 sm:$0xff]  }
 0x7fb   : > { %11591 = vmatpush1.bf16.msra.mxu1 %v17346_v5  ;;  %10959 = vmatprep.subr.bf16.mxu0 %v17351_v53  ;;  %v17415_v5 = vld [vmem:[%s18238_s7 + $0x20e0] ss:$24 sps:$4 sm:$0xff]   ;;  %v17418_v53 = vld [vmem:[%s18238_s7 + $0x23d0] ss:$24 sps:$4 sm:$0xff]  }
 0x7fc   : > { %11592 = vmatprep.subr.bf16.mxu1 %v17354_v17  ;;  %v17425_v17 = vld [vmem:[%s18238_s7 + $0x210c] ss:$24 sps:$4 sm:$0xff]  }
 0x7fe   : > { %10960 = vmatpush1.bf16.msra.mxu0 %v17349_v9  ;;  %v17428_v9 = vld [vmem:[%s18238_s7 + $0x2114] ss:$24 sps:$4 sm:$0xff]  }
 0x7ff   : > { %11593 = vmatpush1.bf16.msra.mxu1 %v17352_v21  ;;  %10961 = vmatprep.subr.bf16.mxu0 %v17357_v46  ;;  %v21231_v21 = vcombine.low %v21143_v31, %v21143_v31  ;;  %v17423_v46 = vld [vmem:[%s18238_s7 + $0x2108] ss:$24 sps:$4 sm:$0xff]   ;;  %v17429_v31 = vld [vmem:[%s18238_s7 + $0x2138] ss:$24 sps:$4 sm:$0xff]  }
 0x800   : > { %11594 = vmatprep.subr.bf16.mxu1 %v17360_v8  ;;  %v9473_v28 = vpop.f32.mrb[48].mxu0  ;;  %v17426_v8 = vld [vmem:[%s18238_s7 + $0x2110] ss:$24 sps:$4 sm:$0xff]  }
 0x801   : > { %v9514_v3 = vpop.f32.mrb[48].mxu1  ;;  %v21178_v12 = vadd.f32 %v9473_v28, %v21005_v43  ;;  %v9475_v18 = vpop.f32.mrb[49].mxu0  ;;  %v17361_v43 = vld [vmem:[%s18238_s7 + $0x1f30] ss:$24 sps:$4 sm:$0xff]   ;;  %v17440_v28 = vld [vmem:[%s18238_s7 + $0x2174] ss:$24 sps:$4 sm:$0xff]  }
 0x802   : > { %v21181_v50 = vadd.f32 %v9514_v3, %v21088_v60  ;;  %v9516_v56 = vpop.f32.mrb[49].mxu1  ;;  %v21184_v52 = vadd.f32 %v9475_v18, %v21011_v24  ;;  %v9477_v47 = vpop.f32.mrb[50].mxu0  ;;  %10962 = vmatpush1.bf16.msra.mxu0 %v17355_v19  ;;  %v17364_v60 = vld [vmem:[%s18238_s7 + $0x2220] ss:$24 sps:$4 sm:$0xff]   ;;  %v17369_v24 = vld [vmem:[%s18238_s7 + $0x1f64] ss:$24 sps:$4 sm:$0xff]  }
 0x803   : > { %v21187_v49 = vadd.f32 %v9516_v56, %v21094_v62  ;;  %v9518_v26 = vpop.f32.mrb[50].mxu1  ;;  %11595 = vmatpush1.bf16.msra.mxu1 %v17358_v63  ;;  %v9478_v11 = vpop.f32.mrb[51].mxu0  ;;  %10963 = vmatprep.subr.bf16.mxu0 %v17363_v30  ;;  %v17367_v62 = vld [vmem:[%s18238_s7 + $0x1f60] ss:$24 sps:$4 sm:$0xff]   ;;  %v17431_v19 = vld [vmem:[%s18238_s7 + $0x213c] ss:$24 sps:$4 sm:$0xff]  }
 0x804   : > { %v9519_v13 = vpop.f32.mrb[51].mxu1  ;;  %11596 = vmatprep.subr.bf16.mxu1 %v17366_v51  ;;  %v17434_v63 = vld [vmem:[%s18238_s7 + $0x2144] ss:$24 sps:$4 sm:$0xff]   ;;  %v17432_v30 = vld [vmem:[%s18238_s7 + $0x2140] ss:$24 sps:$4 sm:$0xff]  }
 0x805   : > { %v17437_v51 = vld [vmem:[%s18238_s7 + $0x216c] ss:$24 sps:$4 sm:$0xff]   ;;  %v17438_v3 = vld [vmem:[%s18238_s7 + $0x2170] ss:$24 sps:$4 sm:$0xff]   ;;  %v17443_v18 = vld [vmem:[%s18238_s7 + $0x219c] ss:$24 sps:$4 sm:$0xff]  }
 0x806   : > { %10964 = vmatpush1.bf16.msra.mxu0 %v17361_v43  ;;  %v17446_v56 = vld [vmem:[%s18238_s7 + $0x21a4] ss:$24 sps:$4 sm:$0xff]   ;;  %v17441_v47 = vld [vmem:[%s18238_s7 + $0x2198] ss:$24 sps:$4 sm:$0xff]   ;;  %v17452_v43 = vld [vmem:[%s18238_s7 + $0x21d4] ss:$24 sps:$4 sm:$0xff]  }
 0x807   : > { %11597 = vmatpush1.bf16.msra.mxu1 %v17364_v60  ;;  %10965 = vmatprep.subr.bf16.mxu0 %v17369_v24  ;;  %v17444_v26 = vld [vmem:[%s18238_s7 + $0x21a0] ss:$24 sps:$4 sm:$0xff]   ;;  %v17450_v11 = vld [vmem:[%s18238_s7 + $0x21d0] ss:$24 sps:$4 sm:$0xff]   ;;  %v17455_v13 = vld [vmem:[%s18238_s7 + $0x21fc] ss:$24 sps:$4 sm:$0xff]  }
 0x808   : > { %11598 = vmatprep.subr.bf16.mxu1 %v17372_v61  ;;  %v17447_v60 = vld [vmem:[%s18238_s7 + $0x21c8] ss:$24 sps:$4 sm:$0xff]   ;;  %v17458_v24 = vld [vmem:[%s18238_s7 + $0x2204] ss:$24 sps:$4 sm:$0xff]   ;;  %v17453_v61 = vld [vmem:[%s18238_s7 + $0x21f8] ss:$24 sps:$4 sm:$0xff]  }
 0x80a   : > { %10966 = vmatpush1.bf16.msra.mxu0 %v17367_v62  ;;  %v17456_v62 = vld [vmem:[%s18238_s7 + $0x2200] ss:$24 sps:$4 sm:$0xff]  }
 0x80b   : > { %11599 = vmatpush1.bf16.msra.mxu1 %v17370_v0  ;;  %10967 = vmatprep.subr.bf16.mxu0 %v17375_v32  ;;  %v17461_v0 = vld [vmem:[%s18238_s7 + $0x222c] ss:$24 sps:$4 sm:$0xff]  }
 0x80c   : > { %11600 = vmatprep.subr.bf16.mxu1 %v17378_v38  ;;  %v17464_v32 = vld [vmem:[%s18238_s7 + $0x2234] ss:$24 sps:$4 sm:$0xff]  }
 0x80e   : > { %10968 = vmatpush1.bf16.msra.mxu0 %v17373_v10 }
 0x80f   : > { %11601 = vmatpush1.bf16.msra.mxu1 %v17376_v54  ;;  %10969 = vmatprep.subr.bf16.mxu0 %v17381_v36 }
 0x810   : > { %11602 = vmatprep.subr.bf16.mxu1 %v17384_v42 }
 0x812   : > { %10970 = vmatpush1.bf16.msra.mxu0 %v17379_v59 }
 0x813   : > { %11603 = vmatpush1.bf16.msra.mxu1 %v17382_v2  ;;  %10971 = vmatprep.subr.bf16.mxu0 %v17387_v25 }
 0x814   : > { %11604 = vmatprep.subr.bf16.mxu1 %v17390_v22 }
 0x816   : > { %10972 = vmatpush1.bf16.msra.mxu0 %v17385_v35 }
 0x817   : > { %11605 = vmatpush1.bf16.msra.mxu1 %v17388_v27  ;;  %10973 = vmatprep.subr.bf16.mxu0 %v17393_v41 }
 0x818   : > { %11606 = vmatprep.subr.bf16.mxu1 %v17396_v14  ;;  %v17470_v14 = vld [vmem:[%s18238_s7 + $0x2264] ss:$24 sps:$4 sm:$0xff]  }
 0x81a   : > { %10974 = vmatpush1.bf16.msra.mxu0 %v17391_v1  ;;  %v17468_v1 = vld [vmem:[%s18238_s7 + $0x2260] ss:$24 sps:$4 sm:$0xff]  }
 0x81b   : > { %11607 = vmatpush1.bf16.msra.mxu1 %v17394_v7  ;;  %10975 = vmatprep.subr.bf16.mxu0 %v17399_v57  ;;  %v17473_v7 = vld [vmem:[%s18238_s7 + $0x228c] ss:$24 sps:$4 sm:$0xff]  }
 0x81c   : > { %11608 = vmatprep.subr.bf16.mxu1 %v17402_v29  ;;  %v17476_v57 = vld [vmem:[%s18238_s7 + $0x2294] ss:$24 sps:$4 sm:$0xff]   ;;  %v17471_v29 = vld [vmem:[%s18238_s7 + $0x2288] ss:$24 sps:$4 sm:$0xff]  }
 0x81e   : > { %10976 = vmatpush1.bf16.msra.mxu0 %v17397_v33  ;;  %v17474_v33 = vld [vmem:[%s18238_s7 + $0x2290] ss:$24 sps:$4 sm:$0xff]  }
 0x81f   : > { %11609 = vmatpush1.bf16.msra.mxu1 %v17400_v40  ;;  %10977 = vmatprep.subr.bf16.mxu0 %v17405_v23  ;;  %v17479_v40 = vld [vmem:[%s18238_s7 + $0x22bc] ss:$24 sps:$4 sm:$0xff]  }
 0x820   : > { %11610 = vmatprep.subr.bf16.mxu1 %v17408_v15  ;;  %v17482_v23 = vld [vmem:[%s18238_s7 + $0x22c4] ss:$24 sps:$4 sm:$0xff]   ;;  %v17477_v15 = vld [vmem:[%s18238_s7 + $0x22b8] ss:$24 sps:$4 sm:$0xff]  }
 0x822   : > { %10978 = vmatpush1.bf16.msra.mxu0 %v17403_v16  ;;  %v17480_v16 = vld [vmem:[%s18238_s7 + $0x22c0] ss:$24 sps:$4 sm:$0xff]  }
 0x823   : > { %11611 = vmatpush1.bf16.msra.mxu1 %v17406_v6  ;;  %10979 = vmatprep.subr.bf16.mxu0 %v17411_v4  ;;  %v17485_v6 = vld [vmem:[%s18238_s7 + $0x22ec] ss:$24 sps:$4 sm:$0xff]  }
 0x824   : > { %11612 = vmatprep.subr.bf16.mxu1 %v17414_v45  ;;  %v17488_v4 = vld [vmem:[%s18238_s7 + $0x22f4] ss:$24 sps:$4 sm:$0xff]   ;;  %v17483_v45 = vld [vmem:[%s18238_s7 + $0x22e8] ss:$24 sps:$4 sm:$0xff]  }
 0x826   : > { %10980 = vmatpush1.bf16.msra.mxu0 %v17409_v48  ;;  %v17486_v48 = vld [vmem:[%s18238_s7 + $0x22f0] ss:$24 sps:$4 sm:$0xff]  }
 0x827   : > { %11613 = vmatpush1.bf16.msra.mxu1 %v17412_v58  ;;  %10981 = vmatprep.subr.bf16.mxu0 %v17417_v20  ;;  %v17491_v58 = vld [vmem:[%s18238_s7 + $0x231c] ss:$24 sps:$4 sm:$0xff]  }
 0x828   : > { %11614 = vmatprep.subr.bf16.mxu1 %v17420_v44  ;;  %v17494_v20 = vld [vmem:[%s18238_s7 + $0x2324] ss:$24 sps:$4 sm:$0xff]   ;;  %v17489_v44 = vld [vmem:[%s18238_s7 + $0x2318] ss:$24 sps:$4 sm:$0xff]  }
 0x82a   : > { %10982 = vmatpush1.bf16.msra.mxu0 %v17415_v5  ;;  %v17492_v5 = vld [vmem:[%s18238_s7 + $0x2320] ss:$24 sps:$4 sm:$0xff]  }
 0x82b   : > { %11615 = vmatpush1.bf16.msra.mxu1 %v17418_v53  ;;  %11625 = vmatprep.subr.bf16.mxu0 %v17425_v17  ;;  %v17497_v53 = vld [vmem:[%s18238_s7 + $0x234c] ss:$24 sps:$4 sm:$0xff]  }
 0x82c   : > { %11666 = vmatprep.subr.bf16.mxu1 %v17428_v9  ;;  %v17500_v17 = vld [vmem:[%s18238_s7 + $0x2354] ss:$24 sps:$4 sm:$0xff]   ;;  %v17495_v9 = vld [vmem:[%s18238_s7 + $0x2348] ss:$24 sps:$4 sm:$0xff]  }
 0x82d   : > { %10984 = vmatmul.mubr.bf16.vlgmr.msra.gmra.mrb[64].mxu0 %v21141_v37  ;;  %v17435_v37 = vld [vmem:[%s18238_s7 + $0x2168] ss:$24 sps:$4 sm:$0xff]  }
 0x82e   : > { %11617 = vmatmul.mubr.bf16.vlgmr.msra.gmra.mrb[64].mxu1 %v21231_v21  ;;  %11626 = vmatpush1.bf16.msra.mxu0 %v17423_v46  ;;  %v17498_v46 = vld [vmem:[%s18238_s7 + $0x2350] ss:$24 sps:$4 sm:$0xff]  }
 0x82f   : > { %11667 = vmatpush1.bf16.msra.mxu1 %v17426_v8  ;;  %11627 = vmatprep.subr.bf16.mxu0 %v17431_v19  ;;  %v17503_v8 = vld [vmem:[%s18238_s7 + $0x237c] ss:$24 sps:$4 sm:$0xff]  }
 0x830   : > { %11668 = vmatprep.subr.bf16.mxu1 %v17434_v63  ;;  %11657 = vmatprep.mubr.bf16.mxu0 %v21151_v39  ;;  %v17506_v19 = vld [vmem:[%s18238_s7 + $0x2384] ss:$24 sps:$4 sm:$0xff]   ;;  %v17501_v63 = vld [vmem:[%s18238_s7 + $0x2378] ss:$24 sps:$4 sm:$0xff]  }
 0x831   : > { %11698 = vmatprep.mubr.bf16.mxu1 %v21151_v39  ;;  %v17449_v39 = vld [vmem:[%s18238_s7 + $0x21cc] ss:$24 sps:$4 sm:$0xff]  }
 0x832   : > { %11628 = vmatpush1.bf16.msra.mxu0 %v17429_v31  ;;  %v17504_v31 = vld [vmem:[%s18238_s7 + $0x2380] ss:$24 sps:$4 sm:$0xff]  }
 0x833   : > { %11669 = vmatpush1.bf16.msra.mxu1 %v17432_v30  ;;  %11629 = vmatprep.subr.bf16.mxu0 %v17437_v51  ;;  %v17509_v30 = vld [vmem:[%s18238_s7 + $0x23ac] ss:$24 sps:$4 sm:$0xff]  }
 0x834   : > { %11670 = vmatprep.subr.bf16.mxu1 %v17440_v28  ;;  %v17512_v51 = vld [vmem:[%s18238_s7 + $0x23b4] ss:$24 sps:$4 sm:$0xff]   ;;  %v17507_v28 = vld [vmem:[%s18238_s7 + $0x23a8] ss:$24 sps:$4 sm:$0xff]  }
 0x836   : > { %11630 = vmatpush1.bf16.msra.mxu0 %v17435_v37  ;;  %v17510_v37 = vld [vmem:[%s18238_s7 + $0x23b0] ss:$24 sps:$4 sm:$0xff]  }
 0x837   : > { %11671 = vmatpush1.bf16.msra.mxu1 %v17438_v3  ;;  %11631 = vmatprep.subr.bf16.mxu0 %v17443_v18  ;;  %v17515_v3 = vld [vmem:[%s18238_s7 + $0x23dc] ss:$24 sps:$4 sm:$0xff]  }
 0x838   : > { %11672 = vmatprep.subr.bf16.mxu1 %v17446_v56  ;;  %v17518_v18 = vld [vmem:[%s18238_s7 + $0x23e4] ss:$24 sps:$4 sm:$0xff]   ;;  %v17513_v56 = vld [vmem:[%s18238_s7 + $0x23d8] ss:$24 sps:$4 sm:$0xff]  }
 0x83a   : > { %11632 = vmatpush1.bf16.msra.mxu0 %v17441_v47  ;;  %v17516_v47 = vld [vmem:[%s18238_s7 + $0x23e0] ss:$24 sps:$4 sm:$0xff]  }
 0x83b   : > { %11673 = vmatpush1.bf16.msra.mxu1 %v17444_v26  ;;  %11633 = vmatprep.subr.bf16.mxu0 %v17449_v39 }
 0x83c   : > { %11674 = vmatprep.subr.bf16.mxu1 %v17452_v43 }
 0x83e   : > { %11634 = vmatpush1.bf16.msra.mxu0 %v17447_v60 }
 0x83f   : > { %11675 = vmatpush1.bf16.msra.mxu1 %v17450_v11  ;;  %11635 = vmatprep.subr.bf16.mxu0 %v17455_v13 }
 0x840   : > { %11676 = vmatprep.subr.bf16.mxu1 %v17458_v24  ;;  %v9555_v38 = vpop.f32.mrb[52].mxu0 }
 0x841   : > { %v10188_v10 = vpop.f32.mrb[52].mxu1  ;;  %v21262_v54 = vadd.f32 %v9555_v38, %v21091_v34  ;;  %v9557_v42 = vpop.f32.mrb[53].mxu0  ;;  %v17459_v34 = vld [vmem:[%s18238_s7 + $0x2228] ss:$24 sps:$4 sm:$0xff]  }
 0x842   : > { %v21265_v36 = vadd.f32 %v10188_v10, %v21178_v12  ;;  %v10190_v59 = vpop.f32.mrb[53].mxu1  ;;  %v21268_v2 = vadd.f32 %v9557_v42, %v21097_v55  ;;  %v9559_v22 = vpop.f32.mrb[54].mxu0  ;;  %11636 = vmatpush1.bf16.msra.mxu0 %v17453_v61  ;;  %v17462_v12 = vld [vmem:[%s18238_s7 + $0x2230] ss:$24 sps:$4 sm:$0xff]   ;;  %v17467_v55 = vld [vmem:[%s18238_s7 + $0x225c] ss:$24 sps:$4 sm:$0xff]  }
 0x843   : > { %v21271_v25 = vadd.f32 %v10190_v59, %v21184_v52  ;;  %v10192_v35 = vpop.f32.mrb[54].mxu1  ;;  %11677 = vmatpush1.bf16.msra.mxu1 %v17456_v62  ;;  %v9560_v27 = vpop.f32.mrb[55].mxu0  ;;  %11637 = vmatprep.subr.bf16.mxu0 %v17461_v0  ;;  %v17465_v52 = vld [vmem:[%s18238_s7 + $0x2258] ss:$24 sps:$4 sm:$0xff]   ;;  %v11877_v38 = vld [vmem:[%s18256_s5 + $0x88] sm:$0xff]  ;;  %v11878_v59 = vld [vmem:[%s18256_s5 + $0x90] sm:$0xff] }
 0x844   : > { %v10193_v41 = vpop.f32.mrb[55].mxu1  ;;  %11678 = vmatprep.subr.bf16.mxu1 %v17464_v32  ;;  %v11876_v32 = vld [vmem:[%s18256_s5 + $0x80] sm:$0xff]  ;;  %v11861_v42 = vld [vmem:[%s18256_s5 + $0x8] sm:$0xff]  ;;  %v11862_v35 = vld [vmem:[%s18256_s5 + $0x10] sm:$0xff] }
 0x845   : > { %v14989_v10 = vpack.c.bf16 %v11877_v38, %v11876_v32  ;;  %v11880_v27 = vld [vmem:[%s18256_s5 + $0xa0] sm:$0xff]  ;;  %v11881_v41 = vld [vmem:[%s18256_s5 + $0xa8] sm:$0xff] }
 0x846   : > { %11638 = vmatpush1.bf16.msra.mxu0 %v17459_v34  ;;  %v11863_v34 = vld [vmem:[%s18256_s5 + $0x18] sm:$0xff] }
 0x847   : > { %11679 = vmatpush1.bf16.msra.mxu1 %v17462_v12  ;;  %11639 = vmatprep.subr.bf16.mxu0 %v17467_v55  ;;  %v14995_v12 = vpack.c.bf16 %v11863_v34, %v11862_v35  ;;  %v14997_v55 = vpack.c.bf16 %v11881_v41, %v11880_v27  ;;  %v11894_v34 = vld [vmem:[%s18256_s5 + $0x110] sm:$0xff]  ;;  %v11912_v41 = vld [vmem:[%s18256_s5 + $0x1a0] sm:$0xff] }
 0x848   : > { %11680 = vmatprep.subr.bf16.mxu1 %v17470_v14  ;;  %v11864_v14 = vld [vmem:[%s18256_s5 + $0x20] sm:$0xff] }
 0x84a   : > { %11640 = vmatpush1.bf16.msra.mxu0 %v17465_v52  ;;  %v11865_v52 = vld [vmem:[%s18256_s5 + $0x28] sm:$0xff] }
 0x84b   : > { %11681 = vmatpush1.bf16.msra.mxu1 %v17468_v1  ;;  %11641 = vmatprep.subr.bf16.mxu0 %v17473_v7  ;;  %v14999_v1 = vpack.c.bf16 %v11865_v52, %v11864_v14  ;;  %v11882_v7 = vld [vmem:[%s18256_s5 + $0xb0] sm:$0xff]  ;;  %v11896_v52 = vld [vmem:[%s18256_s5 + $0x120] sm:$0xff] }
 0x84c   : > { %11682 = vmatprep.subr.bf16.mxu1 %v17476_v57  ;;  %v11883_v57 = vld [vmem:[%s18256_s5 + $0xb8] sm:$0xff] }
 0x84e   : > { %11642 = vmatpush1.bf16.msra.mxu0 %v17471_v29  ;;  %v15001_v29 = vpack.c.bf16 %v11883_v57, %v11882_v7  ;;  %v11914_v57 = vld [vmem:[%s18256_s5 + $0x1b0] sm:$0xff] }
 0x84f   : > { %11683 = vmatpush1.bf16.msra.mxu1 %v17474_v33  ;;  %11643 = vmatprep.subr.bf16.mxu0 %v17479_v40  ;;  %v11866_v33 = vld [vmem:[%s18256_s5 + $0x30] sm:$0xff]  ;;  %v11867_v40 = vld [vmem:[%s18256_s5 + $0x38] sm:$0xff] }
 0x850   : > { %11684 = vmatprep.subr.bf16.mxu1 %v17482_v23  ;;  %v15003_v23 = vpack.c.bf16 %v11867_v40, %v11866_v33  ;;  %v11898_v40 = vld [vmem:[%s18256_s5 + $0x130] sm:$0xff] }
 0x852   : > { %11644 = vmatpush1.bf16.msra.mxu0 %v17477_v15  ;;  %v11884_v15 = vld [vmem:[%s18256_s5 + $0xc0] sm:$0xff] }
 0x853   : > { %11685 = vmatpush1.bf16.msra.mxu1 %v17480_v16  ;;  %11645 = vmatprep.subr.bf16.mxu0 %v17485_v6  ;;  %v11885_v16 = vld [vmem:[%s18256_s5 + $0xc8] sm:$0xff] }
 0x854   : > { %11686 = vmatprep.subr.bf16.mxu1 %v17488_v4  ;;  %v15005_v6 = vpack.c.bf16 %v11885_v16, %v11884_v15  ;;  %v11868_v4 = vld [vmem:[%s18256_s5 + $0x40] sm:$0xff] }
 0x855   : > { %v11916_v16 = vld [vmem:[%s18256_s5 + $0x1c0] sm:$0xff] }
 0x856   : > { %11646 = vmatpush1.bf16.msra.mxu0 %v17483_v45  ;;  %v11869_v45 = vld [vmem:[%s18256_s5 + $0x48] sm:$0xff] }
 0x857   : > { %11687 = vmatpush1.bf16.msra.mxu1 %v17486_v48  ;;  %11647 = vmatprep.subr.bf16.mxu0 %v17491_v58  ;;  %v15007_v48 = vpack.c.bf16 %v11869_v45, %v11868_v4  ;;  %v11886_v58 = vld [vmem:[%s18256_s5 + $0xd0] sm:$0xff]  ;;  %v11900_v45 = vld [vmem:[%s18256_s5 + $0x140] sm:$0xff] }
 0x858   : > { %11688 = vmatprep.subr.bf16.mxu1 %v17494_v20  ;;  %v11887_v20 = vld [vmem:[%s18256_s5 + $0xd8] sm:$0xff] }
 0x85a   : > { %11648 = vmatpush1.bf16.msra.mxu0 %v17489_v44  ;;  %v15009_v44 = vpack.c.bf16 %v11887_v20, %v11886_v58  ;;  %v11918_v20 = vld [vmem:[%s18256_s5 + $0x1d0] sm:$0xff] }
 0x85b   : > { %11689 = vmatpush1.bf16.msra.mxu1 %v17492_v5  ;;  %11649 = vmatprep.subr.bf16.mxu0 %v17497_v53  ;;  %v11870_v5 = vld [vmem:[%s18256_s5 + $0x50] sm:$0xff]  ;;  %v11871_v53 = vld [vmem:[%s18256_s5 + $0x58] sm:$0xff] }
 0x85c   : > { %11690 = vmatprep.subr.bf16.mxu1 %v17500_v17  ;;  %v15011_v17 = vpack.c.bf16 %v11871_v53, %v11870_v5  ;;  %v11902_v53 = vld [vmem:[%s18256_s5 + $0x150] sm:$0xff] }
 0x85e   : > { %11650 = vmatpush1.bf16.msra.mxu0 %v17495_v9  ;;  %v11888_v9 = vld [vmem:[%s18256_s5 + $0xe0] sm:$0xff] }
 0x85f   : > { %11691 = vmatpush1.bf16.msra.mxu1 %v17498_v46  ;;  %11651 = vmatprep.subr.bf16.mxu0 %v17503_v8  ;;  %v11889_v46 = vld [vmem:[%s18256_s5 + $0xe8] sm:$0xff] }
 0x860   : > { %11692 = vmatprep.subr.bf16.mxu1 %v17506_v19  ;;  %v15013_v8 = vpack.c.bf16 %v11889_v46, %v11888_v9  ;;  %v11872_v19 = vld [vmem:[%s18256_s5 + $0x60] sm:$0xff] }
 0x861   : > { %v11920_v46 = vld [vmem:[%s18256_s5 + $0x1e0] sm:$0xff] }
 0x862   : > { %11652 = vmatpush1.bf16.msra.mxu0 %v17501_v63  ;;  %v11873_v63 = vld [vmem:[%s18256_s5 + $0x68] sm:$0xff] }
 0x863   : > { %11693 = vmatpush1.bf16.msra.mxu1 %v17504_v31  ;;  %11653 = vmatprep.subr.bf16.mxu0 %v17509_v30  ;;  %v15015_v31 = vpack.c.bf16 %v11873_v63, %v11872_v19  ;;  %v11890_v30 = vld [vmem:[%s18256_s5 + $0xf0] sm:$0xff]  ;;  %v11904_v63 = vld [vmem:[%s18256_s5 + $0x160] sm:$0xff] }
 0x864   : > { %11694 = vmatprep.subr.bf16.mxu1 %v17512_v51  ;;  %v11891_v51 = vld [vmem:[%s18256_s5 + $0xf8] sm:$0xff] }
 0x866   : > { %11654 = vmatpush1.bf16.msra.mxu0 %v17507_v28  ;;  %v15017_v28 = vpack.c.bf16 %v11891_v51, %v11890_v30  ;;  %v11715_v51 = vlaneseq }
 0x867   : > { %11695 = vmatpush1.bf16.msra.mxu1 %v17510_v37  ;;  %11655 = vmatprep.subr.bf16.mxu0 %v17515_v3  ;;  %v11874_v37 = vld [vmem:[%s18256_s5 + $0x70] sm:$0xff]  ;;  %v11875_v3 = vld [vmem:[%s18256_s5 + $0x78] sm:$0xff] }
 0x868   : > { %11696 = vmatprep.subr.bf16.mxu1 %v17518_v18  ;;  %v15019_v18 = vpack.c.bf16 %v11875_v3, %v11874_v37  ;;  %v11923_v37 = vld [vmem:[%s18256_s5 + $0x1f8] sm:$0xff] }
 0x86a   : > { %11656 = vmatpush1.bf16.msra.mxu0 %v17513_v56 }
 0x86b   : > { %11697 = vmatpush1.bf16.msra.mxu1 %v17516_v47  ;;  %14990 = vmatprep.subr.bf16.mxu0 %v14989_v10  ;;  %v11909_v10 = vld [vmem:[%s18256_s5 + $0x188] sm:$0xff] }
 0x86d   : > { %11658 = vmatmul.mubr.bf16.vlgmr.msra.gmra.mrb[68].mxu0 %v21231_v21 }
 0x86e   : > { %11699 = vmatmul.mubr.bf16.vlgmr.msra.gmra.mrb[68].mxu1 %v21231_v21 }
 0x880   : > { %v10229_v26 = vpop.f32.mrb[56].mxu0 }
 0x881   : > { %v10270_v39 = vpop.f32.mrb[56].mxu1  ;;  %v21314_v43 = vadd.f32 %v10229_v26, %v21181_v50  ;;  %v10231_v11 = vpop.f32.mrb[57].mxu0 }
 0x882   : > { %v21317_v60 = vadd.f32 %v10270_v39, %v21262_v54  ;;  %v10272_v13 = vpop.f32.mrb[57].mxu1  ;;  %v21320_v24 = vadd.f32 %v10231_v11, %v21187_v49  ;;  %v10233_v21 = vpop.f32.mrb[58].mxu0  ;;  %v11860_v54 = vld [vmem:[%s18256_s5] sm:$0xff] }
 0x883   : > { %v21323_v61 = vadd.f32 %v10272_v13, %v21268_v2  ;;  %v10274_v62 = vpop.f32.mrb[58].mxu1  ;;  %v10234_v0 = vpop.f32.mrb[59].mxu0  ;;  %v14991_v49 = vpack.c.bf16 %v11861_v42, %v11860_v54  ;;  %v11879_v2 = vld [vmem:[%s18256_s5 + $0x98] sm:$0xff]  ;;  %v11941_v42 = vld [vmem:[%s18256_s5 + $0x288] sm:$0xff] }
 0x884   : > { %v10275_v50 = vpop.f32.mrb[59].mxu1  ;;  %v14993_v22 = vpack.c.bf16 %v11879_v2, %v11878_v59  ;;  %v11910_v2 = vld [vmem:[%s18256_s5 + $0x190] sm:$0xff] }
 0x885   : > { %14992 = vmatpush3.bf16.msra.mxu0 %v14991_v49  ;;  %v11892_v49 = vld [vmem:[%s18256_s5 + $0x100] sm:$0xff] }
 0x886   : > { %14994 = vmatprep.subr.bf16.mxu0 %v14993_v22  ;;  %v11911_v22 = vld [vmem:[%s18256_s5 + $0x198] sm:$0xff] }
 0x887   : > { %v15025_v35 = vpack.c.bf16 %v11911_v22, %v11910_v2 }
 0x889   : > { %14996 = vmatpush3.bf16.msra.mxu0 %v14995_v12  ;;  %v11895_v12 = vld [vmem:[%s18256_s5 + $0x118] sm:$0xff] }
 0x88a   : > { %14998 = vmatprep.subr.bf16.mxu0 %v14997_v55  ;;  %v15027_v27 = vpack.c.bf16 %v11895_v12, %v11894_v34  ;;  %v11913_v55 = vld [vmem:[%s18256_s5 + $0x1a8] sm:$0xff] }
 0x88b   : > { %v15029_v14 = vpack.c.bf16 %v11913_v55, %v11912_v41 }
 0x88d   : > { %15000 = vmatpush3.bf16.msra.mxu0 %v14999_v1  ;;  %v11897_v1 = vld [vmem:[%s18256_s5 + $0x128] sm:$0xff] }
 0x88e   : > { %15002 = vmatprep.subr.bf16.mxu0 %v15001_v29  ;;  %v15031_v7 = vpack.c.bf16 %v11897_v1, %v11896_v52  ;;  %v11915_v29 = vld [vmem:[%s18256_s5 + $0x1b8] sm:$0xff] }
 0x88f   : > { %v15033_v33 = vpack.c.bf16 %v11915_v29, %v11914_v57 }
 0x891   : > { %15004 = vmatpush3.bf16.msra.mxu0 %v15003_v23  ;;  %v11899_v23 = vld [vmem:[%s18256_s5 + $0x138] sm:$0xff] }
 0x892   : > { %15006 = vmatprep.subr.bf16.mxu0 %v15005_v6  ;;  %v15035_v15 = vpack.c.bf16 %v11899_v23, %v11898_v40  ;;  %v11917_v6 = vld [vmem:[%s18256_s5 + $0x1c8] sm:$0xff] }
 0x893   : > { %v15037_v4 = vpack.c.bf16 %v11917_v6, %v11916_v16 }
 0x895   : > { %15008 = vmatpush3.bf16.msra.mxu0 %v15007_v48  ;;  %v11901_v48 = vld [vmem:[%s18256_s5 + $0x148] sm:$0xff] }
 0x896   : > { %15010 = vmatprep.subr.bf16.mxu0 %v15009_v44  ;;  %v15039_v58 = vpack.c.bf16 %v11901_v48, %v11900_v45  ;;  %v11919_v44 = vld [vmem:[%s18256_s5 + $0x1d8] sm:$0xff] }
 0x897   : > { %v15041_v5 = vpack.c.bf16 %v11919_v44, %v11918_v20 }
 0x899   : > { %15012 = vmatpush3.bf16.msra.mxu0 %v15011_v17  ;;  %v11903_v17 = vld [vmem:[%s18256_s5 + $0x158] sm:$0xff] }
 0x89a   : > { %15014 = vmatprep.subr.bf16.mxu0 %v15013_v8  ;;  %v15043_v9 = vpack.c.bf16 %v11903_v17, %v11902_v53  ;;  %v11921_v8 = vld [vmem:[%s18256_s5 + $0x1e8] sm:$0xff] }
 0x89b   : > { %v15045_v19 = vpack.c.bf16 %v11921_v8, %v11920_v46  ;;  %v11925_v46 = vld [vmem:[%s18256_s5 + $0x208] sm:$0xff] }
 0x89d   : > { %15016 = vmatpush3.bf16.msra.mxu0 %v15015_v31  ;;  %v11905_v31 = vld [vmem:[%s18256_s5 + $0x168] sm:$0xff] }
 0x89e   : > { %15018 = vmatprep.subr.bf16.mxu0 %v15017_v28  ;;  %v15047_v30 = vpack.c.bf16 %v11905_v31, %v11904_v63  ;;  %v11922_v28 = vld [vmem:[%s18256_s5 + $0x1f0] sm:$0xff]  ;;  %v11943_v63 = vld [vmem:[%s18256_s5 + $0x298] sm:$0xff] }
 0x89f   : > { %v15049_v3 = vpack.c.bf16 %v11923_v37, %v11922_v28 }
 0x8a1   : > { %15020 = vmatpush3.bf16.msra.mxu0 %v15019_v18  ;;  %v11906_v18 = vld [vmem:[%s18256_s5 + $0x170] sm:$0xff] }
 0x8c0   : > { %v10903_v56 = vpop.f32.mrb[60].mxu0 }
 0x8c1   : > { %v10944_v47 = vpop.f32.mrb[60].mxu1  ;;  %v21358_v26 = vadd.f32 %v10903_v56, %v21265_v36  ;;  %v10905_v11 = vpop.f32.mrb[61].mxu0  ;;  %v11908_v36 = vld [vmem:[%s18256_s5 + $0x180] sm:$0xff]  ;;  %v11907_v56 = vld [vmem:[%s18256_s5 + $0x178] sm:$0xff] }
 0x8c2   : > { %v21361_v39 = vadd.f32 %v10944_v47, %v21314_v43  ;;  %v10946_v13 = vpop.f32.mrb[61].mxu1  ;;  %v21364_v21 = vadd.f32 %v10905_v11, %v21271_v25  ;;  %v10907_v0 = vpop.f32.mrb[62].mxu0  ;;  %v11940_v43 = vld [vmem:[%s18256_s5 + $0x280] sm:$0xff]  ;;  %v15021_v54 = vpack.c.bf16 %v11909_v10, %v11908_v36  ;;  %v11893_v25 = vld [vmem:[%s18256_s5 + $0x108] sm:$0xff]  ;;  %v15051_v47 = vpack.c.bf16 %v11907_v56, %v11906_v18  ;;  %v11927_v18 = vld [vmem:[%s18256_s5 + $0x218] sm:$0xff] }
 0x8c3   : > { %v21367_v62 = vadd.f32 %v10946_v13, %v21320_v24  ;;  %v10948_v50 = vpop.f32.mrb[62].mxu1  ;;  %v10908_v32 = vpop.f32.mrb[63].mxu0  ;;  %v15053_v59 = vpack.c.bf16 %v11941_v42, %v11940_v43  ;;  %v15023_v24 = vpack.c.bf16 %v11893_v25, %v11892_v49  ;;  %v21403_v11 = vshrl.u32 %v11715_v51, 7  ;;  %v21407_v0 = vld [vmem:[%s18245_s11] sm:$0x3f]  ;;  %v11944_v56 = vld [vmem:[%s18256_s5 + $0x2a0] sm:$0xff] }
 0x8c4   : > { %v10949_v38 = vpop.f32.mrb[63].mxu1  ;;  %15022 = vmatprep.subr.bf16.mxu1 %v15021_v54 }
 0x8c5   : > { %15054 = vmatprep.subr.bf16.mxu0 %v15053_v59  ;;  %15024 = vmatpush3.bf16.msra.mxu1 %v15023_v24  ;;  %v11717_v13 = vsub.s32 0, %v21403_v11  ;;  %v11721_v50 = vsub.s32 1, %v21403_v11 }
 0x8c6   : > { %15026 = vmatprep.subr.bf16.mxu1 %v15025_v35 }
 0x8c7   : > { %v11718_v32 = vrot.slane %v21407_v0, %v11717_v13  ;;  %v11722_v10 = vrot.slane %v21407_v0, %v11721_v50 }
 0x8c9   : > { %15028 = vmatpush3.bf16.msra.mxu1 %v15027_v27 }
 0x8ca   : > { %15030 = vmatprep.subr.bf16.mxu1 %v15029_v14 }
 0x8cd   : > { %15032 = vmatpush3.bf16.msra.mxu1 %v15031_v7 }
 0x8ce   : > { %15034 = vmatprep.subr.bf16.mxu1 %v15033_v33 }
 0x8d1   : > { %15036 = vmatpush3.bf16.msra.mxu1 %v15035_v15 }
 0x8d2   : > { %15038 = vmatprep.subr.bf16.mxu1 %v15037_v4 }
 0x8d5   : > { %15040 = vmatpush3.bf16.msra.mxu1 %v15039_v58 }
 0x8d6   : > { %15042 = vmatprep.subr.bf16.mxu1 %v15041_v5 }
 0x8d9   : > { %15044 = vmatpush3.bf16.msra.mxu1 %v15043_v9  ;;  %v11924_v9 = vld [vmem:[%s18256_s5 + $0x200] sm:$0xff] }
 0x8da   : > { %15046 = vmatprep.subr.bf16.mxu1 %v15045_v19  ;;  %v11942_v19 = vld [vmem:[%s18256_s5 + $0x290] sm:$0xff]  ;;  %v15055_v28 = vpack.c.bf16 %v11925_v46, %v11924_v9  ;;  %v11952_v9 = vld [vmem:[%s18256_s5 + $0x2e0] sm:$0xff]  ;;  %v11953_v46 = vld [vmem:[%s18256_s5 + $0x2e8] sm:$0xff] }
 0x8db   : > { %v15057_v37 = vpack.c.bf16 %v11943_v63, %v11942_v19 }
 0x8dd   : > { %15048 = vmatpush3.bf16.msra.mxu1 %v15047_v30 }
 0x8de   : > { %15050 = vmatprep.subr.bf16.mxu1 %v15049_v3  ;;  %v11926_v3 = vld [vmem:[%s18256_s5 + $0x210] sm:$0xff] }
 0x8df   : > { %v15059_v13 = vpack.c.bf16 %v11927_v18, %v11926_v3  ;;  %v11936_v3 = vld [vmem:[%s18256_s5 + $0x260] sm:$0xff]  ;;  %v11937_v18 = vld [vmem:[%s18256_s5 + $0x268] sm:$0xff] }
 0x8e1   : > { %15052 = vmatpush3.bf16.msra.mxu1 %v15051_v47  ;;  %v11945_v47 = vld [vmem:[%s18256_s5 + $0x2a8] sm:$0xff] }
 0x8e2   : > { %v15061_v50 = vpack.c.bf16 %v11945_v47, %v11944_v56 }
 0x900   : > { %v10985_v38 = vpop.f32.mrb[64].mxu0 }
 0x901   : > { %v11618_v36 = vpop.f32.mrb[64].mxu1  ;;  %v21413_v43 = vadd.f32 %v10985_v38, %v21317_v60  ;;  %v10987_v42 = vpop.f32.mrb[65].mxu0  ;;  %v11929_v38 = vld [vmem:[%s18256_s5 + $0x228] sm:$0xff] }
 0x902   : > { %v11707_v54 = vadd.f32 %v11618_v36, %v21358_v26  ;;  %v11620_v49 = vpop.f32.mrb[65].mxu1  ;;  %v21417_v25 = vadd.f32 %v10987_v42, %v21323_v61  ;;  %v10989_v24 = vpop.f32.mrb[66].mxu0  ;;  %v11946_v36 = vld [vmem:[%s18256_s5 + $0x2b0] sm:$0xff]  ;;  %v11733_v42 = vsub.s32 4, %v21403_v11 }
 0x903   : > { %v11708_v59 = vadd.f32 %v11620_v49, %v21364_v21  ;;  %v11622_v2 = vpop.f32.mrb[66].mxu1  ;;  %v10990_v35 = vpop.f32.mrb[67].mxu0  ;;  %v11729_v49 = vsub.s32 3, %v21403_v11 }
 0x904   : > { %v11745_v22 = vadd.f32 %v11718_v32, %v11707_v54  ;;  %v11623_v34 = vpop.f32.mrb[67].mxu1  ;;  %v11928_v32 = vld [vmem:[%s18256_s5 + $0x220] sm:$0xff]  ;;  %v11725_v54 = vsub.s32 2, %v21403_v11  ;;  %v11931_v35 = vld [vmem:[%s18256_s5 + $0x238] sm:$0xff] }
 0x905   : > { %v11746_v12 = vadd.f32 %v11722_v10, %v11708_v59  ;;  %v11947_v10 = vld [vmem:[%s18256_s5 + $0x2b8] sm:$0xff]  ;;  %v11737_v59 = vsub.s32 5, %v21403_v11  ;;  %v15063_v24 = vpack.c.bf16 %v11929_v38, %v11928_v32  ;;  %v11948_v34 = vld [vmem:[%s18256_s5 + $0x2c0] sm:$0xff]  ;;  %v15079_v32 = vpack.c.bf16 %v11937_v18, %v11936_v3 }
 0x906   : > { %v11757_v27 = vand.u32 2147483647, %v11745_v22  ;;  %v11751_v45 = vmax.f32 %v11745_v22, 0.0  ;;  %v15065_v2 = vpack.c.bf16 %v11947_v10, %v11946_v36  ;;  %v11938_v36 = vld [vmem:[%s18256_s5 + $0x270] sm:$0xff]  ;;  %v11939_v10 = vld [vmem:[%s18256_s5 + $0x278] sm:$0xff] }
 0x907   : > { %v11758_v41 = vand.u32 2147483647, %v11746_v12  ;;  %v11752_v44 = vmax.f32 %v11746_v12, 0.0  ;;  %v11738_v11 = vrot.slane %v21407_v0, %v11737_v59 }
 0x908   : > { %v11763_v55 = vsub.f32 0.0, %v11757_v27  ;;  %v11726_v27 = vrot.slane %v21407_v0, %v11725_v54  ;;  %v15083_v54 = vpack.c.bf16 %v11939_v10, %v11938_v36 }
 0x909   : > { %v11764_v60 = vsub.f32 0.0, %v11758_v41  ;;  %v11734_v41 = vrot.slane %v21407_v0, %v11733_v42 }
 0x90a   : > { %v11769_v14 = vmul.f32 1.442695, %v11763_v55 }
 0x90b   : > { %v11771_v52 = vmul.f32 1.442695, %v11764_v60 }
 0x90c   : > { %17519 = vpow2.f32 %v11769_v14  ;;  %v11730_v14 = vrot.slane %v21407_v0, %v11729_v49 }
 0x90d   : > { %17521 = vpow2.f32 %v11771_v52 }
 0x916   : > { %v17520_v26 = vpop.eup %17519 }
 0x917   : > { %v17522_v1 = vpop.eup %17521  ;;  %v11781_v61 = vadd.f32 1.0, %v17520_v26  ;;  %v11784_v21 = vmul.f32 -0.5, %v17520_v26  ;;  %v11787_v33 = vand.u32 2147483647, %v17520_v26 }
 0x918   : > { %v11790_v7 = vadd.f32 1.0, %v17522_v1  ;;  %v11793_v57 = vmul.f32 -0.5, %v17522_v1  ;;  %v11796_v23 = vand.u32 2147483647, %v17522_v1 }
 0x919   : > { %17523 = vlog2.f32 %v11781_v61  ;;  %v11785_v29 = vadd.f32 1.0, %v11784_v21  ;;  %vm11788_vm5 = vcmp.lt.f32.partialorder %v11787_v33, 0.0004427343 }
 0x91a   : > { %17525 = vlog2.f32 %v11790_v7  ;;  %v11794_v40 = vadd.f32 1.0, %v11793_v57  ;;  %vm11797_vm6 = vcmp.lt.f32.partialorder %v11796_v23, 0.0004427343  ;;  %v11932_v57 = vld [vmem:[%s18256_s5 + $0x240] sm:$0xff] }
 0x91b   : > { %v11786_v4 = vmul.f32 %v17520_v26, %v11785_v29  ;;  %v11933_v29 = vld [vmem:[%s18256_s5 + $0x248] sm:$0xff] }
 0x91c   : > { %v11795_v58 = vmul.f32 %v17522_v1, %v11794_v40 }
 0x923   : > { %v17524_v15 = vpop.eup %17523 }
 0x924   : > { %v17526_v16 = vpop.eup %17525  ;;  %v11783_v6 = vmul.f32 0.6931472, %v17524_v15  ;;  %v11950_v15 = vld [vmem:[%s18256_s5 + $0x2d0] sm:$0xff] }
 0x925   : > { %v11792_v48 = vmul.f32 0.6931472, %v17526_v16  ;;  %v11951_v16 = vld [vmem:[%s18256_s5 + $0x2d8] sm:$0xff] }
 0x926   : > { %v11789_v20 = vsel %vm11788_vm5, %v11786_v4, %v11783_v6 }
 0x927   : > { %v11835_v5 = vadd.f32 %v11789_v20, %v11751_v45  ;;  %v11798_v53 = vsel %vm11797_vm6, %v11795_v58, %v11792_v48  ;;  %v15073_v20 = vpack.c.bf16 %v11951_v16, %v11950_v15 }
 0x928   : > { %v11836_v17 = vadd.f32 %v11798_v53, %v11752_v44  ;;  %v11934_v44 = vld [vmem:[%s18256_s5 + $0x250] sm:$0xff] }
 0x929   : > { %17527 = vtanh.f32 %v11835_v5  ;;  %v11935_v5 = vld [vmem:[%s18256_s5 + $0x258] sm:$0xff] }
 0x92a   : > { %17529 = vtanh.f32 %v11836_v17 }
 0x933   : > { %v17528_v8 = vpop.eup %17527 }
 0x934   : > { %v17530_v31 = vpop.eup %17529  ;;  %v11847_v30 = vmul.f32 %v17528_v8, %v11745_v22  ;;  %v11930_v22 = vld [vmem:[%s18256_s5 + $0x230] sm:$0xff] }
 0x935   : > { %v11848_v51 = vmul.f32 %v17530_v31, %v11746_v12  ;;  %v11949_v12 = vld [vmem:[%s18256_s5 + $0x2c8] sm:$0xff]  ;;  %v15067_v52 = vpack.c.bf16 %v11931_v35, %v11930_v22 }
 0x936   : > { %11853 = vst [vmem:[%s18258_s16] sm:$0xff] %v11847_v30  ;;  %v15069_v21 = vpack.c.bf16 %v11949_v12, %v11948_v34 }
 0x937   : > { %11854 = vst [vmem:[%s18258_s16 + $0x8] sm:$0xff] %v11848_v51  ;;  %12020 = vmatprep.mubr.f32.mxu0 %v11848_v51 }
 0x938   : > { %12021 = vmatmul.mubr.f32.vlgmr.msra.gmra.mrb[72].mxu0 %v11847_v30  ;;  %v15075_v30 = vpack.c.bf16 %v11935_v5, %v11934_v44 }
 0x939   : > { %15056 = vmatpush3.bf16.msra.mxu0 %v15055_v28 }
 0x93a   : > { %15058 = vmatprep.subr.bf16.mxu0 %v15057_v37  ;;  %v15077_v37 = vpack.c.bf16 %v11953_v46, %v11952_v9 }
 0x93d   : > { %15060 = vmatpush3.bf16.msra.mxu0 %v15059_v13  ;;  %v11954_v13 = vld [vmem:[%s18256_s5 + $0x2f0] sm:$0xff] }
 0x93e   : > { %15062 = vmatprep.subr.bf16.mxu0 %v15061_v50  ;;  %v11955_v50 = vld [vmem:[%s18256_s5 + $0x2f8] sm:$0xff] }
 0x93f   : > { %v15081_v38 = vpack.c.bf16 %v11955_v50, %v11954_v13 }
 0x940   : > { %v11659_v55 = vpop.f32.mrb[68].mxu0 }
 0x941   : > { %v11700_v60 = vpop.f32.mrb[68].mxu1  ;;  %15064 = vmatpush3.bf16.msra.mxu0 %v15063_v24  ;;  %v11709_v26 = vadd.f32 %v11659_v55, %v21361_v39  ;;  %v11661_v61 = vpop.f32.mrb[69].mxu0 }
 0x942   : > { %v11711_v1 = vadd.f32 %v11700_v60, %v21413_v43  ;;  %v11702_v7 = vpop.f32.mrb[69].mxu1  ;;  %15066 = vmatprep.subr.bf16.mxu0 %v15065_v2  ;;  %v11710_v33 = vadd.f32 %v11661_v61, %v21367_v62  ;;  %v11663_v23 = vpop.f32.mrb[70].mxu0  ;;  %v15071_v62 = vpack.c.bf16 %v11933_v29, %v11932_v57 }
 0x943   : > { %v11712_v40 = vadd.f32 %v11702_v7, %v21417_v25  ;;  %v11704_v0 = vpop.f32.mrb[70].mxu1  ;;  %v21454_v6 = vadd.f32 %v11726_v27, %v11709_v26  ;;  %v11664_v43 = vpop.f32.mrb[71].mxu0 }
 0x944   : > { %v21456_v39 = vadd.f32 %v11734_v41, %v11711_v1  ;;  %v11705_v4 = vpop.f32.mrb[71].mxu1  ;;  %v21458_v45 = vadd.f32 %v11730_v14, %v11710_v33 }
 0x945   : > { %v21460_v48 = vadd.f32 %v11738_v11, %v11712_v40  ;;  %15068 = vmatpush3.bf16.msra.mxu0 %v15067_v52  ;;  %v11759_v25 = vand.u32 2147483647, %v21454_v6  ;;  %v11753_v61 = vmax.f32 %v21454_v6, 0.0 }
 0x946   : > { %v11761_v58 = vand.u32 2147483647, %v21456_v39  ;;  %15070 = vmatprep.subr.bf16.mxu0 %v15069_v21  ;;  %v11760_v53 = vand.u32 2147483647, %v21458_v45  ;;  %v11755_v33 = vmax.f32 %v21456_v39, 0.0  ;;  %v11754_v44 = vmax.f32 %v21458_v45, 0.0 }
 0x947   : > { %v11762_v17 = vand.u32 2147483647, %v21460_v48  ;;  %v11765_v8 = vsub.f32 0.0, %v11759_v25 }
 0x948   : > { %v11767_v19 = vsub.f32 0.0, %v11761_v58  ;;  %v11766_v63 = vsub.f32 0.0, %v11760_v53 }
 0x949   : > { %v11768_v31 = vsub.f32 0.0, %v11762_v17  ;;  %15072 = vmatpush3.bf16.msra.mxu0 %v15071_v62  ;;  %v11773_v51 = vmul.f32 1.442695, %v11765_v8  ;;  %v11756_v8 = vmax.f32 %v21460_v48, 0.0 }
 0x94a   : > { %v11777_v28 = vmul.f32 1.442695, %v11767_v19  ;;  %15074 = vmatprep.subr.bf16.mxu0 %v15073_v20  ;;  %v11775_v56 = vmul.f32 1.442695, %v11766_v63 }
 0x94b   : > { %v11779_v47 = vmul.f32 1.442695, %v11768_v31  ;;  %17531 = vpow2.f32 %v11773_v51 }
 0x94c   : > { %17533 = vpow2.f32 %v11777_v28 }
 0x94d   : > { %15076 = vmatpush3.bf16.msra.mxu0 %v15075_v30  ;;  %17535 = vpow2.f32 %v11775_v56 }
 0x94e   : > { %15078 = vmatprep.subr.bf16.mxu0 %v15077_v37  ;;  %17537 = vpow2.f32 %v11779_v47 }
 0x951   : > { %15080 = vmatpush3.bf16.msra.mxu0 %v15079_v32 }
 0x952   : > { %15082 = vmatprep.subr.bf16.mxu0 %v15081_v38 }
 0x955   : > { %15084 = vmatpush3.bf16.msra.mxu0 %v15083_v54  ;;  %v17532_v42 = vpop.eup %17531  ;;  %v11859_v54 = vld [vmem:[#allocation3] sm:$0xff] }
 0x956   : > { %v17534_v49 = vpop.eup %17533  ;;  %v11799_v59 = vadd.f32 1.0, %v17532_v42  ;;  %v11802_v12 = vmul.f32 -0.5, %v17532_v42  ;;  %v11805_v14 = vand.u32 2147483647, %v17532_v42 }
 0x957   : > { %v17536_v24 = vpop.eup %17535  ;;  %v11817_v2 = vadd.f32 1.0, %v17534_v49  ;;  %v11820_v27 = vmul.f32 -0.5, %v17534_v49  ;;  %v11823_v52 = vand.u32 2147483647, %v17534_v49 }
 0x958   : > { %v17538_v22 = vpop.eup %17537  ;;  %17539 = vlog2.f32 %v11799_v59  ;;  %v11808_v35 = vadd.f32 1.0, %v17536_v24  ;;  %v11811_v41 = vmul.f32 -0.5, %v17536_v24  ;;  %v11803_v55 = vadd.f32 1.0, %v11802_v12  ;;  %v14799_v59 = vld [vmem:[#allocation14] ss:$0 sm:$0xff] (!%p14798_p3) }
 0x959   : > { %17541 = vlog2.f32 %v11817_v2  ;;  %v11826_v34 = vadd.f32 1.0, %v17538_v22  ;;  %v11829_v60 = vmul.f32 -0.5, %v17538_v22  ;;  %v11821_v11 = vadd.f32 1.0, %v11820_v27 }
 0x95a   : > { %17543 = vlog2.f32 %v11808_v35  ;;  %v11812_v26 = vadd.f32 1.0, %v11811_v41  ;;  %v11814_v7 = vand.u32 2147483647, %v17536_v24  ;;  %v11804_v29 = vmul.f32 %v17532_v42, %v11803_v55 }
 0x95b   : > { %17545 = vlog2.f32 %v11826_v34  ;;  %v11830_v40 = vadd.f32 1.0, %v11829_v60  ;;  %vm11806_vm7 = vcmp.lt.f32.partialorder %v11805_v14, 0.0004427343  ;;  %v11822_v15 = vmul.f32 %v17534_v49, %v11821_v11 }
 0x95c   : > { %v11832_v16 = vand.u32 2147483647, %v17538_v22  ;;  %vm11824_vm8 = vcmp.lt.f32.partialorder %v11823_v52, 0.0004427343  ;;  %v11813_v62 = vmul.f32 %v17536_v24, %v11812_v26  ;;  %vm11815_vm9 = vcmp.lt.f32.partialorder %v11814_v7, 0.0004427343 }
 0x95d   : > { %v11831_v9 = vmul.f32 %v17538_v22, %v11830_v40 }
 0x95e   : > { %vm11833_vm10 = vcmp.lt.f32.partialorder %v11832_v16, 0.0004427343 }
 0x962   : > { %v17540_v1 = vpop.eup %17539 }
 0x963   : > { %v17542_v21 = vpop.eup %17541  ;;  %v11801_v57 = vmul.f32 0.6931472, %v17540_v1 }
 0x964   : > { %v17544_v23 = vpop.eup %17543  ;;  %v11819_v0 = vmul.f32 0.6931472, %v17542_v21 }
 0x965   : > { %v11807_v43 = vsel %vm11806_vm7, %v11804_v29, %v11801_v57  ;;  %v11810_v4 = vmul.f32 0.6931472, %v17544_v23  ;;  %v17546_v25 = vpop.eup %17545 }
 0x966   : > { %v11837_v58 = vadd.f32 %v11807_v43, %v11753_v61  ;;  %v11825_v20 = vsel %vm11824_vm8, %v11822_v15, %v11819_v0  ;;  %v11828_v17 = vmul.f32 0.6931472, %v17546_v25 }
 0x967   : > { %v11839_v5 = vadd.f32 %v11825_v20, %v11755_v33  ;;  %v11816_v53 = vsel %vm11815_vm9, %v11813_v62, %v11810_v4 }
 0x968   : > { %17547 = vtanh.f32 %v11837_v58  ;;  %v11838_v46 = vadd.f32 %v11816_v53, %v11754_v44  ;;  %v11834_v19 = vsel %vm11833_vm10, %v11831_v9, %v11828_v17 }
 0x969   : > { %17549 = vtanh.f32 %v11839_v5  ;;  %v11840_v63 = vadd.f32 %v11834_v19, %v11756_v8 }
 0x96a   : > { %17551 = vtanh.f32 %v11838_v46 }
 0x96b   : > { %17553 = vtanh.f32 %v11840_v63 }
 0x972   : > { %v17548_v31 = vpop.eup %17547 }
 0x973   : > { %v17550_v30 = vpop.eup %17549  ;;  %v11849_v51 = vmul.f32 %v17548_v31, %v21454_v6 }
 0x974   : > { %v17552_v28 = vpop.eup %17551  ;;  %v11851_v37 = vmul.f32 %v17550_v30, %v21456_v39 }
 0x975   : > { %11855 = vst [vmem:[%s18258_s16 + $0x10] sm:$0xff] %v11849_v51  ;;  %v11850_v3 = vmul.f32 %v17552_v28, %v21458_v45  ;;  %v17554_v18 = vpop.eup %17553 }
 0x976   : > { %11857 = vst [vmem:[%s18258_s16 + $0x20] sm:$0xff] %v11851_v37  ;;  %v11852_v56 = vmul.f32 %v17554_v18, %v21460_v48 }
 0x977   : > { %11856 = vst [vmem:[%s18258_s16 + $0x18] sm:$0xff] %v11850_v3  ;;  %12090 = vmatprep.mubr.f32.mxu1 %v11850_v3 }
 0x978   : > { %12091 = vmatmul.mubr.f32.vlgmr.msra.gmra.mrb[72].mxu1 %v11849_v51  ;;  %11858 = vst [vmem:[%s18258_s16 + $0x28] sm:$0xff] %v11852_v56  ;;  %12160 = vmatprep.mubr.f32.mxu0 %v11852_v56 }
 0x979   : > { %12161 = vmatmul.mubr.f32.vlgmr.msra.gmra.mrb[74].mxu0 %v11851_v37 }
 0xa0b   : > { %v14916_v47 = vpop.f32.mrb[72].mxu0 }
 0xa0c   : > { %v14917_v13 = vpop.f32.mrb[73].mxu0 }
 0xa0d   : > { %v14918_v50 = vadd.f32 %v14917_v13, %v14916_v47 }
 0xa4b   : > { %v14951_v6 = vpop.f32.mrb[72].mxu1 }
 0xa4c   : > { %v14952_v32 = vpop.f32.mrb[73].mxu1  ;;  %v14986_v38 = vpop.f32.mrb[74].mxu0 }
 0xa4d   : > { %v14953_v39 = vadd.f32 %v14952_v32, %v14951_v6  ;;  %v14987_v36 = vpop.f32.mrb[75].mxu0 }
 0xa4e   : > { %v14988_v45 = vadd.f32 %v14987_v36, %v14986_v38 }
 0xa4f   : > { %v12093_v10 = vadd.f32 %v14953_v39, %v14918_v50  ;;  %12172 = sbr.rel (%p14798_p3) target bundleno = 2656 (0xa60), region = 100 }
 0xa51   : > { %v12163_v42 = vadd.f32 %v14988_v45, %v12093_v10 }
 0xa53   : > { %v12166_v49 = vadd.f32 %v12163_v42, %v11859_v54 }
 0xa55   : > { %12168 = vst.msk [vmem:[#allocation3] sm:$0xff] %vm12167_vm11, %v12166_v49 }
 0xa5c   : > { %v12173_v48 = vld [vmem:[#allocation3] sm:$0xff] }
 0xa5d   : > { %v12181_v24 = vadd.f32 %v14799_v59, %v12173_v48 }
 0xa5f   : > { %12182 = vst.msk [vmem:[#allocation15] sm:$0xff] %vm12167_vm11, %v12181_v24 }
 0xa60 PF: > { %s17885_s7 = smov [#allocation15]   ;;  %s14819_s5 = smul.u32 768, %s17973_s25 }
 0xa61   : > { %s12195_s11 = sshll.u32 %s17885_s7, 4  ;;  %s12209_s30 = sshll.u32 %s18258_s16, 4  ;;  %s12196_s11 = int_to_ptr.vmem [resolvable:$true] %s12195_s11  ;;  %s12210_s30 = int_to_ptr.vmem [resolvable:$true] %s12209_s30 }
 0xa62   : > { %s17755_s13 = scalar_lea.vmem %s12196_s11, 128  ;;  %p21714_p8 = scmp.eq.s32.totalorder %s17973_s25, 1 }
 0xa63   : > { %p17756_p11 = scmp.ne.s32.totalorder %s12196_s11, %s17755_s13  ;;  %p17762_p2 = scmp.lt.s32.totalorder %s12196_s11, %s12196_s11 }
 0xa64   : > { %p17763_p4 = scmp.lt.s32.totalorder %s17755_s13, %s17755_s13 }
 0xa65   : > { %p17757_p5 = pnand %p17756_p11, %p21714_p8 }
 0xa66   : > { %p17764_p9 = por %p17763_p4, %p17762_p2 }
 0xa67   : > { %p17758_p13 = pneg %p17757_p5 }
 0xa69   : > { %p17765_p10 = pnand %p17764_p9, %p17758_p13 }
 0xa6b   : > { %17768 = shalt.err (!%p17765_p10)
}
 0xa6c   : > { %s21715_s2 = sld [smem:[#allocation35_spill]]  ;;  %p21716_p7 = pmov %p21714_p8 }
 0xa72   : > { %s17769_s21 = scalar_lea.hbm %s21715_s2, 128 }
 0xa73   : > { %p17770_p6 = scmp.ne.s32.totalorder %s21715_s2, %s17769_s21  ;;  %p17775_p12 = scmp.lt.u32.totalorder %s17769_s21, %s21715_s2 }
 0xa75   : > { %p17771_p0 = pnand %p17770_p6, %p21716_p7 }
 0xa77   : > { %p17772_p1 = pneg %p17771_p0 }
 0xa79   : > { %p17777_p3 = pnand %p17775_p12, %p17772_p1 }
 0xa7b   : > { %17780 = shalt.err (!%p17777_p3)
}
 0xa7c   : > { %p21717_p11 = pmov %p21716_p7  ;;  %s21718_s18 = sld [smem:[#allocation36_spill]] }
 0xa7d   : > { %s12184_s13 = scalar_lea.sflag [#allocation17], %s18235_s28  ;;  %s17781_s1 = scalar_lea.vmem %s12210_s30, 768 }
 0xa7e   : > { %15211 = dma.vmem_to_hbm [thread:$0]  (%p21717_p11), %s12196_s11, 128, %s21715_s2, [#allocation6]  }
 0xa7f   : > { %p17782_p8 = scmp.ne.s32.totalorder %s12210_s30, %s17781_s1  ;;  %p21719_p5 = scmp.ne.s32.totalorder %s21606_s26, 0 }
 0xa80   : > { %s17886_s3 = smov [#allocation16]  }
 0xa81   : > { %p17783_p13 = pnand %p17782_p8, %p21719_p5  ;;  %s17785_s21 = sshll.u32 %s17886_s3, 4  ;;  %s17786_s21 = int_to_ptr.vmem [resolvable:$false] %s17785_s21 }
 0xa82   : > { %s21512_s7 = scalar_lea.hbm %s21718_s18, %s14819_s5  ;;  %s17787_s19 = scalar_lea.vmem %s17786_s21, 1536 }
 0xa83   : > { %p17784_p2 = pneg %p17783_p13  ;;  %p17788_p4 = scmp.lt.s32.totalorder %s12210_s30, %s17786_s21 }
 0xa84   : > { %p17789_p9 = scmp.lt.s32.totalorder %s17787_s19, %s17781_s1 }
 0xa86   : > { %p17790_p10 = por %p17789_p9, %p17788_p4 }
 0xa88   : > { %p17791_p6 = pnand %p17790_p10, %p17784_p2 }
 0xa8a   : > { %17794 = shalt.err (!%p17791_p6)
}
 0xa8b   : > { %s17795_s28 = scalar_lea.hbm %s21512_s7, 768  ;;  %s17799_s12 = scalar_lea.hbm %s21718_s18, 1536 }
 0xa8c   : > { %p17796_p7 = scmp.ne.s32.totalorder %s21512_s7, %s17795_s28  ;;  %p17800_p12 = scmp.lt.u32.totalorder %s21512_s7, %s21718_s18 }
 0xa8d   : > { %p17801_p3 = scmp.lt.u32.totalorder %s17799_s12, %s17795_s28  ;;  %p17803_p8 = scmp.lt.u32.totalorder %s17795_s28, %s21512_s7 }
 0xa8e   : > { %p17797_p0 = pnand %p17796_p7, %p21719_p5 }
 0xa8f   : > { %p17802_p11 = por %p17801_p3, %p17800_p12 }
 0xa90   : > { %p17798_p1 = pneg %p17797_p0 }
 0xa91   : > { %p17804_p13 = por %p17803_p8, %p17802_p11 }
 0xa93   : > { %p17805_p2 = pnand %p17804_p13, %p17798_p1 }
 0xa95   : > { %17808 = shalt.err (!%p17805_p2)
}
 0xa96   : > { %15212 = dma.vmem_to_hbm [thread:$0]  (%p21719_p5), %s12210_s30, 768, %s21512_s7, %s12184_s13  }
 0xa97   : > { %p21720_p4 = scmp.eq.s32.totalorder %s17973_s25, 1 }
 0xa99   : > { %17846 = dma.done.wait (%p21720_p4), [#allocation6], 128   ;;  %p21721_p9 = pmov %p21720_p4 }
 0xa9b   : > { %17848 = vsyncadd (%p21721_p9), [#allocation6], 4294967168 }
 0xa9c PF: > { %s21722_s14 = sld [smem:[#allocation25_spill]]  ;;  %s21723_s15 = sld [smem:[#allocation26_spill]] }
 0xa9d   : > { %p21725_p6 = scmp.ge.s32.totalorder %s17867_s24, 2 }
 0xaa2   : > { %s12225_s17 = sand.u32 1, %s21722_s14   ;;  %p21724_p10 = scmp.ne.s32.totalorder %s21723_s15, 0 }
 0xaa3   : > { %s12226_s27 = scalar_lea.sflag [#allocation17], %s12225_s17 }
 0xaa4   : > { %p15240_p7 = pnand %p21725_p6, %p21724_p10 }
 0xaa6   : > { %17850 = dma.done.wait (!%p15240_p7), %s12226_s27, 768  }
 0xaa7   : > { %17852 = vsyncadd (!%p15240_p7), %s12226_s27, 4294966528  ;;  %s21726_s24 = sld [smem:[#allocation27_spill]]  ;;  %s21727_s26 = sld [smem:[#allocation28_spill]] }
 0xaa8   : > { %s21728_s21 = smov %s17859_s22  ;;  %s21729_s22 = smov %s17863_s23 }
 0xaad   : > { %p27_p5 = scmp.ge.s32.totalorder %s21726_s24, 4   ;;  %s21730_s23 = smov %s21727_s26 }
 0xaaf   :  { %29 = sbr.rel (!%p27_p5) target bundleno = 16 (0x10), region = 182 }
 0xab6   :  { %12231 = vsyncpa [#allocation5], 1 }
 0xab7   :  { %12233 = vsyncpa [#allocation5 + $0x1], 1 }
 0xab8   :  { %12234 = vsyncpa [#allocation8], 1 }
 0xab9   :  { %12235 = vsyncpa [#allocation11], 1 }
 0xaba   :  { %12236 = vsyncpa [#allocation6], 1 }
 0xabb   :  { %12238 = vsyncpa [#allocation6 + $0x1], 1 }
 0xabc   :  { %12239 = vsyncpa [#allocation17], 1 }
 0xabd   :  { %12241 = vsyncpa [#allocation17 + $0x1], 1 }

</bundles_post_ra>
